<compile_context>
chip_gen: v7x
topology: tpu7x:2x2x1
jax: 0.10.0
libtpu: 0.0.40
codegen_flags: <defaults>
</compile_context>

<pallas_src>
import functools

import jax
import jax.numpy as jnp
from jax.experimental import pallas as pl
from jax.experimental.pallas import tpu as pltpu


# --------------------------------------------------------------------------- #
# Kernel                                                                      #
# --------------------------------------------------------------------------- #
def _fused_autoencoder_kernel(x_ref, *refs, layer_meta):
    """Fused forward: x -> 12 x (Linear [+ ReLU]) entirely in VMEM.

    refs = (w_0, ..., w_{L-1}, b_all, o_ref)
      w_i   : [Dpad_i, Dpad_{i+1}]  bfloat16 (zero padded)
      b_all : [L, max_fout]         float32  (row i = layer-i bias, zero padded,
                                              lane-0 aligned)
      o_ref : [TB, F_out_last]      float32
    layer_meta: tuple of (padded_f_out, apply_relu) per layer (static).
    """
    n_layers = len(layer_meta)
    w_refs = refs[:n_layers]
    b_ref = refs[n_layers]
    o_ref = refs[n_layers + 1]

    h = x_ref[...]                               # [TB, Dpad_0] bf16
    for i, (f_out, apply_relu) in enumerate(layer_meta):
        w = w_refs[i][...]                       # [Dpad_i, f_out] bf16
        b = b_ref[i:i + 1, :f_out]               # [1, f_out] f32 (static slice)
        y = jnp.dot(h, w, preferred_element_type=jnp.float32) + b
        if apply_relu:
            # Carry the activation in bf16: halves live bytes / spill traffic.
            h = jnp.maximum(y, 0.0).astype(jnp.bfloat16)
        else:
            h = y                                # last layer stays f32
    o_ref[...] = h.astype(o_ref.dtype)


# --------------------------------------------------------------------------- #
# Wrapper                                                                     #
# --------------------------------------------------------------------------- #
def _round_up(x, m):
    return ((x + m - 1) // m) * m


def _choose_batch_tile(B, batch_block):
    """Pick a batch tile: big for roofline, but >=2 grid steps when B >= 256
    so the 'parallel' grid axis can shard across both v7x TensorCores."""
    batch_block = max(8, (batch_block // 8) * 8)
    if B > batch_block:
        return batch_block                       # already >= 2 grid steps
    if B >= 256:
        half = -(-B // 2)                        # cdiv(B, 2)
        half = _round_up(half, 128)              # keep tiles 128-row aligned
        return min(batch_block, half)
    return B                                     # small batch: single step


def autoencoder_forward(x, params, *, batch_block=512):
    """Run the whole autoencoder as a single Pallas call.

    params: list of (w_bf16 [F_in, F_out], b_f32 [F_out], apply_relu: bool).
    """
    B, f_in0 = x.shape
    L = len(params)
    ws = [p[0] for p in params]
    bs = [p[1] for p in params]
    relus = [p[2] for p in params]
    f_out_final = int(ws[-1].shape[1])

    # ---- Zero-pad internal dims (32 / 64) up to 128 lanes (numerically exact).
    dims = [f_in0]
    for i, w in enumerate(ws):
        f_out = int(w.shape[1])
        dims.append(f_out if i == L - 1 else max(_round_up(f_out, 128), 128))

    ws_pad = []
    for i, w in enumerate(ws):
        pi, po = dims[i], dims[i + 1]
        fi, fo = int(w.shape[0]), int(w.shape[1])
        wp = jnp.zeros((pi, po), jnp.bfloat16)
        wp = wp.at[:fi, :fo].set(w.astype(jnp.bfloat16))
        ws_pad.append(wp)

    # ---- Pack biases into a lane-0-aligned [L, max_fout] f32 table.
    max_f = _round_up(max(dims[1:]), 128)
    b_all = jnp.zeros((L, max_f), jnp.float32)
    for i, b in enumerate(bs):
        b_all = b_all.at[i, :int(b.shape[0])].set(b.astype(jnp.float32))

    layer_meta = tuple((dims[i + 1], relus[i]) for i in range(L))
    kernel = functools.partial(_fused_autoencoder_kernel, layer_meta=layer_meta)

    # ---- Batch tiling / grid.
    tb = _choose_batch_tile(B, batch_block)
    grid = (pl.cdiv(B, tb),)

    # ---- Pre-cast the input to bf16 (halves the x tile DMA bytes).
    x_bf = x.astype(jnp.bfloat16)

    # ---- Cost estimate so XLA schedules around the call sensibly.
    flops = 2 * B * sum(dims[i] * dims[i + 1] for i in range(L))
    bytes_accessed = (int(x_bf.size) * 2 + B * f_out_final * 4
                      + sum(int(w.size) * 2 for w in ws_pad)
                      + int(b_all.size) * 4)
    cost = pl.CostEstimate(flops=flops, transcendentals=0,
                           bytes_accessed=bytes_accessed)

    def build(single_buffer_consts):
        # Constant-index weight/bias blocks: single-buffer them (saves ~4 MiB
        # VMEM that default double-buffering would waste).
        const_kwargs = (dict(pipeline_mode=pl.Buffered(1))
                        if single_buffer_consts else {})
        in_specs = [pl.BlockSpec((tb, f_in0), lambda i: (i, 0))]
        for w in ws_pad:
            in_specs.append(pl.BlockSpec(w.shape, lambda i: (0, 0),
                                         **const_kwargs))
        in_specs.append(pl.BlockSpec(b_all.shape, lambda i: (0, 0),
                                     **const_kwargs))
        out_spec = pl.BlockSpec((tb, f_out_final), lambda i: (i, 0))

        return pl.pallas_call(
            kernel,
            out_shape=jax.ShapeDtypeStruct((B, f_out_final), jnp.float32),
            grid_spec=pltpu.PrefetchScalarGridSpec(
                num_scalar_prefetch=0,
                grid=grid,
                in_specs=in_specs,
                out_specs=out_spec,
            ),
            compiler_params=pltpu.CompilerParams(
                dimension_semantics=("parallel",),
                # v7x has only 64 MiB physical VMEM; working set here is well
                # under 40 MiB even with 512-row tiles.
                vmem_limit_bytes=40 * 1024 * 1024,
            ),
            cost_estimate=cost,
        )

    try:
        return jax.block_until_ready(build(True)(x_bf, *ws_pad, b_all))
    except Exception:
        # Fallback if this jax/Mosaic build rejects pipeline_mode=pl.Buffered(1)
        # on pallas_call BlockSpecs: identical semantics, just default
        # double-buffered constant blocks (~4 MiB extra VMEM).
        return build(False)(x_bf, *ws_pad, b_all)


# --------------------------------------------------------------------------- #
# Parameter construction (deterministic, PyTorch-like init)                   #
# --------------------------------------------------------------------------- #
def make_autoencoder_params(input_size, key):
    """Encoder: input->1024->512->256->128->64->32 (ReLU after each);
    Decoder: 32->64->128->256->512->1024->input (ReLU after all but last).
    Weights stored as [F_in, F_out] (transposed from torch) in bfloat16;
    biases in float32."""
    enc_dims = [input_size, 1024, 512, 256, 128, 64, 32]
    dec_dims = [32, 64, 128, 256, 512, 1024, input_size]

    def make_layer(key, f_in, f_out):
        kw, kb = jax.random.split(key)
        bound = 1.0 / jnp.sqrt(jnp.float32(f_in))
        w = jax.random.uniform(kw, (f_in, f_out), jnp.float32, -bound, bound)
        b = jax.random.uniform(kb, (f_out,), jnp.float32, -bound, bound)
        return w.astype(jnp.bfloat16), b

    params = []
    for f_in, f_out in zip(enc_dims[:-1], enc_dims[1:]):
        key, sub = jax.random.split(key)
        w, b = make_layer(sub, f_in, f_out)
        params.append((w, b, True))
    n_dec = len(dec_dims) - 1
    for li, (f_in, f_out) in enumerate(zip(dec_dims[:-1], dec_dims[1:])):
        key, sub = jax.random.split(key)
        w, b = make_layer(sub, f_in, f_out)
        params.append((w, b, li < n_dec - 1))
    return params


def autoencoder_reference(x, params):
    """Pure-JAX reference with the same dtype policy (bf16 matmul inputs,
    f32 accumulation / bias / ReLU)."""
    h = x
    for w, b, relu in params:
        h = jnp.dot(h.astype(jnp.bfloat16), w,
                    preferred_element_type=jnp.float32) + b
        if relu:
            h = jnp.maximum(h, 0.0)
    return h


if __name__ == "__main__":
    input_size = 256
    batch = 8

    key = jax.random.PRNGKey(0)
    key, kx = jax.random.split(key)
    x = jax.random.normal(kx, (batch, input_size), jnp.float32)

    params = make_autoencoder_params(input_size, key)

    out = autoencoder_forward(x, params)
    out = jax.block_until_ready(out)

    ref = autoencoder_reference(x, params)
    assert out.shape == (batch, input_size), out.shape
    assert jnp.allclose(out, ref, atol=2e-3, rtol=2e-3), (
        "mismatch vs reference: max abs diff = "
        f"{jnp.max(jnp.abs(out - ref))}")

    print("KERNEL_OK")
</pallas_src>

<mosaic_0001>
module attributes {stable_mosaic.version = 11 : i64} {
  func.func @_fused_autoencoder_kernel(%arg0: i32, %arg1: memref<8x256xbf16, #tpu.memory_space<vmem>>, %arg2: memref<256x1024xbf16, #tpu.memory_space<vmem>>, %arg3: memref<1024x512xbf16, #tpu.memory_space<vmem>>, %arg4: memref<512x256xbf16, #tpu.memory_space<vmem>>, %arg5: memref<256x128xbf16, #tpu.memory_space<vmem>>, %arg6: memref<128x128xbf16, #tpu.memory_space<vmem>>, %arg7: memref<128x128xbf16, #tpu.memory_space<vmem>>, %arg8: memref<128x128xbf16, #tpu.memory_space<vmem>>, %arg9: memref<128x128xbf16, #tpu.memory_space<vmem>>, %arg10: memref<128x256xbf16, #tpu.memory_space<vmem>>, %arg11: memref<256x512xbf16, #tpu.memory_space<vmem>>, %arg12: memref<512x1024xbf16, #tpu.memory_space<vmem>>, %arg13: memref<1024x256xbf16, #tpu.memory_space<vmem>>, %arg14: memref<12x1024xf32, #tpu.memory_space<vmem>>, %arg15: memref<8x256xf32, #tpu.memory_space<vmem>>) attributes {dimension_semantics = [#tpu.dimension_semantics<parallel>], iteration_bounds = array<i64: 1>, scalar_prefetch = 0 : i64, scratch_operands = 0 : i64, tpu.core_type = #tpu.core_type<tc>, window_params = [{transform_indices = @transform_0, window_bounds = array<i64: 8, 256>}, {pipeline_mode = #tpu.pipeline_mode<synchronous>, transform_indices = @transform_1, window_bounds = array<i64: 256, 1024>}, {pipeline_mode = #tpu.pipeline_mode<synchronous>, transform_indices = @transform_2, window_bounds = array<i64: 1024, 512>}, {pipeline_mode = #tpu.pipeline_mode<synchronous>, transform_indices = @transform_3, window_bounds = array<i64: 512, 256>}, {pipeline_mode = #tpu.pipeline_mode<synchronous>, transform_indices = @transform_4, window_bounds = array<i64: 256, 128>}, {pipeline_mode = #tpu.pipeline_mode<synchronous>, transform_indices = @transform_5, window_bounds = array<i64: 128, 128>}, {pipeline_mode = #tpu.pipeline_mode<synchronous>, transform_indices = @transform_6, window_bounds = array<i64: 128, 128>}, {pipeline_mode = #tpu.pipeline_mode<synchronous>, transform_indices = @transform_7, window_bounds = array<i64: 128, 128>}, {pipeline_mode = #tpu.pipeline_mode<synchronous>, transform_indices = @transform_8, window_bounds = array<i64: 128, 128>}, {pipeline_mode = #tpu.pipeline_mode<synchronous>, transform_indices = @transform_9, window_bounds = array<i64: 128, 256>}, {pipeline_mode = #tpu.pipeline_mode<synchronous>, transform_indices = @transform_10, window_bounds = array<i64: 256, 512>}, {pipeline_mode = #tpu.pipeline_mode<synchronous>, transform_indices = @transform_11, window_bounds = array<i64: 512, 1024>}, {pipeline_mode = #tpu.pipeline_mode<synchronous>, transform_indices = @transform_12, window_bounds = array<i64: 1024, 256>}, {pipeline_mode = #tpu.pipeline_mode<synchronous>, transform_indices = @transform_13, window_bounds = array<i64: 12, 1024>}, {transform_indices = @transform_14, window_bounds = array<i64: 8, 256>}]} {
    %c0 = arith.constant 0 : index
    %c0_0 = arith.constant 0 : index
    %0 = vector.load %arg1[%c0, %c0_0] : memref<8x256xbf16, #tpu.memory_space<vmem>>, vector<8x256xbf16>
    %c0_1 = arith.constant 0 : index
    %c0_2 = arith.constant 0 : index
    %1 = vector.load %arg2[%c0_1, %c0_2] : memref<256x1024xbf16, #tpu.memory_space<vmem>>, vector<256x1024xbf16>
    %c0_3 = arith.constant 0 : index
    %c0_4 = arith.constant 0 : index
    %2 = vector.load %arg14[%c0_3, %c0_4] : memref<12x1024xf32, #tpu.memory_space<vmem>>, vector<1x1024xf32>
    %cst = arith.constant dense<0.000000e+00> : vector<8x1024xf32>
    %3 = tpu.matmul %0, %1, %cst {dimension_numbers = #tpu.dot_dimension_numbers<[1], [0], [0], [1], [0, 0, 1, 1], [], []>} : vector<8x256xbf16>, vector<256x1024xbf16>, vector<8x1024xf32> -> vector<8x1024xf32>
    %4 = vector.broadcast %2 : vector<1x1024xf32> to vector<8x1024xf32>
    %5 = arith.addf %3, %4 : vector<8x1024xf32>
    %cst_5 = arith.constant 0.000000e+00 : f32
    %6 = vector.broadcast %cst_5 : f32 to vector<8x1024xf32>
    %7 = arith.maximumf %5, %6 : vector<8x1024xf32>
    %8 = arith.truncf %7 : vector<8x1024xf32> to vector<8x1024xbf16>
    %c0_6 = arith.constant 0 : index
    %c0_7 = arith.constant 0 : index
    %9 = vector.load %arg3[%c0_6, %c0_7] : memref<1024x512xbf16, #tpu.memory_space<vmem>>, vector<1024x512xbf16>
    %c1 = arith.constant 1 : index
    %c0_8 = arith.constant 0 : index
    %10 = vector.load %arg14[%c1, %c0_8] : memref<12x1024xf32, #tpu.memory_space<vmem>>, vector<1x512xf32>
    %cst_9 = arith.constant dense<0.000000e+00> : vector<8x512xf32>
    %11 = tpu.matmul %8, %9, %cst_9 {dimension_numbers = #tpu.dot_dimension_numbers<[1], [0], [0], [1], [0, 0, 1, 1], [], []>} : vector<8x1024xbf16>, vector<1024x512xbf16>, vector<8x512xf32> -> vector<8x512xf32>
    %12 = vector.broadcast %10 : vector<1x512xf32> to vector<8x512xf32>
    %13 = arith.addf %11, %12 : vector<8x512xf32>
    %cst_10 = arith.constant 0.000000e+00 : f32
    %14 = vector.broadcast %cst_10 : f32 to vector<8x512xf32>
    %15 = arith.maximumf %13, %14 : vector<8x512xf32>
    %16 = arith.truncf %15 : vector<8x512xf32> to vector<8x512xbf16>
    %c0_11 = arith.constant 0 : index
    %c0_12 = arith.constant 0 : index
    %17 = vector.load %arg4[%c0_11, %c0_12] : memref<512x256xbf16, #tpu.memory_space<vmem>>, vector<512x256xbf16>
    %c2 = arith.constant 2 : index
    %c0_13 = arith.constant 0 : index
    %18 = vector.load %arg14[%c2, %c0_13] : memref<12x1024xf32, #tpu.memory_space<vmem>>, vector<1x256xf32>
    %cst_14 = arith.constant dense<0.000000e+00> : vector<8x256xf32>
    %19 = tpu.matmul %16, %17, %cst_14 {dimension_numbers = #tpu.dot_dimension_numbers<[1], [0], [0], [1], [0, 0, 1, 1], [], []>} : vector<8x512xbf16>, vector<512x256xbf16>, vector<8x256xf32> -> vector<8x256xf32>
    %20 = vector.broadcast %18 : vector<1x256xf32> to vector<8x256xf32>
    %21 = arith.addf %19, %20 : vector<8x256xf32>
    %cst_15 = arith.constant 0.000000e+00 : f32
    %22 = vector.broadcast %cst_15 : f32 to vector<8x256xf32>
    %23 = arith.maximumf %21, %22 : vector<8x256xf32>
    %24 = arith.truncf %23 : vector<8x256xf32> to vector<8x256xbf16>
    %c0_16 = arith.constant 0 : index
    %c0_17 = arith.constant 0 : index
    %25 = vector.load %arg5[%c0_16, %c0_17] : memref<256x128xbf16, #tpu.memory_space<vmem>>, vector<256x128xbf16>
    %c3 = arith.constant 3 : index
    %c0_18 = arith.constant 0 : index
    %26 = vector.load %arg14[%c3, %c0_18] : memref<12x1024xf32, #tpu.memory_space<vmem>>, vector<1x128xf32>
    %cst_19 = arith.constant dense<0.000000e+00> : vector<8x128xf32>
    %27 = tpu.matmul %24, %25, %cst_19 {dimension_numbers = #tpu.dot_dimension_numbers<[1], [0], [0], [1], [0, 0, 1, 1], [], []>} : vector<8x256xbf16>, vector<256x128xbf16>, vector<8x128xf32> -> vector<8x128xf32>
    %28 = vector.broadcast %26 : vector<1x128xf32> to vector<8x128xf32>
    %29 = arith.addf %27, %28 : vector<8x128xf32>
    %cst_20 = arith.constant 0.000000e+00 : f32
    %30 = vector.broadcast %cst_20 : f32 to vector<8x128xf32>
    %31 = arith.maximumf %29, %30 : vector<8x128xf32>
    %32 = arith.truncf %31 : vector<8x128xf32> to vector<8x128xbf16>
    %c0_21 = arith.constant 0 : index
    %c0_22 = arith.constant 0 : index
    %33 = vector.load %arg6[%c0_21, %c0_22] : memref<128x128xbf16, #tpu.memory_space<vmem>>, vector<128x128xbf16>
    %c4 = arith.constant 4 : index
    %c0_23 = arith.constant 0 : index
    %34 = vector.load %arg14[%c4, %c0_23] : memref<12x1024xf32, #tpu.memory_space<vmem>>, vector<1x128xf32>
    %cst_24 = arith.constant dense<0.000000e+00> : vector<8x128xf32>
    %35 = tpu.matmul %32, %33, %cst_24 {dimension_numbers = #tpu.dot_dimension_numbers<[1], [0], [0], [1], [0, 0, 1, 1], [], []>} : vector<8x128xbf16>, vector<128x128xbf16>, vector<8x128xf32> -> vector<8x128xf32>
    %36 = vector.broadcast %34 : vector<1x128xf32> to vector<8x128xf32>
    %37 = arith.addf %35, %36 : vector<8x128xf32>
    %cst_25 = arith.constant 0.000000e+00 : f32
    %38 = vector.broadcast %cst_25 : f32 to vector<8x128xf32>
    %39 = arith.maximumf %37, %38 : vector<8x128xf32>
    %40 = arith.truncf %39 : vector<8x128xf32> to vector<8x128xbf16>
    %c0_26 = arith.constant 0 : index
    %c0_27 = arith.constant 0 : index
    %41 = vector.load %arg7[%c0_26, %c0_27] : memref<128x128xbf16, #tpu.memory_space<vmem>>, vector<128x128xbf16>
    %c5 = arith.constant 5 : index
    %c0_28 = arith.constant 0 : index
    %42 = vector.load %arg14[%c5, %c0_28] : memref<12x1024xf32, #tpu.memory_space<vmem>>, vector<1x128xf32>
    %cst_29 = arith.constant dense<0.000000e+00> : vector<8x128xf32>
    %43 = tpu.matmul %40, %41, %cst_29 {dimension_numbers = #tpu.dot_dimension_numbers<[1], [0], [0], [1], [0, 0, 1, 1], [], []>} : vector<8x128xbf16>, vector<128x128xbf16>, vector<8x128xf32> -> vector<8x128xf32>
    %44 = vector.broadcast %42 : vector<1x128xf32> to vector<8x128xf32>
    %45 = arith.addf %43, %44 : vector<8x128xf32>
    %cst_30 = arith.constant 0.000000e+00 : f32
    %46 = vector.broadcast %cst_30 : f32 to vector<8x128xf32>
    %47 = arith.maximumf %45, %46 : vector<8x128xf32>
    %48 = arith.truncf %47 : vector<8x128xf32> to vector<8x128xbf16>
    %c0_31 = arith.constant 0 : index
    %c0_32 = arith.constant 0 : index
    %49 = vector.load %arg8[%c0_31, %c0_32] : memref<128x128xbf16, #tpu.memory_space<vmem>>, vector<128x128xbf16>
    %c6 = arith.constant 6 : index
    %c0_33 = arith.constant 0 : index
    %50 = vector.load %arg14[%c6, %c0_33] : memref<12x1024xf32, #tpu.memory_space<vmem>>, vector<1x128xf32>
    %cst_34 = arith.constant dense<0.000000e+00> : vector<8x128xf32>
    %51 = tpu.matmul %48, %49, %cst_34 {dimension_numbers = #tpu.dot_dimension_numbers<[1], [0], [0], [1], [0, 0, 1, 1], [], []>} : vector<8x128xbf16>, vector<128x128xbf16>, vector<8x128xf32> -> vector<8x128xf32>
    %52 = vector.broadcast %50 : vector<1x128xf32> to vector<8x128xf32>
    %53 = arith.addf %51, %52 : vector<8x128xf32>
    %cst_35 = arith.constant 0.000000e+00 : f32
    %54 = vector.broadcast %cst_35 : f32 to vector<8x128xf32>
    %55 = arith.maximumf %53, %54 : vector<8x128xf32>
    %56 = arith.truncf %55 : vector<8x128xf32> to vector<8x128xbf16>
    %c0_36 = arith.constant 0 : index
    %c0_37 = arith.constant 0 : index
    %57 = vector.load %arg9[%c0_36, %c0_37] : memref<128x128xbf16, #tpu.memory_space<vmem>>, vector<128x128xbf16>
    %c7 = arith.constant 7 : index
    %c0_38 = arith.constant 0 : index
    %58 = vector.load %arg14[%c7, %c0_38] : memref<12x1024xf32, #tpu.memory_space<vmem>>, vector<1x128xf32>
    %cst_39 = arith.constant dense<0.000000e+00> : vector<8x128xf32>
    %59 = tpu.matmul %56, %57, %cst_39 {dimension_numbers = #tpu.dot_dimension_numbers<[1], [0], [0], [1], [0, 0, 1, 1], [], []>} : vector<8x128xbf16>, vector<128x128xbf16>, vector<8x128xf32> -> vector<8x128xf32>
    %60 = vector.broadcast %58 : vector<1x128xf32> to vector<8x128xf32>
    %61 = arith.addf %59, %60 : vector<8x128xf32>
    %cst_40 = arith.constant 0.000000e+00 : f32
    %62 = vector.broadcast %cst_40 : f32 to vector<8x128xf32>
    %63 = arith.maximumf %61, %62 : vector<8x128xf32>
    %64 = arith.truncf %63 : vector<8x128xf32> to vector<8x128xbf16>
    %c0_41 = arith.constant 0 : index
    %c0_42 = arith.constant 0 : index
    %65 = vector.load %arg10[%c0_41, %c0_42] : memref<128x256xbf16, #tpu.memory_space<vmem>>, vector<128x256xbf16>
    %c8 = arith.constant 8 : index
    %c0_43 = arith.constant 0 : index
    %66 = vector.load %arg14[%c8, %c0_43] : memref<12x1024xf32, #tpu.memory_space<vmem>>, vector<1x256xf32>
    %cst_44 = arith.constant dense<0.000000e+00> : vector<8x256xf32>
    %67 = tpu.matmul %64, %65, %cst_44 {dimension_numbers = #tpu.dot_dimension_numbers<[1], [0], [0], [1], [0, 0, 1, 1], [], []>} : vector<8x128xbf16>, vector<128x256xbf16>, vector<8x256xf32> -> vector<8x256xf32>
    %68 = vector.broadcast %66 : vector<1x256xf32> to vector<8x256xf32>
    %69 = arith.addf %67, %68 : vector<8x256xf32>
    %cst_45 = arith.constant 0.000000e+00 : f32
    %70 = vector.broadcast %cst_45 : f32 to vector<8x256xf32>
    %71 = arith.maximumf %69, %70 : vector<8x256xf32>
    %72 = arith.truncf %71 : vector<8x256xf32> to vector<8x256xbf16>
    %c0_46 = arith.constant 0 : index
    %c0_47 = arith.constant 0 : index
    %73 = vector.load %arg11[%c0_46, %c0_47] : memref<256x512xbf16, #tpu.memory_space<vmem>>, vector<256x512xbf16>
    %c9 = arith.constant 9 : index
    %c0_48 = arith.constant 0 : index
    %74 = vector.load %arg14[%c9, %c0_48] : memref<12x1024xf32, #tpu.memory_space<vmem>>, vector<1x512xf32>
    %cst_49 = arith.constant dense<0.000000e+00> : vector<8x512xf32>
    %75 = tpu.matmul %72, %73, %cst_49 {dimension_numbers = #tpu.dot_dimension_numbers<[1], [0], [0], [1], [0, 0, 1, 1], [], []>} : vector<8x256xbf16>, vector<256x512xbf16>, vector<8x512xf32> -> vector<8x512xf32>
    %76 = vector.broadcast %74 : vector<1x512xf32> to vector<8x512xf32>
    %77 = arith.addf %75, %76 : vector<8x512xf32>
    %cst_50 = arith.constant 0.000000e+00 : f32
    %78 = vector.broadcast %cst_50 : f32 to vector<8x512xf32>
    %79 = arith.maximumf %77, %78 : vector<8x512xf32>
    %80 = arith.truncf %79 : vector<8x512xf32> to vector<8x512xbf16>
    %c0_51 = arith.constant 0 : index
    %c0_52 = arith.constant 0 : index
    %81 = vector.load %arg12[%c0_51, %c0_52] : memref<512x1024xbf16, #tpu.memory_space<vmem>>, vector<512x1024xbf16>
    %c10 = arith.constant 10 : index
    %c0_53 = arith.constant 0 : index
    %82 = vector.load %arg14[%c10, %c0_53] : memref<12x1024xf32, #tpu.memory_space<vmem>>, vector<1x1024xf32>
    %cst_54 = arith.constant dense<0.000000e+00> : vector<8x1024xf32>
    %83 = tpu.matmul %80, %81, %cst_54 {dimension_numbers = #tpu.dot_dimension_numbers<[1], [0], [0], [1], [0, 0, 1, 1], [], []>} : vector<8x512xbf16>, vector<512x1024xbf16>, vector<8x1024xf32> -> vector<8x1024xf32>
    %84 = vector.broadcast %82 : vector<1x1024xf32> to vector<8x1024xf32>
    %85 = arith.addf %83, %84 : vector<8x1024xf32>
    %cst_55 = arith.constant 0.000000e+00 : f32
    %86 = vector.broadcast %cst_55 : f32 to vector<8x1024xf32>
    %87 = arith.maximumf %85, %86 : vector<8x1024xf32>
    %88 = arith.truncf %87 : vector<8x1024xf32> to vector<8x1024xbf16>
    %c0_56 = arith.constant 0 : index
    %c0_57 = arith.constant 0 : index
    %89 = vector.load %arg13[%c0_56, %c0_57] : memref<1024x256xbf16, #tpu.memory_space<vmem>>, vector<1024x256xbf16>
    %c11 = arith.constant 11 : index
    %c0_58 = arith.constant 0 : index
    %90 = vector.load %arg14[%c11, %c0_58] : memref<12x1024xf32, #tpu.memory_space<vmem>>, vector<1x256xf32>
    %cst_59 = arith.constant dense<0.000000e+00> : vector<8x256xf32>
    %91 = tpu.matmul %88, %89, %cst_59 {dimension_numbers = #tpu.dot_dimension_numbers<[1], [0], [0], [1], [0, 0, 1, 1], [], []>} : vector<8x1024xbf16>, vector<1024x256xbf16>, vector<8x256xf32> -> vector<8x256xf32>
    %92 = vector.broadcast %90 : vector<1x256xf32> to vector<8x256xf32>
    %93 = arith.addf %91, %92 : vector<8x256xf32>
    %c0_60 = arith.constant 0 : index
    %c0_61 = arith.constant 0 : index
    %94 = vector.load %arg15[%c0_60, %c0_61] : memref<8x256xf32, #tpu.memory_space<vmem>>, vector<8x256xf32>
    tpu.vector_store %arg15[%c0_60, %c0_61], %93 {strides = array<i32>} : memref<8x256xf32, #tpu.memory_space<vmem>>, vector<8x256xf32>,
    return
  }
  func.func @transform_0(%arg0: i32) -> (i32, i32) {
    %c0_i32 = arith.constant 0 : i32
    %c0_i32_0 = arith.constant 0 : i32
    return %arg0, %c0_i32 : i32, i32
  }
  func.func @transform_1(%arg0: i32) -> (i32, i32) {
    %c0_i32 = arith.constant 0 : i32
    %c0_i32_0 = arith.constant 0 : i32
    %c0_i32_1 = arith.constant 0 : i32
    return %c0_i32, %c0_i32_0 : i32, i32
  }
  func.func @transform_2(%arg0: i32) -> (i32, i32) {
    %c0_i32 = arith.constant 0 : i32
    %c0_i32_0 = arith.constant 0 : i32
    %c0_i32_1 = arith.constant 0 : i32
    return %c0_i32, %c0_i32_0 : i32, i32
  }
  func.func @transform_3(%arg0: i32) -> (i32, i32) {
    %c0_i32 = arith.constant 0 : i32
    %c0_i32_0 = arith.constant 0 : i32
    %c0_i32_1 = arith.constant 0 : i32
    return %c0_i32, %c0_i32_0 : i32, i32
  }
  func.func @transform_4(%arg0: i32) -> (i32, i32) {
    %c0_i32 = arith.constant 0 : i32
    %c0_i32_0 = arith.constant 0 : i32
    %c0_i32_1 = arith.constant 0 : i32
    return %c0_i32, %c0_i32_0 : i32, i32
  }
  func.func @transform_5(%arg0: i32) -> (i32, i32) {
    %c0_i32 = arith.constant 0 : i32
    %c0_i32_0 = arith.constant 0 : i32
    %c0_i32_1 = arith.constant 0 : i32
    return %c0_i32, %c0_i32_0 : i32, i32
  }
  func.func @transform_6(%arg0: i32) -> (i32, i32) {
    %c0_i32 = arith.constant 0 : i32
    %c0_i32_0 = arith.constant 0 : i32
    %c0_i32_1 = arith.constant 0 : i32
    return %c0_i32, %c0_i32_0 : i32, i32
  }
  func.func @transform_7(%arg0: i32) -> (i32, i32) {
    %c0_i32 = arith.constant 0 : i32
    %c0_i32_0 = arith.constant 0 : i32
    %c0_i32_1 = arith.constant 0 : i32
    return %c0_i32, %c0_i32_0 : i32, i32
  }
  func.func @transform_8(%arg0: i32) -> (i32, i32) {
    %c0_i32 = arith.constant 0 : i32
    %c0_i32_0 = arith.constant 0 : i32
    %c0_i32_1 = arith.constant 0 : i32
    return %c0_i32, %c0_i32_0 : i32, i32
  }
  func.func @transform_9(%arg0: i32) -> (i32, i32) {
    %c0_i32 = arith.constant 0 : i32
    %c0_i32_0 = arith.constant 0 : i32
    %c0_i32_1 = arith.constant 0 : i32
    return %c0_i32, %c0_i32_0 : i32, i32
  }
  func.func @transform_10(%arg0: i32) -> (i32, i32) {
    %c0_i32 = arith.constant 0 : i32
    %c0_i32_0 = arith.constant 0 : i32
    %c0_i32_1 = arith.constant 0 : i32
    return %c0_i32, %c0_i32_0 : i32, i32
  }
  func.func @transform_11(%arg0: i32) -> (i32, i32) {
    %c0_i32 = arith.constant 0 : i32
    %c0_i32_0 = arith.constant 0 : i32
    %c0_i32_1 = arith.constant 0 : i32
    return %c0_i32, %c0_i32_0 : i32, i32
  }
  func.func @transform_12(%arg0: i32) -> (i32, i32) {
    %c0_i32 = arith.constant 0 : i32
    %c0_i32_0 = arith.constant 0 : i32
    %c0_i32_1 = arith.constant 0 : i32
    return %c0_i32, %c0_i32_0 : i32, i32
  }
  func.func @transform_13(%arg0: i32) -> (i32, i32) {
    %c0_i32 = arith.constant 0 : i32
    %c0_i32_0 = arith.constant 0 : i32
    %c0_i32_1 = arith.constant 0 : i32
    return %c0_i32, %c0_i32_0 : i32, i32
  }
  func.func @transform_14(%arg0: i32) -> (i32, i32) {
    %c0_i32 = arith.constant 0 : i32
    %c0_i32_0 = arith.constant 0 : i32
    return %arg0, %c0_i32 : i32, i32
  }
}

module attributes {stable_mosaic.version = 11 : i64} {
  func.func @_fused_autoencoder_kernel(%arg0: i32, %arg1: memref<8x256xbf16, #tpu.memory_space<vmem>>, %arg2: memref<256x1024xbf16, #tpu.memory_space<vmem>>, %arg3: memref<1024x512xbf16, #tpu.memory_space<vmem>>, %arg4: memref<512x256xbf16, #tpu.memory_space<vmem>>, %arg5: memref<256x128xbf16, #tpu.memory_space<vmem>>, %arg6: memref<128x128xbf16, #tpu.memory_space<vmem>>, %arg7: memref<128x128xbf16, #tpu.memory_space<vmem>>, %arg8: memref<128x128xbf16, #tpu.memory_space<vmem>>, %arg9: memref<128x128xbf16, #tpu.memory_space<vmem>>, %arg10: memref<128x256xbf16, #tpu.memory_space<vmem>>, %arg11: memref<256x512xbf16, #tpu.memory_space<vmem>>, %arg12: memref<512x1024xbf16, #tpu.memory_space<vmem>>, %arg13: memref<1024x256xbf16, #tpu.memory_space<vmem>>, %arg14: memref<12x1024xf32, #tpu.memory_space<vmem>>, %arg15: memref<8x256xf32, #tpu.memory_space<vmem>>) attributes {dimension_semantics = [#tpu.dimension_semantics<parallel>], iteration_bounds = array<i64: 1>, scalar_prefetch = 0 : i64, scratch_operands = 0 : i64, tpu.core_type = #tpu.core_type<tc>, window_params = [{transform_indices = @transform_0, window_bounds = array<i64: 8, 256>}, {pipeline_mode = #tpu.pipeline_mode<synchronous>, transform_indices = @transform_1, window_bounds = array<i64: 256, 1024>}, {pipeline_mode = #tpu.pipeline_mode<synchronous>, transform_indices = @transform_2, window_bounds = array<i64: 1024, 512>}, {pipeline_mode = #tpu.pipeline_mode<synchronous>, transform_indices = @transform_3, window_bounds = array<i64: 512, 256>}, {pipeline_mode = #tpu.pipeline_mode<synchronous>, transform_indices = @transform_4, window_bounds = array<i64: 256, 128>}, {pipeline_mode = #tpu.pipeline_mode<synchronous>, transform_indices = @transform_5, window_bounds = array<i64: 128, 128>}, {pipeline_mode = #tpu.pipeline_mode<synchronous>, transform_indices = @transform_6, window_bounds = array<i64: 128, 128>}, {pipeline_mode = #tpu.pipeline_mode<synchronous>, transform_indices = @transform_7, window_bounds = array<i64: 128, 128>}, {pipeline_mode = #tpu.pipeline_mode<synchronous>, transform_indices = @transform_8, window_bounds = array<i64: 128, 128>}, {pipeline_mode = #tpu.pipeline_mode<synchronous>, transform_indices = @transform_9, window_bounds = array<i64: 128, 256>}, {pipeline_mode = #tpu.pipeline_mode<synchronous>, transform_indices = @transform_10, window_bounds = array<i64: 256, 512>}, {pipeline_mode = #tpu.pipeline_mode<synchronous>, transform_indices = @transform_11, window_bounds = array<i64: 512, 1024>}, {pipeline_mode = #tpu.pipeline_mode<synchronous>, transform_indices = @transform_12, window_bounds = array<i64: 1024, 256>}, {pipeline_mode = #tpu.pipeline_mode<synchronous>, transform_indices = @transform_13, window_bounds = array<i64: 12, 1024>}, {transform_indices = @transform_14, window_bounds = array<i64: 8, 256>}]} {
    %c0 = arith.constant 0 : index
    %c0_0 = arith.constant 0 : index
    %0 = vector.load %arg1[%c0, %c0_0] : memref<8x256xbf16, #tpu.memory_space<vmem>>, vector<8x256xbf16>
    %c0_1 = arith.constant 0 : index
    %c0_2 = arith.constant 0 : index
    %1 = vector.load %arg2[%c0_1, %c0_2] : memref<256x1024xbf16, #tpu.memory_space<vmem>>, vector<256x1024xbf16>
    %c0_3 = arith.constant 0 : index
    %c0_4 = arith.constant 0 : index
    %2 = vector.load %arg14[%c0_3, %c0_4] : memref<12x1024xf32, #tpu.memory_space<vmem>>, vector<1x1024xf32>
    %cst = arith.constant dense<0.000000e+00> : vector<8x1024xf32>
    %3 = tpu.matmul %0, %1, %cst {dimension_numbers = #tpu.dot_dimension_numbers<[1], [0], [0], [1], [0, 0, 1, 1], [], []>} : vector<8x256xbf16>, vector<256x1024xbf16>, vector<8x1024xf32> -> vector<8x1024xf32>
    %4 = vector.broadcast %2 : vector<1x1024xf32> to vector<8x1024xf32>
    %5 = arith.addf %3, %4 : vector<8x1024xf32>
    %cst_5 = arith.constant 0.000000e+00 : f32
    %6 = vector.broadcast %cst_5 : f32 to vector<8x1024xf32>
    %7 = arith.maximumf %5, %6 : vector<8x1024xf32>
    %8 = arith.truncf %7 : vector<8x1024xf32> to vector<8x1024xbf16>
    %c0_6 = arith.constant 0 : index
    %c0_7 = arith.constant 0 : index
    %9 = vector.load %arg3[%c0_6, %c0_7] : memref<1024x512xbf16, #tpu.memory_space<vmem>>, vector<1024x512xbf16>
    %c1 = arith.constant 1 : index
    %c0_8 = arith.constant 0 : index
    %10 = vector.load %arg14[%c1, %c0_8] : memref<12x1024xf32, #tpu.memory_space<vmem>>, vector<1x512xf32>
    %cst_9 = arith.constant dense<0.000000e+00> : vector<8x512xf32>
    %11 = tpu.matmul %8, %9, %cst_9 {dimension_numbers = #tpu.dot_dimension_numbers<[1], [0], [0], [1], [0, 0, 1, 1], [], []>} : vector<8x1024xbf16>, vector<1024x512xbf16>, vector<8x512xf32> -> vector<8x512xf32>
    %12 = vector.broadcast %10 : vector<1x512xf32> to vector<8x512xf32>
    %13 = arith.addf %11, %12 : vector<8x512xf32>
    %cst_10 = arith.constant 0.000000e+00 : f32
    %14 = vector.broadcast %cst_10 : f32 to vector<8x512xf32>
    %15 = arith.maximumf %13, %14 : vector<8x512xf32>
    %16 = arith.truncf %15 : vector<8x512xf32> to vector<8x512xbf16>
    %c0_11 = arith.constant 0 : index
    %c0_12 = arith.constant 0 : index
    %17 = vector.load %arg4[%c0_11, %c0_12] : memref<512x256xbf16, #tpu.memory_space<vmem>>, vector<512x256xbf16>
    %c2 = arith.constant 2 : index
    %c0_13 = arith.constant 0 : index
    %18 = vector.load %arg14[%c2, %c0_13] : memref<12x1024xf32, #tpu.memory_space<vmem>>, vector<1x256xf32>
    %cst_14 = arith.constant dense<0.000000e+00> : vector<8x256xf32>
    %19 = tpu.matmul %16, %17, %cst_14 {dimension_numbers = #tpu.dot_dimension_numbers<[1], [0], [0], [1], [0, 0, 1, 1], [], []>} : vector<8x512xbf16>, vector<512x256xbf16>, vector<8x256xf32> -> vector<8x256xf32>
    %20 = vector.broadcast %18 : vector<1x256xf32> to vector<8x256xf32>
    %21 = arith.addf %19, %20 : vector<8x256xf32>
    %cst_15 = arith.constant 0.000000e+00 : f32
    %22 = vector.broadcast %cst_15 : f32 to vector<8x256xf32>
    %23 = arith.maximumf %21, %22 : vector<8x256xf32>
    %24 = arith.truncf %23 : vector<8x256xf32> to vector<8x256xbf16>
    %c0_16 = arith.constant 0 : index
    %c0_17 = arith.constant 0 : index
    %25 = vector.load %arg5[%c0_16, %c0_17] : memref<256x128xbf16, #tpu.memory_space<vmem>>, vector<256x128xbf16>
    %c3 = arith.constant 3 : index
    %c0_18 = arith.constant 0 : index
    %26 = vector.load %arg14[%c3, %c0_18] : memref<12x1024xf32, #tpu.memory_space<vmem>>, vector<1x128xf32>
    %cst_19 = arith.constant dense<0.000000e+00> : vector<8x128xf32>
    %27 = tpu.matmul %24, %25, %cst_19 {dimension_numbers = #tpu.dot_dimension_numbers<[1], [0], [0], [1], [0, 0, 1, 1], [], []>} : vector<8x256xbf16>, vector<256x128xbf16>, vector<8x128xf32> -> vector<8x128xf32>
    %28 = vector.broadcast %26 : vector<1x128xf32> to vector<8x128xf32>
    %29 = arith.addf %27, %28 : vector<8x128xf32>
    %cst_20 = arith.constant 0.000000e+00 : f32
    %30 = vector.broadcast %cst_20 : f32 to vector<8x128xf32>
    %31 = arith.maximumf %29, %30 : vector<8x128xf32>
    %32 = arith.truncf %31 : vector<8x128xf32> to vector<8x128xbf16>
    %c0_21 = arith.constant 0 : index
    %c0_22 = arith.constant 0 : index
    %33 = vector.load %arg6[%c0_21, %c0_22] : memref<128x128xbf16, #tpu.memory_space<vmem>>, vector<128x128xbf16>
    %c4 = arith.constant 4 : index
    %c0_23 = arith.constant 0 : index
    %34 = vector.load %arg14[%c4, %c0_23] : memref<12x1024xf32, #tpu.memory_space<vmem>>, vector<1x128xf32>
    %cst_24 = arith.constant dense<0.000000e+00> : vector<8x128xf32>
    %35 = tpu.matmul %32, %33, %cst_24 {dimension_numbers = #tpu.dot_dimension_numbers<[1], [0], [0], [1], [0, 0, 1, 1], [], []>} : vector<8x128xbf16>, vector<128x128xbf16>, vector<8x128xf32> -> vector<8x128xf32>
    %36 = vector.broadcast %34 : vector<1x128xf32> to vector<8x128xf32>
    %37 = arith.addf %35, %36 : vector<8x128xf32>
    %cst_25 = arith.constant 0.000000e+00 : f32
    %38 = vector.broadcast %cst_25 : f32 to vector<8x128xf32>
    %39 = arith.maximumf %37, %38 : vector<8x128xf32>
    %40 = arith.truncf %39 : vector<8x128xf32> to vector<8x128xbf16>
    %c0_26 = arith.constant 0 : index
    %c0_27 = arith.constant 0 : index
    %41 = vector.load %arg7[%c0_26, %c0_27] : memref<128x128xbf16, #tpu.memory_space<vmem>>, vector<128x128xbf16>
    %c5 = arith.constant 5 : index
    %c0_28 = arith.constant 0 : index
    %42 = vector.load %arg14[%c5, %c0_28] : memref<12x1024xf32, #tpu.memory_space<vmem>>, vector<1x128xf32>
    %cst_29 = arith.constant dense<0.000000e+00> : vector<8x128xf32>
    %43 = tpu.matmul %40, %41, %cst_29 {dimension_numbers = #tpu.dot_dimension_numbers<[1], [0], [0], [1], [0, 0, 1, 1], [], []>} : vector<8x128xbf16>, vector<128x128xbf16>, vector<8x128xf32> -> vector<8x128xf32>
    %44 = vector.broadcast %42 : vector<1x128xf32> to vector<8x128xf32>
    %45 = arith.addf %43, %44 : vector<8x128xf32>
    %cst_30 = arith.constant 0.000000e+00 : f32
    %46 = vector.broadcast %cst_30 : f32 to vector<8x128xf32>
    %47 = arith.maximumf %45, %46 : vector<8x128xf32>
    %48 = arith.truncf %47 : vector<8x128xf32> to vector<8x128xbf16>
    %c0_31 = arith.constant 0 : index
    %c0_32 = arith.constant 0 : index
    %49 = vector.load %arg8[%c0_31, %c0_32] : memref<128x128xbf16, #tpu.memory_space<vmem>>, vector<128x128xbf16>
    %c6 = arith.constant 6 : index
    %c0_33 = arith.constant 0 : index
    %50 = vector.load %arg14[%c6, %c0_33] : memref<12x1024xf32, #tpu.memory_space<vmem>>, vector<1x128xf32>
    %cst_34 = arith.constant dense<0.000000e+00> : vector<8x128xf32>
    %51 = tpu.matmul %48, %49, %cst_34 {dimension_numbers = #tpu.dot_dimension_numbers<[1], [0], [0], [1], [0, 0, 1, 1], [], []>} : vector<8x128xbf16>, vector<128x128xbf16>, vector<8x128xf32> -> vector<8x128xf32>
    %52 = vector.broadcast %50 : vector<1x128xf32> to vector<8x128xf32>
    %53 = arith.addf %51, %52 : vector<8x128xf32>
    %cst_35 = arith.constant 0.000000e+00 : f32
    %54 = vector.broadcast %cst_35 : f32 to vector<8x128xf32>
    %55 = arith.maximumf %53, %54 : vector<8x128xf32>
    %56 = arith.truncf %55 : vector<8x128xf32> to vector<8x128xbf16>
    %c0_36 = arith.constant 0 : index
    %c0_37 = arith.constant 0 : index
    %57 = vector.load %arg9[%c0_36, %c0_37] : memref<128x128xbf16, #tpu.memory_space<vmem>>, vector<128x128xbf16>
    %c7 = arith.constant 7 : index
    %c0_38 = arith.constant 0 : index
    %58 = vector.load %arg14[%c7, %c0_38] : memref<12x1024xf32, #tpu.memory_space<vmem>>, vector<1x128xf32>
    %cst_39 = arith.constant dense<0.000000e+00> : vector<8x128xf32>
    %59 = tpu.matmul %56, %57, %cst_39 {dimension_numbers = #tpu.dot_dimension_numbers<[1], [0], [0], [1], [0, 0, 1, 1], [], []>} : vector<8x128xbf16>, vector<128x128xbf16>, vector<8x128xf32> -> vector<8x128xf32>
    %60 = vector.broadcast %58 : vector<1x128xf32> to vector<8x128xf32>
    %61 = arith.addf %59, %60 : vector<8x128xf32>
    %cst_40 = arith.constant 0.000000e+00 : f32
    %62 = vector.broadcast %cst_40 : f32 to vector<8x128xf32>
    %63 = arith.maximumf %61, %62 : vector<8x128xf32>
    %64 = arith.truncf %63 : vector<8x128xf32> to vector<8x128xbf16>
    %c0_41 = arith.constant 0 : index
    %c0_42 = arith.constant 0 : index
    %65 = vector.load %arg10[%c0_41, %c0_42] : memref<128x256xbf16, #tpu.memory_space<vmem>>, vector<128x256xbf16>
    %c8 = arith.constant 8 : index
    %c0_43 = arith.constant 0 : index
    %66 = vector.load %arg14[%c8, %c0_43] : memref<12x1024xf32, #tpu.memory_space<vmem>>, vector<1x256xf32>
    %cst_44 = arith.constant dense<0.000000e+00> : vector<8x256xf32>
    %67 = tpu.matmul %64, %65, %cst_44 {dimension_numbers = #tpu.dot_dimension_numbers<[1], [0], [0], [1], [0, 0, 1, 1], [], []>} : vector<8x128xbf16>, vector<128x256xbf16>, vector<8x256xf32> -> vector<8x256xf32>
    %68 = vector.broadcast %66 : vector<1x256xf32> to vector<8x256xf32>
    %69 = arith.addf %67, %68 : vector<8x256xf32>
    %cst_45 = arith.constant 0.000000e+00 : f32
    %70 = vector.broadcast %cst_45 : f32 to vector<8x256xf32>
    %71 = arith.maximumf %69, %70 : vector<8x256xf32>
    %72 = arith.truncf %71 : vector<8x256xf32> to vector<8x256xbf16>
    %c0_46 = arith.constant 0 : index
    %c0_47 = arith.constant 0 : index
    %73 = vector.load %arg11[%c0_46, %c0_47] : memref<256x512xbf16, #tpu.memory_space<vmem>>, vector<256x512xbf16>
    %c9 = arith.constant 9 : index
    %c0_48 = arith.constant 0 : index
    %74 = vector.load %arg14[%c9, %c0_48] : memref<12x1024xf32, #tpu.memory_space<vmem>>, vector<1x512xf32>
    %cst_49 = arith.constant dense<0.000000e+00> : vector<8x512xf32>
    %75 = tpu.matmul %72, %73, %cst_49 {dimension_numbers = #tpu.dot_dimension_numbers<[1], [0], [0], [1], [0, 0, 1, 1], [], []>} : vector<8x256xbf16>, vector<256x512xbf16>, vector<8x512xf32> -> vector<8x512xf32>
    %76 = vector.broadcast %74 : vector<1x512xf32> to vector<8x512xf32>
    %77 = arith.addf %75, %76 : vector<8x512xf32>
    %cst_50 = arith.constant 0.000000e+00 : f32
    %78 = vector.broadcast %cst_50 : f32 to vector<8x512xf32>
    %79 = arith.maximumf %77, %78 : vector<8x512xf32>
    %80 = arith.truncf %79 : vector<8x512xf32> to vector<8x512xbf16>
    %c0_51 = arith.constant 0 : index
    %c0_52 = arith.constant 0 : index
    %81 = vector.load %arg12[%c0_51, %c0_52] : memref<512x1024xbf16, #tpu.memory_space<vmem>>, vector<512x1024xbf16>
    %c10 = arith.constant 10 : index
    %c0_53 = arith.constant 0 : index
    %82 = vector.load %arg14[%c10, %c0_53] : memref<12x1024xf32, #tpu.memory_space<vmem>>, vector<1x1024xf32>
    %cst_54 = arith.constant dense<0.000000e+00> : vector<8x1024xf32>
    %83 = tpu.matmul %80, %81, %cst_54 {dimension_numbers = #tpu.dot_dimension_numbers<[1], [0], [0], [1], [0, 0, 1, 1], [], []>} : vector<8x512xbf16>, vector<512x1024xbf16>, vector<8x1024xf32> -> vector<8x1024xf32>
    %84 = vector.broadcast %82 : vector<1x1024xf32> to vector<8x1024xf32>
    %85 = arith.addf %83, %84 : vector<8x1024xf32>
    %cst_55 = arith.constant 0.000000e+00 : f32
    %86 = vector.broadcast %cst_55 : f32 to vector<8x1024xf32>
    %87 = arith.maximumf %85, %86 : vector<8x1024xf32>
    %88 = arith.truncf %87 : vector<8x1024xf32> to vector<8x1024xbf16>
    %c0_56 = arith.constant 0 : index
    %c0_57 = arith.constant 0 : index
    %89 = vector.load %arg13[%c0_56, %c0_57] : memref<1024x256xbf16, #tpu.memory_space<vmem>>, vector<1024x256xbf16>
    %c11 = arith.constant 11 : index
    %c0_58 = arith.constant 0 : index
    %90 = vector.load %arg14[%c11, %c0_58] : memref<12x1024xf32, #tpu.memory_space<vmem>>, vector<1x256xf32>
    %cst_59 = arith.constant dense<0.000000e+00> : vector<8x256xf32>
    %91 = tpu.matmul %88, %89, %cst_59 {dimension_numbers = #tpu.dot_dimension_numbers<[1], [0], [0], [1], [0, 0, 1, 1], [], []>} : vector<8x1024xbf16>, vector<1024x256xbf16>, vector<8x256xf32> -> vector<8x256xf32>
    %92 = vector.broadcast %90 : vector<1x256xf32> to vector<8x256xf32>
    %93 = arith.addf %91, %92 : vector<8x256xf32>
    %c0_60 = arith.constant 0 : index
    %c0_61 = arith.constant 0 : index
    %94 = vector.load %arg15[%c0_60, %c0_61] : memref<8x256xf32, #tpu.memory_space<vmem>>, vector<8x256xf32>
    tpu.vector_store %arg15[%c0_60, %c0_61], %93 {strides = array<i32>} : memref<8x256xf32, #tpu.memory_space<vmem>>, vector<8x256xf32>,
    return
  }
  func.func @transform_0(%arg0: i32) -> (i32, i32) {
    %c0_i32 = arith.constant 0 : i32
    %c0_i32_0 = arith.constant 0 : i32
    return %arg0, %c0_i32 : i32, i32
  }
  func.func @transform_1(%arg0: i32) -> (i32, i32) {
    %c0_i32 = arith.constant 0 : i32
    %c0_i32_0 = arith.constant 0 : i32
    %c0_i32_1 = arith.constant 0 : i32
    return %c0_i32, %c0_i32_0 : i32, i32
  }
  func.func @transform_2(%arg0: i32) -> (i32, i32) {
    %c0_i32 = arith.constant 0 : i32
    %c0_i32_0 = arith.constant 0 : i32
    %c0_i32_1 = arith.constant 0 : i32
    return %c0_i32, %c0_i32_0 : i32, i32
  }
  func.func @transform_3(%arg0: i32) -> (i32, i32) {
    %c0_i32 = arith.constant 0 : i32
    %c0_i32_0 = arith.constant 0 : i32
    %c0_i32_1 = arith.constant 0 : i32
    return %c0_i32, %c0_i32_0 : i32, i32
  }
  func.func @transform_4(%arg0: i32) -> (i32, i32) {
    %c0_i32 = arith.constant 0 : i32
    %c0_i32_0 = arith.constant 0 : i32
    %c0_i32_1 = arith.constant 0 : i32
    return %c0_i32, %c0_i32_0 : i32, i32
  }
  func.func @transform_5(%arg0: i32) -> (i32, i32) {
    %c0_i32 = arith.constant 0 : i32
    %c0_i32_0 = arith.constant 0 : i32
    %c0_i32_1 = arith.constant 0 : i32
    return %c0_i32, %c0_i32_0 : i32, i32
  }
  func.func @transform_6(%arg0: i32) -> (i32, i32) {
    %c0_i32 = arith.constant 0 : i32
    %c0_i32_0 = arith.constant 0 : i32
    %c0_i32_1 = arith.constant 0 : i32
    return %c0_i32, %c0_i32_0 : i32, i32
  }
  func.func @transform_7(%arg0: i32) -> (i32, i32) {
    %c0_i32 = arith.constant 0 : i32
    %c0_i32_0 = arith.constant 0 : i32
    %c0_i32_1 = arith.constant 0 : i32
    return %c0_i32, %c0_i32_0 : i32, i32
  }
  func.func @transform_8(%arg0: i32) -> (i32, i32) {
    %c0_i32 = arith.constant 0 : i32
    %c0_i32_0 = arith.constant 0 : i32
    %c0_i32_1 = arith.constant 0 : i32
    return %c0_i32, %c0_i32_0 : i32, i32
  }
  func.func @transform_9(%arg0: i32) -> (i32, i32) {
    %c0_i32 = arith.constant 0 : i32
    %c0_i32_0 = arith.constant 0 : i32
    %c0_i32_1 = arith.constant 0 : i32
    return %c0_i32, %c0_i32_0 : i32, i32
  }
  func.func @transform_10(%arg0: i32) -> (i32, i32) {
    %c0_i32 = arith.constant 0 : i32
    %c0_i32_0 = arith.constant 0 : i32
    %c0_i32_1 = arith.constant 0 : i32
    return %c0_i32, %c0_i32_0 : i32, i32
  }
  func.func @transform_11(%arg0: i32) -> (i32, i32) {
    %c0_i32 = arith.constant 0 : i32
    %c0_i32_0 = arith.constant 0 : i32
    %c0_i32_1 = arith.constant 0 : i32
    return %c0_i32, %c0_i32_0 : i32, i32
  }
  func.func @transform_12(%arg0: i32) -> (i32, i32) {
    %c0_i32 = arith.constant 0 : i32
    %c0_i32_0 = arith.constant 0 : i32
    %c0_i32_1 = arith.constant 0 : i32
    return %c0_i32, %c0_i32_0 : i32, i32
  }
  func.func @transform_13(%arg0: i32) -> (i32, i32) {
    %c0_i32 = arith.constant 0 : i32
    %c0_i32_0 = arith.constant 0 : i32
    %c0_i32_1 = arith.constant 0 : i32
    return %c0_i32, %c0_i32_0 : i32, i32
  }
  func.func @transform_14(%arg0: i32) -> (i32, i32) {
    %c0_i32 = arith.constant 0 : i32
    %c0_i32_0 = arith.constant 0 : i32
    return %arg0, %c0_i32 : i32, i32
  }
}

</mosaic_0001>

<bundles_post_ra>
// kernel: tpu_custom_call.1
= control target key start
LH: loop header
LB: loop body
LE: loop exit
PB: predicated region body
PF: predicated region fallthrough
CT: control target
= control target key end

     0   :  { %19 = vsyncpa [#allocation3], 0  ;;  %s10704_s0 = inlined_call_operand.hbm [shape: bf16[8,256], index: 0, kind: input, shape index: {}]   ;;  %s10705_s1 = inlined_call_operand.hbm [shape: bf16[256,1024], index: 1, kind: input, shape index: {}]   ;;  %s10706_s2 = inlined_call_operand.hbm [shape: bf16[1024,512], index: 2, kind: input, shape index: {}]   ;;  %s10707_s3 = inlined_call_operand.hbm [shape: bf16[512,256], index: 3, kind: input, shape index: {}]   ;;  %s10708_s4 = inlined_call_operand.hbm [shape: bf16[256,128], index: 4, kind: input, shape index: {}]   ;;  %s10709_s5 = inlined_call_operand.hbm [shape: bf16[128,128], index: 5, kind: input, shape index: {}]   ;;  %s10710_s6 = inlined_call_operand.hbm [shape: bf16[128,128], index: 6, kind: input, shape index: {}]   ;;  %s10711_s7 = inlined_call_operand.hbm [shape: bf16[128,128], index: 7, kind: input, shape index: {}]   ;;  %s10712_s8 = inlined_call_operand.hbm [shape: bf16[128,128], index: 8, kind: input, shape index: {}]   ;;  %s10713_s9 = inlined_call_operand.hbm [shape: bf16[128,256], index: 9, kind: input, shape index: {}]   ;;  %s10714_s10 = inlined_call_operand.hbm [shape: bf16[256,512], index: 10, kind: input, shape index: {}]   ;;  %s10715_s11 = inlined_call_operand.hbm [shape: bf16[512,1024], index: 11, kind: input, shape index: {}]   ;;  %s10716_s12 = inlined_call_operand.hbm [shape: bf16[1024,256], index: 12, kind: input, shape index: {}]   ;;  %s10717_s13 = inlined_call_operand.hbm [shape: f32[12,1024], index: 13, kind: input, shape index: {}]   ;;  %s10718_s14 = inlined_call_operand.hbm [shape: f32[8,256], index: 14, kind: output, shape index: {}]  }
   0x1   :  { %20 = vsyncpa [#allocation6], 0 }
   0x2   :  { %21 = vsyncpa [#allocation9], 0 }
   0x3   :  { %22 = vsyncpa [#allocation12], 0 }
   0x4   :  { %23 = vsyncpa [#allocation15], 0 }
   0x5   :  { %24 = vsyncpa [#allocation18], 0 }
   0x6   :  { %25 = vsyncpa [#allocation21], 0 }
   0x7   :  { %26 = vsyncpa [#allocation24], 0 }
   0x8   :  { %27 = vsyncpa [#allocation4], 0  ;;  %s10148_s29 = smov [#allocation5]   ;;  %s9800_s17 = scalar_lea.hbm %s10705_s1, 16384 }
   0x9   :  { %s43_s30 = sshll.u32 %s10148_s29, 4  ;;  %p9801_p0 = scmp.ne.s32.totalorder %s10705_s1, %s9800_s17  ;;  %s44_s30 = int_to_ptr.vmem [resolvable:$true] %s43_s30 }
   0xa   :  { %p9804_p1 = scmp.lt.u32.totalorder %s9800_s17, %s10705_s1 }
   0xc   :  { %p9806_p2 = pnand %p9804_p1, %p9801_p0 }
   0xe   :  { %9809 = shalt.err (!%p9806_p2)
}
   0xf   :  { %s9810_s22 = scalar_lea.vmem %s44_s30, 16384  ;;  %p9815_p4 = scmp.lt.s32.totalorder %s44_s30, %s44_s30 }
  0x10   :  { %p9811_p3 = scmp.ne.s32.totalorder %s44_s30, %s9810_s22  ;;  %p9816_p5 = scmp.lt.s32.totalorder %s9810_s22, %s9810_s22 }
  0x12   :  { %p9817_p6 = por %p9816_p5, %p9815_p4 }
  0x14   :  { %p9818_p7 = pnand %p9817_p6, %p9811_p3 }
  0x16   :  { %9821 = shalt.err (!%p9818_p7)
}
  0x17   :  { %s10719_s23 = smov 512   ;;  %s10150_s24 = smov 32  }
  0x18   :  { %49 = dma.hbm_to_vmem [thread:$0]  %s10705_s1, 16384, %s44_s30, [#allocation6], %s10719_s23, %s10719_s23, %s10150_s24  }
  0x19   :  { %s10151_s27 = smov [#allocation8]   ;;  %s9822_s16 = scalar_lea.hbm %s10707_s3, 8192 }
  0x1a   :  { %s67_s28 = sshll.u32 %s10151_s27, 4  ;;  %p9823_p8 = scmp.ne.s32.totalorder %s10707_s3, %s9822_s16  ;;  %s68_s28 = int_to_ptr.vmem [resolvable:$true] %s67_s28 }
  0x1b   :  { %p9826_p9 = scmp.lt.u32.totalorder %s9822_s16, %s10707_s3 }
  0x1d   :  { %p9828_p10 = pnand %p9826_p9, %p9823_p8 }
  0x1f   :  { %9831 = shalt.err (!%p9828_p10)
}
  0x20   :  { %s9832_s21 = scalar_lea.vmem %s68_s28, 8192  ;;  %p9837_p12 = scmp.lt.s32.totalorder %s68_s28, %s68_s28 }
  0x21   :  { %p9833_p11 = scmp.ne.s32.totalorder %s68_s28, %s9832_s21  ;;  %p9838_p13 = scmp.lt.s32.totalorder %s9832_s21, %s9832_s21 }
  0x23   :  { %p9839_p0 = por %p9838_p13, %p9837_p12 }
  0x25   :  { %p9840_p1 = pnand %p9839_p0, %p9833_p11 }
  0x27   :  { %9843 = shalt.err (!%p9840_p1)
}
  0x28   :  { %s10152_s1 = smov 128   ;;  %s10153_s30 = smov 8  }
  0x29   :  { %73 = dma.hbm_to_vmem [thread:$0]  %s10707_s3, 8192, %s68_s28, [#allocation9], %s10152_s1, %s10152_s1, %s10153_s30  }
  0x2a   :  { %s10154_s26 = smov [#allocation11]   ;;  %s10155_s29 = smov [#allocation14]  }
  0x2b   :  { %s91_s27 = sshll.u32 %s10154_s26, 4  ;;  %s115_s15 = sshll.u32 %s10155_s29, 4  ;;  %s92_s27 = int_to_ptr.vmem [resolvable:$true] %s91_s27  ;;  %s10280_s15 = int_to_ptr.vmem [resolvable:$true] %s115_s15 }
  0x2c   :  { %s9844_s18 = scalar_lea.hbm %s10709_s5, 1024 }
  0x2d   :  { %p9845_p2 = scmp.ne.s32.totalorder %s10709_s5, %s9844_s18  ;;  %p9848_p3 = scmp.lt.u32.totalorder %s9844_s18, %s10709_s5 }
  0x2f   :  { %p9850_p4 = pnand %p9848_p3, %p9845_p2 }
  0x31   :  { %9853 = shalt.err (!%p9850_p4)
}
  0x32   :  { %s9854_s3 = scalar_lea.vmem %s92_s27, 1024  ;;  %p9859_p6 = scmp.lt.s32.totalorder %s92_s27, %s92_s27 }
  0x33   :  { %p9855_p5 = scmp.ne.s32.totalorder %s92_s27, %s9854_s3  ;;  %p9860_p7 = scmp.lt.s32.totalorder %s9854_s3, %s9854_s3 }
  0x35   :  { %p9861_p8 = por %p9860_p7, %p9859_p6 }
  0x37   :  { %p9862_p9 = pnand %p9861_p8, %p9855_p5 }
  0x39   :  { %9865 = shalt.err (!%p9862_p9)
}
  0x3a   :  { %s10156_s28 = smov 64   ;;  %s10157_s22 = smov 4  }
  0x3b   :  { %97 = dma.hbm_to_vmem [thread:$0]  %s10709_s5, 1024, %s92_s27, [#allocation12], %s10156_s28, %s10156_s28, %s10157_s22  }
  0x3c   :  { %s9866_s16 = scalar_lea.hbm %s10711_s7, 1024 }
  0x3d   :  { %p9867_p10 = scmp.ne.s32.totalorder %s10711_s7, %s9866_s16  ;;  %p9870_p11 = scmp.lt.u32.totalorder %s9866_s16, %s10711_s7 }
  0x3f   :  { %p9872_p12 = pnand %p9870_p11, %p9867_p10 }
  0x41   :  { %9875 = shalt.err (!%p9872_p12)
}
  0x42   :  { %s9876_s21 = scalar_lea.vmem %s10280_s15, 1024  ;;  %p9881_p0 = scmp.lt.s32.totalorder %s10280_s15, %s10280_s15 }
  0x43   :  { %p9877_p13 = scmp.ne.s32.totalorder %s10280_s15, %s9876_s21  ;;  %p9882_p1 = scmp.lt.s32.totalorder %s9876_s21, %s9876_s21 }
  0x45   :  { %p9883_p2 = por %p9882_p1, %p9881_p0 }
  0x47   :  { %p9884_p3 = pnand %p9883_p2, %p9877_p13 }
  0x49   :  { %9887 = shalt.err (!%p9884_p3)
}
  0x4a   :  { %121 = dma.hbm_to_vmem [thread:$0]  %s10711_s7, 1024, %s10280_s15, [#allocation15], %s10156_s28, %s10156_s28, %s10157_s22  }
  0x4b   :  { %s10158_s3 = smov [#allocation17]   ;;  %s10159_s26 = smov [#allocation20]  }
  0x4c   :  { %s139_s25 = sshll.u32 %s10158_s3, 4  ;;  %s163_s23 = sshll.u32 %s10159_s26, 4  ;;  %s140_s25 = int_to_ptr.vmem [resolvable:$true] %s139_s25  ;;  %s10317_s23 = int_to_ptr.vmem [resolvable:$true] %s163_s23 }
  0x4d   :  { %s9888_s17 = scalar_lea.hbm %s10713_s9, 2048 }
  0x4e   :  { %p9889_p4 = scmp.ne.s32.totalorder %s10713_s9, %s9888_s17  ;;  %p9892_p5 = scmp.lt.u32.totalorder %s9888_s17, %s10713_s9 }
  0x50   :  { %p9894_p6 = pnand %p9892_p5, %p9889_p4 }
  0x52   :  { %9897 = shalt.err (!%p9894_p6)
}
  0x53   :  { %s9898_s7 = scalar_lea.vmem %s140_s25, 2048  ;;  %p9903_p8 = scmp.lt.s32.totalorder %s140_s25, %s140_s25 }
  0x54   :  { %p9899_p7 = scmp.ne.s32.totalorder %s140_s25, %s9898_s7  ;;  %p9904_p9 = scmp.lt.s32.totalorder %s9898_s7, %s9898_s7 }
  0x56   :  { %p9905_p10 = por %p9904_p9, %p9903_p8 }
  0x58   :  { %p9906_p11 = pnand %p9905_p10, %p9899_p7 }
  0x5a   :  { %9909 = shalt.err (!%p9906_p11)
}
  0x5b   :  { %145 = dma.hbm_to_vmem [thread:$0]  %s10713_s9, 2048, %s140_s25, [#allocation18], %s10152_s1, %s10152_s1, %s10153_s30  }
  0x5c   :  { %s9910_s26 = scalar_lea.hbm %s10715_s11, 32768 }
  0x5d   :  { %p9911_p12 = scmp.ne.s32.totalorder %s10715_s11, %s9910_s26  ;;  %p9914_p13 = scmp.lt.u32.totalorder %s9910_s26, %s10715_s11 }
  0x5f   :  { %p9916_p0 = pnand %p9914_p13, %p9911_p12 }
  0x61   :  { %9919 = shalt.err (!%p9916_p0)
}
  0x62   :  { %s9920_s19 = scalar_lea.vmem %s10317_s23, 32768  ;;  %p9925_p2 = scmp.lt.s32.totalorder %s10317_s23, %s10317_s23 }
  0x63   :  { %p9921_p1 = scmp.ne.s32.totalorder %s10317_s23, %s9920_s19  ;;  %p9926_p3 = scmp.lt.s32.totalorder %s9920_s19, %s9920_s19 }
  0x65   :  { %p9927_p4 = por %p9926_p3, %p9925_p2 }
  0x67   :  { %p9928_p5 = pnand %p9927_p4, %p9921_p1 }
  0x69   :  { %9931 = shalt.err (!%p9928_p5)
}
  0x6a   :  { %s10720_s9 = smov 512   ;;  %s10160_s21 = smov [#allocation2]  }
  0x6b   :  { %169 = dma.hbm_to_vmem [thread:$0]  %s10715_s11, 32768, %s10317_s23, [#allocation21], %s10720_s9, %s10720_s9, %s10150_s24  }
  0x6c   :  { %s34_s7 = sshll.u32 %s10160_s21, 4  ;;  %s10161_s15 = smov [#allocation7]   ;;  %s35_s7 = int_to_ptr.vmem [resolvable:$true] %s34_s7 }
  0x6d   :  { %s55_s5 = sshll.u32 %s10161_s15, 4  ;;  %s9932_s26 = scalar_lea.hbm %s10704_s0, 128  ;;  %s10354_s5 = int_to_ptr.vmem [resolvable:$true] %s55_s5 }
  0x6e   :  { %p9933_p6 = scmp.ne.s32.totalorder %s10704_s0, %s9932_s26  ;;  %p9936_p7 = scmp.lt.u32.totalorder %s9932_s26, %s10704_s0 }
  0x70   :  { %p9938_p8 = pnand %p9936_p7, %p9933_p6 }
  0x72   :  { %9941 = shalt.err (!%p9938_p8)
}
  0x73   :  { %s9942_s11 = scalar_lea.vmem %s35_s7, 128  ;;  %p9947_p10 = scmp.lt.s32.totalorder %s35_s7, %s35_s7 }
  0x74   :  { %p9943_p9 = scmp.ne.s32.totalorder %s35_s7, %s9942_s11  ;;  %p9948_p11 = scmp.lt.s32.totalorder %s9942_s11, %s9942_s11 }
  0x76   :  { %p9949_p12 = por %p9948_p11, %p9947_p10 }
  0x78   :  { %p9950_p13 = pnand %p9949_p12, %p9943_p9 }
  0x7a   :  { %9953 = shalt.err (!%p9950_p13)
}
  0x7b   :  { %37 = dma.hbm_to_vmem [thread:$0]  %s10704_s0, 128, %s35_s7, [#allocation3]  }
  0x7c   :  { %s9954_s25 = scalar_lea.hbm %s10706_s2, 32768 }
  0x7d   :  { %p9955_p0 = scmp.ne.s32.totalorder %s10706_s2, %s9954_s25  ;;  %p9958_p1 = scmp.lt.u32.totalorder %s9954_s25, %s10706_s2 }
  0x7f   :  { %p9960_p2 = pnand %p9958_p1, %p9955_p0 }
  0x81   :  { %9963 = shalt.err (!%p9960_p2)
}
  0x82   :  { %s9964_s3 = scalar_lea.vmem %s10354_s5, 32768  ;;  %p9969_p4 = scmp.lt.s32.totalorder %s10354_s5, %s10354_s5 }
  0x83   :  { %p9965_p3 = scmp.ne.s32.totalorder %s10354_s5, %s9964_s3  ;;  %p9970_p5 = scmp.lt.s32.totalorder %s9964_s3, %s9964_s3 }
  0x85   :  { %p9971_p6 = por %p9970_p5, %p9969_p4 }
  0x87   :  { %p9972_p7 = pnand %p9971_p6, %p9965_p3 }
  0x89   :  { %9975 = shalt.err (!%p9972_p7)
}
  0x8a   :  { %s10162_s0 = smov 256   ;;  %s10163_s7 = smov 16  }
  0x8b   :  { %61 = dma.hbm_to_vmem [thread:$0]  %s10706_s2, 32768, %s10354_s5, [#allocation6], %s10162_s0, %s10162_s0, %s10163_s7  }
  0x8c   :  { %s10164_s16 = smov [#allocation10]   ;;  %s10165_s18 = smov [#allocation13]  }
  0x8d   :  { %s79_s17 = sshll.u32 %s10164_s16, 4  ;;  %s103_s11 = sshll.u32 %s10165_s18, 4  ;;  %s80_s17 = int_to_ptr.vmem [resolvable:$true] %s79_s17  ;;  %s10388_s11 = int_to_ptr.vmem [resolvable:$true] %s103_s11 }
  0x8e   :  { %s9976_s19 = scalar_lea.hbm %s10708_s4, 2048 }
  0x8f   :  { %p9977_p8 = scmp.ne.s32.totalorder %s10708_s4, %s9976_s19  ;;  %p9980_p9 = scmp.lt.u32.totalorder %s9976_s19, %s10708_s4 }
  0x91   :  { %p9982_p10 = pnand %p9980_p9, %p9977_p8 }
  0x93   :  { %9985 = shalt.err (!%p9982_p10)
}
  0x94   :  { %s9986_s2 = scalar_lea.vmem %s80_s17, 2048  ;;  %p9991_p12 = scmp.lt.s32.totalorder %s80_s17, %s80_s17 }
  0x95   :  { %p9987_p11 = scmp.ne.s32.totalorder %s80_s17, %s9986_s2  ;;  %p9992_p13 = scmp.lt.s32.totalorder %s9986_s2, %s9986_s2 }
  0x97   :  { %p9993_p0 = por %p9992_p13, %p9991_p12 }
  0x99   :  { %p9994_p1 = pnand %p9993_p0, %p9987_p11 }
  0x9b   :  { %9997 = shalt.err (!%p9994_p1)
}
  0x9c   :  { %85 = dma.hbm_to_vmem [thread:$0]  %s10708_s4, 2048, %s80_s17, [#allocation9], %s10156_s28, %s10156_s28, %s10157_s22  }
  0x9d   :  { %s9998_s26 = scalar_lea.hbm %s10710_s6, 1024 }
  0x9e   :  { %p9999_p2 = scmp.ne.s32.totalorder %s10710_s6, %s9998_s26  ;;  %p10002_p3 = scmp.lt.u32.totalorder %s9998_s26, %s10710_s6 }
  0xa0   :  { %p10004_p4 = pnand %p10002_p3, %p9999_p2 }
  0xa2   :  { %10007 = shalt.err (!%p10004_p4)
}
  0xa3   :  { %s10008_s23 = scalar_lea.vmem %s10388_s11, 1024  ;;  %p10013_p6 = scmp.lt.s32.totalorder %s10388_s11, %s10388_s11 }
  0xa4   :  { %p10009_p5 = scmp.ne.s32.totalorder %s10388_s11, %s10008_s23  ;;  %p10014_p7 = scmp.lt.s32.totalorder %s10008_s23, %s10008_s23 }
  0xa6   :  { %p10015_p8 = por %p10014_p7, %p10013_p6 }
  0xa8   :  { %p10016_p9 = pnand %p10015_p8, %p10009_p5 }
  0xaa   :  { %10019 = shalt.err (!%p10016_p9)
}
  0xab   :  { %109 = dma.hbm_to_vmem [thread:$0]  %s10710_s6, 1024, %s10388_s11, [#allocation12], %s10156_s28, %s10156_s28, %s10157_s22  }
  0xac   :  { %s10166_s19 = smov [#allocation16]   ;;  %s10167_s25 = smov [#allocation19]  }
  0xad   :  { %s127_s9 = sshll.u32 %s10166_s19, 4  ;;  %s151_s20 = sshll.u32 %s10167_s25, 4  ;;  %s128_s9 = int_to_ptr.vmem [resolvable:$true] %s127_s9  ;;  %s10425_s20 = int_to_ptr.vmem [resolvable:$true] %s151_s20 }
  0xae   :  { %s10020_s5 = scalar_lea.hbm %s10712_s8, 1024 }
  0xaf   :  { %p10021_p10 = scmp.ne.s32.totalorder %s10712_s8, %s10020_s5  ;;  %p10024_p11 = scmp.lt.u32.totalorder %s10020_s5, %s10712_s8 }
  0xb1   :  { %p10026_p12 = pnand %p10024_p11, %p10021_p10 }
  0xb3   :  { %10029 = shalt.err (!%p10026_p12)
}
  0xb4   :  { %s10030_s6 = scalar_lea.vmem %s128_s9, 1024  ;;  %p10035_p0 = scmp.lt.s32.totalorder %s128_s9, %s128_s9 }
  0xb5   :  { %p10031_p13 = scmp.ne.s32.totalorder %s128_s9, %s10030_s6  ;;  %p10036_p1 = scmp.lt.s32.totalorder %s10030_s6, %s10030_s6 }
  0xb7   :  { %p10037_p2 = por %p10036_p1, %p10035_p0 }
  0xb9   :  { %p10038_p3 = pnand %p10037_p2, %p10031_p13 }
  0xbb   :  { %10041 = shalt.err (!%p10038_p3)
}
  0xbc   :  { %133 = dma.hbm_to_vmem [thread:$0]  %s10712_s8, 1024, %s128_s9, [#allocation15], %s10156_s28, %s10156_s28, %s10157_s22  }
  0xbd   :  { %s10042_s24 = scalar_lea.hbm %s10714_s10, 8192 }
  0xbe   :  { %p10043_p4 = scmp.ne.s32.totalorder %s10714_s10, %s10042_s24  ;;  %p10046_p5 = scmp.lt.u32.totalorder %s10042_s24, %s10714_s10 }
  0xc0   :  { %p10048_p6 = pnand %p10046_p5, %p10043_p4 }
  0xc2   :  { %10051 = shalt.err (!%p10048_p6)
}
  0xc3   :  { %s10052_s25 = scalar_lea.vmem %s10425_s20, 8192  ;;  %p10057_p8 = scmp.lt.s32.totalorder %s10425_s20, %s10425_s20 }
  0xc4   :  { %p10053_p7 = scmp.ne.s32.totalorder %s10425_s20, %s10052_s25  ;;  %p10058_p9 = scmp.lt.s32.totalorder %s10052_s25, %s10052_s25 }
  0xc6   :  { %p10059_p10 = por %p10058_p9, %p10057_p8 }
  0xc8   :  { %p10060_p11 = pnand %p10059_p10, %p10053_p7 }
  0xca   :  { %10063 = shalt.err (!%p10060_p11)
}
  0xcb   :  { %157 = dma.hbm_to_vmem [thread:$0]  %s10714_s10, 8192, %s10425_s20, [#allocation18], %s10162_s0, %s10162_s0, %s10163_s7  }
  0xcc   :  { %s10168_s9 = smov [#allocation22]   ;;  %s10169_s2 = smov [#allocation23]  }
  0xcd   :  { %s175_s21 = sshll.u32 %s10168_s9, 4  ;;  %s187_s5 = sshll.u32 %s10169_s2, 4  ;;  %s176_s21 = int_to_ptr.vmem [resolvable:$true] %s175_s21  ;;  %s10462_s5 = int_to_ptr.vmem [resolvable:$true] %s187_s5 }
  0xce   :  { %s10064_s3 = scalar_lea.hbm %s10716_s12, 16384 }
  0xcf   :  { %p10065_p12 = scmp.ne.s32.totalorder %s10716_s12, %s10064_s3  ;;  %p10068_p13 = scmp.lt.u32.totalorder %s10064_s3, %s10716_s12 }
  0xd1   :  { %p10070_p0 = pnand %p10068_p13, %p10065_p12 }
  0xd3   :  { %10073 = shalt.err (!%p10070_p0)
}
  0xd4   :  { %s10074_s10 = scalar_lea.vmem %s176_s21, 16384  ;;  %p10079_p2 = scmp.lt.s32.totalorder %s176_s21, %s176_s21 }
  0xd5   :  { %p10075_p1 = scmp.ne.s32.totalorder %s176_s21, %s10074_s10  ;;  %p10080_p3 = scmp.lt.s32.totalorder %s10074_s10, %s10074_s10 }
  0xd7   :  { %p10081_p4 = por %p10080_p3, %p10079_p2 }
  0xd9   :  { %p10082_p5 = pnand %p10081_p4, %p10075_p1 }
  0xdb   :  { %10085 = shalt.err (!%p10082_p5)
}
  0xdc   :  { %181 = dma.hbm_to_vmem [thread:$0]  %s10716_s12, 16384, %s176_s21, [#allocation21], %s10152_s1, %s10152_s1, %s10153_s30  }
  0xdd   :  { %s10086_s18 = scalar_lea.hbm %s10717_s13, 2048 }
  0xde   :  { %p10087_p6 = scmp.ne.s32.totalorder %s10717_s13, %s10086_s18  ;;  %p10090_p7 = scmp.lt.u32.totalorder %s10086_s18, %s10717_s13 }
  0xe0   :  { %p10092_p8 = pnand %p10090_p7, %p10087_p6 }
  0xe2   :  { %10095 = shalt.err (!%p10092_p8)
}
  0xe3   :  { %s10096_s19 = scalar_lea.vmem %s10462_s5, 2048  ;;  %p10101_p10 = scmp.lt.s32.totalorder %s10462_s5, %s10462_s5 }
  0xe4   :  { %p10097_p9 = scmp.ne.s32.totalorder %s10462_s5, %s10096_s19  ;;  %p10102_p11 = scmp.lt.s32.totalorder %s10096_s19, %s10096_s19 }
  0xe6   :  { %p10103_p12 = por %p10102_p11, %p10101_p10 }
  0xe8   :  { %p10104_p13 = pnand %p10103_p12, %p10097_p9 }
  0xea   :  { %10107 = shalt.err (!%p10104_p13)
}
  0xeb   :  { %s10170_s12 = smov 1024  }
  0xec   :  { %193 = dma.hbm_to_vmem [thread:$0]  %s10717_s13, 2048, %s10462_s5, [#allocation24], %s10170_s12, %s10170_s12, %s10156_s28  }
  0xed   :  { %10130 = dma.done.wait [#allocation3], 128  }
  0xee   :  { %10131 = vsyncadd [#allocation3], 4294967168 }
  0xef   :  { %10132 = dma.done.wait [#allocation6], 49152  }
  0xf0   :  { %10133 = vsyncadd [#allocation6], 4294918144 }
  0xf1   :  { %10134 = dma.done.wait [#allocation9], 10240  }
  0xf2   :  { %10135 = vsyncadd [#allocation9], 4294957056 }
  0xf3   :  { %10136 = dma.done.wait [#allocation12], 2048  }
  0xf4   :  { %10137 = vsyncadd [#allocation12], 4294965248 }
  0xf5   :  { %10138 = dma.done.wait [#allocation15], 2048  }
  0xf6   :  { %10139 = vsyncadd [#allocation15], 4294965248 }
  0xf7   :  { %10140 = dma.done.wait [#allocation18], 10240  }
  0xf8   :  { %10141 = vsyncadd [#allocation18], 4294957056 }
  0xf9   :  { %10142 = dma.done.wait [#allocation21], 49152  }
  0xfa   :  { %10143 = vsyncadd [#allocation21], 4294918144 }
  0xfb   :  { %10144 = dma.done.wait [#allocation24], 2048  }
  0xfc   :  { %10145 = vsyncadd [#allocation24], 4294965248  ;;  %v238_v0 = vld [vmem:[#allocation5] sm:$0xff]  ;;  %v10497_v17 = vld [vmem:[#allocation2] sm:$0xff]  ;;  %vm10172_vm0 = vmmov 0   ;;  %s10174_s13 = smov [#allocation25]  }
  0xfd   :  { %v242_v1 = vld [vmem:[#allocation5 + $0x20] sm:$0xff]  ;;  %v10501_v18 = vcombine.high %v10497_v17, %v10497_v17  ;;  %s7743_s28 = sshll.u32 %s10174_s13, 4  ;;  %s7744_s28 = int_to_ptr.vmem [resolvable:$true] %s7743_s28 }
  0xfe   :  { %v246_v2 = vld [vmem:[#allocation5 + $0x40] sm:$0xff]  ;;  %v7762_v3 = vcombine.high %v238_v0, %v242_v1  ;;  %v7761_v4 = vcombine.low %v238_v0, %v242_v1  ;;  %v239_v0 = vld [vmem:[#allocation5 + $0x8] sm:$0xff]  ;;  %s10108_s25 = scalar_lea.vmem %s7744_s28, 256  ;;  %p10113_p1 = scmp.lt.s32.totalorder %s7744_s28, %s7744_s28 }
  0xff   :  { %v250_v5 = vld [vmem:[#allocation5 + $0x60] sm:$0xff]  ;;  %1089 = vmatprep.mubr.bf16.mxu1 %v10501_v18  ;;  %v243_v1 = vld [vmem:[#allocation5 + $0x28] sm:$0xff]  ;;  %p10109_p0 = scmp.ne.s32.totalorder %s7744_s28, %s10108_s25  ;;  %p10114_p2 = scmp.lt.s32.totalorder %s10108_s25, %s10108_s25 }
 0x100   :  { %v7770_v6 = vcombine.high %v246_v2, %v250_v5  ;;  %v254_v7 = vld [vmem:[#allocation5 + $0x80] sm:$0xff]  ;;  %1057 = vmatprep.subr.bf16.mxu1 %v7762_v3  ;;  %v7769_v9 = vcombine.low %v246_v2, %v250_v5  ;;  %v251_v5 = vld [vmem:[#allocation5 + $0x68] sm:$0xff] }
 0x101   :  { %v258_v8 = vld [vmem:[#allocation5 + $0xa0] sm:$0xff]  ;;  %1058 = vmatpush1.bf16.msra.mxu1 %v7761_v4  ;;  %v247_v4 = vld [vmem:[#allocation5 + $0x48] sm:$0xff]  ;;  %p10115_p3 = por %p10114_p2, %p10113_p1 }
 0x102   :  { %1059 = vmatprep.subr.bf16.mxu1 %v7770_v6  ;;  %v7778_v10 = vcombine.high %v254_v7, %v258_v8  ;;  %v262_v11 = vld [vmem:[#allocation5 + $0xc0] sm:$0xff]  ;;  %v7777_v13 = vcombine.low %v254_v7, %v258_v8  ;;  %v7764_v6 = vcombine.high %v239_v0, %v243_v1  ;;  %v10506_v7 = vcombine.low %v10497_v17, %v10497_v17  ;;  %v271_v17 = vld [vmem:[#allocation5 + $0x108] sm:$0xff] }
 0x103   :  { %v266_v12 = vld [vmem:[#allocation5 + $0xe0] sm:$0xff]  ;;  %v7763_v8 = vcombine.low %v239_v0, %v243_v1  ;;  %p10116_p4 = pnand %p10115_p3, %p10109_p0 }
 0x104   :  { %v7786_v14 = vcombine.high %v262_v11, %v266_v12  ;;  %v270_v15 = vld [vmem:[#allocation5 + $0x100] sm:$0xff]  ;;  %v7785_v19 = vcombine.low %v262_v11, %v266_v12  ;;  %v7772_v11 = vcombine.high %v247_v4, %v251_v5  ;;  %v7771_v12 = vcombine.low %v247_v4, %v251_v5  ;;  %v351_v4 = vld [vmem:[#allocation5 + $0x388] sm:$0xff] }
 0x105   :  { %1060 = vmatpush1.bf16.msra.mxu1 %v7769_v9  ;;  %v274_v16 = vld [vmem:[#allocation5 + $0x120] sm:$0xff]  ;;  %v255_v9 = vld [vmem:[#allocation5 + $0x88] sm:$0xff] }
 0x106   :  { %1061 = vmatprep.subr.bf16.mxu1 %v7778_v10  ;;  %v7794_v20 = vcombine.high %v270_v15, %v274_v16  ;;  %v278_v21 = vld [vmem:[#allocation5 + $0x140] sm:$0xff]  ;;  %v7793_v23 = vcombine.low %v270_v15, %v274_v16  ;;  %v259_v10 = vld [vmem:[#allocation5 + $0xa8] sm:$0xff] }
 0x107   :  { %v282_v22 = vld [vmem:[#allocation5 + $0x160] sm:$0xff]  ;;  %v7780_v15 = vcombine.high %v255_v9, %v259_v10  ;;  %v7779_v16 = vcombine.low %v255_v9, %v259_v10  ;;  %v355_v5 = vld [vmem:[#allocation5 + $0x3a8] sm:$0xff] }
 0x108   :  { %v7802_v24 = vcombine.high %v278_v21, %v282_v22  ;;  %v286_v25 = vld [vmem:[#allocation5 + $0x180] sm:$0xff]  ;;  %v7801_v27 = vcombine.low %v278_v21, %v282_v22  ;;  %v279_v22 = vld [vmem:[#allocation5 + $0x148] sm:$0xff] }
 0x109   :  { %1062 = vmatpush1.bf16.msra.mxu1 %v7777_v13  ;;  %v290_v26 = vld [vmem:[#allocation5 + $0x1a0] sm:$0xff]  ;;  %v263_v13 = vld [vmem:[#allocation5 + $0xc8] sm:$0xff] }
 0x10a   :  { %1063 = vmatprep.subr.bf16.mxu1 %v7786_v14  ;;  %v7810_v28 = vcombine.high %v286_v25, %v290_v26  ;;  %v294_v29 = vld [vmem:[#allocation5 + $0x1c0] sm:$0xff]  ;;  %v7809_v31 = vcombine.low %v286_v25, %v290_v26  ;;  %v267_v14 = vld [vmem:[#allocation5 + $0xe8] sm:$0xff] }
 0x10b   :  { %v298_v30 = vld [vmem:[#allocation5 + $0x1e0] sm:$0xff]  ;;  %v7787_v21 = vcombine.low %v263_v13, %v267_v14  ;;  %v287_v26 = vld [vmem:[#allocation5 + $0x188] sm:$0xff] }
 0x10c   :  { %v7818_v32 = vcombine.high %v294_v29, %v298_v30  ;;  %v302_v33 = vld [vmem:[#allocation5 + $0x200] sm:$0xff]  ;;  %v7817_v35 = vcombine.low %v294_v29, %v298_v30  ;;  %v295_v30 = vld [vmem:[#allocation5 + $0x1c8] sm:$0xff] }
 0x10d   :  { %1064 = vmatpush1.bf16.msra.mxu1 %v7785_v19  ;;  %v306_v34 = vld [vmem:[#allocation5 + $0x220] sm:$0xff]  ;;  %v275_v19 = vld [vmem:[#allocation5 + $0x128] sm:$0xff] }
 0x10e   :  { %1065 = vmatprep.subr.bf16.mxu1 %v7794_v20  ;;  %v310_v36 = vld [vmem:[#allocation5 + $0x240] sm:$0xff]  ;;  %v7826_v38 = vcombine.high %v302_v33, %v306_v34  ;;  %v7825_v39 = vcombine.low %v302_v33, %v306_v34  ;;  %v7788_v20 = vcombine.high %v263_v13, %v267_v14  ;;  %v7795_v25 = vcombine.low %v271_v17, %v275_v19  ;;  %v303_v34 = vld [vmem:[#allocation5 + $0x208] sm:$0xff] }
 0x10f   :  { %v314_v37 = vld [vmem:[#allocation5 + $0x260] sm:$0xff]  ;;  %v7876_v13 = vcombine.high %v351_v4, %v355_v5 }
 0x110   :  { %v318_v40 = vld [vmem:[#allocation5 + $0x280] sm:$0xff]  ;;  %v7834_v42 = vcombine.high %v310_v36, %v314_v37  ;;  %v7833_v43 = vcombine.low %v310_v36, %v314_v37 }
 0x111   :  { %1066 = vmatpush1.bf16.msra.mxu1 %v7793_v23  ;;  %v322_v41 = vld [vmem:[#allocation5 + $0x2a0] sm:$0xff]  ;;  %v283_v23 = vld [vmem:[#allocation5 + $0x168] sm:$0xff] }
 0x112   :  { %1067 = vmatprep.subr.bf16.mxu1 %v7802_v24  ;;  %v326_v44 = vld [vmem:[#allocation5 + $0x2c0] sm:$0xff]  ;;  %v7842_v46 = vcombine.high %v318_v40, %v322_v41  ;;  %v7841_v47 = vcombine.low %v318_v40, %v322_v41  ;;  %v7796_v24 = vcombine.high %v271_v17, %v275_v19  ;;  %v7803_v29 = vcombine.low %v279_v22, %v283_v23  ;;  %v240_v17 = vld [vmem:[#allocation5 + $0x10] sm:$0xff] }
 0x113   :  { %v330_v45 = vld [vmem:[#allocation5 + $0x2e0] sm:$0xff]  ;;  %v244_v19 = vld [vmem:[#allocation5 + $0x30] sm:$0xff] }
 0x114   :  { %v334_v48 = vld [vmem:[#allocation5 + $0x300] sm:$0xff]  ;;  %v7850_v50 = vcombine.high %v326_v44, %v330_v45  ;;  %v7849_v51 = vcombine.low %v326_v44, %v330_v45  ;;  %v319_v44 = vld [vmem:[#allocation5 + $0x288] sm:$0xff] }
 0x115   :  { %1068 = vmatpush1.bf16.msra.mxu1 %v7801_v27  ;;  %v338_v49 = vld [vmem:[#allocation5 + $0x320] sm:$0xff]  ;;  %v291_v27 = vld [vmem:[#allocation5 + $0x1a8] sm:$0xff] }
 0x116   :  { %1069 = vmatprep.subr.bf16.mxu1 %v7810_v28  ;;  %v342_v52 = vld [vmem:[#allocation5 + $0x340] sm:$0xff]  ;;  %v7858_v54 = vcombine.high %v334_v48, %v338_v49  ;;  %v7857_v55 = vcombine.low %v334_v48, %v338_v49  ;;  %v7804_v28 = vcombine.high %v279_v22, %v283_v23  ;;  %v7811_v33 = vcombine.low %v287_v26, %v291_v27  ;;  %v323_v45 = vld [vmem:[#allocation5 + $0x2a8] sm:$0xff] }
 0x117   :  { %v346_v53 = vld [vmem:[#allocation5 + $0x360] sm:$0xff] }
 0x118   :  { %v350_v56 = vld [vmem:[#allocation5 + $0x380] sm:$0xff]  ;;  %v7866_v58 = vcombine.high %v342_v52, %v346_v53  ;;  %v7865_v59 = vcombine.low %v342_v52, %v346_v53  ;;  %v7844_v52 = vcombine.high %v319_v44, %v323_v45 }
 0x119   :  { %1070 = vmatpush1.bf16.msra.mxu1 %v7809_v31  ;;  %v354_v57 = vld [vmem:[#allocation5 + $0x3a0] sm:$0xff]  ;;  %v299_v31 = vld [vmem:[#allocation5 + $0x1e8] sm:$0xff] }
 0x11a   :  { %1071 = vmatprep.subr.bf16.mxu1 %v7818_v32  ;;  %v358_v60 = vld [vmem:[#allocation5 + $0x3c0] sm:$0xff]  ;;  %v7874_v62 = vcombine.high %v350_v56, %v354_v57  ;;  %v7873_v63 = vcombine.low %v350_v56, %v354_v57  ;;  %v7812_v32 = vcombine.high %v287_v26, %v291_v27  ;;  %v7820_v36 = vcombine.high %v295_v30, %v299_v31  ;;  %v335_v56 = vld [vmem:[#allocation5 + $0x308] sm:$0xff] }
 0x11b   :  { %v362_v61 = vld [vmem:[#allocation5 + $0x3e0] sm:$0xff]  ;;  %v7819_v37 = vcombine.low %v295_v30, %v299_v31  ;;  %v339_v57 = vld [vmem:[#allocation5 + $0x328] sm:$0xff]  ;;  %v7766_v26 = vcombine.high %v240_v17, %v244_v19  ;;  %v256_v31 = vld [vmem:[#allocation5 + $0x90] sm:$0xff] }
 0x11c   :  { %v7882_v2 = vcombine.high %v358_v60, %v362_v61  ;;  %v7881_v3 = vcombine.low %v358_v60, %v362_v61  ;;  %v8960_v41 = vld [vmem:[#allocation7 + $0x4] ss:$16 sps:$4 sm:$0xff]   ;;  %v8965_v48 = vld [vmem:[#allocation7 + $0x20] ss:$16 sps:$4 sm:$0xff]   ;;  %v7860_v0 = vcombine.high %v335_v56, %v339_v57 }
 0x11d   :  { %1072 = vmatpush1.bf16.msra.mxu1 %v7817_v35  ;;  %v307_v35 = vld [vmem:[#allocation5 + $0x228] sm:$0xff]  ;;  %2796 = vmatprep.subr.bf16.mxu0 %v8960_v41  ;;  %v8966_v53 = vld [vmem:[#allocation7 + $0x44] ss:$16 sps:$4 sm:$0xff]   ;;  %v8971_v60 = vld [vmem:[#allocation7 + $0x60] ss:$16 sps:$4 sm:$0xff]  }
 0x11e   :  { %1073 = vmatprep.subr.bf16.mxu1 %v7826_v38  ;;  %v311_v38 = vld [vmem:[#allocation5 + $0x248] sm:$0xff]  ;;  %v7828_v40 = vcombine.high %v303_v34, %v307_v35  ;;  %v8972_v1 = vld [vmem:[#allocation7 + $0x84] ss:$16 sps:$4 sm:$0xff]   ;;  %v8977_v9 = vld [vmem:[#allocation7 + $0xa0] ss:$16 sps:$4 sm:$0xff]  }
 0x11f   :  { %v8978_v14 = vld [vmem:[#allocation7 + $0xc4] ss:$16 sps:$4 sm:$0xff]   ;;  %v8983_v22 = vld [vmem:[#allocation7 + $0xe0] ss:$16 sps:$4 sm:$0xff]  }
 0x120   :  { %v8984_v27 = vld [vmem:[#allocation7 + $0x104] ss:$16 sps:$4 sm:$0xff]  }
 0x121   :  { %1074 = vmatpush1.bf16.msra.mxu1 %v7825_v39  ;;  %v315_v39 = vld [vmem:[#allocation5 + $0x268] sm:$0xff] }
 0x122   :  { %1075 = vmatprep.subr.bf16.mxu1 %v7834_v42  ;;  %v8962_v42 = vld [vmem:[#allocation7] ss:$16 sps:$4 sm:$0xff]   ;;  %v7835_v49 = vcombine.low %v311_v38, %v315_v39 }
 0x123   :  { %2797 = vmatpush1.bf16.msra.mxu0 %v8962_v42  ;;  %v272_v42 = vld [vmem:[#allocation5 + $0x110] sm:$0xff] }
 0x125   :  { %1076 = vmatpush1.bf16.msra.mxu1 %v7833_v43  ;;  %v7827_v43 = vcombine.low %v303_v34, %v307_v35  ;;  %v8992_v34 = vld [vmem:[#allocation7 + $0x120] ss:$16 sps:$4 sm:$0xff]  }
 0x126   :  { %1077 = vmatprep.subr.bf16.mxu1 %v7842_v46  ;;  %v7836_v46 = vcombine.high %v311_v38, %v315_v39  ;;  %v8993_v38 = vld [vmem:[#allocation7 + $0x144] ss:$16 sps:$4 sm:$0xff]  }
 0x129   :  { %1078 = vmatpush1.bf16.msra.mxu1 %v7841_v47  ;;  %v8963_v47 = vld [vmem:[#allocation7 + $0x24] ss:$16 sps:$4 sm:$0xff]  }
 0x12a   :  { %1079 = vmatprep.subr.bf16.mxu1 %v7850_v50  ;;  %2798 = vmatprep.subr.bf16.mxu0 %v8963_v47  ;;  %v327_v50 = vld [vmem:[#allocation5 + $0x2c8] sm:$0xff] }
 0x12b   :  { %2799 = vmatpush1.bf16.msra.mxu0 %v8965_v48  ;;  %v280_v48 = vld [vmem:[#allocation5 + $0x150] sm:$0xff] }
 0x12c   :  { %2800 = vmatprep.subr.bf16.mxu0 %v8966_v53 }
 0x12d   :  { %1080 = vmatpush1.bf16.msra.mxu1 %v7849_v51  ;;  %v331_v51 = vld [vmem:[#allocation5 + $0x2e8] sm:$0xff] }
 0x12e   :  { %1081 = vmatprep.subr.bf16.mxu1 %v7858_v54  ;;  %v8968_v54 = vld [vmem:[#allocation7 + $0x40] ss:$16 sps:$4 sm:$0xff]   ;;  %v7851_v61 = vcombine.low %v327_v50, %v331_v51 }
 0x12f   :  { %2801 = vmatpush1.bf16.msra.mxu0 %v8968_v54  ;;  %v288_v54 = vld [vmem:[#allocation5 + $0x190] sm:$0xff] }
 0x131   :  { %1082 = vmatpush1.bf16.msra.mxu1 %v7857_v55  ;;  %v7843_v55 = vcombine.low %v319_v44, %v323_v45  ;;  %v8999_v44 = vld [vmem:[#allocation7 + $0x164] ss:$16 sps:$4 sm:$0xff]  }
 0x132   :  { %1083 = vmatprep.subr.bf16.mxu1 %v7866_v58  ;;  %v7852_v58 = vcombine.high %v327_v50, %v331_v51  ;;  %v9005_v50 = vld [vmem:[#allocation7 + $0x184] ss:$16 sps:$4 sm:$0xff]  }
 0x135   :  { %1084 = vmatpush1.bf16.msra.mxu1 %v7865_v59  ;;  %v8969_v59 = vld [vmem:[#allocation7 + $0x64] ss:$16 sps:$4 sm:$0xff]  }
 0x136   :  { %1085 = vmatprep.subr.bf16.mxu1 %v7874_v62  ;;  %2802 = vmatprep.subr.bf16.mxu0 %v8969_v59  ;;  %v343_v62 = vld [vmem:[#allocation5 + $0x348] sm:$0xff] }
 0x137   :  { %2803 = vmatpush1.bf16.msra.mxu0 %v8971_v60 }
 0x138   :  { %2804 = vmatprep.subr.bf16.mxu0 %v8972_v1 }
 0x139   :  { %1086 = vmatpush1.bf16.msra.mxu1 %v7873_v63  ;;  %v347_v63 = vld [vmem:[#allocation5 + $0x368] sm:$0xff] }
 0x13a   :  { %1087 = vmatprep.subr.bf16.mxu1 %v7882_v2  ;;  %v8974_v2 = vld [vmem:[#allocation7 + $0x80] ss:$16 sps:$4 sm:$0xff]   ;;  %v7867_v10 = vcombine.low %v343_v62, %v347_v63 }
 0x13b   :  { %2805 = vmatpush1.bf16.msra.mxu0 %v8974_v2 }
 0x13d   :  { %1088 = vmatpush1.bf16.msra.mxu1 %v7881_v3  ;;  %v7859_v3 = vcombine.low %v335_v56, %v339_v57  ;;  %v9011_v56 = vld [vmem:[#allocation7 + $0x1a4] ss:$16 sps:$4 sm:$0xff]  }
 0x13e   :  { %1098 = vmatprep.subr.bf16.mxu1 %v7764_v6  ;;  %v7868_v6 = vcombine.high %v343_v62, %v347_v63  ;;  %v9017_v62 = vld [vmem:[#allocation7 + $0x1c4] ss:$16 sps:$4 sm:$0xff]  }
 0x13f   :  { %v300_v63 = vld [vmem:[#allocation5 + $0x1f0] sm:$0xff] }
 0x140   :  { %1090 = vmatmul.mubr.bf16.vlgmr.msra.gmra.mrb[0].mxu1 %v10506_v7 }
 0x141   :  { %1099 = vmatpush1.bf16.msra.mxu1 %v7763_v8  ;;  %1130 = vmatprep.mubr.bf16.mxu1 %v10501_v18  ;;  %v8975_v8 = vld [vmem:[#allocation7 + $0xa4] ss:$16 sps:$4 sm:$0xff]  }
 0x142   :  { %1100 = vmatprep.subr.bf16.mxu1 %v7772_v11  ;;  %2806 = vmatprep.subr.bf16.mxu0 %v8975_v8  ;;  %v359_v11 = vld [vmem:[#allocation5 + $0x3c8] sm:$0xff] }
 0x143   :  { %2807 = vmatpush1.bf16.msra.mxu0 %v8977_v9 }
 0x144   :  { %2808 = vmatprep.subr.bf16.mxu0 %v8978_v14 }
 0x145   :  { %1101 = vmatpush1.bf16.msra.mxu1 %v7771_v12  ;;  %v363_v12 = vld [vmem:[#allocation5 + $0x3e8] sm:$0xff] }
 0x146   :  { %1102 = vmatprep.subr.bf16.mxu1 %v7780_v15  ;;  %v8980_v15 = vld [vmem:[#allocation7 + $0xc0] ss:$16 sps:$4 sm:$0xff]   ;;  %v7883_v23 = vcombine.low %v359_v11, %v363_v12 }
 0x147   :  { %2809 = vmatpush1.bf16.msra.mxu0 %v8980_v15  ;;  %v320_v15 = vld [vmem:[#allocation5 + $0x290] sm:$0xff] }
 0x149   :  { %1103 = vmatpush1.bf16.msra.mxu1 %v7779_v16  ;;  %v7875_v16 = vcombine.low %v351_v4, %v355_v5  ;;  %v9023_v4 = vld [vmem:[#allocation7 + $0x1e4] ss:$16 sps:$4 sm:$0xff]  }
 0x14a   :  { %1104 = vmatprep.subr.bf16.mxu1 %v7788_v20  ;;  %v7884_v20 = vcombine.high %v359_v11, %v363_v12  ;;  %v308_v5 = vld [vmem:[#allocation5 + $0x230] sm:$0xff] }
 0x14b   :  { %v312_v11 = vld [vmem:[#allocation5 + $0x250] sm:$0xff] }
 0x14c   :  { %v316_v12 = vld [vmem:[#allocation5 + $0x270] sm:$0xff] }
 0x14d   :  { %1105 = vmatpush1.bf16.msra.mxu1 %v7787_v21  ;;  %v8981_v21 = vld [vmem:[#allocation7 + $0xe4] ss:$16 sps:$4 sm:$0xff]   ;;  %v7838_v14 = vcombine.high %v312_v11, %v316_v12 }
 0x14e   :  { %1106 = vmatprep.subr.bf16.mxu1 %v7796_v24  ;;  %2810 = vmatprep.subr.bf16.mxu0 %v8981_v21  ;;  %v248_v24 = vld [vmem:[#allocation5 + $0x50] sm:$0xff] }
 0x14f   :  { %2811 = vmatpush1.bf16.msra.mxu0 %v8983_v22  ;;  %v332_v21 = vld [vmem:[#allocation5 + $0x2f0] sm:$0xff] }
 0x150   :  { %2812 = vmatprep.subr.bf16.mxu0 %v8984_v27 }
 0x151   :  { %1107 = vmatpush1.bf16.msra.mxu1 %v7795_v25  ;;  %v252_v25 = vld [vmem:[#allocation5 + $0x70] sm:$0xff] }
 0x152   :  { %1108 = vmatprep.subr.bf16.mxu1 %v7804_v28  ;;  %v8986_v28 = vld [vmem:[#allocation7 + $0x100] ss:$16 sps:$4 sm:$0xff]   ;;  %v7774_v30 = vcombine.high %v248_v24, %v252_v25  ;;  %v7773_v35 = vcombine.low %v248_v24, %v252_v25 }
 0x153   :  { %2813 = vmatpush1.bf16.msra.mxu0 %v8986_v28  ;;  %v336_v24 = vld [vmem:[#allocation5 + $0x310] sm:$0xff] }
 0x154   :  { %v340_v25 = vld [vmem:[#allocation5 + $0x330] sm:$0xff] }
 0x155   :  { %1109 = vmatpush1.bf16.msra.mxu1 %v7803_v29  ;;  %v7765_v29 = vcombine.low %v240_v17, %v244_v19  ;;  %v7837_v17 = vcombine.low %v312_v11, %v316_v12  ;;  %v7862_v27 = vcombine.high %v336_v24, %v340_v25  ;;  %v344_v28 = vld [vmem:[#allocation5 + $0x350] sm:$0xff]  ;;  %v313_v12 = vld [vmem:[#allocation5 + $0x258] sm:$0xff] }
 0x156   :  { %1110 = vmatprep.subr.bf16.mxu1 %v7812_v32  ;;  %v8987_v32 = vld [vmem:[#allocation7 + $0x124] ss:$16 sps:$4 sm:$0xff]  }
 0x157   :  { %2814 = vmatprep.subr.bf16.mxu0 %v8987_v32  ;;  %v352_v32 = vld [vmem:[#allocation5 + $0x390] sm:$0xff] }
 0x158   :  { %2815 = vmatpush1.bf16.msra.mxu0 %v8992_v34 }
 0x159   :  { %1111 = vmatpush1.bf16.msra.mxu1 %v7811_v33  ;;  %v260_v33 = vld [vmem:[#allocation5 + $0xb0] sm:$0xff]  ;;  %2816 = vmatprep.subr.bf16.mxu0 %v8993_v38 }
 0x15a   :  { %1112 = vmatprep.subr.bf16.mxu1 %v7820_v36  ;;  %v264_v36 = vld [vmem:[#allocation5 + $0xd0] sm:$0xff]  ;;  %v7782_v39 = vcombine.high %v256_v31, %v260_v33  ;;  %v7781_v41 = vcombine.low %v256_v31, %v260_v33 }
 0x15b   :  { %v356_v33 = vld [vmem:[#allocation5 + $0x3b0] sm:$0xff] }
 0x15c   :  { %v7877_v38 = vcombine.low %v352_v32, %v356_v33 }
 0x15d   :  { %1113 = vmatpush1.bf16.msra.mxu1 %v7819_v37  ;;  %v268_v37 = vld [vmem:[#allocation5 + $0xf0] sm:$0xff] }
 0x15e   :  { %1114 = vmatprep.subr.bf16.mxu1 %v7828_v40  ;;  %v8998_v40 = vld [vmem:[#allocation7 + $0x140] ss:$16 sps:$4 sm:$0xff]   ;;  %v7790_v45 = vcombine.high %v264_v36, %v268_v37  ;;  %v7789_v47 = vcombine.low %v264_v36, %v268_v37 }
 0x15f   :  { %2817 = vmatpush1.bf16.msra.mxu0 %v8998_v40  ;;  %v360_v36 = vld [vmem:[#allocation5 + $0x3d0] sm:$0xff]  ;;  %v241_v40 = vld [vmem:[#allocation5 + $0x18] sm:$0xff] }
 0x160   :  { %2818 = vmatprep.subr.bf16.mxu0 %v8999_v44  ;;  %v364_v37 = vld [vmem:[#allocation5 + $0x3f0] sm:$0xff]  ;;  %v249_v44 = vld [vmem:[#allocation5 + $0x58] sm:$0xff] }
 0x161   :  { %1115 = vmatpush1.bf16.msra.mxu1 %v7827_v43  ;;  %v276_v43 = vld [vmem:[#allocation5 + $0x130] sm:$0xff] }
 0x162   :  { %1116 = vmatprep.subr.bf16.mxu1 %v7836_v46  ;;  %v9004_v46 = vld [vmem:[#allocation7 + $0x160] ss:$16 sps:$4 sm:$0xff]   ;;  %v7798_v51 = vcombine.high %v272_v42, %v276_v43  ;;  %v7797_v53 = vcombine.low %v272_v42, %v276_v43  ;;  %v7885_v42 = vcombine.low %v360_v36, %v364_v37 }
 0x163   :  { %2819 = vmatpush1.bf16.msra.mxu0 %v9004_v46 }
 0x164   :  { %2820 = vmatprep.subr.bf16.mxu0 %v9005_v50 }
 0x165   :  { %1117 = vmatpush1.bf16.msra.mxu1 %v7835_v49  ;;  %v284_v49 = vld [vmem:[#allocation5 + $0x170] sm:$0xff] }
 0x166   :  { %1118 = vmatprep.subr.bf16.mxu1 %v7844_v52  ;;  %v9010_v52 = vld [vmem:[#allocation7 + $0x180] ss:$16 sps:$4 sm:$0xff]   ;;  %v7806_v57 = vcombine.high %v280_v48, %v284_v49  ;;  %v7805_v59 = vcombine.low %v280_v48, %v284_v49  ;;  %v257_v48 = vld [vmem:[#allocation5 + $0x98] sm:$0xff] }
 0x167   :  { %2821 = vmatpush1.bf16.msra.mxu0 %v9010_v52  ;;  %v261_v49 = vld [vmem:[#allocation5 + $0xb8] sm:$0xff] }
 0x168   :  { %2822 = vmatprep.subr.bf16.mxu0 %v9011_v56  ;;  %v265_v52 = vld [vmem:[#allocation5 + $0xd8] sm:$0xff] }
 0x169   :  { %1119 = vmatpush1.bf16.msra.mxu1 %v7843_v55  ;;  %v292_v55 = vld [vmem:[#allocation5 + $0x1b0] sm:$0xff]  ;;  %v273_v56 = vld [vmem:[#allocation5 + $0x118] sm:$0xff] }
 0x16a   :  { %1120 = vmatprep.subr.bf16.mxu1 %v7852_v58  ;;  %v9016_v58 = vld [vmem:[#allocation7 + $0x1a0] ss:$16 sps:$4 sm:$0xff]   ;;  %v7814_v60 = vcombine.high %v288_v54, %v292_v55  ;;  %v7813_v1 = vcombine.low %v288_v54, %v292_v55  ;;  %v7783_v54 = vcombine.low %v257_v48, %v261_v49 }
 0x16b   :  { %2823 = vmatpush1.bf16.msra.mxu0 %v9016_v58 }
 0x16c   :  { %2824 = vmatprep.subr.bf16.mxu0 %v9017_v62 }
 0x16d   :  { %1121 = vmatpush1.bf16.msra.mxu1 %v7851_v61  ;;  %v296_v61 = vld [vmem:[#allocation5 + $0x1d0] sm:$0xff] }
 0x16e   :  { %1122 = vmatprep.subr.bf16.mxu1 %v7860_v0  ;;  %v9022_v0 = vld [vmem:[#allocation7 + $0x1c0] ss:$16 sps:$4 sm:$0xff]   ;;  %v7822_v2 = vcombine.high %v296_v61, %v300_v63  ;;  %v7821_v8 = vcombine.low %v296_v61, %v300_v63  ;;  %v285_v61 = vld [vmem:[#allocation5 + $0x178] sm:$0xff] }
 0x16f   :  { %2825 = vmatpush1.bf16.msra.mxu0 %v9022_v0  ;;  %v289_v63 = vld [vmem:[#allocation5 + $0x198] sm:$0xff] }
 0x170   :  { %2826 = vmatprep.subr.bf16.mxu0 %v9023_v4  ;;  %v293_v0 = vld [vmem:[#allocation5 + $0x1b8] sm:$0xff] }
 0x171   :  { %1123 = vmatpush1.bf16.msra.mxu1 %v7859_v3  ;;  %v304_v3 = vld [vmem:[#allocation5 + $0x210] sm:$0xff]  ;;  %v301_v4 = vld [vmem:[#allocation5 + $0x1f8] sm:$0xff] }
 0x172   :  { %1124 = vmatprep.subr.bf16.mxu1 %v7868_v6  ;;  %v9028_v6 = vld [vmem:[#allocation7 + $0x1e0] ss:$16 sps:$4 sm:$0xff]   ;;  %v7830_v9 = vcombine.high %v304_v3, %v308_v5 }
 0x173   :  { %2827 = vmatpush1.bf16.msra.mxu0 %v9028_v6 }
 0x175   :  { %1125 = vmatpush1.bf16.msra.mxu1 %v7867_v10  ;;  %v9031_v10 = vld [vmem:[#allocation7 + $0x204] ss:$16 sps:$4 sm:$0xff]  }
 0x176   :  { %1126 = vmatprep.subr.bf16.mxu1 %v7876_v13  ;;  %2837 = vmatprep.subr.bf16.mxu0 %v9031_v10  ;;  %v7829_v13 = vcombine.low %v304_v3, %v308_v5  ;;  %v297_v3 = vld [vmem:[#allocation5 + $0x1d8] sm:$0xff]  ;;  %v7815_v5 = vcombine.low %v289_v63, %v293_v0 }
 0x177   :  { %v7824_v6 = vcombine.high %v297_v3, %v301_v4  ;;  %v7823_v10 = vcombine.low %v297_v3, %v301_v4 }
 0x179   :  { %1127 = vmatpush1.bf16.msra.mxu1 %v7875_v16  ;;  %v324_v16 = vld [vmem:[#allocation5 + $0x2b0] sm:$0xff] }
 0x17a   :  { %1128 = vmatprep.subr.bf16.mxu1 %v7884_v20  ;;  %v7846_v19 = vcombine.high %v320_v15, %v324_v16  ;;  %v328_v20 = vld [vmem:[#allocation5 + $0x2d0] sm:$0xff]  ;;  %v7845_v22 = vcombine.low %v320_v15, %v324_v16  ;;  %v321_v16 = vld [vmem:[#allocation5 + $0x298] sm:$0xff] }
 0x17d   :  { %1129 = vmatpush1.bf16.msra.mxu1 %v7883_v23  ;;  %v7854_v23 = vcombine.high %v328_v20, %v332_v21 }
 0x17e   :  { %1139 = vmatprep.subr.bf16.mxu1 %v7766_v26  ;;  %v7853_v26 = vcombine.low %v328_v20, %v332_v21  ;;  %v329_v21 = vld [vmem:[#allocation5 + $0x2d8] sm:$0xff] }
 0x180   :  { %1131 = vmatmul.mubr.bf16.vlgmr.msra.gmra.mrb[4].mxu1 %v10506_v7 }
 0x181   :  { %1140 = vmatpush1.bf16.msra.mxu1 %v7765_v29  ;;  %1171 = vmatprep.mubr.bf16.mxu1 %v10501_v18  ;;  %v348_v29 = vld [vmem:[#allocation5 + $0x370] sm:$0xff] }
 0x182   :  { %1141 = vmatprep.subr.bf16.mxu1 %v7774_v30  ;;  %v7861_v30 = vcombine.low %v336_v24, %v340_v25  ;;  %v7870_v31 = vcombine.high %v344_v28, %v348_v29  ;;  %v7869_v34 = vcombine.low %v344_v28, %v348_v29  ;;  %v337_v25 = vld [vmem:[#allocation5 + $0x318] sm:$0xff] }
 0x183   :  { %v345_v29 = vld [vmem:[#allocation5 + $0x358] sm:$0xff] }
 0x185   :  { %1142 = vmatpush1.bf16.msra.mxu1 %v7773_v35  ;;  %v7878_v35 = vcombine.high %v352_v32, %v356_v33  ;;  %v353_v33 = vld [vmem:[#allocation5 + $0x398] sm:$0xff] }
 0x186   :  { %1143 = vmatprep.subr.bf16.mxu1 %v7782_v39  ;;  %v7886_v39 = vcombine.high %v360_v36, %v364_v37  ;;  %v361_v37 = vld [vmem:[#allocation5 + $0x3d8] sm:$0xff] }
 0x189   :  { %1144 = vmatpush1.bf16.msra.mxu1 %v7781_v41  ;;  %v245_v41 = vld [vmem:[#allocation5 + $0x38] sm:$0xff] }
 0x18a   :  { %1145 = vmatprep.subr.bf16.mxu1 %v7790_v45  ;;  %v7768_v43 = vcombine.high %v241_v40, %v245_v41  ;;  %v253_v45 = vld [vmem:[#allocation5 + $0x78] sm:$0xff]  ;;  %v7767_v46 = vcombine.low %v241_v40, %v245_v41 }
 0x18b   :  { %v7775_v50 = vcombine.low %v249_v44, %v253_v45 }
 0x18d   :  { %1146 = vmatpush1.bf16.msra.mxu1 %v7789_v47  ;;  %v7776_v47 = vcombine.high %v249_v44, %v253_v45  ;;  %v8997_v44 = vld [vmem:[#allocation7 + $0x2c] ss:$16 sps:$4 sm:$0xff]   ;;  %v8995_v45 = vld [vmem:[#allocation7 + $0x28] ss:$16 sps:$4 sm:$0xff]  }
 0x18e   :  { %1147 = vmatprep.subr.bf16.mxu1 %v7798_v51  ;;  %v7784_v51 = vcombine.high %v257_v48, %v261_v49  ;;  %v9001_v48 = vld [vmem:[#allocation7 + $0x48] ss:$16 sps:$4 sm:$0xff]   ;;  %v9009_v49 = vld [vmem:[#allocation7 + $0x6c] ss:$16 sps:$4 sm:$0xff]  }
 0x191   :  { %1148 = vmatpush1.bf16.msra.mxu1 %v7797_v53  ;;  %v269_v53 = vld [vmem:[#allocation5 + $0xf8] sm:$0xff] }
 0x192   :  { %1149 = vmatprep.subr.bf16.mxu1 %v7806_v57  ;;  %v7792_v55 = vcombine.high %v265_v52, %v269_v53  ;;  %v277_v57 = vld [vmem:[#allocation5 + $0x138] sm:$0xff]  ;;  %v7791_v58 = vcombine.low %v265_v52, %v269_v53 }
 0x193   :  { %v7799_v62 = vcombine.low %v273_v56, %v277_v57  ;;  %v9007_v52 = vld [vmem:[#allocation7 + $0x68] ss:$16 sps:$4 sm:$0xff]  }
 0x194   :  { %v367_v53 = vld [vmem:[#allocation23] ss:$8 sm:$0xf0] }
 0x195   :  { %1150 = vmatpush1.bf16.msra.mxu1 %v7805_v59  ;;  %v7800_v59 = vcombine.high %v273_v56, %v277_v57  ;;  %v9013_v56 = vld [vmem:[#allocation7 + $0x88] ss:$16 sps:$4 sm:$0xff]  }
 0x196   :  { %1151 = vmatprep.subr.bf16.mxu1 %v7814_v60  ;;  %v281_v60 = vld [vmem:[#allocation5 + $0x158] sm:$0xff] }
 0x199   :  { %1152 = vmatpush1.bf16.msra.mxu1 %v7813_v1  ;;  %v7807_v1 = vcombine.low %v281_v60, %v285_v61 }
 0x19a   :  { %1153 = vmatprep.subr.bf16.mxu1 %v7822_v2  ;;  %v7816_v2 = vcombine.high %v289_v63, %v293_v0  ;;  %v9025_v63 = vld [vmem:[#allocation7 + $0xc8] ss:$16 sps:$4 sm:$0xff]  }
 0x19d   :  { %1154 = vmatpush1.bf16.msra.mxu1 %v7821_v8  ;;  %v305_v8 = vld [vmem:[#allocation5 + $0x218] sm:$0xff] }
 0x19e   :  { %1155 = vmatprep.subr.bf16.mxu1 %v7830_v9  ;;  %v309_v9 = vld [vmem:[#allocation5 + $0x238] sm:$0xff] }
 0x19f   :  { %v7832_v11 = vcombine.high %v305_v8, %v309_v9 }
 0x1a1   :  { %1156 = vmatpush1.bf16.msra.mxu1 %v7829_v13  ;;  %v317_v13 = vld [vmem:[#allocation5 + $0x278] sm:$0xff] }
 0x1a2   :  { %1157 = vmatprep.subr.bf16.mxu1 %v7838_v14  ;;  %v7831_v14 = vcombine.low %v305_v8, %v309_v9  ;;  %v7840_v15 = vcombine.high %v313_v12, %v317_v13  ;;  %v9029_v9 = vld [vmem:[#allocation7 + $0x200] ss:$16 sps:$4 sm:$0xff]  }
 0x1a5   :  { %1158 = vmatpush1.bf16.msra.mxu1 %v7837_v17  ;;  %v325_v17 = vld [vmem:[#allocation5 + $0x2b8] sm:$0xff] }
 0x1a6   :  { %1159 = vmatprep.subr.bf16.mxu1 %v7846_v19  ;;  %v7839_v19 = vcombine.low %v313_v12, %v317_v13  ;;  %v7848_v20 = vcombine.high %v321_v16, %v325_v17  ;;  %v9037_v13 = vld [vmem:[#allocation7 + $0x224] ss:$16 sps:$4 sm:$0xff]  }
 0x1a9   :  { %1160 = vmatpush1.bf16.msra.mxu1 %v7845_v22  ;;  %v333_v22 = vld [vmem:[#allocation5 + $0x2f8] sm:$0xff] }
 0x1aa   :  { %1161 = vmatprep.subr.bf16.mxu1 %v7854_v23  ;;  %v7847_v23 = vcombine.low %v321_v16, %v325_v17  ;;  %v7856_v24 = vcombine.high %v329_v21, %v333_v22  ;;  %v9038_v16 = vld [vmem:[#allocation7 + $0x108] ss:$16 sps:$4 sm:$0xff]   ;;  %v9043_v17 = vld [vmem:[#allocation7 + $0x244] ss:$16 sps:$4 sm:$0xff]  }
 0x1ad   :  { %1162 = vmatpush1.bf16.msra.mxu1 %v7853_v26  ;;  %v341_v26 = vld [vmem:[#allocation5 + $0x338] sm:$0xff] }
 0x1ae   :  { %1163 = vmatprep.subr.bf16.mxu1 %v7862_v27  ;;  %v7855_v27 = vcombine.low %v329_v21, %v333_v22  ;;  %v7864_v28 = vcombine.high %v337_v25, %v341_v26  ;;  %v9044_v21 = vld [vmem:[#allocation7 + $0x128] ss:$16 sps:$4 sm:$0xff]   ;;  %v9049_v22 = vld [vmem:[#allocation7 + $0x264] ss:$16 sps:$4 sm:$0xff]  }
 0x1b1   :  { %1164 = vmatpush1.bf16.msra.mxu1 %v7861_v30  ;;  %v349_v30 = vld [vmem:[#allocation5 + $0x378] sm:$0xff] }
 0x1b2   :  { %1165 = vmatprep.subr.bf16.mxu1 %v7870_v31  ;;  %v7863_v31 = vcombine.low %v337_v25, %v341_v26  ;;  %v7872_v32 = vcombine.high %v345_v29, %v349_v30  ;;  %v9050_v25 = vld [vmem:[#allocation7 + $0x148] ss:$16 sps:$4 sm:$0xff]   ;;  %v9055_v26 = vld [vmem:[#allocation7 + $0x284] ss:$16 sps:$4 sm:$0xff]  }
 0x1b5   :  { %1166 = vmatpush1.bf16.msra.mxu1 %v7869_v34  ;;  %v357_v34 = vld [vmem:[#allocation5 + $0x3b8] sm:$0xff] }
 0x1b6   :  { %1167 = vmatprep.subr.bf16.mxu1 %v7878_v35  ;;  %v7871_v35 = vcombine.low %v345_v29, %v349_v30  ;;  %v7880_v36 = vcombine.high %v353_v33, %v357_v34  ;;  %v9056_v29 = vld [vmem:[#allocation7 + $0x168] ss:$16 sps:$4 sm:$0xff]   ;;  %v9061_v30 = vld [vmem:[#allocation7 + $0x2a4] ss:$16 sps:$4 sm:$0xff]  }
 0x1b9   :  { %1168 = vmatpush1.bf16.msra.mxu1 %v7877_v38  ;;  %v365_v38 = vld [vmem:[#allocation5 + $0x3f8] sm:$0xff] }
 0x1ba   :  { %1169 = vmatprep.subr.bf16.mxu1 %v7886_v39  ;;  %v7879_v39 = vcombine.low %v353_v33, %v357_v34  ;;  %v7888_v40 = vcombine.high %v361_v37, %v365_v38  ;;  %v7887_v41 = vcombine.low %v361_v37, %v365_v38  ;;  %v9062_v33 = vld [vmem:[#allocation7 + $0x188] ss:$16 sps:$4 sm:$0xff]   ;;  %v9067_v34 = vld [vmem:[#allocation7 + $0x2c4] ss:$16 sps:$4 sm:$0xff]  }
 0x1bb   :  { %v9068_v37 = vld [vmem:[#allocation7 + $0x1a8] ss:$16 sps:$4 sm:$0xff]   ;;  %v9073_v38 = vld [vmem:[#allocation7 + $0x2e4] ss:$16 sps:$4 sm:$0xff]  }
 0x1bd   :  { %1170 = vmatpush1.bf16.msra.mxu1 %v7885_v42  ;;  %v8991_v42 = vld [vmem:[#allocation7 + $0xc] ss:$16 sps:$4 sm:$0xff]  }
 0x1be   :  { %1180 = vmatprep.subr.bf16.mxu1 %v7768_v43  ;;  %v8989_v43 = vld [vmem:[#allocation7 + $0x8] ss:$16 sps:$4 sm:$0xff]  }
 0x1c0   :  { %1172 = vmatmul.mubr.bf16.vlgmr.msra.gmra.mrb[8].mxu1 %v10506_v7 }
 0x1c1   :  { %1181 = vmatpush1.bf16.msra.mxu1 %v7767_v46  ;;  %1212 = vmatprep.mubr.bf16.mxu1 %v10501_v18  ;;  %v7808_v18 = vcombine.high %v281_v60, %v285_v61  ;;  %v9003_v46 = vld [vmem:[#allocation7 + $0x4c] ss:$16 sps:$4 sm:$0xff]  }
 0x1c2   :  { %1182 = vmatprep.subr.bf16.mxu1 %v7776_v47  ;;  %v370_v47 = vlaneseq }
 0x1c5   :  { %1183 = vmatpush1.bf16.msra.mxu1 %v7775_v50  ;;  %v366_v50 = vld [vmem:[#allocation23] ss:$8 sm:$0xf] }
 0x1c6   :  { %1184 = vmatprep.subr.bf16.mxu1 %v7784_v51  ;;  %v10515_v51 = vshrl.u32 %v370_v47, 7  ;;  %v9088_v47 = vld [vmem:[#allocation7 + $0x20c] ss:$16 sps:$4 sm:$0xff]  }
 0x1c8   :  { %v10523_v57 = vsub.s32 1, %v10515_v51 }
 0x1c9   :  { %1185 = vmatpush1.bf16.msra.mxu1 %v7783_v54  ;;  %v9015_v54 = vld [vmem:[#allocation7 + $0x8c] ss:$16 sps:$4 sm:$0xff]  }
 0x1ca   :  { %1186 = vmatprep.subr.bf16.mxu1 %v7792_v55  ;;  %v10517_v55 = vor.u32 %v367_v53, %v366_v50  ;;  %v9091_v50 = vld [vmem:[#allocation7 + $0x344] ss:$16 sps:$4 sm:$0xff]   ;;  %v9089_v53 = vld [vmem:[#allocation7 + $0x340] ss:$16 sps:$4 sm:$0xff]  }
 0x1cc   :  { %v377_v61 = vrot.slane %v10517_v55, %v10523_v57 }
 0x1cd   :  { %1187 = vmatpush1.bf16.msra.mxu1 %v7791_v58  ;;  %v9021_v58 = vld [vmem:[#allocation7 + $0xac] ss:$16 sps:$4 sm:$0xff]  }
 0x1ce   :  { %1188 = vmatprep.subr.bf16.mxu1 %v7800_v59  ;;  %v9019_v59 = vld [vmem:[#allocation7 + $0xa8] ss:$16 sps:$4 sm:$0xff]  }
 0x1d1   :  { %1189 = vmatpush1.bf16.msra.mxu1 %v7799_v62  ;;  %v9027_v62 = vld [vmem:[#allocation7 + $0xcc] ss:$16 sps:$4 sm:$0xff]  }
 0x1d2   :  { %1190 = vmatprep.subr.bf16.mxu1 %v7808_v18 }
 0x1d5   :  { %1191 = vmatpush1.bf16.msra.mxu1 %v7807_v1 }
 0x1d6   :  { %1192 = vmatprep.subr.bf16.mxu1 %v7816_v2 }
 0x1d9   :  { %1193 = vmatpush1.bf16.msra.mxu1 %v7815_v5 }
 0x1da   :  { %1194 = vmatprep.subr.bf16.mxu1 %v7824_v6  ;;  %v9034_v6 = vld [vmem:[#allocation7 + $0xec] ss:$16 sps:$4 sm:$0xff]  }
 0x1dd   :  { %1195 = vmatpush1.bf16.msra.mxu1 %v7823_v10  ;;  %v9032_v10 = vld [vmem:[#allocation7 + $0xe8] ss:$16 sps:$4 sm:$0xff]  }
 0x1de   :  { %1196 = vmatprep.subr.bf16.mxu1 %v7832_v11 }
 0x1e1   :  { %1197 = vmatpush1.bf16.msra.mxu1 %v7831_v14  ;;  %v9040_v14 = vld [vmem:[#allocation7 + $0x10c] ss:$16 sps:$4 sm:$0xff]  }
 0x1e2   :  { %1198 = vmatprep.subr.bf16.mxu1 %v7840_v15  ;;  %v9035_v15 = vld [vmem:[#allocation7 + $0x220] ss:$16 sps:$4 sm:$0xff]  }
 0x1e5   :  { %1199 = vmatpush1.bf16.msra.mxu1 %v7839_v19  ;;  %v9046_v19 = vld [vmem:[#allocation7 + $0x12c] ss:$16 sps:$4 sm:$0xff]  }
 0x1e6   :  { %1200 = vmatprep.subr.bf16.mxu1 %v7848_v20  ;;  %v9041_v20 = vld [vmem:[#allocation7 + $0x240] ss:$16 sps:$4 sm:$0xff]  }
 0x1e9   :  { %1201 = vmatpush1.bf16.msra.mxu1 %v7847_v23  ;;  %v9052_v23 = vld [vmem:[#allocation7 + $0x14c] ss:$16 sps:$4 sm:$0xff]  }
 0x1ea   :  { %1202 = vmatprep.subr.bf16.mxu1 %v7856_v24  ;;  %v9047_v24 = vld [vmem:[#allocation7 + $0x260] ss:$16 sps:$4 sm:$0xff]  }
 0x1ed   :  { %1203 = vmatpush1.bf16.msra.mxu1 %v7855_v27  ;;  %v9058_v27 = vld [vmem:[#allocation7 + $0x16c] ss:$16 sps:$4 sm:$0xff]  }
 0x1ee   :  { %1204 = vmatprep.subr.bf16.mxu1 %v7864_v28  ;;  %v9053_v28 = vld [vmem:[#allocation7 + $0x280] ss:$16 sps:$4 sm:$0xff]  }
 0x1f1   :  { %1205 = vmatpush1.bf16.msra.mxu1 %v7863_v31  ;;  %v9064_v31 = vld [vmem:[#allocation7 + $0x18c] ss:$16 sps:$4 sm:$0xff]  }
 0x1f2   :  { %1206 = vmatprep.subr.bf16.mxu1 %v7872_v32  ;;  %v9059_v32 = vld [vmem:[#allocation7 + $0x2a0] ss:$16 sps:$4 sm:$0xff]  }
 0x1f5   :  { %1207 = vmatpush1.bf16.msra.mxu1 %v7871_v35  ;;  %v9070_v35 = vld [vmem:[#allocation7 + $0x1ac] ss:$16 sps:$4 sm:$0xff]  }
 0x1f6   :  { %1208 = vmatprep.subr.bf16.mxu1 %v7880_v36  ;;  %v9065_v36 = vld [vmem:[#allocation7 + $0x2c0] ss:$16 sps:$4 sm:$0xff]  }
 0x1f9   :  { %1209 = vmatpush1.bf16.msra.mxu1 %v7879_v39  ;;  %v9076_v39 = vld [vmem:[#allocation7 + $0x1cc] ss:$16 sps:$4 sm:$0xff]  }
 0x1fa   :  { %1210 = vmatprep.subr.bf16.mxu1 %v7888_v40  ;;  %v9071_v40 = vld [vmem:[#allocation7 + $0x2e0] ss:$16 sps:$4 sm:$0xff]  }
 0x1fd   :  { %1211 = vmatpush1.bf16.msra.mxu1 %v7887_v41  ;;  %v9074_v41 = vld [vmem:[#allocation7 + $0x1c8] ss:$16 sps:$4 sm:$0xff]  }
 0x1fe   :  { %2960 = vmatprep.subr.bf16.mxu1 %v8991_v42  ;;  %v9079_v42 = vld [vmem:[#allocation7 + $0x304] ss:$16 sps:$4 sm:$0xff]  }
 0x200   :  { %1213 = vmatmul.mubr.bf16.vlgmr.msra.gmra.mrb[12].mxu1 %v10506_v7  ;;  %v10520_v7 = vsub.s32 0, %v10515_v51 }
 0x201   :  { %2961 = vmatpush1.bf16.msra.mxu1 %v8989_v43  ;;  %v9082_v43 = vld [vmem:[#allocation7 + $0x1ec] ss:$16 sps:$4 sm:$0xff]  }
 0x202   :  { %2962 = vmatprep.subr.bf16.mxu1 %v8997_v44  ;;  %v373_v60 = vrot.slane %v10517_v55, %v10520_v7  ;;  %v9077_v44 = vld [vmem:[#allocation7 + $0x300] ss:$16 sps:$4 sm:$0xff]  }
 0x205   :  { %2963 = vmatpush1.bf16.msra.mxu1 %v8995_v45  ;;  %v9080_v45 = vld [vmem:[#allocation7 + $0x1e8] ss:$16 sps:$4 sm:$0xff]  }
 0x206   :  { %2964 = vmatprep.subr.bf16.mxu1 %v9003_v46  ;;  %v9085_v46 = vld [vmem:[#allocation7 + $0x324] ss:$16 sps:$4 sm:$0xff]  }
 0x209   :  { %2965 = vmatpush1.bf16.msra.mxu1 %v9001_v48  ;;  %v9083_v48 = vld [vmem:[#allocation7 + $0x320] ss:$16 sps:$4 sm:$0xff]  }
 0x20a   :  { %2966 = vmatprep.subr.bf16.mxu1 %v9009_v49  ;;  %v9086_v49 = vld [vmem:[#allocation7 + $0x208] ss:$16 sps:$4 sm:$0xff]  }
 0x20d   :  { %2967 = vmatpush1.bf16.msra.mxu1 %v9007_v52  ;;  %v9094_v52 = vld [vmem:[#allocation7 + $0x22c] ss:$16 sps:$4 sm:$0xff]  }
 0x20e   :  { %2968 = vmatprep.subr.bf16.mxu1 %v9015_v54  ;;  %v9092_v54 = vld [vmem:[#allocation7 + $0x228] ss:$16 sps:$4 sm:$0xff]  }
 0x211   :  { %2969 = vmatpush1.bf16.msra.mxu1 %v9013_v56  ;;  %v9097_v56 = vld [vmem:[#allocation7 + $0x364] ss:$16 sps:$4 sm:$0xff]  }
 0x212   :  { %2970 = vmatprep.subr.bf16.mxu1 %v9021_v58  ;;  %v9100_v58 = vld [vmem:[#allocation7 + $0x24c] ss:$16 sps:$4 sm:$0xff]  }
 0x213   :  { %v1091_v18 = vpop.f32.mrb[0].mxu1 }
 0x214   :  { %v1092_v0 = vadd.f32 %v1091_v18, %v373_v60  ;;  %v1093_v1 = vpop.f32.mrb[1].mxu1  ;;  %v9098_v60 = vld [vmem:[#allocation7 + $0x248] ss:$16 sps:$4 sm:$0xff]   ;;  %v9101_v18 = vld [vmem:[#allocation7 + $0x380] ss:$16 sps:$4 sm:$0xff]  }
 0x215   :  { %v1094_v2 = vadd.f32 %v1093_v1, %v377_v61  ;;  %v1095_v3 = vpop.f32.mrb[2].mxu1  ;;  %2971 = vmatpush1.bf16.msra.mxu1 %v9019_v59  ;;  %v9095_v59 = vld [vmem:[#allocation7 + $0x360] ss:$16 sps:$4 sm:$0xff]   ;;  %v9103_v61 = vld [vmem:[#allocation7 + $0x384] ss:$16 sps:$4 sm:$0xff]  }
 0x216   :  { %v1221_v4 = vmax.f32 %v1092_v0, 0.0  ;;  %v1096_v5 = vpop.f32.mrb[3].mxu1  ;;  %2972 = vmatprep.subr.bf16.mxu1 %v9027_v62  ;;  %v9106_v62 = vld [vmem:[#allocation7 + $0x26c] ss:$16 sps:$4 sm:$0xff]   ;;  %v9109_v0 = vld [vmem:[#allocation7 + $0x3a4] ss:$16 sps:$4 sm:$0xff]  }
 0x217   :  { %v1222_v8 = vmax.f32 %v1094_v2, 0.0  ;;  %v9112_v1 = vld [vmem:[#allocation7 + $0x28c] ss:$16 sps:$4 sm:$0xff]   ;;  %v10534_v2 = vsub.s32 2, %v10515_v51  ;;  %v9107_v3 = vld [vmem:[#allocation7 + $0x3a0] ss:$16 sps:$4 sm:$0xff]  }
 0x218   :  { %v10529_v11 = vpack.c.bf16 %v1221_v4, %v1221_v4  ;;  %v9110_v4 = vld [vmem:[#allocation7 + $0x288] ss:$16 sps:$4 sm:$0xff]   ;;  %v10537_v5 = vsub.s32 3, %v10515_v51 }
 0x219   :  { %2973 = vmatpush1.bf16.msra.mxu1 %v9025_v63  ;;  %v1230_v12 = vpack.c.bf16 %v1222_v8, %v1222_v8  ;;  %v9104_v63 = vld [vmem:[#allocation7 + $0x268] ss:$16 sps:$4 sm:$0xff]   ;;  %v9118_v8 = vld [vmem:[#allocation7 + $0x2ac] ss:$16 sps:$4 sm:$0xff]  }
 0x21a   :  { %2974 = vmatprep.subr.bf16.mxu1 %v9034_v6  ;;  %v9115_v6 = vld [vmem:[#allocation7 + $0x3c4] ss:$16 sps:$4 sm:$0xff]  }
 0x21b   :  { %2828 = vmatprep.mubr.bf16.mxu0 %v1230_v12  ;;  %2992 = vmatprep.mubr.bf16.mxu1 %v1230_v12  ;;  %v9116_v12 = vld [vmem:[#allocation7 + $0x2a8] ss:$16 sps:$4 sm:$0xff]  }
 0x21c   :  { %2829 = vmatmul.mubr.bf16.vlgmr.msra.gmra.mrb[0].mxu0 %v10529_v11 }
 0x21d   :  { %2838 = vmatpush1.bf16.msra.mxu0 %v9029_v9  ;;  %2975 = vmatpush1.bf16.msra.mxu1 %v9032_v10  ;;  %v381_v9 = vrot.slane %v10517_v55, %v10534_v2  ;;  %v385_v10 = vrot.slane %v10517_v55, %v10537_v5 }
 0x21e   :  { %2839 = vmatprep.subr.bf16.mxu0 %v9037_v13  ;;  %2976 = vmatprep.subr.bf16.mxu1 %v9040_v14  ;;  %v9121_v13 = vld [vmem:[#allocation7 + $0x3e4] ss:$16 sps:$4 sm:$0xff]   ;;  %v9124_v14 = vld [vmem:[#allocation7 + $0x2cc] ss:$16 sps:$4 sm:$0xff]  }
 0x221   :  { %2840 = vmatpush1.bf16.msra.mxu0 %v9035_v15  ;;  %2977 = vmatpush1.bf16.msra.mxu1 %v9038_v16 }
 0x222   :  { %2841 = vmatprep.subr.bf16.mxu0 %v9043_v17  ;;  %2978 = vmatprep.subr.bf16.mxu1 %v9046_v19 }
 0x225   :  { %2842 = vmatpush1.bf16.msra.mxu0 %v9041_v20  ;;  %2979 = vmatpush1.bf16.msra.mxu1 %v9044_v21  ;;  %v9119_v21 = vld [vmem:[#allocation7 + $0x3e0] ss:$16 sps:$4 sm:$0xff]  }
 0x226   :  { %2843 = vmatprep.subr.bf16.mxu0 %v9049_v22  ;;  %2980 = vmatprep.subr.bf16.mxu1 %v9052_v23  ;;  %v9122_v22 = vld [vmem:[#allocation7 + $0x2c8] ss:$16 sps:$4 sm:$0xff]  }
 0x229   :  { %2844 = vmatpush1.bf16.msra.mxu0 %v9047_v24  ;;  %2981 = vmatpush1.bf16.msra.mxu1 %v9050_v25  ;;  %v9127_v25 = vld [vmem:[#allocation7 + $0x404] ss:$16 sps:$4 sm:$0xff]  }
 0x22a   :  { %2845 = vmatprep.subr.bf16.mxu0 %v9055_v26  ;;  %2982 = vmatprep.subr.bf16.mxu1 %v9058_v27  ;;  %v9130_v26 = vld [vmem:[#allocation7 + $0x2ec] ss:$16 sps:$4 sm:$0xff]  }
 0x22d   :  { %2846 = vmatpush1.bf16.msra.mxu0 %v9053_v28  ;;  %2983 = vmatpush1.bf16.msra.mxu1 %v9056_v29 }
 0x22e   :  { %2847 = vmatprep.subr.bf16.mxu0 %v9061_v30  ;;  %2984 = vmatprep.subr.bf16.mxu1 %v9064_v31  ;;  %v9125_v30 = vld [vmem:[#allocation7 + $0x400] ss:$16 sps:$4 sm:$0xff]   ;;  %v9128_v31 = vld [vmem:[#allocation7 + $0x2e8] ss:$16 sps:$4 sm:$0xff]  }
 0x231   :  { %2848 = vmatpush1.bf16.msra.mxu0 %v9059_v32  ;;  %2985 = vmatpush1.bf16.msra.mxu1 %v9062_v33  ;;  %v9133_v32 = vld [vmem:[#allocation7 + $0x424] ss:$16 sps:$4 sm:$0xff]   ;;  %v9136_v33 = vld [vmem:[#allocation7 + $0x30c] ss:$16 sps:$4 sm:$0xff]  }
 0x232   :  { %2849 = vmatprep.subr.bf16.mxu0 %v9067_v34  ;;  %2986 = vmatprep.subr.bf16.mxu1 %v9070_v35  ;;  %v9131_v34 = vld [vmem:[#allocation7 + $0x420] ss:$16 sps:$4 sm:$0xff]   ;;  %v9134_v35 = vld [vmem:[#allocation7 + $0x308] ss:$16 sps:$4 sm:$0xff]  }
 0x235   :  { %2850 = vmatpush1.bf16.msra.mxu0 %v9065_v36  ;;  %2987 = vmatpush1.bf16.msra.mxu1 %v9068_v37  ;;  %v9139_v36 = vld [vmem:[#allocation7 + $0x444] ss:$16 sps:$4 sm:$0xff]   ;;  %v9142_v37 = vld [vmem:[#allocation7 + $0x32c] ss:$16 sps:$4 sm:$0xff]  }
 0x236   :  { %2851 = vmatprep.subr.bf16.mxu0 %v9073_v38  ;;  %2988 = vmatprep.subr.bf16.mxu1 %v9076_v39  ;;  %v9137_v38 = vld [vmem:[#allocation7 + $0x440] ss:$16 sps:$4 sm:$0xff]   ;;  %v9140_v39 = vld [vmem:[#allocation7 + $0x328] ss:$16 sps:$4 sm:$0xff]  }
 0x239   :  { %2852 = vmatpush1.bf16.msra.mxu0 %v9071_v40  ;;  %2989 = vmatpush1.bf16.msra.mxu1 %v9074_v41  ;;  %v9145_v40 = vld [vmem:[#allocation7 + $0x464] ss:$16 sps:$4 sm:$0xff]   ;;  %v9148_v41 = vld [vmem:[#allocation7 + $0x34c] ss:$16 sps:$4 sm:$0xff]  }
 0x23a   :  { %2853 = vmatprep.subr.bf16.mxu0 %v9079_v42  ;;  %2990 = vmatprep.subr.bf16.mxu1 %v9082_v43  ;;  %v9143_v42 = vld [vmem:[#allocation7 + $0x460] ss:$16 sps:$4 sm:$0xff]   ;;  %v9146_v43 = vld [vmem:[#allocation7 + $0x348] ss:$16 sps:$4 sm:$0xff]  }
 0x23d   :  { %2854 = vmatpush1.bf16.msra.mxu0 %v9077_v44  ;;  %2991 = vmatpush1.bf16.msra.mxu1 %v9080_v45  ;;  %v9151_v44 = vld [vmem:[#allocation7 + $0x484] ss:$16 sps:$4 sm:$0xff]   ;;  %v9154_v45 = vld [vmem:[#allocation7 + $0x36c] ss:$16 sps:$4 sm:$0xff]  }
 0x23e   :  { %2855 = vmatprep.subr.bf16.mxu0 %v9085_v46  ;;  %3001 = vmatprep.subr.bf16.mxu1 %v9088_v47  ;;  %v9149_v46 = vld [vmem:[#allocation7 + $0x480] ss:$16 sps:$4 sm:$0xff]   ;;  %v9152_v47 = vld [vmem:[#allocation7 + $0x368] ss:$16 sps:$4 sm:$0xff]  }
 0x240   :  { %2993 = vmatmul.mubr.bf16.vlgmr.msra.gmra.mrb[16].mxu1 %v10529_v11  ;;  %v9113_v11 = vld [vmem:[#allocation7 + $0x3c0] ss:$16 sps:$4 sm:$0xff]  }
 0x241   :  { %2856 = vmatpush1.bf16.msra.mxu0 %v9083_v48  ;;  %3002 = vmatpush1.bf16.msra.mxu1 %v9086_v49  ;;  %v9157_v48 = vld [vmem:[#allocation7 + $0x4a4] ss:$16 sps:$4 sm:$0xff]   ;;  %v9160_v49 = vld [vmem:[#allocation7 + $0x38c] ss:$16 sps:$4 sm:$0xff]  }
 0x242   :  { %2857 = vmatprep.subr.bf16.mxu0 %v9091_v50  ;;  %3003 = vmatprep.subr.bf16.mxu1 %v9094_v52  ;;  %v9155_v50 = vld [vmem:[#allocation7 + $0x4a0] ss:$16 sps:$4 sm:$0xff]   ;;  %v9158_v52 = vld [vmem:[#allocation7 + $0x388] ss:$16 sps:$4 sm:$0xff]  }
 0x245   :  { %2858 = vmatpush1.bf16.msra.mxu0 %v9089_v53  ;;  %3004 = vmatpush1.bf16.msra.mxu1 %v9092_v54  ;;  %v9163_v53 = vld [vmem:[#allocation7 + $0x4c4] ss:$16 sps:$4 sm:$0xff]   ;;  %v9166_v54 = vld [vmem:[#allocation7 + $0x3ac] ss:$16 sps:$4 sm:$0xff]  }
 0x246   :  { %2859 = vmatprep.subr.bf16.mxu0 %v9097_v56  ;;  %3005 = vmatprep.subr.bf16.mxu1 %v9100_v58  ;;  %v9161_v56 = vld [vmem:[#allocation7 + $0x4c0] ss:$16 sps:$4 sm:$0xff]   ;;  %v9164_v58 = vld [vmem:[#allocation7 + $0x3a8] ss:$16 sps:$4 sm:$0xff]  }
 0x249   :  { %2860 = vmatpush1.bf16.msra.mxu0 %v9095_v59  ;;  %3006 = vmatpush1.bf16.msra.mxu1 %v9098_v60  ;;  %v9169_v59 = vld [vmem:[#allocation7 + $0x4e4] ss:$16 sps:$4 sm:$0xff]   ;;  %v9172_v60 = vld [vmem:[#allocation7 + $0x3cc] ss:$16 sps:$4 sm:$0xff]  }
 0x24a   :  { %2861 = vmatprep.subr.bf16.mxu0 %v9103_v61  ;;  %3007 = vmatprep.subr.bf16.mxu1 %v9106_v62  ;;  %v9167_v61 = vld [vmem:[#allocation7 + $0x4e0] ss:$16 sps:$4 sm:$0xff]   ;;  %v9170_v62 = vld [vmem:[#allocation7 + $0x3c8] ss:$16 sps:$4 sm:$0xff]  }
 0x24d   :  { %2862 = vmatpush1.bf16.msra.mxu0 %v9101_v18  ;;  %3008 = vmatpush1.bf16.msra.mxu1 %v9104_v63  ;;  %v9175_v18 = vld [vmem:[#allocation7 + $0x504] ss:$16 sps:$4 sm:$0xff]   ;;  %v9178_v63 = vld [vmem:[#allocation7 + $0x3ec] ss:$16 sps:$4 sm:$0xff]  }
 0x24e   :  { %2863 = vmatprep.subr.bf16.mxu0 %v9109_v0  ;;  %3009 = vmatprep.subr.bf16.mxu1 %v9112_v1  ;;  %v9173_v0 = vld [vmem:[#allocation7 + $0x500] ss:$16 sps:$4 sm:$0xff]   ;;  %v9176_v1 = vld [vmem:[#allocation7 + $0x3e8] ss:$16 sps:$4 sm:$0xff]  }
 0x251   :  { %2864 = vmatpush1.bf16.msra.mxu0 %v9107_v3  ;;  %3010 = vmatpush1.bf16.msra.mxu1 %v9110_v4  ;;  %v9181_v3 = vld [vmem:[#allocation7 + $0x524] ss:$16 sps:$4 sm:$0xff]   ;;  %v9184_v4 = vld [vmem:[#allocation7 + $0x40c] ss:$16 sps:$4 sm:$0xff]  }
 0x252   :  { %2865 = vmatprep.subr.bf16.mxu0 %v9115_v6  ;;  %3011 = vmatprep.subr.bf16.mxu1 %v9118_v8  ;;  %v9179_v6 = vld [vmem:[#allocation7 + $0x520] ss:$16 sps:$4 sm:$0xff]   ;;  %v9182_v8 = vld [vmem:[#allocation7 + $0x408] ss:$16 sps:$4 sm:$0xff]  }
 0x253   :  { %v1132_v15 = vpop.f32.mrb[4].mxu1 }
 0x254   :  { %v1133_v16 = vadd.f32 %v1132_v15, %v381_v9  ;;  %v1134_v17 = vpop.f32.mrb[5].mxu1  ;;  %v9187_v9 = vld [vmem:[#allocation7 + $0x544] ss:$16 sps:$4 sm:$0xff]   ;;  %v9191_v15 = vld [vmem:[#allocation7 + $0x560] ss:$16 sps:$4 sm:$0xff]  }
 0x255   :  { %v1135_v19 = vadd.f32 %v1134_v17, %v385_v10  ;;  %v1136_v20 = vpop.f32.mrb[6].mxu1  ;;  %2866 = vmatpush1.bf16.msra.mxu0 %v9113_v11  ;;  %3012 = vmatpush1.bf16.msra.mxu1 %v9116_v12  ;;  %v9190_v10 = vld [vmem:[#allocation7 + $0x42c] ss:$16 sps:$4 sm:$0xff]   ;;  %v9185_v11 = vld [vmem:[#allocation7 + $0x540] ss:$16 sps:$4 sm:$0xff]  }
 0x256   :  { %v1223_v23 = vmax.f32 %v1133_v16, 0.0  ;;  %v1137_v24 = vpop.f32.mrb[7].mxu1  ;;  %2867 = vmatprep.subr.bf16.mxu0 %v9121_v13  ;;  %3013 = vmatprep.subr.bf16.mxu1 %v9124_v14  ;;  %v9188_v12 = vld [vmem:[#allocation7 + $0x428] ss:$16 sps:$4 sm:$0xff]   ;;  %v9193_v13 = vld [vmem:[#allocation7 + $0x564] ss:$16 sps:$4 sm:$0xff]  }
 0x257   :  { %v1224_v27 = vmax.f32 %v1135_v19, 0.0  ;;  %v9196_v14 = vld [vmem:[#allocation7 + $0x44c] ss:$16 sps:$4 sm:$0xff]   ;;  %v9194_v16 = vld [vmem:[#allocation7 + $0x448] ss:$16 sps:$4 sm:$0xff]   ;;  %v388_v24 = vsub.s32 4, %v10515_v51 }
 0x258   :  { %v10543_v28 = vpack.c.bf16 %v1223_v23, %v1223_v23  ;;  %v9199_v17 = vld [vmem:[#allocation7 + $0x584] ss:$16 sps:$4 sm:$0xff]   ;;  %v9202_v19 = vld [vmem:[#allocation7 + $0x46c] ss:$16 sps:$4 sm:$0xff]   ;;  %v9197_v20 = vld [vmem:[#allocation7 + $0x580] ss:$16 sps:$4 sm:$0xff]  }
 0x259   :  { %v1232_v29 = vpack.c.bf16 %v1224_v27, %v1224_v27  ;;  %2868 = vmatpush1.bf16.msra.mxu0 %v9119_v21  ;;  %3014 = vmatpush1.bf16.msra.mxu1 %v9122_v22  ;;  %v9200_v21 = vld [vmem:[#allocation7 + $0x468] ss:$16 sps:$4 sm:$0xff]   ;;  %v9205_v22 = vld [vmem:[#allocation7 + $0x5a4] ss:$16 sps:$4 sm:$0xff]   ;;  %v9208_v23 = vld [vmem:[#allocation7 + $0x48c] ss:$16 sps:$4 sm:$0xff]  }
 0x25a   :  { %2878 = vmatprep.subr.bf16.mxu0 %v9127_v25  ;;  %3015 = vmatprep.subr.bf16.mxu1 %v9130_v26  ;;  %v9203_v25 = vld [vmem:[#allocation7 + $0x5a0] ss:$16 sps:$4 sm:$0xff]   ;;  %v9206_v26 = vld [vmem:[#allocation7 + $0x488] ss:$16 sps:$4 sm:$0xff]   ;;  %v392_v27 = vsub.s32 5, %v10515_v51 }
 0x25b   :  { %2869 = vmatprep.mubr.bf16.mxu0 %v1232_v29  ;;  %3033 = vmatprep.mubr.bf16.mxu1 %v1232_v29  ;;  %v9214_v29 = vld [vmem:[#allocation7 + $0x4ac] ss:$16 sps:$4 sm:$0xff]  }
 0x25c   :  { %2870 = vmatmul.mubr.bf16.vlgmr.msra.gmra.mrb[0].mxu0 %v10543_v28 }
 0x25d   :  { %2879 = vmatpush1.bf16.msra.mxu0 %v9125_v30  ;;  %3016 = vmatpush1.bf16.msra.mxu1 %v9128_v31  ;;  %v389_v30 = vrot.slane %v10517_v55, %v388_v24  ;;  %v393_v31 = vrot.slane %v10517_v55, %v392_v27 }
 0x25e   :  { %2880 = vmatprep.subr.bf16.mxu0 %v9133_v32  ;;  %3017 = vmatprep.subr.bf16.mxu1 %v9136_v33  ;;  %v9209_v32 = vld [vmem:[#allocation7 + $0x5c0] ss:$16 sps:$4 sm:$0xff]   ;;  %v9212_v33 = vld [vmem:[#allocation7 + $0x4a8] ss:$16 sps:$4 sm:$0xff]  }
 0x261   :  { %2881 = vmatpush1.bf16.msra.mxu0 %v9131_v34  ;;  %3018 = vmatpush1.bf16.msra.mxu1 %v9134_v35  ;;  %v9217_v34 = vld [vmem:[#allocation7 + $0x5e4] ss:$16 sps:$4 sm:$0xff]   ;;  %v9220_v35 = vld [vmem:[#allocation7 + $0x4cc] ss:$16 sps:$4 sm:$0xff]  }
 0x262   :  { %2882 = vmatprep.subr.bf16.mxu0 %v9139_v36  ;;  %3019 = vmatprep.subr.bf16.mxu1 %v9142_v37 }
 0x265   :  { %2883 = vmatpush1.bf16.msra.mxu0 %v9137_v38  ;;  %3020 = vmatpush1.bf16.msra.mxu1 %v9140_v39 }
 0x266   :  { %2884 = vmatprep.subr.bf16.mxu0 %v9145_v40  ;;  %3021 = vmatprep.subr.bf16.mxu1 %v9148_v41  ;;  %v9215_v41 = vld [vmem:[#allocation7 + $0x5e0] ss:$16 sps:$4 sm:$0xff]  }
 0x269   :  { %2885 = vmatpush1.bf16.msra.mxu0 %v9143_v42  ;;  %3022 = vmatpush1.bf16.msra.mxu1 %v9146_v43  ;;  %v9218_v42 = vld [vmem:[#allocation7 + $0x4c8] ss:$16 sps:$4 sm:$0xff]  }
 0x26a   :  { %2886 = vmatprep.subr.bf16.mxu0 %v9151_v44  ;;  %3023 = vmatprep.subr.bf16.mxu1 %v9154_v45  ;;  %v9223_v45 = vld [vmem:[#allocation7 + $0x604] ss:$16 sps:$4 sm:$0xff]  }
 0x26d   :  { %2887 = vmatpush1.bf16.msra.mxu0 %v9149_v46  ;;  %3024 = vmatpush1.bf16.msra.mxu1 %v9152_v47  ;;  %v9226_v46 = vld [vmem:[#allocation7 + $0x4ec] ss:$16 sps:$4 sm:$0xff]  }
 0x26e   :  { %2888 = vmatprep.subr.bf16.mxu0 %v9157_v48  ;;  %3025 = vmatprep.subr.bf16.mxu1 %v9160_v49 }
 0x271   :  { %2889 = vmatpush1.bf16.msra.mxu0 %v9155_v50  ;;  %3026 = vmatpush1.bf16.msra.mxu1 %v9158_v52  ;;  %v9221_v50 = vld [vmem:[#allocation7 + $0x600] ss:$16 sps:$4 sm:$0xff]   ;;  %v9224_v52 = vld [vmem:[#allocation7 + $0x4e8] ss:$16 sps:$4 sm:$0xff]  }
 0x272   :  { %2890 = vmatprep.subr.bf16.mxu0 %v9163_v53  ;;  %3027 = vmatprep.subr.bf16.mxu1 %v9166_v54  ;;  %v9229_v53 = vld [vmem:[#allocation7 + $0x624] ss:$16 sps:$4 sm:$0xff]   ;;  %v9232_v54 = vld [vmem:[#allocation7 + $0x50c] ss:$16 sps:$4 sm:$0xff]  }
 0x275   :  { %2891 = vmatpush1.bf16.msra.mxu0 %v9161_v56  ;;  %3028 = vmatpush1.bf16.msra.mxu1 %v9164_v58  ;;  %v9227_v56 = vld [vmem:[#allocation7 + $0x620] ss:$16 sps:$4 sm:$0xff]   ;;  %v9230_v58 = vld [vmem:[#allocation7 + $0x508] ss:$16 sps:$4 sm:$0xff]  }
 0x276   :  { %2892 = vmatprep.subr.bf16.mxu0 %v9169_v59  ;;  %3029 = vmatprep.subr.bf16.mxu1 %v9172_v60  ;;  %v9235_v59 = vld [vmem:[#allocation7 + $0x644] ss:$16 sps:$4 sm:$0xff]   ;;  %v9238_v60 = vld [vmem:[#allocation7 + $0x52c] ss:$16 sps:$4 sm:$0xff]  }
 0x279   :  { %2893 = vmatpush1.bf16.msra.mxu0 %v9167_v61  ;;  %3030 = vmatpush1.bf16.msra.mxu1 %v9170_v62  ;;  %v9233_v61 = vld [vmem:[#allocation7 + $0x640] ss:$16 sps:$4 sm:$0xff]   ;;  %v9236_v62 = vld [vmem:[#allocation7 + $0x528] ss:$16 sps:$4 sm:$0xff]  }
 0x27a   :  { %2894 = vmatprep.subr.bf16.mxu0 %v9175_v18  ;;  %3031 = vmatprep.subr.bf16.mxu1 %v9178_v63  ;;  %v9241_v18 = vld [vmem:[#allocation7 + $0x664] ss:$16 sps:$4 sm:$0xff]   ;;  %v9244_v63 = vld [vmem:[#allocation7 + $0x54c] ss:$16 sps:$4 sm:$0xff]  }
 0x27d   :  { %2895 = vmatpush1.bf16.msra.mxu0 %v9173_v0  ;;  %3032 = vmatpush1.bf16.msra.mxu1 %v9176_v1  ;;  %v9239_v0 = vld [vmem:[#allocation7 + $0x660] ss:$16 sps:$4 sm:$0xff]   ;;  %v9242_v1 = vld [vmem:[#allocation7 + $0x548] ss:$16 sps:$4 sm:$0xff]  }
 0x27e   :  { %2896 = vmatprep.subr.bf16.mxu0 %v9181_v3  ;;  %3042 = vmatprep.subr.bf16.mxu1 %v9184_v4  ;;  %v9247_v3 = vld [vmem:[#allocation7 + $0x684] ss:$16 sps:$4 sm:$0xff]   ;;  %v9250_v4 = vld [vmem:[#allocation7 + $0x56c] ss:$16 sps:$4 sm:$0xff]  }
 0x280   :  { %3034 = vmatmul.mubr.bf16.vlgmr.msra.gmra.mrb[16].mxu1 %v10543_v28  ;;  %v9211_v28 = vld [vmem:[#allocation7 + $0x5c4] ss:$16 sps:$4 sm:$0xff]  }
 0x281   :  { %2897 = vmatpush1.bf16.msra.mxu0 %v9179_v6  ;;  %3043 = vmatpush1.bf16.msra.mxu1 %v9182_v8  ;;  %v9245_v6 = vld [vmem:[#allocation7 + $0x680] ss:$16 sps:$4 sm:$0xff]   ;;  %v9248_v8 = vld [vmem:[#allocation7 + $0x568] ss:$16 sps:$4 sm:$0xff]  }
 0x282   :  { %2898 = vmatprep.subr.bf16.mxu0 %v9187_v9  ;;  %3044 = vmatprep.subr.bf16.mxu1 %v9190_v10  ;;  %v9253_v9 = vld [vmem:[#allocation7 + $0x6a4] ss:$16 sps:$4 sm:$0xff]   ;;  %v9256_v10 = vld [vmem:[#allocation7 + $0x58c] ss:$16 sps:$4 sm:$0xff]  }
 0x285   :  { %2899 = vmatpush1.bf16.msra.mxu0 %v9185_v11  ;;  %3045 = vmatpush1.bf16.msra.mxu1 %v9188_v12  ;;  %v9251_v11 = vld [vmem:[#allocation7 + $0x6a0] ss:$16 sps:$4 sm:$0xff]   ;;  %v9254_v12 = vld [vmem:[#allocation7 + $0x588] ss:$16 sps:$4 sm:$0xff]  }
 0x286   :  { %2900 = vmatprep.subr.bf16.mxu0 %v9193_v13  ;;  %3046 = vmatprep.subr.bf16.mxu1 %v9196_v14  ;;  %v9259_v13 = vld [vmem:[#allocation7 + $0x6c4] ss:$16 sps:$4 sm:$0xff]   ;;  %v9262_v14 = vld [vmem:[#allocation7 + $0x5ac] ss:$16 sps:$4 sm:$0xff]  }
 0x289   :  { %2901 = vmatpush1.bf16.msra.mxu0 %v9191_v15  ;;  %3047 = vmatpush1.bf16.msra.mxu1 %v9194_v16  ;;  %v9257_v15 = vld [vmem:[#allocation7 + $0x6c0] ss:$16 sps:$4 sm:$0xff]   ;;  %v9260_v16 = vld [vmem:[#allocation7 + $0x5a8] ss:$16 sps:$4 sm:$0xff]  }
 0x28a   :  { %2902 = vmatprep.subr.bf16.mxu0 %v9199_v17  ;;  %3048 = vmatprep.subr.bf16.mxu1 %v9202_v19  ;;  %v9265_v17 = vld [vmem:[#allocation7 + $0x6e4] ss:$16 sps:$4 sm:$0xff]   ;;  %v9268_v19 = vld [vmem:[#allocation7 + $0x5cc] ss:$16 sps:$4 sm:$0xff]  }
 0x28d   :  { %2903 = vmatpush1.bf16.msra.mxu0 %v9197_v20  ;;  %3049 = vmatpush1.bf16.msra.mxu1 %v9200_v21  ;;  %v9263_v20 = vld [vmem:[#allocation7 + $0x6e0] ss:$16 sps:$4 sm:$0xff]   ;;  %v9266_v21 = vld [vmem:[#allocation7 + $0x5c8] ss:$16 sps:$4 sm:$0xff]  }
 0x28e   :  { %2904 = vmatprep.subr.bf16.mxu0 %v9205_v22  ;;  %3050 = vmatprep.subr.bf16.mxu1 %v9208_v23  ;;  %v9271_v22 = vld [vmem:[#allocation7 + $0x704] ss:$16 sps:$4 sm:$0xff]   ;;  %v9274_v23 = vld [vmem:[#allocation7 + $0x5ec] ss:$16 sps:$4 sm:$0xff]  }
 0x291   :  { %2905 = vmatpush1.bf16.msra.mxu0 %v9203_v25  ;;  %3051 = vmatpush1.bf16.msra.mxu1 %v9206_v26  ;;  %v9269_v25 = vld [vmem:[#allocation7 + $0x700] ss:$16 sps:$4 sm:$0xff]   ;;  %v9272_v26 = vld [vmem:[#allocation7 + $0x5e8] ss:$16 sps:$4 sm:$0xff]  }
 0x292   :  { %2906 = vmatprep.subr.bf16.mxu0 %v9211_v28  ;;  %3052 = vmatprep.subr.bf16.mxu1 %v9214_v29  ;;  %v9277_v28 = vld [vmem:[#allocation7 + $0x724] ss:$16 sps:$4 sm:$0xff]   ;;  %v9280_v29 = vld [vmem:[#allocation7 + $0x60c] ss:$16 sps:$4 sm:$0xff]  }
 0x293   :  { %v1173_v36 = vpop.f32.mrb[8].mxu1 }
 0x294   :  { %v1174_v37 = vadd.f32 %v1173_v36, %v389_v30  ;;  %v1175_v38 = vpop.f32.mrb[9].mxu1  ;;  %v9275_v30 = vld [vmem:[#allocation7 + $0x720] ss:$16 sps:$4 sm:$0xff]   ;;  %v9289_v36 = vld [vmem:[#allocation7 + $0x764] ss:$16 sps:$4 sm:$0xff]  }
 0x295   :  { %v1176_v39 = vadd.f32 %v1175_v38, %v393_v31  ;;  %v1177_v40 = vpop.f32.mrb[10].mxu1  ;;  %2907 = vmatpush1.bf16.msra.mxu0 %v9209_v32  ;;  %3053 = vmatpush1.bf16.msra.mxu1 %v9212_v33  ;;  %v9278_v31 = vld [vmem:[#allocation7 + $0x608] ss:$16 sps:$4 sm:$0xff]   ;;  %v9283_v32 = vld [vmem:[#allocation7 + $0x744] ss:$16 sps:$4 sm:$0xff]  }
 0x296   :  { %v1225_v43 = vmax.f32 %v1174_v37, 0.0  ;;  %v1178_v44 = vpop.f32.mrb[11].mxu1  ;;  %2908 = vmatprep.subr.bf16.mxu0 %v9217_v34  ;;  %3054 = vmatprep.subr.bf16.mxu1 %v9220_v35  ;;  %v9286_v33 = vld [vmem:[#allocation7 + $0x62c] ss:$16 sps:$4 sm:$0xff]   ;;  %v9281_v34 = vld [vmem:[#allocation7 + $0x740] ss:$16 sps:$4 sm:$0xff]  }
 0x297   :  { %v1226_v47 = vmax.f32 %v1176_v39, 0.0  ;;  %v9284_v35 = vld [vmem:[#allocation7 + $0x628] ss:$16 sps:$4 sm:$0xff]   ;;  %v9292_v37 = vld [vmem:[#allocation7 + $0x64c] ss:$16 sps:$4 sm:$0xff]  }
 0x298   :  { %v10555_v48 = vpack.c.bf16 %v1225_v43, %v1225_v43  ;;  %v9287_v38 = vld [vmem:[#allocation7 + $0x760] ss:$16 sps:$4 sm:$0xff]   ;;  %v9290_v39 = vld [vmem:[#allocation7 + $0x648] ss:$16 sps:$4 sm:$0xff]   ;;  %v9295_v40 = vld [vmem:[#allocation7 + $0x784] ss:$16 sps:$4 sm:$0xff]  }
 0x299   :  { %v1234_v49 = vpack.c.bf16 %v1226_v47, %v1226_v47  ;;  %2909 = vmatpush1.bf16.msra.mxu0 %v9215_v41  ;;  %3055 = vmatpush1.bf16.msra.mxu1 %v9218_v42  ;;  %v9298_v41 = vld [vmem:[#allocation7 + $0x66c] ss:$16 sps:$4 sm:$0xff]   ;;  %v9293_v42 = vld [vmem:[#allocation7 + $0x780] ss:$16 sps:$4 sm:$0xff]   ;;  %v9296_v43 = vld [vmem:[#allocation7 + $0x668] ss:$16 sps:$4 sm:$0xff]  }
 0x29a   :  { %2919 = vmatprep.subr.bf16.mxu0 %v9223_v45  ;;  %3056 = vmatprep.subr.bf16.mxu1 %v9226_v46  ;;  %v9301_v44 = vld [vmem:[#allocation7 + $0x7a4] ss:$16 sps:$4 sm:$0xff]   ;;  %v9304_v45 = vld [vmem:[#allocation7 + $0x68c] ss:$16 sps:$4 sm:$0xff]   ;;  %v396_v46 = vsub.s32 6, %v10515_v51 }
 0x29b   :  { %2910 = vmatprep.mubr.bf16.mxu0 %v1234_v49  ;;  %3074 = vmatprep.mubr.bf16.mxu1 %v1234_v49  ;;  %v9299_v47 = vld [vmem:[#allocation7 + $0x7a0] ss:$16 sps:$4 sm:$0xff]   ;;  %v400_v49 = vsub.s32 7, %v10515_v51 }
 0x29c   :  { %2911 = vmatmul.mubr.bf16.vlgmr.msra.gmra.mrb[0].mxu0 %v10555_v48 }
 0x29d   :  { %2920 = vmatpush1.bf16.msra.mxu0 %v9221_v50  ;;  %3057 = vmatpush1.bf16.msra.mxu1 %v9224_v52  ;;  %v9307_v50 = vld [vmem:[#allocation7 + $0x7c4] ss:$16 sps:$4 sm:$0xff]   ;;  %v9310_v52 = vld [vmem:[#allocation7 + $0x6ac] ss:$16 sps:$4 sm:$0xff]  }
 0x29e   :  { %2921 = vmatprep.subr.bf16.mxu0 %v9229_v53  ;;  %3058 = vmatprep.subr.bf16.mxu1 %v9232_v54  ;;  %v397_v53 = vrot.slane %v10517_v55, %v396_v46  ;;  %v401_v54 = vrot.slane %v10517_v55, %v400_v49  ;;  %v9319_v55 = vld [vmem:[#allocation7 + $0x6ec] ss:$16 sps:$4 sm:$0xff]  }
 0x2a1   :  { %2922 = vmatpush1.bf16.msra.mxu0 %v9227_v56  ;;  %3059 = vmatpush1.bf16.msra.mxu1 %v9230_v58  ;;  %v9305_v56 = vld [vmem:[#allocation7 + $0x7c0] ss:$16 sps:$4 sm:$0xff]   ;;  %v9308_v58 = vld [vmem:[#allocation7 + $0x6a8] ss:$16 sps:$4 sm:$0xff]  }
 0x2a2   :  { %2923 = vmatprep.subr.bf16.mxu0 %v9235_v59  ;;  %3060 = vmatprep.subr.bf16.mxu1 %v9238_v60  ;;  %v9313_v59 = vld [vmem:[#allocation7 + $0x7e4] ss:$16 sps:$4 sm:$0xff]   ;;  %v9316_v60 = vld [vmem:[#allocation7 + $0x6cc] ss:$16 sps:$4 sm:$0xff]  }
 0x2a5   :  { %2924 = vmatpush1.bf16.msra.mxu0 %v9233_v61  ;;  %3061 = vmatpush1.bf16.msra.mxu1 %v9236_v62 }
 0x2a6   :  { %2925 = vmatprep.subr.bf16.mxu0 %v9241_v18  ;;  %3062 = vmatprep.subr.bf16.mxu1 %v9244_v63 }
 0x2a9   :  { %2926 = vmatpush1.bf16.msra.mxu0 %v9239_v0  ;;  %3063 = vmatpush1.bf16.msra.mxu1 %v9242_v1  ;;  %v9311_v1 = vld [vmem:[#allocation7 + $0x7e0] ss:$16 sps:$4 sm:$0xff]  }
 0x2aa   :  { %2927 = vmatprep.subr.bf16.mxu0 %v9247_v3  ;;  %3064 = vmatprep.subr.bf16.mxu1 %v9250_v4  ;;  %v9314_v3 = vld [vmem:[#allocation7 + $0x6c8] ss:$16 sps:$4 sm:$0xff]  }
 0x2ad   :  { %2928 = vmatpush1.bf16.msra.mxu0 %v9245_v6  ;;  %3065 = vmatpush1.bf16.msra.mxu1 %v9248_v8  ;;  %v9346_v8 = vld [vmem:[#allocation8 + $0x4] ss:$8 sps:$4 sm:$0xff]  }
 0x2ae   :  { %2929 = vmatprep.subr.bf16.mxu0 %v9253_v9  ;;  %3066 = vmatprep.subr.bf16.mxu1 %v9256_v10 }
 0x2b1   :  { %2930 = vmatpush1.bf16.msra.mxu0 %v9251_v11  ;;  %3067 = vmatpush1.bf16.msra.mxu1 %v9254_v12  ;;  %v9317_v11 = vld [vmem:[#allocation7 + $0x6e8] ss:$16 sps:$4 sm:$0xff]  }
 0x2b2   :  { %2931 = vmatprep.subr.bf16.mxu0 %v9259_v13  ;;  %3068 = vmatprep.subr.bf16.mxu1 %v9262_v14  ;;  %v9344_v12 = vld [vmem:[#allocation8] ss:$8 sps:$4 sm:$0xff]   ;;  %v9322_v14 = vld [vmem:[#allocation7 + $0x70c] ss:$16 sps:$4 sm:$0xff]  }
 0x2b5   :  { %2932 = vmatpush1.bf16.msra.mxu0 %v9257_v15  ;;  %3069 = vmatpush1.bf16.msra.mxu1 %v9260_v16  ;;  %v9349_v15 = vld [vmem:[#allocation8 + $0x14] ss:$8 sps:$4 sm:$0xff]   ;;  %v9320_v16 = vld [vmem:[#allocation7 + $0x708] ss:$16 sps:$4 sm:$0xff]  }
 0x2b6   :  { %2933 = vmatprep.subr.bf16.mxu0 %v9265_v17  ;;  %3070 = vmatprep.subr.bf16.mxu1 %v9268_v19  ;;  %v9347_v17 = vld [vmem:[#allocation8 + $0x10] ss:$8 sps:$4 sm:$0xff]   ;;  %v9325_v19 = vld [vmem:[#allocation7 + $0x72c] ss:$16 sps:$4 sm:$0xff]  }
 0x2b9   :  { %2934 = vmatpush1.bf16.msra.mxu0 %v9263_v20  ;;  %3071 = vmatpush1.bf16.msra.mxu1 %v9266_v21  ;;  %v9352_v20 = vld [vmem:[#allocation8 + $0x24] ss:$8 sps:$4 sm:$0xff]   ;;  %v9323_v21 = vld [vmem:[#allocation7 + $0x728] ss:$16 sps:$4 sm:$0xff]  }
 0x2ba   :  { %2935 = vmatprep.subr.bf16.mxu0 %v9271_v22  ;;  %3072 = vmatprep.subr.bf16.mxu1 %v9274_v23  ;;  %v9350_v22 = vld [vmem:[#allocation8 + $0x20] ss:$8 sps:$4 sm:$0xff]   ;;  %v9328_v23 = vld [vmem:[#allocation7 + $0x74c] ss:$16 sps:$4 sm:$0xff]  }
 0x2bd   :  { %2936 = vmatpush1.bf16.msra.mxu0 %v9269_v25  ;;  %3073 = vmatpush1.bf16.msra.mxu1 %v9272_v26  ;;  %v9355_v25 = vld [vmem:[#allocation8 + $0x34] ss:$8 sps:$4 sm:$0xff]   ;;  %v9326_v26 = vld [vmem:[#allocation7 + $0x748] ss:$16 sps:$4 sm:$0xff]  }
 0x2be   :  { %2937 = vmatprep.subr.bf16.mxu0 %v9277_v28  ;;  %3083 = vmatprep.subr.bf16.mxu1 %v9280_v29  ;;  %v9353_v28 = vld [vmem:[#allocation8 + $0x30] ss:$8 sps:$4 sm:$0xff]   ;;  %v9331_v29 = vld [vmem:[#allocation7 + $0x76c] ss:$16 sps:$4 sm:$0xff]  }
 0x2c0   :  { %3075 = vmatmul.mubr.bf16.vlgmr.msra.gmra.mrb[16].mxu1 %v10555_v48  ;;  %v9302_v48 = vld [vmem:[#allocation7 + $0x688] ss:$16 sps:$4 sm:$0xff]  }
 0x2c1   :  { %2938 = vmatpush1.bf16.msra.mxu0 %v9275_v30  ;;  %3084 = vmatpush1.bf16.msra.mxu1 %v9278_v31  ;;  %v9358_v30 = vld [vmem:[#allocation8 + $0x44] ss:$8 sps:$4 sm:$0xff]   ;;  %v9329_v31 = vld [vmem:[#allocation7 + $0x768] ss:$16 sps:$4 sm:$0xff]  }
 0x2c2   :  { %2939 = vmatprep.subr.bf16.mxu0 %v9283_v32  ;;  %3085 = vmatprep.subr.bf16.mxu1 %v9286_v33  ;;  %v9356_v32 = vld [vmem:[#allocation8 + $0x40] ss:$8 sps:$4 sm:$0xff]   ;;  %v9334_v33 = vld [vmem:[#allocation7 + $0x78c] ss:$16 sps:$4 sm:$0xff]  }
 0x2c5   :  { %2940 = vmatpush1.bf16.msra.mxu0 %v9281_v34  ;;  %3086 = vmatpush1.bf16.msra.mxu1 %v9284_v35  ;;  %v9361_v34 = vld [vmem:[#allocation8 + $0x54] ss:$8 sps:$4 sm:$0xff]   ;;  %v9332_v35 = vld [vmem:[#allocation7 + $0x788] ss:$16 sps:$4 sm:$0xff]  }
 0x2c6   :  { %2941 = vmatprep.subr.bf16.mxu0 %v9289_v36  ;;  %3087 = vmatprep.subr.bf16.mxu1 %v9292_v37  ;;  %v9359_v36 = vld [vmem:[#allocation8 + $0x50] ss:$8 sps:$4 sm:$0xff]   ;;  %v9337_v37 = vld [vmem:[#allocation7 + $0x7ac] ss:$16 sps:$4 sm:$0xff]  }
 0x2c9   :  { %2942 = vmatpush1.bf16.msra.mxu0 %v9287_v38  ;;  %3088 = vmatpush1.bf16.msra.mxu1 %v9290_v39  ;;  %v9364_v38 = vld [vmem:[#allocation8 + $0x64] ss:$8 sps:$4 sm:$0xff]   ;;  %v9335_v39 = vld [vmem:[#allocation7 + $0x7a8] ss:$16 sps:$4 sm:$0xff]  }
 0x2ca   :  { %2943 = vmatprep.subr.bf16.mxu0 %v9295_v40  ;;  %3089 = vmatprep.subr.bf16.mxu1 %v9298_v41  ;;  %v9362_v40 = vld [vmem:[#allocation8 + $0x60] ss:$8 sps:$4 sm:$0xff]   ;;  %v9340_v41 = vld [vmem:[#allocation7 + $0x7cc] ss:$16 sps:$4 sm:$0xff]  }
 0x2cd   :  { %2944 = vmatpush1.bf16.msra.mxu0 %v9293_v42  ;;  %3090 = vmatpush1.bf16.msra.mxu1 %v9296_v43  ;;  %v9367_v42 = vld [vmem:[#allocation8 + $0x74] ss:$8 sps:$4 sm:$0xff]   ;;  %v9338_v43 = vld [vmem:[#allocation7 + $0x7c8] ss:$16 sps:$4 sm:$0xff]  }
 0x2ce   :  { %2945 = vmatprep.subr.bf16.mxu0 %v9301_v44  ;;  %3091 = vmatprep.subr.bf16.mxu1 %v9304_v45  ;;  %v9365_v44 = vld [vmem:[#allocation8 + $0x70] ss:$8 sps:$4 sm:$0xff]   ;;  %v9343_v45 = vld [vmem:[#allocation7 + $0x7ec] ss:$16 sps:$4 sm:$0xff]  }
 0x2d1   :  { %2946 = vmatpush1.bf16.msra.mxu0 %v9299_v47  ;;  %3092 = vmatpush1.bf16.msra.mxu1 %v9302_v48  ;;  %v9370_v47 = vld [vmem:[#allocation8 + $0x84] ss:$8 sps:$4 sm:$0xff]   ;;  %v9341_v48 = vld [vmem:[#allocation7 + $0x7e8] ss:$16 sps:$4 sm:$0xff]  }
 0x2d2   :  { %2947 = vmatprep.subr.bf16.mxu0 %v9307_v50  ;;  %3093 = vmatprep.subr.bf16.mxu1 %v9310_v52  ;;  %v9368_v50 = vld [vmem:[#allocation8 + $0x80] ss:$8 sps:$4 sm:$0xff]   ;;  %v9373_v52 = vld [vmem:[#allocation8 + $0x94] ss:$8 sps:$4 sm:$0xff]  }
 0x2d3   :  { %v1214_v61 = vpop.f32.mrb[12].mxu1 }
 0x2d4   :  { %v1215_v62 = vadd.f32 %v1214_v61, %v397_v53  ;;  %v1216_v18 = vpop.f32.mrb[13].mxu1  ;;  %v9371_v53 = vld [vmem:[#allocation8 + $0x90] ss:$8 sps:$4 sm:$0xff]   ;;  %v9380_v61 = vld [vmem:[#allocation8 + $0xc0] ss:$8 sps:$4 sm:$0xff]  }
 0x2d5   :  { %v1217_v63 = vadd.f32 %v1216_v18, %v401_v54  ;;  %v1218_v0 = vpop.f32.mrb[14].mxu1  ;;  %2948 = vmatpush1.bf16.msra.mxu0 %v9305_v56  ;;  %3094 = vmatpush1.bf16.msra.mxu1 %v9308_v58  ;;  %v9376_v54 = vld [vmem:[#allocation8 + $0xa4] ss:$8 sps:$4 sm:$0xff]   ;;  %v9374_v56 = vld [vmem:[#allocation8 + $0xa0] ss:$8 sps:$4 sm:$0xff]  }
 0x2d6   :  { %v1227_v4 = vmax.f32 %v1215_v62, 0.0  ;;  %v1219_v6 = vpop.f32.mrb[15].mxu1  ;;  %2949 = vmatprep.subr.bf16.mxu0 %v9313_v59  ;;  %3095 = vmatprep.subr.bf16.mxu1 %v9316_v60  ;;  %v9379_v58 = vld [vmem:[#allocation8 + $0xb4] ss:$8 sps:$4 sm:$0xff]   ;;  %v9377_v59 = vld [vmem:[#allocation8 + $0xb0] ss:$8 sps:$4 sm:$0xff]  }
 0x2d7   :  { %v1228_v9 = vmax.f32 %v1217_v63, 0.0  ;;  %v9382_v60 = vld [vmem:[#allocation8 + $0xc4] ss:$8 sps:$4 sm:$0xff]   ;;  %v9385_v62 = vld [vmem:[#allocation8 + $0xd4] ss:$8 sps:$4 sm:$0xff]  }
 0x2d8   :  { %v10567_v13 = vpack.c.bf16 %v1227_v4, %v1227_v4  ;;  %v9383_v18 = vld [vmem:[#allocation8 + $0xd0] ss:$8 sps:$4 sm:$0xff]   ;;  %v9388_v63 = vld [vmem:[#allocation8 + $0xe4] ss:$8 sps:$4 sm:$0xff]   ;;  %v9386_v0 = vld [vmem:[#allocation8 + $0xe0] ss:$8 sps:$4 sm:$0xff]  }
 0x2d9   :  { %v1236_v10 = vpack.c.bf16 %v1228_v9, %v1228_v9  ;;  %2950 = vmatpush1.bf16.msra.mxu0 %v9311_v1  ;;  %3096 = vmatpush1.bf16.msra.mxu1 %v9314_v3  ;;  %v9391_v1 = vld [vmem:[#allocation8 + $0xf4] ss:$8 sps:$4 sm:$0xff]   ;;  %v9389_v3 = vld [vmem:[#allocation8 + $0xf0] ss:$8 sps:$4 sm:$0xff]   ;;  %v9394_v4 = vld [vmem:[#allocation8 + $0x104] ss:$8 sps:$4 sm:$0xff]  }
 0x2da   :  { %3097 = vmatprep.subr.bf16.mxu1 %v9319_v55  ;;  %3529 = vmatprep.subr.bf16.mxu0 %v9346_v8  ;;  %v9440_v6 = vld [vmem:[#allocation10 + $0x40] sm:$0xff]   ;;  %v9442_v8 = vld [vmem:[#allocation10 + $0x48] sm:$0xff]  }
 0x2db   :  { %2951 = vmatprep.mubr.bf16.mxu0 %v1236_v10  ;;  %3115 = vmatprep.mubr.bf16.mxu1 %v1236_v10  ;;  %v9441_v55 = vld [vmem:[#allocation10] sm:$0xff]   ;;  %v9443_v9 = vld [vmem:[#allocation10 + $0x8] sm:$0xff]   ;;  %v9444_v10 = vld [vmem:[#allocation10 + $0x50] sm:$0xff]  }
 0x2dc   :  { %2952 = vmatmul.mubr.bf16.vlgmr.msra.gmra.mrb[0].mxu0 %v10567_v13 }
 0x2dd   :  { %3098 = vmatpush1.bf16.msra.mxu1 %v9317_v11  ;;  %3530 = vmatpush1.bf16.msra.mxu0 %v9344_v12  ;;  %v9445_v11 = vld [vmem:[#allocation10 + $0x10] sm:$0xff]   ;;  %v9446_v12 = vld [vmem:[#allocation10 + $0x58] sm:$0xff]  }
 0x2de   :  { %3099 = vmatprep.subr.bf16.mxu1 %v9322_v14  ;;  %3531 = vmatprep.subr.bf16.mxu0 %v9349_v15  ;;  %v9448_v14 = vld [vmem:[#allocation10 + $0x60] sm:$0xff]  }
 0x2df   :  { %v9449_v15 = vld [vmem:[#allocation10 + $0x20] sm:$0xff]  }
 0x2e1   :  { %3100 = vmatpush1.bf16.msra.mxu1 %v9320_v16  ;;  %3532 = vmatpush1.bf16.msra.mxu0 %v9347_v17  ;;  %v9450_v16 = vld [vmem:[#allocation10 + $0x68] sm:$0xff]  }
 0x2e2   :  { %3101 = vmatprep.subr.bf16.mxu1 %v9325_v19  ;;  %3533 = vmatprep.subr.bf16.mxu0 %v9352_v20  ;;  %v9451_v17 = vld [vmem:[#allocation10 + $0x28] sm:$0xff]  }
 0x2e3   :  { %v10571_v19 = vld [vmem:[#allocation23 + $0x1] ss:$8 sm:$0xf] }
 0x2e4   :  { %v1499_v20 = vrot.slane %v10571_v19, %v10520_v7 }
 0x2e5   :  { %3102 = vmatpush1.bf16.msra.mxu1 %v9323_v21  ;;  %3534 = vmatpush1.bf16.msra.mxu0 %v9350_v22  ;;  %v1503_v21 = vrot.slane %v10571_v19, %v10523_v57 }
 0x2e6   :  { %3103 = vmatprep.subr.bf16.mxu1 %v9328_v23  ;;  %3535 = vmatprep.subr.bf16.mxu0 %v9355_v25 }
 0x2e9   :  { %3104 = vmatpush1.bf16.msra.mxu1 %v9326_v26  ;;  %3536 = vmatpush1.bf16.msra.mxu0 %v9353_v28 }
 0x2ea   :  { %3105 = vmatprep.subr.bf16.mxu1 %v9331_v29  ;;  %3537 = vmatprep.subr.bf16.mxu0 %v9358_v30 }
 0x2ed   :  { %3106 = vmatpush1.bf16.msra.mxu1 %v9329_v31  ;;  %3538 = vmatpush1.bf16.msra.mxu0 %v9356_v32 }
 0x2ee   :  { %3107 = vmatprep.subr.bf16.mxu1 %v9334_v33  ;;  %3539 = vmatprep.subr.bf16.mxu0 %v9361_v34  ;;  %v9392_v33 = vld [vmem:[#allocation8 + $0x100] ss:$8 sps:$4 sm:$0xff]  }
 0x2f1   :  { %3108 = vmatpush1.bf16.msra.mxu1 %v9332_v35  ;;  %3540 = vmatpush1.bf16.msra.mxu0 %v9359_v36  ;;  %v9397_v35 = vld [vmem:[#allocation8 + $0x114] ss:$8 sps:$4 sm:$0xff]   ;;  %v9395_v36 = vld [vmem:[#allocation8 + $0x110] ss:$8 sps:$4 sm:$0xff]  }
 0x2f2   :  { %3109 = vmatprep.subr.bf16.mxu1 %v9337_v37  ;;  %3541 = vmatprep.subr.bf16.mxu0 %v9364_v38  ;;  %v9400_v37 = vld [vmem:[#allocation8 + $0x124] ss:$8 sps:$4 sm:$0xff]   ;;  %v9398_v38 = vld [vmem:[#allocation8 + $0x120] ss:$8 sps:$4 sm:$0xff]  }
 0x2f5   :  { %3110 = vmatpush1.bf16.msra.mxu1 %v9335_v39  ;;  %3542 = vmatpush1.bf16.msra.mxu0 %v9362_v40  ;;  %v9403_v39 = vld [vmem:[#allocation8 + $0x134] ss:$8 sps:$4 sm:$0xff]   ;;  %v9401_v40 = vld [vmem:[#allocation8 + $0x130] ss:$8 sps:$4 sm:$0xff]  }
 0x2f6   :  { %3111 = vmatprep.subr.bf16.mxu1 %v9340_v41  ;;  %3543 = vmatprep.subr.bf16.mxu0 %v9367_v42  ;;  %v9406_v41 = vld [vmem:[#allocation8 + $0x144] ss:$8 sps:$4 sm:$0xff]   ;;  %v9404_v42 = vld [vmem:[#allocation8 + $0x140] ss:$8 sps:$4 sm:$0xff]  }
 0x2f9   :  { %3112 = vmatpush1.bf16.msra.mxu1 %v9338_v43  ;;  %3544 = vmatpush1.bf16.msra.mxu0 %v9365_v44  ;;  %v9409_v43 = vld [vmem:[#allocation8 + $0x154] ss:$8 sps:$4 sm:$0xff]   ;;  %v9407_v44 = vld [vmem:[#allocation8 + $0x150] ss:$8 sps:$4 sm:$0xff]  }
 0x2fa   :  { %3113 = vmatprep.subr.bf16.mxu1 %v9343_v45  ;;  %3545 = vmatprep.subr.bf16.mxu0 %v9370_v47  ;;  %v9412_v45 = vld [vmem:[#allocation8 + $0x164] ss:$8 sps:$4 sm:$0xff]   ;;  %v9410_v47 = vld [vmem:[#allocation8 + $0x160] ss:$8 sps:$4 sm:$0xff]  }
 0x2fd   :  { %3114 = vmatpush1.bf16.msra.mxu1 %v9341_v48  ;;  %3546 = vmatpush1.bf16.msra.mxu0 %v9368_v50  ;;  %v9415_v48 = vld [vmem:[#allocation8 + $0x174] ss:$8 sps:$4 sm:$0xff]   ;;  %v9413_v50 = vld [vmem:[#allocation8 + $0x170] ss:$8 sps:$4 sm:$0xff]  }
 0x2fe   :  { %3547 = vmatprep.subr.bf16.mxu0 %v9373_v52  ;;  %8721 = vmatprep.subr.bf16.mxu1 %v9440_v6  ;;  %v1511_v52 = vrot.slane %v10571_v19, %v10537_v5  ;;  %v9425_v6 = vld [vmem:[#allocation8 + $0x1b0] ss:$8 sps:$4 sm:$0xff]  }
 0x300   :  { %3116 = vmatmul.mubr.bf16.vlgmr.msra.gmra.mrb[16].mxu1 %v10567_v13  ;;  %v9447_v13 = vld [vmem:[#allocation10 + $0x18] sm:$0xff]  }
 0x301   :  { %3548 = vmatpush1.bf16.msra.mxu0 %v9371_v53  ;;  %8722 = vmatpush3.bf16.msra.mxu1 %v9441_v55  ;;  %v9418_v53 = vld [vmem:[#allocation8 + $0x184] ss:$8 sps:$4 sm:$0xff]  }
 0x302   :  { %3549 = vmatprep.subr.bf16.mxu0 %v9376_v54  ;;  %8723 = vmatprep.subr.bf16.mxu1 %v9442_v8  ;;  %v9430_v55 = vld [vmem:[#allocation8 + $0x1c4] ss:$8 sps:$4 sm:$0xff]   ;;  %v9428_v8 = vld [vmem:[#allocation8 + $0x1c0] ss:$8 sps:$4 sm:$0xff]  }
 0x305   :  { %3550 = vmatpush1.bf16.msra.mxu0 %v9374_v56  ;;  %8724 = vmatpush3.bf16.msra.mxu1 %v9443_v9  ;;  %v9433_v9 = vld [vmem:[#allocation8 + $0x1d4] ss:$8 sps:$4 sm:$0xff]  }
 0x306   :  { %3551 = vmatprep.subr.bf16.mxu0 %v9379_v58  ;;  %8725 = vmatprep.subr.bf16.mxu1 %v9444_v10  ;;  %v9431_v10 = vld [vmem:[#allocation8 + $0x1d0] ss:$8 sps:$4 sm:$0xff]  }
 0x309   :  { %3552 = vmatpush1.bf16.msra.mxu0 %v9377_v59  ;;  %8726 = vmatpush3.bf16.msra.mxu1 %v9445_v11  ;;  %v1507_v11 = vrot.slane %v10571_v19, %v10534_v2  ;;  %v9455_v19 = vld [vmem:[#allocation10 + $0x38] sm:$0xff]  }
 0x30a   :  { %3553 = vmatprep.subr.bf16.mxu0 %v9382_v60  ;;  %8727 = vmatprep.subr.bf16.mxu1 %v9446_v12  ;;  %v9416_v60 = vld [vmem:[#allocation8 + $0x180] ss:$8 sps:$4 sm:$0xff]   ;;  %v9436_v12 = vld [vmem:[#allocation8 + $0x1e4] ss:$8 sps:$4 sm:$0xff]  }
 0x30d   :  { %3554 = vmatpush1.bf16.msra.mxu0 %v9380_v61  ;;  %8728 = vmatpush3.bf16.msra.mxu1 %v9447_v13  ;;  %v9434_v13 = vld [vmem:[#allocation8 + $0x1e0] ss:$8 sps:$4 sm:$0xff]  }
 0x30e   :  { %3555 = vmatprep.subr.bf16.mxu0 %v9385_v62  ;;  %8729 = vmatprep.subr.bf16.mxu1 %v9448_v14  ;;  %v9421_v62 = vld [vmem:[#allocation8 + $0x194] ss:$8 sps:$4 sm:$0xff]  }
 0x311   :  { %3556 = vmatpush1.bf16.msra.mxu0 %v9383_v18  ;;  %8730 = vmatpush3.bf16.msra.mxu1 %v9449_v15  ;;  %v9439_v15 = vld [vmem:[#allocation8 + $0x1f4] ss:$8 sps:$4 sm:$0xff]  }
 0x312   :  { %3557 = vmatprep.subr.bf16.mxu0 %v9388_v63  ;;  %8731 = vmatprep.subr.bf16.mxu1 %v9450_v16  ;;  %v9437_v16 = vld [vmem:[#allocation8 + $0x1f0] ss:$8 sps:$4 sm:$0xff]  }
 0x315   :  { %3558 = vmatpush1.bf16.msra.mxu0 %v9386_v0  ;;  %8732 = vmatpush3.bf16.msra.mxu1 %v9451_v17  ;;  %v9419_v0 = vld [vmem:[#allocation8 + $0x190] ss:$8 sps:$4 sm:$0xff]  }
 0x316   :  { %3559 = vmatprep.subr.bf16.mxu0 %v9391_v1  ;;  %v9424_v1 = vld [vmem:[#allocation8 + $0x1a4] ss:$8 sps:$4 sm:$0xff]  }
 0x319   :  { %3560 = vmatpush1.bf16.msra.mxu0 %v9389_v3  ;;  %v9422_v3 = vld [vmem:[#allocation8 + $0x1a0] ss:$8 sps:$4 sm:$0xff]  }
 0x31a   :  { %3570 = vmatprep.subr.bf16.mxu0 %v9394_v4  ;;  %v9427_v4 = vld [vmem:[#allocation8 + $0x1b4] ss:$8 sps:$4 sm:$0xff]  }
 0x3af   :  { %v2953_v22 = vpop.f32.mrb[0].mxu0 }
 0x3b0   :  { %v8859_v23 = vadd.f32 %v2953_v22, %v1499_v20  ;;  %v2955_v25 = vpop.f32.mrb[1].mxu0  ;;  %v9453_v22 = vld [vmem:[#allocation10 + $0x30] sm:$0xff]  }
 0x3b1   :  { %v8860_v26 = vadd.f32 %v2955_v25, %v1503_v21  ;;  %v2957_v28 = vpop.f32.mrb[2].mxu0  ;;  %v9452_v21 = vld [vmem:[#allocation10 + $0x70] sm:$0xff]   ;;  %v10171_v25 = vmov 0.0  }
 0x3b2   :  { %v3124_v29 = vmax.f32 %v8859_v23, 0.0  ;;  %v2958_v30 = vpop.f32.mrb[3].mxu0  ;;  %8733 = vmatprep.subr.bf16.mxu1 %v9452_v21  ;;  %v9454_v23 = vld [vmem:[#allocation10 + $0x78] sm:$0xff]   ;;  %v9476_v21 = vld [vmem:[#allocation14 + $0x20] sm:$0xff]  }
 0x3b3   :  { %v3125_v31 = vmax.f32 %v8860_v26, 0.0  ;;  %8734 = vmatpush3.bf16.msra.mxu1 %v9453_v22  ;;  %v3197_v26 = vld [vmem:[#allocation23 + $0x2] ss:$8 sm:$0x3] }
 0x3b4   :  { %v3128_v34 = vpack.c.bf16 %v3124_v29, %v3124_v29  ;;  %8735 = vmatprep.subr.bf16.mxu1 %v9454_v23  ;;  %v3202_v28 = vrot.slane %v3197_v26, %v10520_v7  ;;  %v3206_v29 = vrot.slane %v3197_v26, %v10523_v57  ;;  %v9477_v22 = vld [vmem:[#allocation14 + $0x28] sm:$0xff]   ;;  %v9478_v23 = vld [vmem:[#allocation14 + $0x30] sm:$0xff]   ;;  %v9480_v26 = vld [vmem:[#allocation16] sm:$0xff]  }
 0x3b5   :  { %v3129_v32 = vpack.c.bf16 %v3125_v31, %v3125_v31 }
 0x3b7   :  { %3561 = vmatprep.mubr.bf16.mxu0 %v3129_v32  ;;  %8736 = vmatpush3.bf16.msra.mxu1 %v9455_v19  ;;  %v9479_v19 = vld [vmem:[#allocation14 + $0x38] sm:$0xff]  }
 0x3b8   :  { %3562 = vmatmul.mubr.bf16.vlgmr.msra.gmra.mrb[4].mxu0 %v3128_v34  ;;  %8779 = vmatprep.subr.bf16.mxu1 %v10171_v25 }
 0x3b9   :  { %3571 = vmatpush1.bf16.msra.mxu0 %v9392_v33 }
 0x3ba   :  { %3572 = vmatprep.subr.bf16.mxu0 %v9397_v35 }
 0x3bd   :  { %3573 = vmatpush1.bf16.msra.mxu0 %v9395_v36 }
 0x3be   :  { %3574 = vmatprep.subr.bf16.mxu0 %v9400_v37 }
 0x3c1   :  { %3575 = vmatpush1.bf16.msra.mxu0 %v9398_v38 }
 0x3c2   :  { %3576 = vmatprep.subr.bf16.mxu0 %v9403_v39  ;;  %v9456_v39 = vld [vmem:[#allocation11] sm:$0xff]  }
 0x3c5   :  { %3577 = vmatpush1.bf16.msra.mxu0 %v9401_v40 }
 0x3c6   :  { %3578 = vmatprep.subr.bf16.mxu0 %v9406_v41  ;;  %v9457_v41 = vld [vmem:[#allocation11 + $0x8] sm:$0xff]  }
 0x3c9   :  { %3579 = vmatpush1.bf16.msra.mxu0 %v9404_v42  ;;  %v9458_v42 = vld [vmem:[#allocation11 + $0x10] sm:$0xff]  }
 0x3ca   :  { %3580 = vmatprep.subr.bf16.mxu0 %v9409_v43  ;;  %v9459_v43 = vld [vmem:[#allocation11 + $0x18] sm:$0xff]  }
 0x3cd   :  { %3581 = vmatpush1.bf16.msra.mxu0 %v9407_v44  ;;  %v9460_v44 = vld [vmem:[#allocation11 + $0x20] sm:$0xff]  }
 0x3ce   :  { %3582 = vmatprep.subr.bf16.mxu0 %v9412_v45  ;;  %v9461_v45 = vld [vmem:[#allocation11 + $0x28] sm:$0xff]  }
 0x3d1   :  { %3583 = vmatpush1.bf16.msra.mxu0 %v9410_v47  ;;  %v9462_v47 = vld [vmem:[#allocation11 + $0x30] sm:$0xff]  }
 0x3d2   :  { %3584 = vmatprep.subr.bf16.mxu0 %v9415_v48  ;;  %v9463_v48 = vld [vmem:[#allocation11 + $0x38] sm:$0xff]  }
 0x3d3   :  { %v3117_v54 = vpop.f32.mrb[16].mxu1 }
 0x3d4   :  { %v3119_v56 = vpop.f32.mrb[17].mxu1  ;;  %v8861_v14 = vadd.f32 %v3117_v54, %v1507_v11 }
 0x3d5   :  { %v8862_v58 = vadd.f32 %v3119_v56, %v1511_v52  ;;  %3585 = vmatpush1.bf16.msra.mxu0 %v9413_v50  ;;  %v3121_v59 = vpop.f32.mrb[18].mxu1  ;;  %v3647_v52 = vld [vmem:[#allocation23 + $0x3] ss:$0 sm:$0xff] }
 0x3d6   :  { %v3122_v61 = vpop.f32.mrb[19].mxu1  ;;  %3586 = vmatprep.subr.bf16.mxu0 %v9418_v53  ;;  %v3126_v17 = vmax.f32 %v8861_v14, 0.0  ;;  %v9472_v14 = vld [vmem:[#allocation14] sm:$0xff]  }
 0x3d7   :  { %v3127_v18 = vmax.f32 %v8862_v58, 0.0  ;;  %v9464_v61 = vld [vmem:[#allocation13] sm:$0xff]  }
 0x3d8   :  { %v3130_v20 = vpack.c.bf16 %v3126_v17, %v3126_v17  ;;  %v9474_v17 = vld [vmem:[#allocation14 + $0x10] sm:$0xff]  }
 0x3d9   :  { %v3131_v63 = vpack.c.bf16 %v3127_v18, %v3127_v18  ;;  %3587 = vmatpush1.bf16.msra.mxu0 %v9416_v60  ;;  %v9465_v18 = vld [vmem:[#allocation13 + $0x8] sm:$0xff]  }
 0x3da   :  { %3588 = vmatprep.subr.bf16.mxu0 %v9421_v62 }
 0x3db   :  { %3602 = vmatprep.mubr.bf16.mxu0 %v3131_v63  ;;  %v9466_v63 = vld [vmem:[#allocation13 + $0x10] sm:$0xff]  }
 0x3dd   :  { %3589 = vmatpush1.bf16.msra.mxu0 %v9419_v0  ;;  %v9467_v0 = vld [vmem:[#allocation13 + $0x18] sm:$0xff]  }
 0x3de   :  { %3590 = vmatprep.subr.bf16.mxu0 %v9424_v1  ;;  %v9468_v1 = vld [vmem:[#allocation13 + $0x20] sm:$0xff]  }
 0x3e1   :  { %3591 = vmatpush1.bf16.msra.mxu0 %v9422_v3  ;;  %v9469_v3 = vld [vmem:[#allocation13 + $0x28] sm:$0xff]  }
 0x3e2   :  { %3592 = vmatprep.subr.bf16.mxu0 %v9427_v4  ;;  %v9470_v4 = vld [vmem:[#allocation13 + $0x30] sm:$0xff]  }
 0x3e5   :  { %3593 = vmatpush1.bf16.msra.mxu0 %v9425_v6  ;;  %v9471_v6 = vld [vmem:[#allocation13 + $0x38] sm:$0xff]  }
 0x3e6   :  { %3594 = vmatprep.subr.bf16.mxu0 %v9430_v55  ;;  %v3802_v55 = vld [vmem:[#allocation23 + $0x4] ss:$0 sm:$0xff] }
 0x3e9   :  { %3595 = vmatpush1.bf16.msra.mxu0 %v9428_v8 }
 0x3ea   :  { %3596 = vmatprep.subr.bf16.mxu0 %v9433_v9 }
 0x3ed   :  { %3597 = vmatpush1.bf16.msra.mxu0 %v9431_v10 }
 0x3ee   :  { %3598 = vmatprep.subr.bf16.mxu0 %v9436_v12 }
 0x3f1   :  { %3599 = vmatpush1.bf16.msra.mxu0 %v9434_v13 }
 0x3f2   :  { %3600 = vmatprep.subr.bf16.mxu0 %v9439_v15 }
 0x3f5   :  { %3601 = vmatpush1.bf16.msra.mxu0 %v9437_v16  ;;  %v9473_v16 = vld [vmem:[#allocation14 + $0x8] sm:$0xff]  }
 0x3f6   :  { %8839 = vmatprep.subr.bf16.mxu0 %v10171_v25 }
 0x3f8   :  { %3603 = vmatmul.mubr.bf16.vlgmr.msra.gmra.mrb[4].mxu0 %v3130_v20  ;;  %v9475_v20 = vld [vmem:[#allocation14 + $0x18] sm:$0xff]  }
 0x3f9   :  { %8855 = vmatprep.mubr.msk.bf16.mxu0 %vm10172_vm0, %v10171_v25  ;;  %8840 = vmatpush3.bf16.msra.mxu0 %v9480_v26  ;;  %v9548_v26 = vld [vmem:[#allocation19 + $0xc0] ss:$16 sps:$4 sm:$0xff]  }
 0x3fa   :  { %8841 = vmatprep.subr.bf16.mxu0 %v10171_v25 }
 0x4cb   :  { %v3604_v30 = vpop.f32.mrb[4].mxu0 }
 0x4cc   :  { %v8863_v31 = vadd.f32 %v3604_v30, %v3202_v28  ;;  %v3606_v32 = vpop.f32.mrb[5].mxu0  ;;  %v9481_v28 = vld [vmem:[#allocation16 + $0x8] sm:$0xff]   ;;  %v9483_v30 = vld [vmem:[#allocation16 + $0x18] sm:$0xff]  }
 0x4cd   :  { %v8864_v33 = vadd.f32 %v3606_v32, %v3206_v29  ;;  %v3608_v34 = vpop.f32.mrb[6].mxu0  ;;  %8842 = vmatpush3.bf16.msra.mxu0 %v9481_v28  ;;  %v9482_v29 = vld [vmem:[#allocation16 + $0x10] sm:$0xff]   ;;  %v9485_v32 = vld [vmem:[#allocation16 + $0x28] sm:$0xff]  }
 0x4ce   :  { %v3611_v35 = vmax.f32 %v8863_v31, 0.0  ;;  %v3609_v36 = vpop.f32.mrb[7].mxu0  ;;  %8843 = vmatprep.subr.bf16.mxu0 %v10171_v25  ;;  %v9484_v31 = vld [vmem:[#allocation16 + $0x20] sm:$0xff]  }
 0x4cf   :  { %v3612_v37 = vmax.f32 %v8864_v33, 0.0  ;;  %v3909_v33 = vld [vmem:[#allocation23 + $0x5] ss:$0 sm:$0xff] }
 0x4d0   :  { %v3613_v40 = vpack.c.bf16 %v3611_v35, %v3611_v35  ;;  %v9556_v28 = vld [vmem:[#allocation19 + $0xe4] ss:$16 sps:$4 sm:$0xff]  }
 0x4d1   :  { %v3614_v38 = vpack.c.bf16 %v3612_v37, %v3612_v37  ;;  %8844 = vmatpush3.bf16.msra.mxu0 %v9482_v29  ;;  %v9554_v29 = vld [vmem:[#allocation19 + $0xe0] ss:$16 sps:$4 sm:$0xff]  }
 0x4d2   :  { %8845 = vmatprep.subr.bf16.mxu0 %v10171_v25 }
 0x4d3   :  { %3776 = vmatprep.mubr.bf16.mxu1 %v3614_v38 }
 0x4d4   :  { %3777 = vmatmul.mubr.bf16.vlgmr.msra.gmra.mrb[20].mxu1 %v3613_v40 }
 0x4d5   :  { %8780 = vmatpush3.bf16.msra.mxu1 %v9456_v39  ;;  %8795 = vmatprep.mubr.msk.bf16.mxu1 %vm10172_vm0, %v10171_v25 }
 0x4d6   :  { %8781 = vmatprep.subr.bf16.mxu1 %v10171_v25  ;;  %8846 = vmatpush3.bf16.msra.mxu0 %v9483_v30  ;;  %v9562_v30 = vld [vmem:[#allocation19 + $0x104] ss:$16 sps:$4 sm:$0xff]  }
 0x4d7   :  { %8847 = vmatprep.subr.bf16.mxu0 %v10171_v25 }
 0x4d9   :  { %8782 = vmatpush3.bf16.msra.mxu1 %v9457_v41  ;;  %v9486_v41 = vld [vmem:[#allocation16 + $0x30] sm:$0xff]  }
 0x4da   :  { %8783 = vmatprep.subr.bf16.mxu1 %v10171_v25  ;;  %8848 = vmatpush3.bf16.msra.mxu0 %v9484_v31  ;;  %v9560_v31 = vld [vmem:[#allocation19 + $0x100] ss:$16 sps:$4 sm:$0xff]  }
 0x4db   :  { %8849 = vmatprep.subr.bf16.mxu0 %v10171_v25 }
 0x4dd   :  { %8784 = vmatpush3.bf16.msra.mxu1 %v9458_v42  ;;  %v9487_v42 = vld [vmem:[#allocation16 + $0x38] sm:$0xff]  }
 0x4de   :  { %8785 = vmatprep.subr.bf16.mxu1 %v10171_v25  ;;  %8850 = vmatpush3.bf16.msra.mxu0 %v9485_v32  ;;  %v9568_v32 = vld [vmem:[#allocation19 + $0x124] ss:$16 sps:$4 sm:$0xff]  }
 0x4df   :  { %8851 = vmatprep.subr.bf16.mxu0 %v10171_v25 }
 0x4e1   :  { %8786 = vmatpush3.bf16.msra.mxu1 %v9459_v43  ;;  %v9488_v43 = vld [vmem:[#allocation17] ss:$8 sps:$4 sm:$0xff]  }
 0x4e2   :  { %8787 = vmatprep.subr.bf16.mxu1 %v10171_v25  ;;  %8852 = vmatpush3.bf16.msra.mxu0 %v9486_v41  ;;  %v9590_v41 = vld [vmem:[#allocation19 + $0x1a0] ss:$16 sps:$4 sm:$0xff]  }
 0x4e3   :  { %8853 = vmatprep.subr.bf16.mxu0 %v10171_v25 }
 0x4e5   :  { %8788 = vmatpush3.bf16.msra.mxu1 %v9460_v44  ;;  %v9490_v44 = vld [vmem:[#allocation17 + $0x4] ss:$8 sps:$4 sm:$0xff]  }
 0x4e6   :  { %8789 = vmatprep.subr.bf16.mxu1 %v10171_v25  ;;  %8854 = vmatpush3.bf16.msra.mxu0 %v9487_v42  ;;  %v4123_v42 = vld [vmem:[#allocation23 + $0x7] ss:$0 sm:$0xff] }
 0x4e9   :  { %8790 = vmatpush3.bf16.msra.mxu1 %v9461_v45  ;;  %v9493_v45 = vld [vmem:[#allocation17 + $0x14] ss:$8 sps:$4 sm:$0xff]  }
 0x4ea   :  { %8791 = vmatprep.subr.bf16.mxu1 %v10171_v25 }
 0x4ed   :  { %8792 = vmatpush3.bf16.msra.mxu1 %v9462_v47  ;;  %v9491_v47 = vld [vmem:[#allocation17 + $0x10] ss:$8 sps:$4 sm:$0xff]  }
 0x4ee   :  { %8793 = vmatprep.subr.bf16.mxu1 %v10171_v25 }
 0x4f1   :  { %8794 = vmatpush3.bf16.msra.mxu1 %v9463_v48  ;;  %v9496_v48 = vld [vmem:[#allocation17 + $0x24] ss:$8 sps:$4 sm:$0xff]  }
 0x4f2   :  { %8799 = vmatprep.subr.bf16.mxu1 %v10171_v25 }
 0x5a7   :  { %v8737_v50 = vpop.f32.mrb[20].mxu1 }
 0x5a8   :  { %v8738_v53 = vpop.f32.mrb[21].mxu1 }
 0x5a9   :  { %v8739_v54 = vadd.f32 %v8738_v53, %v8737_v50  ;;  %v8740_v56 = vpop.f32.mrb[22].mxu1  ;;  %v9494_v50 = vld [vmem:[#allocation17 + $0x20] ss:$8 sps:$4 sm:$0xff]   ;;  %v9497_v53 = vld [vmem:[#allocation17 + $0x30] ss:$8 sps:$4 sm:$0xff]  }
 0x5aa   :  { %v8741_v58 = vpop.f32.mrb[23].mxu1  ;;  %v9505_v56 = vld [vmem:[#allocation17 + $0x54] ss:$8 sps:$4 sm:$0xff]  }
 0x5ab   :  { %v3779_v59 = vadd.f32 %v8739_v54, %v3647_v52  ;;  %v9499_v52 = vld [vmem:[#allocation17 + $0x34] ss:$8 sps:$4 sm:$0xff]   ;;  %v9502_v54 = vld [vmem:[#allocation17 + $0x44] ss:$8 sps:$4 sm:$0xff]   ;;  %v9503_v58 = vld [vmem:[#allocation17 + $0x50] ss:$8 sps:$4 sm:$0xff]  }
 0x5ad   :  { %v3784_v60 = vmax.f32 %v3779_v59, 0.0  ;;  %v9508_v59 = vld [vmem:[#allocation17 + $0x64] ss:$8 sps:$4 sm:$0xff]  }
 0x5af   :  { %v3785_v62 = vpack.c.bf16 %v3784_v60, %v3784_v60  ;;  %v9506_v60 = vld [vmem:[#allocation17 + $0x60] ss:$8 sps:$4 sm:$0xff]  }
 0x5b1   :  { %8796 = vmatmul.mubr.bf16.vlgmr.msra.gmra.mrb[24].mxu1 %v3785_v62 }
 0x5b2   :  { %8800 = vmatpush3.bf16.msra.mxu1 %v9464_v61  ;;  %8815 = vmatprep.mubr.msk.bf16.mxu1 %vm10172_vm0, %v10171_v25  ;;  %v4016_v61 = vld [vmem:[#allocation23 + $0x6] ss:$0 sm:$0xff] }
 0x5b3   :  { %8801 = vmatprep.subr.bf16.mxu1 %v10171_v25 }
 0x5b6   :  { %8802 = vmatpush3.bf16.msra.mxu1 %v9465_v18 }
 0x5b7   :  { %8803 = vmatprep.subr.bf16.mxu1 %v10171_v25 }
 0x5ba   :  { %8804 = vmatpush3.bf16.msra.mxu1 %v9466_v63 }
 0x5bb   :  { %8805 = vmatprep.subr.bf16.mxu1 %v10171_v25 }
 0x5be   :  { %8806 = vmatpush3.bf16.msra.mxu1 %v9467_v0 }
 0x5bf   :  { %8807 = vmatprep.subr.bf16.mxu1 %v10171_v25 }
 0x5c2   :  { %8808 = vmatpush3.bf16.msra.mxu1 %v9468_v1 }
 0x5c3   :  { %8809 = vmatprep.subr.bf16.mxu1 %v10171_v25 }
 0x5c6   :  { %8810 = vmatpush3.bf16.msra.mxu1 %v9469_v3 }
 0x5c7   :  { %8811 = vmatprep.subr.bf16.mxu1 %v10171_v25 }
 0x5ca   :  { %8812 = vmatpush3.bf16.msra.mxu1 %v9470_v4 }
 0x5cb   :  { %8813 = vmatprep.subr.bf16.mxu1 %v10171_v25 }
 0x5ce   :  { %8814 = vmatpush3.bf16.msra.mxu1 %v9471_v6  ;;  %v9511_v6 = vld [vmem:[#allocation17 + $0x74] ss:$8 sps:$4 sm:$0xff]  }
 0x5cf   :  { %8819 = vmatprep.subr.bf16.mxu1 %v10171_v25 }
 0x684   :  { %v3885_v8 = vpop.f32.mrb[24].mxu1 }
 0x685   :  { %v3886_v9 = vadd.f32 %v3885_v8, %v3802_v55  ;;  %v8797_v10 = vpop.f32.mrb[25].mxu1  ;;  %v9509_v55 = vld [vmem:[#allocation17 + $0x70] ss:$8 sps:$4 sm:$0xff]   ;;  %v10173_v8 = vmov 0  }
 0x686   :  { %v3888_v11 = vpop.f32.mrb[26].mxu1  ;;  %v9514_v10 = vld [vmem:[#allocation19 + $0x4] ss:$16 sps:$4 sm:$0xff]  }
 0x687   :  { %v3891_v12 = vmax.f32 %v3886_v9, 0.0  ;;  %v8798_v13 = vpop.f32.mrb[27].mxu1  ;;  %v9512_v9 = vld [vmem:[#allocation19] ss:$16 sps:$4 sm:$0xff]   ;;  %v9517_v11 = vld [vmem:[#allocation19 + $0xc] ss:$16 sps:$4 sm:$0xff]   ;;  %4775 = vmatprep.subr.bf16.mxu0 %v9514_v10 }
 0x688   :  { %v9518_v13 = vld [vmem:[#allocation19 + $0x20] ss:$16 sps:$4 sm:$0xff]   ;;  %v9577_v10 = vld [vmem:[#allocation19 + $0x14c] ss:$16 sps:$4 sm:$0xff]  }
 0x689   :  { %v3892_v15 = vpack.c.bf16 %v3891_v12, %v3891_v12  ;;  %v9520_v12 = vld [vmem:[#allocation19 + $0x24] ss:$16 sps:$4 sm:$0xff]  }
 0x68b   :  { %8816 = vmatmul.mubr.bf16.vlgmr.msra.gmra.mrb[28].mxu1 %v3892_v15  ;;  %v9524_v15 = vld [vmem:[#allocation19 + $0x40] ss:$16 sps:$4 sm:$0xff]  }
 0x68c   :  { %8820 = vmatpush3.bf16.msra.mxu1 %v9472_v14  ;;  %8835 = vmatprep.mubr.msk.bf16.mxu1 %vm10172_vm0, %v10171_v25  ;;  %v9526_v14 = vld [vmem:[#allocation19 + $0x44] ss:$16 sps:$4 sm:$0xff]  }
 0x68d   :  { %8821 = vmatprep.subr.bf16.mxu1 %v10171_v25 }
 0x690   :  { %8822 = vmatpush3.bf16.msra.mxu1 %v9473_v16  ;;  %v9532_v16 = vld [vmem:[#allocation19 + $0x64] ss:$16 sps:$4 sm:$0xff]  }
 0x691   :  { %8823 = vmatprep.subr.bf16.mxu1 %v10171_v25 }
 0x694   :  { %8824 = vmatpush3.bf16.msra.mxu1 %v9474_v17  ;;  %v9530_v17 = vld [vmem:[#allocation19 + $0x60] ss:$16 sps:$4 sm:$0xff]  }
 0x695   :  { %8825 = vmatprep.subr.bf16.mxu1 %v10171_v25 }
 0x698   :  { %8826 = vmatpush3.bf16.msra.mxu1 %v9475_v20  ;;  %v9538_v20 = vld [vmem:[#allocation19 + $0x84] ss:$16 sps:$4 sm:$0xff]  }
 0x699   :  { %8827 = vmatprep.subr.bf16.mxu1 %v10171_v25 }
 0x69c   :  { %8828 = vmatpush3.bf16.msra.mxu1 %v9476_v21  ;;  %v9536_v21 = vld [vmem:[#allocation19 + $0x80] ss:$16 sps:$4 sm:$0xff]  }
 0x69d   :  { %8829 = vmatprep.subr.bf16.mxu1 %v10171_v25 }
 0x6a0   :  { %8830 = vmatpush3.bf16.msra.mxu1 %v9477_v22  ;;  %v9544_v22 = vld [vmem:[#allocation19 + $0xa4] ss:$16 sps:$4 sm:$0xff]  }
 0x6a1   :  { %8831 = vmatprep.subr.bf16.mxu1 %v10171_v25 }
 0x6a4   :  { %8832 = vmatpush3.bf16.msra.mxu1 %v9478_v23  ;;  %v9542_v23 = vld [vmem:[#allocation19 + $0xa0] ss:$16 sps:$4 sm:$0xff]  }
 0x6a5   :  { %8833 = vmatprep.subr.bf16.mxu1 %v10171_v25  ;;  %v9500_v25 = vld [vmem:[#allocation17 + $0x40] ss:$8 sps:$4 sm:$0xff]  }
 0x6a8   :  { %8834 = vmatpush3.bf16.msra.mxu1 %v9479_v19  ;;  %v9550_v19 = vld [vmem:[#allocation19 + $0xc4] ss:$16 sps:$4 sm:$0xff]  }
 0x6a9   :  { %4323 = vmatprep.subr.bf16.mxu1 %v9490_v44 }
 0x75e   :  { %v3992_v34 = vpop.f32.mrb[28].mxu1 }
 0x75f   :  { %v3993_v35 = vadd.f32 %v3992_v34, %v3909_v33  ;;  %v8817_v36 = vpop.f32.mrb[29].mxu1  ;;  %v9566_v33 = vld [vmem:[#allocation19 + $0x120] ss:$16 sps:$4 sm:$0xff]   ;;  %v9574_v34 = vld [vmem:[#allocation19 + $0x144] ss:$16 sps:$4 sm:$0xff]  }
 0x760   :  { %v3995_v37 = vpop.f32.mrb[30].mxu1  ;;  %v9580_v36 = vld [vmem:[#allocation19 + $0x164] ss:$16 sps:$4 sm:$0xff]  }
 0x761   :  { %v3998_v38 = vmax.f32 %v3993_v35, 0.0  ;;  %v8818_v39 = vpop.f32.mrb[31].mxu1  ;;  %v9572_v35 = vld [vmem:[#allocation19 + $0x140] ss:$16 sps:$4 sm:$0xff]  }
 0x762   :  { %v9578_v37 = vld [vmem:[#allocation19 + $0x160] ss:$16 sps:$4 sm:$0xff]  }
 0x763   :  { %v3999_v40 = vpack.c.bf16 %v3998_v38, %v3998_v38  ;;  %v9586_v38 = vld [vmem:[#allocation19 + $0x184] ss:$16 sps:$4 sm:$0xff]   ;;  %v9584_v39 = vld [vmem:[#allocation19 + $0x180] ss:$16 sps:$4 sm:$0xff]  }
 0x765   :  { %8836 = vmatmul.mubr.bf16.vlgmr.msra.gmra.mrb[32].mxu1 %v3999_v40  ;;  %v9592_v40 = vld [vmem:[#allocation19 + $0x1a4] ss:$16 sps:$4 sm:$0xff]  }
 0x766   :  { %4324 = vmatpush1.bf16.msra.mxu1 %v9488_v43  ;;  %4355 = vmatprep.mubr.bf16.mxu1 %v10173_v8  ;;  %v9571_v8 = vld [vmem:[#allocation19 + $0x12c] ss:$16 sps:$4 sm:$0xff]  }
 0x767   :  { %4325 = vmatprep.subr.bf16.mxu1 %v9493_v45 }
 0x76a   :  { %4326 = vmatpush1.bf16.msra.mxu1 %v9491_v47 }
 0x76b   :  { %4327 = vmatprep.subr.bf16.mxu1 %v9496_v48 }
 0x76e   :  { %4328 = vmatpush1.bf16.msra.mxu1 %v9494_v50 }
 0x76f   :  { %4329 = vmatprep.subr.bf16.mxu1 %v9499_v52  ;;  %v9515_v52 = vld [vmem:[#allocation19 + $0x8] ss:$16 sps:$4 sm:$0xff]  }
 0x772   :  { %4330 = vmatpush1.bf16.msra.mxu1 %v9497_v53 }
 0x773   :  { %4331 = vmatprep.subr.bf16.mxu1 %v9502_v54  ;;  %v9523_v54 = vld [vmem:[#allocation19 + $0x2c] ss:$16 sps:$4 sm:$0xff]  }
 0x776   :  { %4332 = vmatpush1.bf16.msra.mxu1 %v9500_v25  ;;  %v9521_v25 = vld [vmem:[#allocation19 + $0x28] ss:$16 sps:$4 sm:$0xff]  }
 0x777   :  { %4333 = vmatprep.subr.bf16.mxu1 %v9505_v56  ;;  %v9529_v56 = vld [vmem:[#allocation19 + $0x4c] ss:$16 sps:$4 sm:$0xff]  }
 0x77a   :  { %4334 = vmatpush1.bf16.msra.mxu1 %v9503_v58  ;;  %v9527_v58 = vld [vmem:[#allocation19 + $0x48] ss:$16 sps:$4 sm:$0xff]  }
 0x77b   :  { %4335 = vmatprep.subr.bf16.mxu1 %v9508_v59  ;;  %v9535_v59 = vld [vmem:[#allocation19 + $0x6c] ss:$16 sps:$4 sm:$0xff]  }
 0x77e   :  { %4336 = vmatpush1.bf16.msra.mxu1 %v9506_v60  ;;  %v9533_v60 = vld [vmem:[#allocation19 + $0x68] ss:$16 sps:$4 sm:$0xff]  }
 0x77f   :  { %4337 = vmatprep.subr.bf16.mxu1 %v9511_v6  ;;  %v9565_v6 = vld [vmem:[#allocation19 + $0x10c] ss:$16 sps:$4 sm:$0xff]  }
 0x782   :  { %4338 = vmatpush1.bf16.msra.mxu1 %v9509_v55  ;;  %v9563_v55 = vld [vmem:[#allocation19 + $0x108] ss:$16 sps:$4 sm:$0xff]  }
 0x783   :  { %4816 = vmatprep.subr.bf16.mxu1 %v9517_v11  ;;  %v9575_v11 = vld [vmem:[#allocation19 + $0x148] ss:$16 sps:$4 sm:$0xff]  }
 0x838   :  { %v4099_v62 = vpop.f32.mrb[32].mxu1 }
 0x839   :  { %v4100_v18 = vadd.f32 %v4099_v62, %v4016_v61  ;;  %v8837_v63 = vpop.f32.mrb[33].mxu1  ;;  %v9541_v61 = vld [vmem:[#allocation19 + $0x8c] ss:$16 sps:$4 sm:$0xff]   ;;  %v9539_v62 = vld [vmem:[#allocation19 + $0x88] ss:$16 sps:$4 sm:$0xff]  }
 0x83a   :  { %v4102_v0 = vpop.f32.mrb[34].mxu1  ;;  %v9545_v63 = vld [vmem:[#allocation19 + $0xa8] ss:$16 sps:$4 sm:$0xff]  }
 0x83b   :  { %v4105_v1 = vmax.f32 %v4100_v18, 0.0  ;;  %v8838_v3 = vpop.f32.mrb[35].mxu1  ;;  %v9547_v18 = vld [vmem:[#allocation19 + $0xac] ss:$16 sps:$4 sm:$0xff]  }
 0x83c   :  { %v9553_v0 = vld [vmem:[#allocation19 + $0xcc] ss:$16 sps:$4 sm:$0xff]  }
 0x83d   :  { %v4106_v4 = vpack.c.bf16 %v4105_v1, %v4105_v1  ;;  %v9551_v1 = vld [vmem:[#allocation19 + $0xc8] ss:$16 sps:$4 sm:$0xff]   ;;  %v9559_v3 = vld [vmem:[#allocation19 + $0xec] ss:$16 sps:$4 sm:$0xff]  }
 0x83f   :  { %8856 = vmatmul.mubr.bf16.vlgmr.msra.gmra.mrb[8].mxu0 %v4106_v4  ;;  %v9557_v4 = vld [vmem:[#allocation19 + $0xe8] ss:$16 sps:$4 sm:$0xff]  }
 0x840   :  { %4776 = vmatpush1.bf16.msra.mxu0 %v9512_v9  ;;  %v9569_v9 = vld [vmem:[#allocation19 + $0x128] ss:$16 sps:$4 sm:$0xff]  }
 0x841   :  { %4777 = vmatprep.subr.bf16.mxu0 %v9520_v12  ;;  %v9583_v12 = vld [vmem:[#allocation19 + $0x16c] ss:$16 sps:$4 sm:$0xff]  }
 0x844   :  { %4778 = vmatpush1.bf16.msra.mxu0 %v9518_v13  ;;  %v9581_v13 = vld [vmem:[#allocation19 + $0x168] ss:$16 sps:$4 sm:$0xff]  }
 0x845   :  { %4779 = vmatprep.subr.bf16.mxu0 %v9526_v14  ;;  %v9589_v14 = vld [vmem:[#allocation19 + $0x18c] ss:$16 sps:$4 sm:$0xff]  }
 0x848   :  { %4780 = vmatpush1.bf16.msra.mxu0 %v9524_v15  ;;  %v9587_v15 = vld [vmem:[#allocation19 + $0x188] ss:$16 sps:$4 sm:$0xff]  }
 0x849   :  { %4781 = vmatprep.subr.bf16.mxu0 %v9532_v16  ;;  %v9595_v16 = vld [vmem:[#allocation19 + $0x1ac] ss:$16 sps:$4 sm:$0xff]  }
 0x84c   :  { %4782 = vmatpush1.bf16.msra.mxu0 %v9530_v17  ;;  %v9593_v17 = vld [vmem:[#allocation19 + $0x1a8] ss:$16 sps:$4 sm:$0xff]  }
 0x84d   :  { %4783 = vmatprep.subr.bf16.mxu0 %v9538_v20  ;;  %v9598_v20 = vld [vmem:[#allocation19 + $0x1c4] ss:$16 sps:$4 sm:$0xff]  }
 0x850   :  { %4784 = vmatpush1.bf16.msra.mxu0 %v9536_v21  ;;  %v9601_v21 = vld [vmem:[#allocation19 + $0x1cc] ss:$16 sps:$4 sm:$0xff]  }
 0x851   :  { %4785 = vmatprep.subr.bf16.mxu0 %v9544_v22  ;;  %v9596_v22 = vld [vmem:[#allocation19 + $0x1c0] ss:$16 sps:$4 sm:$0xff]  }
 0x854   :  { %4786 = vmatpush1.bf16.msra.mxu0 %v9542_v23  ;;  %v9599_v23 = vld [vmem:[#allocation19 + $0x1c8] ss:$16 sps:$4 sm:$0xff]  }
 0x855   :  { %4787 = vmatprep.subr.bf16.mxu0 %v9550_v19  ;;  %v9604_v19 = vld [vmem:[#allocation19 + $0x1e4] ss:$16 sps:$4 sm:$0xff]  }
 0x858   :  { %4788 = vmatpush1.bf16.msra.mxu0 %v9548_v26  ;;  %v9607_v26 = vld [vmem:[#allocation19 + $0x1ec] ss:$16 sps:$4 sm:$0xff]  }
 0x859   :  { %4789 = vmatprep.subr.bf16.mxu0 %v9556_v28  ;;  %v9602_v28 = vld [vmem:[#allocation19 + $0x1e0] ss:$16 sps:$4 sm:$0xff]  }
 0x85c   :  { %4790 = vmatpush1.bf16.msra.mxu0 %v9554_v29  ;;  %v9605_v29 = vld [vmem:[#allocation19 + $0x1e8] ss:$16 sps:$4 sm:$0xff]  }
 0x85d   :  { %4791 = vmatprep.subr.bf16.mxu0 %v9562_v30  ;;  %v4865_v30 = vld [vmem:[#allocation20] sm:$0xff] }
 0x860   :  { %4792 = vmatpush1.bf16.msra.mxu0 %v9560_v31  ;;  %v4869_v31 = vld [vmem:[#allocation20 + $0x20] sm:$0xff] }
 0x861   :  { %4793 = vmatprep.subr.bf16.mxu0 %v9568_v32  ;;  %v4866_v32 = vld [vmem:[#allocation20 + $0x8] sm:$0xff] }
 0x864   :  { %4794 = vmatpush1.bf16.msra.mxu0 %v9566_v33  ;;  %v8337_v33 = vcombine.low %v4865_v30, %v4869_v31 }
 0x865   :  { %4795 = vmatprep.subr.bf16.mxu0 %v9574_v34  ;;  %v8338_v34 = vcombine.high %v4865_v30, %v4869_v31 }
 0x868   :  { %4796 = vmatpush1.bf16.msra.mxu0 %v9572_v35  ;;  %v4870_v35 = vld [vmem:[#allocation20 + $0x28] sm:$0xff] }
 0x869   :  { %4797 = vmatprep.subr.bf16.mxu0 %v9580_v36  ;;  %v8339_v36 = vcombine.low %v4866_v32, %v4870_v35 }
 0x86c   :  { %4798 = vmatpush1.bf16.msra.mxu0 %v9578_v37  ;;  %v8340_v37 = vcombine.high %v4866_v32, %v4870_v35  ;;  %v4917_v35 = vld [vmem:[#allocation20 + $0x1a0] sm:$0xff] }
 0x86d   :  { %4799 = vmatprep.subr.bf16.mxu0 %v9586_v38  ;;  %v4231_v38 = vld [vmem:[#allocation23 + $0x40] ss:$8 sm:$0x3] }
 0x870   :  { %4800 = vmatpush1.bf16.msra.mxu0 %v9584_v39  ;;  %v4236_v39 = vrot.slane %v4231_v38, %v10520_v7 }
 0x871   :  { %4801 = vmatprep.subr.bf16.mxu0 %v9592_v40  ;;  %v4240_v40 = vrot.slane %v4231_v38, %v10523_v57 }
 0x874   :  { %4802 = vmatpush1.bf16.msra.mxu0 %v9590_v41 }
 0x875   :  { %4803 = vmatprep.subr.bf16.mxu0 %v9598_v20 }
 0x878   :  { %4804 = vmatpush1.bf16.msra.mxu0 %v9596_v22 }
 0x879   :  { %4805 = vmatprep.subr.bf16.mxu0 %v9604_v19  ;;  %v4905_v19 = vld [vmem:[#allocation20 + $0x140] sm:$0xff] }
 0x87c   :  { %4806 = vmatpush1.bf16.msra.mxu0 %v9602_v28  ;;  %v4906_v28 = vld [vmem:[#allocation20 + $0x148] sm:$0xff] }
 0x87d   :  { %6446 = vmatprep.subr.bf16.mxu0 %v8338_v34  ;;  %v4913_v34 = vld [vmem:[#allocation20 + $0x180] sm:$0xff] }
 0x912   :  { %v4206_v43 = vpop.f32.mrb[8].mxu0 }
 0x913   :  { %v4207_v44 = vadd.f32 %v4206_v43, %v4123_v42  ;;  %v8857_v45 = vpop.f32.mrb[9].mxu0 }
 0x914   :  { %v4209_v47 = vpop.f32.mrb[10].mxu0 }
 0x915   :  { %v4212_v48 = vmax.f32 %v4207_v44, 0.0  ;;  %v8858_v50 = vpop.f32.mrb[11].mxu0 }
 0x916   :  { %v4873_v50 = vld [vmem:[#allocation20 + $0x40] sm:$0xff] }
 0x917   :  { %v4213_v53 = vpack.c.bf16 %v4212_v48, %v4212_v48 }
 0x919   :  { %4356 = vmatmul.mubr.bf16.vlgmr.msra.gmra.mrb[36].mxu1 %v4213_v53  ;;  %v4877_v53 = vld [vmem:[#allocation20 + $0x60] sm:$0xff] }
 0x91a   :  { %4817 = vmatpush1.bf16.msra.mxu1 %v9515_v52 }
 0x91b   :  { %4818 = vmatprep.subr.bf16.mxu1 %v9523_v54  ;;  %v4874_v54 = vld [vmem:[#allocation20 + $0x48] sm:$0xff] }
 0x91e   :  { %4819 = vmatpush1.bf16.msra.mxu1 %v9521_v25  ;;  %v4878_v25 = vld [vmem:[#allocation20 + $0x68] sm:$0xff] }
 0x91f   :  { %4820 = vmatprep.subr.bf16.mxu1 %v9529_v56 }
 0x922   :  { %4821 = vmatpush1.bf16.msra.mxu1 %v9527_v58 }
 0x923   :  { %4822 = vmatprep.subr.bf16.mxu1 %v9535_v59  ;;  %v8346_v59 = vcombine.high %v4873_v50, %v4877_v53 }
 0x926   :  { %4823 = vmatpush1.bf16.msra.mxu1 %v9533_v60  ;;  %v8348_v60 = vcombine.high %v4874_v54, %v4878_v25 }
 0x927   :  { %4824 = vmatprep.subr.bf16.mxu1 %v9541_v61  ;;  %v4881_v61 = vld [vmem:[#allocation20 + $0x80] sm:$0xff] }
 0x92a   :  { %4825 = vmatpush1.bf16.msra.mxu1 %v9539_v62  ;;  %v4885_v62 = vld [vmem:[#allocation20 + $0xa0] sm:$0xff] }
 0x92b   :  { %4826 = vmatprep.subr.bf16.mxu1 %v9547_v18  ;;  %v4882_v18 = vld [vmem:[#allocation20 + $0x88] sm:$0xff] }
 0x92e   :  { %4827 = vmatpush1.bf16.msra.mxu1 %v9545_v63  ;;  %v4886_v63 = vld [vmem:[#allocation20 + $0xa8] sm:$0xff] }
 0x92f   :  { %4828 = vmatprep.subr.bf16.mxu1 %v9553_v0  ;;  %v8345_v0 = vcombine.low %v4873_v50, %v4877_v53  ;;  %v4929_v53 = vld [vmem:[#allocation20 + $0x200] sm:$0xff] }
 0x932   :  { %4829 = vmatpush1.bf16.msra.mxu1 %v9551_v1  ;;  %v8347_v1 = vcombine.low %v4874_v54, %v4878_v25  ;;  %v4933_v54 = vld [vmem:[#allocation20 + $0x220] sm:$0xff]  ;;  %v4930_v25 = vld [vmem:[#allocation20 + $0x208] sm:$0xff] }
 0x933   :  { %4830 = vmatprep.subr.bf16.mxu1 %v9559_v3  ;;  %v8354_v3 = vcombine.high %v4881_v61, %v4885_v62 }
 0x936   :  { %4831 = vmatpush1.bf16.msra.mxu1 %v9557_v4  ;;  %v8356_v4 = vcombine.high %v4882_v18, %v4886_v63 }
 0x937   :  { %4832 = vmatprep.subr.bf16.mxu1 %v9565_v6  ;;  %v4889_v6 = vld [vmem:[#allocation20 + $0xc0] sm:$0xff] }
 0x93a   :  { %4833 = vmatpush1.bf16.msra.mxu1 %v9563_v55  ;;  %v4893_v55 = vld [vmem:[#allocation20 + $0xe0] sm:$0xff] }
 0x93b   :  { %4834 = vmatprep.subr.bf16.mxu1 %v9571_v8  ;;  %v4890_v8 = vld [vmem:[#allocation20 + $0xc8] sm:$0xff]  ;;  %v8361_v20 = vcombine.low %v4889_v6, %v4893_v55 }
 0x93e   :  { %4835 = vmatpush1.bf16.msra.mxu1 %v9569_v9  ;;  %v4894_v9 = vld [vmem:[#allocation20 + $0xe8] sm:$0xff] }
 0x93f   :  { %4836 = vmatprep.subr.bf16.mxu1 %v9577_v10  ;;  %v8353_v10 = vcombine.low %v4881_v61, %v4885_v62  ;;  %v4937_v62 = vld [vmem:[#allocation20 + $0x240] sm:$0xff] }
 0x942   :  { %4837 = vmatpush1.bf16.msra.mxu1 %v9575_v11  ;;  %v8355_v11 = vcombine.low %v4882_v18, %v4886_v63  ;;  %v4941_v18 = vld [vmem:[#allocation20 + $0x260] sm:$0xff]  ;;  %v4938_v63 = vld [vmem:[#allocation20 + $0x248] sm:$0xff] }
 0x943   :  { %4838 = vmatprep.subr.bf16.mxu1 %v9583_v12  ;;  %v8362_v12 = vcombine.high %v4889_v6, %v4893_v55  ;;  %v4945_v55 = vld [vmem:[#allocation20 + $0x280] sm:$0xff] }
 0x946   :  { %4839 = vmatpush1.bf16.msra.mxu1 %v9581_v13  ;;  %v8364_v13 = vcombine.high %v4890_v8, %v4894_v9 }
 0x947   :  { %4840 = vmatprep.subr.bf16.mxu1 %v9589_v14  ;;  %v4897_v14 = vld [vmem:[#allocation20 + $0x100] sm:$0xff] }
 0x94a   :  { %4841 = vmatpush1.bf16.msra.mxu1 %v9587_v15  ;;  %v4901_v15 = vld [vmem:[#allocation20 + $0x120] sm:$0xff] }
 0x94b   :  { %4842 = vmatprep.subr.bf16.mxu1 %v9595_v16  ;;  %v4898_v16 = vld [vmem:[#allocation20 + $0x108] sm:$0xff]  ;;  %v8370_v22 = vcombine.high %v4897_v14, %v4901_v15  ;;  %v8369_v30 = vcombine.low %v4897_v14, %v4901_v15  ;;  %v4953_v15 = vld [vmem:[#allocation20 + $0x2c0] sm:$0xff] }
 0x94e   :  { %4843 = vmatpush1.bf16.msra.mxu1 %v9593_v17  ;;  %v4902_v17 = vld [vmem:[#allocation20 + $0x128] sm:$0xff] }
 0x94f   :  { %4844 = vmatprep.subr.bf16.mxu1 %v9601_v21  ;;  %v8363_v21 = vcombine.low %v4890_v8, %v4894_v9  ;;  %v8371_v31 = vcombine.low %v4898_v16, %v4902_v17  ;;  %v4949_v8 = vld [vmem:[#allocation20 + $0x2a0] sm:$0xff]  ;;  %v4946_v9 = vld [vmem:[#allocation20 + $0x288] sm:$0xff] }
 0x952   :  { %4845 = vmatpush1.bf16.msra.mxu1 %v9599_v23  ;;  %v8372_v23 = vcombine.high %v4898_v16, %v4902_v17  ;;  %v4957_v16 = vld [vmem:[#allocation20 + $0x2e0] sm:$0xff]  ;;  %v4954_v17 = vld [vmem:[#allocation20 + $0x2c8] sm:$0xff] }
 0x953   :  { %4846 = vmatprep.subr.bf16.mxu1 %v9607_v26  ;;  %v4909_v26 = vld [vmem:[#allocation20 + $0x160] sm:$0xff] }
 0x954   :  { %v8378_v32 = vcombine.high %v4905_v19, %v4909_v26  ;;  %v8377_v38 = vcombine.low %v4905_v19, %v4909_v26  ;;  %v4961_v26 = vld [vmem:[#allocation20 + $0x300] sm:$0xff] }
 0x956   :  { %4847 = vmatpush1.bf16.msra.mxu1 %v9605_v29  ;;  %v4910_v29 = vld [vmem:[#allocation20 + $0x168] sm:$0xff] }
 0x957   :  { %6528 = vmatprep.subr.bf16.mxu1 %v8340_v37  ;;  %v4918_v37 = vld [vmem:[#allocation20 + $0x1a8] sm:$0xff] }
 0x9ec   :  { %v4357_v41 = vpop.f32.mrb[36].mxu1 }
 0x9ed   :  { %v4358_v42 = vadd.f32 %v4357_v41, %v4236_v39  ;;  %v4359_v43 = vpop.f32.mrb[37].mxu1  ;;  %v8379_v39 = vcombine.low %v4906_v28, %v4910_v29 }
 0x9ee   :  { %v4360_v44 = vadd.f32 %v4359_v43, %v4240_v40  ;;  %v4361_v45 = vpop.f32.mrb[38].mxu1  ;;  %v8386_v40 = vcombine.high %v4913_v34, %v4917_v35  ;;  %v4925_v43 = vld [vmem:[#allocation20 + $0x1e0] sm:$0xff] }
 0x9ef   :  { %v4364_v47 = vmax.f32 %v4358_v42, 0.0  ;;  %v4362_v48 = vpop.f32.mrb[39].mxu1  ;;  %v4921_v42 = vld [vmem:[#allocation20 + $0x1c0] sm:$0xff]  ;;  %v4926_v45 = vld [vmem:[#allocation20 + $0x1e8] sm:$0xff] }
 0x9f0   :  { %v4365_v52 = vmax.f32 %v4360_v44, 0.0  ;;  %v4922_v44 = vld [vmem:[#allocation20 + $0x1c8] sm:$0xff]  ;;  %v8394_v50 = vcombine.high %v4921_v42, %v4925_v43 }
 0x9f1   :  { %v4366_v58 = vpack.c.bf16 %v4364_v47, %v4364_v47  ;;  %v8385_v47 = vcombine.low %v4913_v34, %v4917_v35  ;;  %v4969_v35 = vld [vmem:[#allocation20 + $0x340] sm:$0xff] }
 0x9f2   :  { %v4367_v56 = vpack.c.bf16 %v4365_v52, %v4365_v52  ;;  %v8396_v52 = vcombine.high %v4922_v44, %v4926_v45 }
 0x9f4   :  { %4807 = vmatprep.mubr.bf16.mxu0 %v4367_v56  ;;  %4848 = vmatprep.mubr.bf16.mxu1 %v4367_v56  ;;  %v4934_v56 = vld [vmem:[#allocation20 + $0x228] sm:$0xff] }
 0x9f5   :  { %4808 = vmatmul.mubr.bf16.vlgmr.msra.gmra.mrb[12].mxu0 %v4366_v58  ;;  %4849 = vmatmul.mubr.bf16.vlgmr.msra.gmra.mrb[40].mxu1 %v4366_v58  ;;  %v8393_v58 = vcombine.low %v4921_v42, %v4925_v43  ;;  %v8404_v61 = vcombine.high %v4930_v25, %v4934_v56 }
 0x9f6   :  { %6447 = vmatpush1.bf16.msra.mxu0 %v8337_v33  ;;  %6529 = vmatpush1.bf16.msra.mxu1 %v8339_v36  ;;  %v8380_v33 = vcombine.high %v4906_v28, %v4910_v29  ;;  %v4914_v36 = vld [vmem:[#allocation20 + $0x188] sm:$0xff]  ;;  %v4965_v28 = vld [vmem:[#allocation20 + $0x320] sm:$0xff] }
 0x9f7   :  { %6448 = vmatprep.subr.bf16.mxu0 %v8346_v59  ;;  %6530 = vmatprep.subr.bf16.mxu1 %v8348_v60  ;;  %v8388_v41 = vcombine.high %v4914_v36, %v4918_v37  ;;  %v8387_v48 = vcombine.low %v4914_v36, %v4918_v37  ;;  %v8395_v59 = vcombine.low %v4922_v44, %v4926_v45  ;;  %v4962_v29 = vld [vmem:[#allocation20 + $0x308] sm:$0xff]  ;;  %v4973_v36 = vld [vmem:[#allocation20 + $0x360] sm:$0xff] }
 0x9f8   :  { %v8402_v60 = vcombine.high %v4929_v53, %v4933_v54  ;;  %v4970_v37 = vld [vmem:[#allocation20 + $0x348] sm:$0xff]  ;;  %v8441_v43 = vcombine.low %v4969_v35, %v4973_v36  ;;  %v4977_v45 = vld [vmem:[#allocation20 + $0x380] sm:$0xff] }
 0x9fa   :  { %6449 = vmatpush1.bf16.msra.mxu0 %v8345_v0  ;;  %6531 = vmatpush1.bf16.msra.mxu1 %v8347_v1  ;;  %v4942_v0 = vld [vmem:[#allocation20 + $0x268] sm:$0xff]  ;;  %v8401_v1 = vcombine.low %v4929_v53, %v4933_v54 }
 0x9fb   :  { %6450 = vmatprep.subr.bf16.mxu0 %v8354_v3  ;;  %6532 = vmatprep.subr.bf16.mxu1 %v8356_v4  ;;  %v8403_v3 = vcombine.low %v4930_v25, %v4934_v56  ;;  %v8410_v4 = vcombine.high %v4937_v62, %v4941_v18  ;;  %v8412_v6 = vcombine.high %v4938_v63, %v4942_v0  ;;  %v4985_v56 = vld [vmem:[#allocation20 + $0x3c0] sm:$0xff] }
 0x9fe   :  { %6451 = vmatpush1.bf16.msra.mxu0 %v8353_v10  ;;  %6533 = vmatpush1.bf16.msra.mxu1 %v8355_v11  ;;  %v4950_v10 = vld [vmem:[#allocation20 + $0x2a8] sm:$0xff]  ;;  %v8409_v11 = vcombine.low %v4937_v62, %v4941_v18 }
 0x9ff   :  { %6452 = vmatprep.subr.bf16.mxu0 %v8362_v12  ;;  %6534 = vmatprep.subr.bf16.mxu1 %v8364_v13  ;;  %v8411_v12 = vcombine.low %v4938_v63, %v4942_v0  ;;  %v8418_v13 = vcombine.high %v4945_v55, %v4949_v8  ;;  %v8420_v14 = vcombine.high %v4946_v9, %v4950_v10  ;;  %v4993_v0 = vld [vmem:[#allocation20 + $0x400] sm:$0xff] }
 0xa02   :  { %6453 = vmatpush1.bf16.msra.mxu0 %v8361_v20  ;;  %6535 = vmatpush1.bf16.msra.mxu1 %v8363_v21  ;;  %v4958_v20 = vld [vmem:[#allocation20 + $0x2e8] sm:$0xff]  ;;  %v8417_v21 = vcombine.low %v4945_v55, %v4949_v8 }
 0xa03   :  { %6454 = vmatprep.subr.bf16.mxu0 %v8370_v22  ;;  %6536 = vmatprep.subr.bf16.mxu1 %v8372_v23  ;;  %v8419_v22 = vcombine.low %v4946_v9, %v4950_v10  ;;  %v8426_v23 = vcombine.high %v4953_v15, %v4957_v16  ;;  %v8428_v19 = vcombine.high %v4954_v17, %v4958_v20  ;;  %v10625_v10 = vld [vmem:[#allocation23 + $0x41] ss:$8 sm:$0xf] }
 0xa06   :  { %6455 = vmatpush1.bf16.msra.mxu0 %v8369_v30  ;;  %6537 = vmatpush1.bf16.msra.mxu1 %v8371_v31  ;;  %v4966_v30 = vld [vmem:[#allocation20 + $0x328] sm:$0xff]  ;;  %v8425_v31 = vcombine.low %v4953_v15, %v4957_v16 }
 0xa07   :  { %6456 = vmatprep.subr.bf16.mxu0 %v8378_v32  ;;  %6538 = vmatprep.subr.bf16.mxu1 %v8380_v33  ;;  %v8427_v32 = vcombine.low %v4954_v17, %v4958_v20  ;;  %v8434_v33 = vcombine.high %v4961_v26, %v4965_v28  ;;  %v8436_v34 = vcombine.high %v4962_v29, %v4966_v30 }
 0xa0a   :  { %6457 = vmatpush1.bf16.msra.mxu0 %v8377_v38  ;;  %6539 = vmatpush1.bf16.msra.mxu1 %v8379_v39  ;;  %v4974_v38 = vld [vmem:[#allocation20 + $0x368] sm:$0xff]  ;;  %v8433_v39 = vcombine.low %v4961_v26, %v4965_v28 }
 0xa0b   :  { %6458 = vmatprep.subr.bf16.mxu0 %v8386_v40  ;;  %6540 = vmatprep.subr.bf16.mxu1 %v8388_v41  ;;  %v8435_v40 = vcombine.low %v4962_v29, %v4966_v30  ;;  %v8442_v41 = vcombine.high %v4969_v35, %v4973_v36  ;;  %v8444_v42 = vcombine.high %v4970_v37, %v4974_v38  ;;  %v5006_v35 = vld [vmem:[#allocation20 + $0x468] sm:$0xff] }
 0xa0c   :  { %v8443_v44 = vcombine.low %v4970_v37, %v4974_v38  ;;  %v5009_v38 = vld [vmem:[#allocation20 + $0x480] sm:$0xff] }
 0xa0e   :  { %6459 = vmatpush1.bf16.msra.mxu0 %v8385_v47  ;;  %6541 = vmatpush1.bf16.msra.mxu1 %v8387_v48  ;;  %v4981_v47 = vld [vmem:[#allocation20 + $0x3a0] sm:$0xff]  ;;  %v4978_v48 = vld [vmem:[#allocation20 + $0x388] sm:$0xff] }
 0xa0f   :  { %6460 = vmatprep.subr.bf16.mxu0 %v8394_v50  ;;  %6542 = vmatprep.subr.bf16.mxu1 %v8396_v52  ;;  %v8450_v50 = vcombine.high %v4977_v45, %v4981_v47  ;;  %v4982_v52 = vld [vmem:[#allocation20 + $0x3a8] sm:$0xff]  ;;  %v8449_v53 = vcombine.low %v4977_v45, %v4981_v47 }
 0xa10   :  { %v8451_v54 = vcombine.low %v4978_v48, %v4982_v52  ;;  %v8452_v25 = vcombine.high %v4978_v48, %v4982_v52  ;;  %v5017_v52 = vld [vmem:[#allocation20 + $0x4c0] sm:$0xff] }
 0xa12   :  { %6461 = vmatpush1.bf16.msra.mxu0 %v8393_v58  ;;  %6543 = vmatpush1.bf16.msra.mxu1 %v8395_v59  ;;  %v4989_v58 = vld [vmem:[#allocation20 + $0x3e0] sm:$0xff]  ;;  %v4986_v59 = vld [vmem:[#allocation20 + $0x3c8] sm:$0xff] }
 0xa13   :  { %6462 = vmatprep.subr.bf16.mxu0 %v8402_v60  ;;  %6544 = vmatprep.subr.bf16.mxu1 %v8404_v61  ;;  %v8458_v60 = vcombine.high %v4985_v56, %v4989_v58  ;;  %v4990_v61 = vld [vmem:[#allocation20 + $0x3e8] sm:$0xff]  ;;  %v8457_v62 = vcombine.low %v4985_v56, %v4989_v58 }
 0xa14   :  { %v8459_v18 = vcombine.low %v4986_v59, %v4990_v61  ;;  %v8460_v63 = vcombine.high %v4986_v59, %v4990_v61  ;;  %v5025_v61 = vld [vmem:[#allocation20 + $0x500] sm:$0xff] }
 0xa16   :  { %6463 = vmatpush1.bf16.msra.mxu0 %v8401_v1  ;;  %6545 = vmatpush1.bf16.msra.mxu1 %v8403_v3  ;;  %v4997_v1 = vld [vmem:[#allocation20 + $0x420] sm:$0xff]  ;;  %v4994_v3 = vld [vmem:[#allocation20 + $0x408] sm:$0xff] }
 0xa17   :  { %6464 = vmatprep.subr.bf16.mxu0 %v8410_v4  ;;  %6546 = vmatprep.subr.bf16.mxu1 %v8412_v6  ;;  %v8466_v4 = vcombine.high %v4993_v0, %v4997_v1  ;;  %v4998_v6 = vld [vmem:[#allocation20 + $0x428] sm:$0xff]  ;;  %v8465_v55 = vcombine.low %v4993_v0, %v4997_v1 }
 0xa18   :  { %v8467_v8 = vcombine.low %v4994_v3, %v4998_v6  ;;  %v8468_v9 = vcombine.high %v4994_v3, %v4998_v6  ;;  %v5033_v6 = vld [vmem:[#allocation20 + $0x540] sm:$0xff] }
 0xa1a   :  { %6465 = vmatpush1.bf16.msra.mxu0 %v8409_v11  ;;  %6547 = vmatpush1.bf16.msra.mxu1 %v8411_v12  ;;  %v4438_v11 = vrot.slane %v10625_v10, %v10520_v7  ;;  %v4442_v12 = vrot.slane %v10625_v10, %v10523_v57 }
 0xa1b   :  { %6466 = vmatprep.subr.bf16.mxu0 %v8418_v13  ;;  %6548 = vmatprep.subr.bf16.mxu1 %v8420_v14  ;;  %v4450_v13 = vrot.slane %v10625_v10, %v10537_v5 }
 0xa1e   :  { %6467 = vmatpush1.bf16.msra.mxu0 %v8417_v21  ;;  %6549 = vmatpush1.bf16.msra.mxu1 %v8419_v22 }
 0xa1f   :  { %6468 = vmatprep.subr.bf16.mxu0 %v8426_v23  ;;  %6550 = vmatprep.subr.bf16.mxu1 %v8428_v19 }
 0xa22   :  { %6469 = vmatpush1.bf16.msra.mxu0 %v8425_v31  ;;  %6551 = vmatpush1.bf16.msra.mxu1 %v8427_v32  ;;  %v5001_v31 = vld [vmem:[#allocation20 + $0x440] sm:$0xff] }
 0xa23   :  { %6470 = vmatprep.subr.bf16.mxu0 %v8434_v33  ;;  %6552 = vmatprep.subr.bf16.mxu1 %v8436_v34  ;;  %v5005_v33 = vld [vmem:[#allocation20 + $0x460] sm:$0xff]  ;;  %v5002_v34 = vld [vmem:[#allocation20 + $0x448] sm:$0xff] }
 0xa24   :  { %v8473_v45 = vcombine.low %v5001_v31, %v5005_v33  ;;  %v8475_v47 = vcombine.low %v5002_v34, %v5006_v35 }
 0xa26   :  { %6471 = vmatpush1.bf16.msra.mxu0 %v8433_v39  ;;  %6553 = vmatpush1.bf16.msra.mxu1 %v8435_v40  ;;  %v8474_v39 = vcombine.high %v5001_v31, %v5005_v33  ;;  %v8476_v40 = vcombine.high %v5002_v34, %v5006_v35  ;;  %v5054_v31 = vld [vmem:[#allocation20 + $0x5e8] sm:$0xff] }
 0xa27   :  { %6472 = vmatprep.subr.bf16.mxu0 %v8442_v41  ;;  %6554 = vmatprep.subr.bf16.mxu1 %v8444_v42  ;;  %v5013_v41 = vld [vmem:[#allocation20 + $0x4a0] sm:$0xff]  ;;  %v5010_v42 = vld [vmem:[#allocation20 + $0x488] sm:$0xff] }
 0xa28   :  { %v8482_v48 = vcombine.high %v5009_v38, %v5013_v41  ;;  %v8481_v56 = vcombine.low %v5009_v38, %v5013_v41  ;;  %v5057_v38 = vld [vmem:[#allocation20 + $0x600] sm:$0xff]  ;;  %v5062_v41 = vld [vmem:[#allocation20 + $0x628] sm:$0xff] }
 0xa2a   :  { %6473 = vmatpush1.bf16.msra.mxu0 %v8441_v43  ;;  %6555 = vmatpush1.bf16.msra.mxu1 %v8443_v44  ;;  %v5014_v43 = vld [vmem:[#allocation20 + $0x4a8] sm:$0xff] }
 0xa2b   :  { %6474 = vmatprep.subr.bf16.mxu0 %v8450_v50  ;;  %6556 = vmatprep.subr.bf16.mxu1 %v8452_v25  ;;  %v8484_v50 = vcombine.high %v5010_v42, %v5014_v43  ;;  %v5022_v25 = vld [vmem:[#allocation20 + $0x4e8] sm:$0xff]  ;;  %v8483_v58 = vcombine.low %v5010_v42, %v5014_v43 }
 0xa2e   :  { %6475 = vmatpush1.bf16.msra.mxu0 %v8449_v53  ;;  %6557 = vmatpush1.bf16.msra.mxu1 %v8451_v54  ;;  %v5021_v53 = vld [vmem:[#allocation20 + $0x4e0] sm:$0xff]  ;;  %v5018_v54 = vld [vmem:[#allocation20 + $0x4c8] sm:$0xff] }
 0xa2f   :  { %6476 = vmatprep.subr.bf16.mxu0 %v8458_v60  ;;  %6558 = vmatprep.subr.bf16.mxu1 %v8460_v63  ;;  %v8490_v59 = vcombine.high %v5017_v52, %v5021_v53  ;;  %v8492_v60 = vcombine.high %v5018_v54, %v5022_v25  ;;  %v5030_v63 = vld [vmem:[#allocation20 + $0x528] sm:$0xff]  ;;  %v8489_v0 = vcombine.low %v5017_v52, %v5021_v53 }
 0xa30   :  { %v8491_v1 = vcombine.low %v5018_v54, %v5022_v25  ;;  %v5066_v52 = vld [vmem:[#allocation20 + $0x648] sm:$0xff] }
 0xa31   :  { %v5070_v53 = vld [vmem:[#allocation20 + $0x668] sm:$0xff] }
 0xa32   :  { %6477 = vmatpush1.bf16.msra.mxu0 %v8457_v62  ;;  %6559 = vmatpush1.bf16.msra.mxu1 %v8459_v18  ;;  %v5029_v62 = vld [vmem:[#allocation20 + $0x520] sm:$0xff]  ;;  %v5026_v18 = vld [vmem:[#allocation20 + $0x508] sm:$0xff] }
 0xa33   :  { %6487 = vmatprep.subr.bf16.mxu0 %v8466_v4  ;;  %6569 = vmatprep.subr.bf16.mxu1 %v8468_v9  ;;  %v8498_v3 = vcombine.high %v5025_v61, %v5029_v62  ;;  %v8500_v4 = vcombine.high %v5026_v18, %v5030_v63  ;;  %v5038_v9 = vld [vmem:[#allocation20 + $0x568] sm:$0xff] }
 0xac8   :  { %v4809_v14 = vpop.f32.mrb[12].mxu0  ;;  %v10633_v15 = vpop.f32.mrb[40].mxu1 }
 0xac9   :  { %v4810_v16 = vadd.f32 %v4809_v14, %v4438_v11  ;;  %v4811_v17 = vpop.f32.mrb[13].mxu0  ;;  %v4852_v20 = vpop.f32.mrb[41].mxu1  ;;  %v8497_v11 = vcombine.low %v5025_v61, %v5029_v62  ;;  %v5074_v61 = vld [vmem:[#allocation20 + $0x688] sm:$0xff] }
 0xaca   :  { %v4812_v21 = vadd.f32 %v4811_v17, %v4442_v12  ;;  %v4853_v22 = vadd.f32 %v4852_v20, %v4450_v13  ;;  %v4813_v23 = vpop.f32.mrb[14].mxu0  ;;  %v4854_v19 = vpop.f32.mrb[42].mxu1  ;;  %v8499_v12 = vcombine.low %v5026_v18, %v5030_v63  ;;  %v5045_v17 = vld [vmem:[#allocation20 + $0x5a0] sm:$0xff]  ;;  %v5042_v20 = vld [vmem:[#allocation20 + $0x588] sm:$0xff]  ;;  %v8539_v63 = vcombine.low %v5066_v52, %v5070_v53 }
 0xacb   :  { %v4857_v26 = vmax.f32 %v4810_v16, 0.0  ;;  %v4814_v28 = vpop.f32.mrb[15].mxu0  ;;  %v4855_v29 = vpop.f32.mrb[43].mxu1  ;;  %v5041_v16 = vld [vmem:[#allocation20 + $0x580] sm:$0xff]  ;;  %v5078_v62 = vld [vmem:[#allocation20 + $0x6a8] sm:$0xff] }
 0xacc   :  { %v4858_v30 = vmax.f32 %v4812_v21, 0.0  ;;  %v4860_v32 = vmax.f32 %v4853_v22, 0.0  ;;  %v5046_v21 = vld [vmem:[#allocation20 + $0x5a8] sm:$0xff]  ;;  %v8514_v19 = vcombine.high %v5041_v16, %v5045_v17  ;;  %v5049_v28 = vld [vmem:[#allocation20 + $0x5c0] sm:$0xff] }
 0xacd   :  { %v10637_v37 = vpack.c.bf16 %v4857_v26, %v4857_v26  ;;  %v8516_v26 = vcombine.high %v5042_v20, %v5046_v21  ;;  %v5053_v29 = vld [vmem:[#allocation20 + $0x5e0] sm:$0xff]  ;;  %v8515_v33 = vcombine.low %v5042_v20, %v5046_v21 }
 0xace   :  { %v10635_v36 = vpack.c.bf16 %v4858_v30, %v4858_v30  ;;  %v10641_v44 = vpack.c.bf16 %v4860_v32, %v4860_v32  ;;  %v5050_v30 = vld [vmem:[#allocation20 + $0x5c8] sm:$0xff]  ;;  %v8513_v32 = vcombine.low %v5041_v16, %v5045_v17  ;;  %v8522_v34 = vcombine.high %v5049_v28, %v5053_v29 }
 0xacf   :  { %v8524_v35 = vcombine.high %v5050_v30, %v5054_v31  ;;  %v8521_v42 = vcombine.low %v5049_v28, %v5053_v29  ;;  %v8523_v43 = vcombine.low %v5050_v30, %v5054_v31  ;;  %v5090_v16 = vld [vmem:[#allocation20 + $0x708] sm:$0xff] }
 0xad0   :  { %6478 = vmatprep.mubr.bf16.mxu0 %v10635_v36  ;;  %6560 = vmatprep.mubr.bf16.mxu1 %v10635_v36  ;;  %v5094_v17 = vld [vmem:[#allocation20 + $0x728] sm:$0xff] }
 0xad1   :  { %6479 = vmatmul.mubr.bf16.vlgmr.msra.gmra.mrb[16].mxu0 %v10637_v37  ;;  %6561 = vmatmul.mubr.bf16.vlgmr.msra.gmra.mrb[44].mxu1 %v10637_v37  ;;  %v5098_v28 = vld [vmem:[#allocation20 + $0x748] sm:$0xff]  ;;  %v8563_v31 = vcombine.low %v5090_v16, %v5094_v17 }
 0xad2   :  { %6488 = vmatpush1.bf16.msra.mxu0 %v8465_v55  ;;  %6570 = vmatpush1.bf16.msra.mxu1 %v8467_v8  ;;  %v5037_v55 = vld [vmem:[#allocation20 + $0x560] sm:$0xff]  ;;  %v5034_v8 = vld [vmem:[#allocation20 + $0x548] sm:$0xff] }
 0xad3   :  { %6519 = vmatprep.mubr.bf16.mxu0 %v10641_v44  ;;  %6601 = vmatprep.mubr.bf16.mxu1 %v10641_v44  ;;  %v8506_v13 = vcombine.high %v5033_v6, %v5037_v55  ;;  %v8508_v14 = vcombine.high %v5034_v8, %v5038_v9  ;;  %v8505_v22 = vcombine.low %v5033_v6, %v5037_v55  ;;  %v5082_v6 = vld [vmem:[#allocation20 + $0x6c8] sm:$0xff] }
 0xad4   :  { %6489 = vmatprep.subr.bf16.mxu0 %v8474_v39  ;;  %6571 = vmatprep.subr.bf16.mxu1 %v8476_v40  ;;  %v8507_v23 = vcombine.low %v5034_v8, %v5038_v9  ;;  %v5061_v39 = vld [vmem:[#allocation20 + $0x620] sm:$0xff]  ;;  %v5058_v40 = vld [vmem:[#allocation20 + $0x608] sm:$0xff]  ;;  %v8547_v9 = vcombine.low %v5074_v61, %v5078_v62 }
 0xad5   :  { %v8529_v54 = vcombine.low %v5057_v38, %v5061_v39  ;;  %v8531_v25 = vcombine.low %v5058_v40, %v5062_v41  ;;  %v5086_v55 = vld [vmem:[#allocation20 + $0x6e8] sm:$0xff] }
 0xad6   :  { %6490 = vmatpush1.bf16.msra.mxu0 %v8473_v45  ;;  %6572 = vmatpush1.bf16.msra.mxu1 %v8475_v47  ;;  %v8530_v45 = vcombine.high %v5057_v38, %v5061_v39  ;;  %v8532_v47 = vcombine.high %v5058_v40, %v5062_v41  ;;  %v8555_v21 = vcombine.low %v5082_v6, %v5086_v55  ;;  %v5102_v29 = vld [vmem:[#allocation20 + $0x768] sm:$0xff] }
 0xad7   :  { %6491 = vmatprep.subr.bf16.mxu0 %v8482_v48  ;;  %6573 = vmatprep.subr.bf16.mxu1 %v8484_v50  ;;  %v5065_v48 = vld [vmem:[#allocation20 + $0x640] sm:$0xff]  ;;  %v5106_v38 = vld [vmem:[#allocation20 + $0x788] sm:$0xff]  ;;  %v8571_v41 = vcombine.low %v5098_v28, %v5102_v29 }
 0xad8   :  { %v5069_v50 = vld [vmem:[#allocation20 + $0x660] sm:$0xff]  ;;  %v5110_v39 = vld [vmem:[#allocation20 + $0x7a8] sm:$0xff] }
 0xad9   :  { %v8537_v18 = vcombine.low %v5065_v48, %v5069_v50 }
 0xada   :  { %6492 = vmatpush1.bf16.msra.mxu0 %v8481_v56  ;;  %6574 = vmatpush1.bf16.msra.mxu1 %v8483_v58  ;;  %v8538_v56 = vcombine.high %v5065_v48, %v5069_v50  ;;  %v8540_v58 = vcombine.high %v5066_v52, %v5070_v53  ;;  %v5117_v48 = vld [vmem:[#allocation20 + $0x7e0] sm:$0xff]  ;;  %v5114_v50 = vld [vmem:[#allocation20 + $0x7c8] sm:$0xff] }
 0xadb   :  { %6493 = vmatprep.subr.bf16.mxu0 %v8490_v59  ;;  %6575 = vmatprep.subr.bf16.mxu1 %v8492_v60  ;;  %v5073_v59 = vld [vmem:[#allocation20 + $0x680] sm:$0xff]  ;;  %v5118_v52 = vld [vmem:[#allocation20 + $0x7e8] sm:$0xff] }
 0xadc   :  { %v5077_v60 = vld [vmem:[#allocation20 + $0x6a0] sm:$0xff] }
 0xadd   :  { %v8545_v8 = vcombine.low %v5073_v59, %v5077_v60 }
 0xade   :  { %6494 = vmatpush1.bf16.msra.mxu0 %v8489_v0  ;;  %6576 = vmatpush1.bf16.msra.mxu1 %v8491_v1  ;;  %v8546_v0 = vcombine.high %v5073_v59, %v5077_v60  ;;  %v8548_v1 = vcombine.high %v5074_v61, %v5078_v62  ;;  %v4867_v59 = vld [vmem:[#allocation20 + $0x10] sm:$0xff]  ;;  %v4868_v60 = vld [vmem:[#allocation20 + $0x18] sm:$0xff] }
 0xadf   :  { %6495 = vmatprep.subr.bf16.mxu0 %v8498_v3  ;;  %6577 = vmatprep.subr.bf16.mxu1 %v8500_v4  ;;  %v5081_v3 = vld [vmem:[#allocation20 + $0x6c0] sm:$0xff]  ;;  %v4872_v61 = vld [vmem:[#allocation20 + $0x38] sm:$0xff] }
 0xae0   :  { %v5085_v4 = vld [vmem:[#allocation20 + $0x6e0] sm:$0xff] }
 0xae1   :  { %v8553_v20 = vcombine.low %v5081_v3, %v5085_v4 }
 0xae2   :  { %6496 = vmatpush1.bf16.msra.mxu0 %v8497_v11  ;;  %6578 = vmatpush1.bf16.msra.mxu1 %v8499_v12  ;;  %v8554_v11 = vcombine.high %v5081_v3, %v5085_v4  ;;  %v8556_v12 = vcombine.high %v5082_v6, %v5086_v55  ;;  %v4875_v3 = vld [vmem:[#allocation20 + $0x50] sm:$0xff]  ;;  %v4880_v6 = vld [vmem:[#allocation20 + $0x78] sm:$0xff] }
 0xae3   :  { %6497 = vmatprep.subr.bf16.mxu0 %v8506_v13  ;;  %6579 = vmatprep.subr.bf16.mxu1 %v8508_v14  ;;  %v5089_v13 = vld [vmem:[#allocation20 + $0x700] sm:$0xff]  ;;  %v4879_v4 = vld [vmem:[#allocation20 + $0x70] sm:$0xff] }
 0xae4   :  { %v5093_v14 = vld [vmem:[#allocation20 + $0x720] sm:$0xff] }
 0xae5   :  { %v8561_v30 = vcombine.low %v5089_v13, %v5093_v14 }
 0xae6   :  { %6498 = vmatpush1.bf16.msra.mxu0 %v8505_v22  ;;  %6580 = vmatpush1.bf16.msra.mxu1 %v8507_v23  ;;  %v8562_v22 = vcombine.high %v5089_v13, %v5093_v14  ;;  %v8564_v23 = vcombine.high %v5090_v16, %v5094_v17  ;;  %v4883_v13 = vld [vmem:[#allocation20 + $0x90] sm:$0xff]  ;;  %v4884_v16 = vld [vmem:[#allocation20 + $0x98] sm:$0xff] }
 0xae7   :  { %6499 = vmatprep.subr.bf16.mxu0 %v8514_v19  ;;  %6581 = vmatprep.subr.bf16.mxu1 %v8516_v26  ;;  %v5097_v19 = vld [vmem:[#allocation20 + $0x740] sm:$0xff]  ;;  %v4887_v14 = vld [vmem:[#allocation20 + $0xb0] sm:$0xff]  ;;  %v4888_v17 = vld [vmem:[#allocation20 + $0xb8] sm:$0xff] }
 0xae8   :  { %v5101_v26 = vld [vmem:[#allocation20 + $0x760] sm:$0xff] }
 0xae9   :  { %v8569_v40 = vcombine.low %v5097_v19, %v5101_v26 }
 0xaea   :  { %6500 = vmatpush1.bf16.msra.mxu0 %v8513_v32  ;;  %6582 = vmatpush1.bf16.msra.mxu1 %v8515_v33  ;;  %v8570_v32 = vcombine.high %v5097_v19, %v5101_v26  ;;  %v8572_v33 = vcombine.high %v5098_v28, %v5102_v29  ;;  %v4891_v19 = vld [vmem:[#allocation20 + $0xd0] sm:$0xff]  ;;  %v4892_v28 = vld [vmem:[#allocation20 + $0xd8] sm:$0xff] }
 0xaeb   :  { %6501 = vmatprep.subr.bf16.mxu0 %v8522_v34  ;;  %6583 = vmatprep.subr.bf16.mxu1 %v8524_v35  ;;  %v5105_v34 = vld [vmem:[#allocation20 + $0x780] sm:$0xff]  ;;  %v4895_v26 = vld [vmem:[#allocation20 + $0xf0] sm:$0xff]  ;;  %v4896_v29 = vld [vmem:[#allocation20 + $0xf8] sm:$0xff] }
 0xaec   :  { %v5109_v35 = vld [vmem:[#allocation20 + $0x7a0] sm:$0xff] }
 0xaed   :  { %v8577_v53 = vcombine.low %v5105_v34, %v5109_v35 }
 0xaee   :  { %6502 = vmatpush1.bf16.msra.mxu0 %v8521_v42  ;;  %6584 = vmatpush1.bf16.msra.mxu1 %v8523_v43  ;;  %v4446_v42 = vrot.slane %v10625_v10, %v10534_v2  ;;  %v8578_v43 = vcombine.high %v5105_v34, %v5109_v35  ;;  %v4871_v10 = vld [vmem:[#allocation20 + $0x30] sm:$0xff] }
 0xaef   :  { %6503 = vmatprep.subr.bf16.mxu0 %v8530_v45  ;;  %6585 = vmatprep.subr.bf16.mxu1 %v8532_v47  ;;  %v8580_v45 = vcombine.high %v5106_v38, %v5110_v39  ;;  %v5113_v47 = vld [vmem:[#allocation20 + $0x7c0] sm:$0xff]  ;;  %v8341_v55 = vcombine.low %v4867_v59, %v4871_v10  ;;  %v4899_v34 = vld [vmem:[#allocation20 + $0x110] sm:$0xff] }
 0xaf0   :  { %v8585_v62 = vcombine.low %v5113_v47, %v5117_v48  ;;  %v4903_v35 = vld [vmem:[#allocation20 + $0x130] sm:$0xff] }
 0xaf2   :  { %6504 = vmatpush1.bf16.msra.mxu0 %v8529_v54  ;;  %6586 = vmatpush1.bf16.msra.mxu1 %v8531_v25  ;;  %v8579_v54 = vcombine.low %v5106_v38, %v5110_v39  ;;  %v4851_v25 = vadd.f32 %v10633_v15, %v4446_v42  ;;  %v4876_v15 = vld [vmem:[#allocation20 + $0x58] sm:$0xff]  ;;  %v8365_v39 = vcombine.low %v4891_v19, %v4895_v26 }
 0xaf3   :  { %6505 = vmatprep.subr.bf16.mxu0 %v8538_v56  ;;  %6587 = vmatprep.subr.bf16.mxu1 %v8540_v58  ;;  %v8586_v56 = vcombine.high %v5113_v47, %v5117_v48  ;;  %v8588_v58 = vcombine.high %v5114_v50, %v5118_v52  ;;  %v4904_v38 = vld [vmem:[#allocation20 + $0x138] sm:$0xff] }
 0xaf4   :  { %v4908_v47 = vld [vmem:[#allocation20 + $0x158] sm:$0xff] }
 0xaf5   :  { %v4912_v48 = vld [vmem:[#allocation20 + $0x178] sm:$0xff] }
 0xaf6   :  { %6506 = vmatpush1.bf16.msra.mxu0 %v8537_v18  ;;  %6588 = vmatpush1.bf16.msra.mxu1 %v8539_v63  ;;  %v8587_v18 = vcombine.low %v5114_v50, %v5118_v52  ;;  %v4859_v63 = vmax.f32 %v4851_v25, 0.0  ;;  %v8373_v50 = vcombine.low %v4899_v34, %v4903_v35  ;;  %v4915_v25 = vld [vmem:[#allocation20 + $0x190] sm:$0xff] }
 0xaf7   :  { %6507 = vmatprep.subr.bf16.mxu0 %v8546_v0  ;;  %6589 = vmatprep.subr.bf16.mxu1 %v8548_v1  ;;  %v8342_v0 = vcombine.high %v4867_v59, %v4871_v10  ;;  %v8344_v1 = vcombine.high %v4868_v60, %v4872_v61  ;;  %v4920_v59 = vld [vmem:[#allocation20 + $0x1b8] sm:$0xff] }
 0xafa   :  { %6508 = vmatpush1.bf16.msra.mxu0 %v8545_v8  ;;  %6590 = vmatpush1.bf16.msra.mxu1 %v8547_v9  ;;  %v10650_v8 = vpack.c.bf16 %v4859_v63, %v4859_v63  ;;  %v8343_v9 = vcombine.low %v4868_v60, %v4872_v61  ;;  %v8383_v60 = vcombine.low %v4908_v47, %v4912_v48  ;;  %v4927_v63 = vld [vmem:[#allocation20 + $0x1f0] sm:$0xff] }
 0xafb   :  { %6509 = vmatprep.subr.bf16.mxu0 %v8554_v11  ;;  %6591 = vmatprep.subr.bf16.mxu1 %v8556_v12  ;;  %v8350_v11 = vcombine.high %v4875_v3, %v4879_v4  ;;  %v8352_v12 = vcombine.high %v4876_v15, %v4880_v6 }
 0xafe   :  { %6510 = vmatpush1.bf16.msra.mxu0 %v8553_v20  ;;  %6592 = vmatpush1.bf16.msra.mxu1 %v8555_v21  ;;  %v8349_v20 = vcombine.low %v4875_v3, %v4879_v4  ;;  %v8351_v21 = vcombine.low %v4876_v15, %v4880_v6 }
 0xaff   :  { %6511 = vmatprep.subr.bf16.mxu0 %v8562_v22  ;;  %6593 = vmatprep.subr.bf16.mxu1 %v8564_v23  ;;  %v8358_v22 = vcombine.high %v4883_v13, %v4887_v14  ;;  %v8360_v23 = vcombine.high %v4884_v16, %v4888_v17 }
 0xb02   :  { %6512 = vmatpush1.bf16.msra.mxu0 %v8561_v30  ;;  %6594 = vmatpush1.bf16.msra.mxu1 %v8563_v31  ;;  %v8357_v30 = vcombine.low %v4883_v13, %v4887_v14  ;;  %v8359_v31 = vcombine.low %v4884_v16, %v4888_v17 }
 0xb03   :  { %6513 = vmatprep.subr.bf16.mxu0 %v8570_v32  ;;  %6595 = vmatprep.subr.bf16.mxu1 %v8572_v33  ;;  %v8366_v32 = vcombine.high %v4891_v19, %v4895_v26  ;;  %v8368_v33 = vcombine.high %v4892_v28, %v4896_v29 }
 0xb06   :  { %6514 = vmatpush1.bf16.msra.mxu0 %v8569_v40  ;;  %6596 = vmatpush1.bf16.msra.mxu1 %v8571_v41  ;;  %v8367_v40 = vcombine.low %v4892_v28, %v4896_v29  ;;  %v8374_v41 = vcombine.high %v4899_v34, %v4903_v35 }
 0xb07   :  { %6515 = vmatprep.subr.bf16.mxu0 %v8578_v43  ;;  %6597 = vmatprep.subr.bf16.mxu1 %v8580_v45  ;;  %v4907_v43 = vld [vmem:[#allocation20 + $0x150] sm:$0xff] }
 0xb08   :  { %v4911_v45 = vld [vmem:[#allocation20 + $0x170] sm:$0xff] }
 0xb09   :  { %v8381_v10 = vcombine.low %v4907_v43, %v4911_v45 }
 0xb0a   :  { %6516 = vmatpush1.bf16.msra.mxu0 %v8577_v53  ;;  %6598 = vmatpush1.bf16.msra.mxu1 %v8579_v54  ;;  %v8382_v53 = vcombine.high %v4907_v43, %v4911_v45  ;;  %v8384_v54 = vcombine.high %v4908_v47, %v4912_v48 }
 0xb0b   :  { %6517 = vmatprep.subr.bf16.mxu0 %v8586_v56  ;;  %6599 = vmatprep.subr.bf16.mxu1 %v8588_v58  ;;  %v4919_v56 = vld [vmem:[#allocation20 + $0x1b0] sm:$0xff]  ;;  %v4916_v58 = vld [vmem:[#allocation20 + $0x198] sm:$0xff] }
 0xb0c   :  { %v8390_v61 = vcombine.high %v4915_v25, %v4919_v56  ;;  %v8389_v3 = vcombine.low %v4915_v25, %v4919_v56  ;;  %v8391_v4 = vcombine.low %v4916_v58, %v4920_v59 }
 0xb0e   :  { %6518 = vmatpush1.bf16.msra.mxu0 %v8585_v62  ;;  %6600 = vmatpush1.bf16.msra.mxu1 %v8587_v18  ;;  %v8392_v62 = vcombine.high %v4916_v58, %v4920_v59  ;;  %v4923_v18 = vld [vmem:[#allocation20 + $0x1d0] sm:$0xff] }
 0xb0f   :  { %6610 = vmatprep.subr.bf16.mxu0 %v8342_v0  ;;  %6692 = vmatprep.subr.bf16.mxu1 %v8344_v1  ;;  %v4924_v0 = vld [vmem:[#allocation20 + $0x1d8] sm:$0xff]  ;;  %v8398_v15 = vcombine.high %v4923_v18, %v4927_v63  ;;  %v8397_v13 = vcombine.low %v4923_v18, %v4927_v63 }
 0xb10   :  { %v4928_v1 = vld [vmem:[#allocation20 + $0x1f8] sm:$0xff] }
 0xb11   :  { %6520 = vmatmul.mubr.bf16.vlgmr.msra.gmra.mrb[16].mxu0 %v10650_v8  ;;  %6602 = vmatmul.mubr.bf16.vlgmr.msra.gmra.mrb[44].mxu1 %v10650_v8  ;;  %v8400_v6 = vcombine.high %v4924_v0, %v4928_v1  ;;  %v8399_v14 = vcombine.low %v4924_v0, %v4928_v1 }
 0xb12   :  { %6611 = vmatpush1.bf16.msra.mxu0 %v8341_v55  ;;  %6642 = vmatprep.mubr.bf16.mxu0 %v10635_v36  ;;  %v4931_v55 = vld [vmem:[#allocation20 + $0x210] sm:$0xff] }
 0xb13   :  { %6693 = vmatpush1.bf16.msra.mxu1 %v8343_v9  ;;  %6724 = vmatprep.mubr.bf16.mxu1 %v10635_v36  ;;  %v4900_v36 = vld [vmem:[#allocation20 + $0x118] sm:$0xff]  ;;  %v4935_v9 = vld [vmem:[#allocation20 + $0x230] sm:$0xff] }
 0xb14   :  { %6612 = vmatprep.subr.bf16.mxu0 %v8350_v11  ;;  %6694 = vmatprep.subr.bf16.mxu1 %v8352_v12  ;;  %v8376_v42 = vcombine.high %v4900_v36, %v4904_v38  ;;  %v8375_v52 = vcombine.low %v4900_v36, %v4904_v38  ;;  %v4932_v11 = vld [vmem:[#allocation20 + $0x218] sm:$0xff]  ;;  %v8406_v16 = vcombine.high %v4931_v55, %v4935_v9 }
 0xb15   :  { %v4936_v12 = vld [vmem:[#allocation20 + $0x238] sm:$0xff]  ;;  %v8405_v19 = vcombine.low %v4931_v55, %v4935_v9 }
 0xb16   :  { %6613 = vmatpush1.bf16.msra.mxu0 %v8349_v20  ;;  %v8408_v17 = vcombine.high %v4932_v11, %v4936_v12  ;;  %v4939_v20 = vld [vmem:[#allocation20 + $0x250] sm:$0xff]  ;;  %v8407_v26 = vcombine.low %v4932_v11, %v4936_v12 }
 0xb17   :  { %6695 = vmatpush1.bf16.msra.mxu1 %v8351_v21  ;;  %6614 = vmatprep.subr.bf16.mxu0 %v8358_v22  ;;  %v4943_v21 = vld [vmem:[#allocation20 + $0x270] sm:$0xff]  ;;  %v4940_v22 = vld [vmem:[#allocation20 + $0x258] sm:$0xff] }
 0xb18   :  { %6696 = vmatprep.subr.bf16.mxu1 %v8360_v23  ;;  %v4944_v23 = vld [vmem:[#allocation20 + $0x278] sm:$0xff]  ;;  %v8414_v28 = vcombine.high %v4939_v20, %v4943_v21  ;;  %v8413_v34 = vcombine.low %v4939_v20, %v4943_v21 }
 0xb19   :  { %v8416_v29 = vcombine.high %v4940_v22, %v4944_v23  ;;  %v8415_v35 = vcombine.low %v4940_v22, %v4944_v23 }
 0xb1a   :  { %6615 = vmatpush1.bf16.msra.mxu0 %v8357_v30  ;;  %v4947_v30 = vld [vmem:[#allocation20 + $0x290] sm:$0xff] }
 0xb1b   :  { %6697 = vmatpush1.bf16.msra.mxu1 %v8359_v31  ;;  %6616 = vmatprep.subr.bf16.mxu0 %v8366_v32  ;;  %v4951_v31 = vld [vmem:[#allocation20 + $0x2b0] sm:$0xff]  ;;  %v4948_v32 = vld [vmem:[#allocation20 + $0x298] sm:$0xff] }
 0xb1c   :  { %6698 = vmatprep.subr.bf16.mxu1 %v8368_v33  ;;  %v4952_v33 = vld [vmem:[#allocation20 + $0x2b8] sm:$0xff]  ;;  %v8422_v36 = vcombine.high %v4947_v30, %v4951_v31  ;;  %v8421_v43 = vcombine.low %v4947_v30, %v4951_v31 }
 0xb1d   :  { %v8424_v38 = vcombine.high %v4948_v32, %v4952_v33  ;;  %v8423_v45 = vcombine.low %v4948_v32, %v4952_v33 }
 0xb1e   :  { %6617 = vmatpush1.bf16.msra.mxu0 %v8365_v39  ;;  %v4955_v39 = vld [vmem:[#allocation20 + $0x2d0] sm:$0xff] }
 0xb1f   :  { %6699 = vmatpush1.bf16.msra.mxu1 %v8367_v40  ;;  %6618 = vmatprep.subr.bf16.mxu0 %v8374_v41  ;;  %v4959_v40 = vld [vmem:[#allocation20 + $0x2f0] sm:$0xff]  ;;  %v4956_v41 = vld [vmem:[#allocation20 + $0x2d8] sm:$0xff] }
 0xb20   :  { %6700 = vmatprep.subr.bf16.mxu1 %v8376_v42  ;;  %v4960_v42 = vld [vmem:[#allocation20 + $0x2f8] sm:$0xff]  ;;  %v8430_v47 = vcombine.high %v4955_v39, %v4959_v40  ;;  %v8429_v25 = vcombine.low %v4955_v39, %v4959_v40 }
 0xb21   :  { %v8432_v48 = vcombine.high %v4956_v41, %v4960_v42  ;;  %v8431_v56 = vcombine.low %v4956_v41, %v4960_v42  ;;  %v5008_v39 = vld [vmem:[#allocation20 + $0x478] sm:$0xff]  ;;  %v5011_v42 = vld [vmem:[#allocation20 + $0x490] sm:$0xff] }
 0xb22   :  { %6619 = vmatpush1.bf16.msra.mxu0 %v8373_v50  ;;  %v4963_v50 = vld [vmem:[#allocation20 + $0x310] sm:$0xff] }
 0xb23   :  { %6701 = vmatpush1.bf16.msra.mxu1 %v8375_v52  ;;  %6620 = vmatprep.subr.bf16.mxu0 %v8382_v53  ;;  %v4967_v52 = vld [vmem:[#allocation20 + $0x330] sm:$0xff]  ;;  %v4964_v53 = vld [vmem:[#allocation20 + $0x318] sm:$0xff] }
 0xb24   :  { %6702 = vmatprep.subr.bf16.mxu1 %v8384_v54  ;;  %v4968_v54 = vld [vmem:[#allocation20 + $0x338] sm:$0xff]  ;;  %v8438_v58 = vcombine.high %v4963_v50, %v4967_v52  ;;  %v8437_v18 = vcombine.low %v4963_v50, %v4967_v52 }
 0xb25   :  { %v8440_v59 = vcombine.high %v4964_v53, %v4968_v54  ;;  %v8439_v63 = vcombine.low %v4964_v53, %v4968_v54 }
 0xb26   :  { %6621 = vmatpush1.bf16.msra.mxu0 %v8381_v10  ;;  %v4971_v10 = vld [vmem:[#allocation20 + $0x350] sm:$0xff] }
 0xb27   :  { %6703 = vmatpush1.bf16.msra.mxu1 %v8383_v60  ;;  %6622 = vmatprep.subr.bf16.mxu0 %v8390_v61  ;;  %v4975_v60 = vld [vmem:[#allocation20 + $0x370] sm:$0xff]  ;;  %v4972_v61 = vld [vmem:[#allocation20 + $0x358] sm:$0xff] }
 0xb28   :  { %6704 = vmatprep.subr.bf16.mxu1 %v8392_v62  ;;  %v4976_v62 = vld [vmem:[#allocation20 + $0x378] sm:$0xff]  ;;  %v8446_v0 = vcombine.high %v4971_v10, %v4975_v60  ;;  %v8445_v55 = vcombine.low %v4971_v10, %v4975_v60 }
 0xb29   :  { %v8448_v1 = vcombine.high %v4972_v61, %v4976_v62  ;;  %v8447_v9 = vcombine.low %v4972_v61, %v4976_v62  ;;  %v5027_v62 = vld [vmem:[#allocation20 + $0x510] sm:$0xff] }
 0xb2a   :  { %6623 = vmatpush1.bf16.msra.mxu0 %v8389_v3  ;;  %v4979_v3 = vld [vmem:[#allocation20 + $0x390] sm:$0xff] }
 0xb2b   :  { %6705 = vmatpush1.bf16.msra.mxu1 %v8391_v4  ;;  %6624 = vmatprep.subr.bf16.mxu0 %v8398_v15  ;;  %v4983_v4 = vld [vmem:[#allocation20 + $0x3b0] sm:$0xff]  ;;  %v4980_v15 = vld [vmem:[#allocation20 + $0x398] sm:$0xff] }
 0xb2c   :  { %6706 = vmatprep.subr.bf16.mxu1 %v8400_v6  ;;  %v4984_v6 = vld [vmem:[#allocation20 + $0x3b8] sm:$0xff]  ;;  %v8454_v11 = vcombine.high %v4979_v3, %v4983_v4  ;;  %v8453_v20 = vcombine.low %v4979_v3, %v4983_v4 }
 0xb2d   :  { %v8456_v12 = vcombine.high %v4980_v15, %v4984_v6  ;;  %v8455_v21 = vcombine.low %v4980_v15, %v4984_v6  ;;  %v5035_v15 = vld [vmem:[#allocation20 + $0x550] sm:$0xff] }
 0xb2e   :  { %6625 = vmatpush1.bf16.msra.mxu0 %v8397_v13  ;;  %v4987_v13 = vld [vmem:[#allocation20 + $0x3d0] sm:$0xff] }
 0xb2f   :  { %6707 = vmatpush1.bf16.msra.mxu1 %v8399_v14  ;;  %6626 = vmatprep.subr.bf16.mxu0 %v8406_v16  ;;  %v4991_v14 = vld [vmem:[#allocation20 + $0x3f0] sm:$0xff]  ;;  %v4988_v16 = vld [vmem:[#allocation20 + $0x3d8] sm:$0xff] }
 0xb30   :  { %6708 = vmatprep.subr.bf16.mxu1 %v8408_v17  ;;  %v4992_v17 = vld [vmem:[#allocation20 + $0x3f8] sm:$0xff]  ;;  %v8462_v22 = vcombine.high %v4987_v13, %v4991_v14  ;;  %v8461_v30 = vcombine.low %v4987_v13, %v4991_v14  ;;  %v5039_v6 = vld [vmem:[#allocation20 + $0x570] sm:$0xff] }
 0xb31   :  { %v8464_v23 = vcombine.high %v4988_v16, %v4992_v17  ;;  %v8463_v31 = vcombine.low %v4988_v16, %v4992_v17  ;;  %v8510_v13 = vcombine.high %v5035_v15, %v5039_v6  ;;  %v5043_v16 = vld [vmem:[#allocation20 + $0x590] sm:$0xff] }
 0xb32   :  { %6627 = vmatpush1.bf16.msra.mxu0 %v8405_v19  ;;  %v4995_v19 = vld [vmem:[#allocation20 + $0x410] sm:$0xff] }
 0xb33   :  { %6709 = vmatpush1.bf16.msra.mxu1 %v8407_v26  ;;  %6628 = vmatprep.subr.bf16.mxu0 %v8414_v28  ;;  %v4999_v26 = vld [vmem:[#allocation20 + $0x430] sm:$0xff]  ;;  %v4996_v28 = vld [vmem:[#allocation20 + $0x418] sm:$0xff] }
 0xb34   :  { %6710 = vmatprep.subr.bf16.mxu1 %v8416_v29  ;;  %v5000_v29 = vld [vmem:[#allocation20 + $0x438] sm:$0xff]  ;;  %v8470_v32 = vcombine.high %v4995_v19, %v4999_v26  ;;  %v5047_v17 = vld [vmem:[#allocation20 + $0x5b0] sm:$0xff] }
 0xb35   :  { %v8472_v33 = vcombine.high %v4996_v28, %v5000_v29  ;;  %v8471_v40 = vcombine.low %v4996_v28, %v5000_v29  ;;  %v5051_v28 = vld [vmem:[#allocation20 + $0x5d0] sm:$0xff] }
 0xb36   :  { %6629 = vmatpush1.bf16.msra.mxu0 %v8413_v34  ;;  %v5003_v34 = vld [vmem:[#allocation20 + $0x450] sm:$0xff] }
 0xb37   :  { %6711 = vmatpush1.bf16.msra.mxu1 %v8415_v35  ;;  %6630 = vmatprep.subr.bf16.mxu0 %v8422_v36  ;;  %v5007_v35 = vld [vmem:[#allocation20 + $0x470] sm:$0xff]  ;;  %v8469_v36 = vcombine.low %v4995_v19, %v4999_v26  ;;  %v8518_v19 = vcombine.high %v5043_v16, %v5047_v17 }
 0xb38   :  { %6712 = vmatprep.subr.bf16.mxu1 %v8424_v38  ;;  %v5004_v38 = vld [vmem:[#allocation20 + $0x458] sm:$0xff]  ;;  %v8478_v41 = vcombine.high %v5003_v34, %v5007_v35  ;;  %v8477_v50 = vcombine.low %v5003_v34, %v5007_v35  ;;  %v5055_v29 = vld [vmem:[#allocation20 + $0x5f0] sm:$0xff] }
 0xb39   :  { %v8479_v52 = vcombine.low %v5004_v38, %v5008_v39  ;;  %v8526_v34 = vcombine.high %v5051_v28, %v5055_v29 }
 0xb3a   :  { %6631 = vmatpush1.bf16.msra.mxu0 %v8421_v43  ;;  %v5015_v43 = vld [vmem:[#allocation20 + $0x4b0] sm:$0xff] }
 0xb3b   :  { %6713 = vmatpush1.bf16.msra.mxu1 %v8423_v45  ;;  %6632 = vmatprep.subr.bf16.mxu0 %v8430_v47  ;;  %v8480_v45 = vcombine.high %v5004_v38, %v5008_v39  ;;  %v5012_v47 = vld [vmem:[#allocation20 + $0x498] sm:$0xff]  ;;  %v8486_v53 = vcombine.high %v5011_v42, %v5015_v43  ;;  %v8485_v10 = vcombine.low %v5011_v42, %v5015_v43  ;;  %v5063_v38 = vld [vmem:[#allocation20 + $0x630] sm:$0xff] }
 0xb3c   :  { %6714 = vmatprep.subr.bf16.mxu1 %v8432_v48  ;;  %v5016_v48 = vld [vmem:[#allocation20 + $0x4b8] sm:$0xff] }
 0xb3d   :  { %v8488_v54 = vcombine.high %v5012_v47, %v5016_v48  ;;  %v5060_v39 = vld [vmem:[#allocation20 + $0x618] sm:$0xff] }
 0xb3e   :  { %6633 = vmatpush1.bf16.msra.mxu0 %v8429_v25  ;;  %v5019_v25 = vld [vmem:[#allocation20 + $0x4d0] sm:$0xff] }
 0xb3f   :  { %6715 = vmatpush1.bf16.msra.mxu1 %v8431_v56  ;;  %6634 = vmatprep.subr.bf16.mxu0 %v8438_v58  ;;  %v5023_v56 = vld [vmem:[#allocation20 + $0x4f0] sm:$0xff]  ;;  %v5020_v58 = vld [vmem:[#allocation20 + $0x4d8] sm:$0xff] }
 0xb40   :  { %6716 = vmatprep.subr.bf16.mxu1 %v8440_v59  ;;  %v5024_v59 = vld [vmem:[#allocation20 + $0x4f8] sm:$0xff]  ;;  %v8494_v60 = vcombine.high %v5019_v25, %v5023_v56 }
 0xb41   :  { %v8496_v61 = vcombine.high %v5020_v58, %v5024_v59 }
 0xb42   :  { %6635 = vmatpush1.bf16.msra.mxu0 %v8437_v18  ;;  %v5031_v18 = vld [vmem:[#allocation20 + $0x530] sm:$0xff] }
 0xb43   :  { %6717 = vmatpush1.bf16.msra.mxu1 %v8439_v63  ;;  %6636 = vmatprep.subr.bf16.mxu0 %v8446_v0  ;;  %v5028_v63 = vld [vmem:[#allocation20 + $0x518] sm:$0xff]  ;;  %v8502_v3 = vcombine.high %v5027_v62, %v5031_v18 }
 0xb44   :  { %6718 = vmatprep.subr.bf16.mxu1 %v8448_v1  ;;  %v5032_v0 = vld [vmem:[#allocation20 + $0x538] sm:$0xff]  ;;  %v8495_v1 = vcombine.low %v5020_v58, %v5024_v59  ;;  %v5075_v58 = vld [vmem:[#allocation20 + $0x690] sm:$0xff] }
 0xb45   :  { %v8504_v4 = vcombine.high %v5028_v63, %v5032_v0  ;;  %v5079_v59 = vld [vmem:[#allocation20 + $0x6b0] sm:$0xff] }
 0xb46   :  { %6637 = vmatpush1.bf16.msra.mxu0 %v8445_v55  ;;  %v5036_v55 = vld [vmem:[#allocation20 + $0x558] sm:$0xff] }
 0xb47   :  { %6719 = vmatpush1.bf16.msra.mxu1 %v8447_v9  ;;  %6638 = vmatprep.subr.bf16.mxu0 %v8454_v11  ;;  %v5040_v9 = vld [vmem:[#allocation20 + $0x578] sm:$0xff]  ;;  %v8501_v11 = vcombine.low %v5027_v62, %v5031_v18  ;;  %v8550_v62 = vcombine.high %v5075_v58, %v5079_v59 }
 0xb48   :  { %6720 = vmatprep.subr.bf16.mxu1 %v8456_v12  ;;  %v8503_v12 = vcombine.low %v5028_v63, %v5032_v0  ;;  %v8512_v14 = vcombine.high %v5036_v55, %v5040_v9  ;;  %v5083_v63 = vld [vmem:[#allocation20 + $0x6d0] sm:$0xff] }
 0xb49   :  { %v5087_v0 = vld [vmem:[#allocation20 + $0x6f0] sm:$0xff] }
 0xb4a   :  { %6639 = vmatpush1.bf16.msra.mxu0 %v8453_v20  ;;  %v5044_v20 = vld [vmem:[#allocation20 + $0x598] sm:$0xff] }
 0xb4b   :  { %6721 = vmatpush1.bf16.msra.mxu1 %v8455_v21  ;;  %6640 = vmatprep.subr.bf16.mxu0 %v8462_v22  ;;  %v5048_v21 = vld [vmem:[#allocation20 + $0x5b8] sm:$0xff]  ;;  %v8509_v22 = vcombine.low %v5035_v15, %v5039_v6  ;;  %v8558_v15 = vcombine.high %v5083_v63, %v5087_v0 }
 0xb4c   :  { %6722 = vmatprep.subr.bf16.mxu1 %v8464_v23  ;;  %v8511_v23 = vcombine.low %v5036_v55, %v5040_v9  ;;  %v8520_v26 = vcombine.high %v5044_v20, %v5048_v21  ;;  %v5091_v55 = vld [vmem:[#allocation20 + $0x710] sm:$0xff] }
 0xb4d   :  { %v5095_v9 = vld [vmem:[#allocation20 + $0x730] sm:$0xff] }
 0xb4e   :  { %6641 = vmatpush1.bf16.msra.mxu0 %v8461_v30  ;;  %v5052_v30 = vld [vmem:[#allocation20 + $0x5d8] sm:$0xff] }
 0xb4f   :  { %6723 = vmatpush1.bf16.msra.mxu1 %v8463_v31  ;;  %6651 = vmatprep.subr.bf16.mxu0 %v8470_v32  ;;  %v5056_v31 = vld [vmem:[#allocation20 + $0x5f8] sm:$0xff]  ;;  %v8517_v32 = vcombine.low %v5043_v16, %v5047_v17  ;;  %v8566_v16 = vcombine.high %v5091_v55, %v5095_v9 }
 0xb50   :  { %6733 = vmatprep.subr.bf16.mxu1 %v8472_v33  ;;  %v8519_v33 = vcombine.low %v5044_v20, %v5048_v21  ;;  %v8528_v35 = vcombine.high %v5052_v30, %v5056_v31  ;;  %v8527_v42 = vcombine.low %v5052_v30, %v5056_v31  ;;  %v5099_v20 = vld [vmem:[#allocation20 + $0x750] sm:$0xff] }
 0xb51   :  { %6643 = vmatmul.mubr.bf16.vlgmr.msra.gmra.mrb[20].mxu0 %v10637_v37  ;;  %v5103_v21 = vld [vmem:[#allocation20 + $0x770] sm:$0xff] }
 0xb52   :  { %6725 = vmatmul.mubr.bf16.vlgmr.msra.gmra.mrb[48].mxu1 %v10637_v37  ;;  %6652 = vmatpush1.bf16.msra.mxu0 %v8469_v36  ;;  %v8487_v37 = vcombine.low %v5012_v47, %v5016_v48  ;;  %v5059_v36 = vld [vmem:[#allocation20 + $0x610] sm:$0xff] }
 0xb53   :  { %6683 = vmatprep.mubr.bf16.mxu0 %v10641_v44  ;;  %6734 = vmatpush1.bf16.msra.mxu1 %v8471_v40  ;;  %v5064_v40 = vld [vmem:[#allocation20 + $0x638] sm:$0xff]  ;;  %v8534_v43 = vcombine.high %v5059_v36, %v5063_v38  ;;  %v5067_v47 = vld [vmem:[#allocation20 + $0x650] sm:$0xff] }
 0xb54   :  { %6765 = vmatprep.mubr.bf16.mxu1 %v10641_v44  ;;  %6653 = vmatprep.subr.bf16.mxu0 %v8478_v41  ;;  %v8493_v44 = vcombine.low %v5019_v25, %v5023_v56  ;;  %v8525_v41 = vcombine.low %v5051_v28, %v5055_v29  ;;  %v5071_v48 = vld [vmem:[#allocation20 + $0x670] sm:$0xff]  ;;  %v8574_v28 = vcombine.high %v5099_v20, %v5103_v21 }
 0xb55   :  { %6735 = vmatprep.subr.bf16.mxu1 %v8480_v45  ;;  %v8536_v45 = vcombine.high %v5060_v39, %v5064_v40  ;;  %v8542_v25 = vcombine.high %v5067_v47, %v5071_v48  ;;  %v5107_v30 = vld [vmem:[#allocation20 + $0x790] sm:$0xff] }
 0xb56   :  { %6654 = vmatpush1.bf16.msra.mxu0 %v8477_v50  ;;  %v5068_v50 = vld [vmem:[#allocation20 + $0x658] sm:$0xff]  ;;  %v5111_v31 = vld [vmem:[#allocation20 + $0x7b0] sm:$0xff] }
 0xb57   :  { %6736 = vmatpush1.bf16.msra.mxu1 %v8479_v52  ;;  %6655 = vmatprep.subr.bf16.mxu0 %v8486_v53  ;;  %v5072_v52 = vld [vmem:[#allocation20 + $0x678] sm:$0xff]  ;;  %v8533_v53 = vcombine.low %v5059_v36, %v5063_v38  ;;  %v8582_v36 = vcombine.high %v5107_v30, %v5111_v31 }
 0xb58   :  { %6737 = vmatprep.subr.bf16.mxu1 %v8488_v54  ;;  %v8535_v54 = vcombine.low %v5060_v39, %v5064_v40  ;;  %v8544_v56 = vcombine.high %v5068_v50, %v5072_v52  ;;  %v5115_v39 = vld [vmem:[#allocation20 + $0x7d0] sm:$0xff] }
 0xb59   :  { %v5119_v40 = vld [vmem:[#allocation20 + $0x7f0] sm:$0xff] }
 0xb5a   :  { %6656 = vmatpush1.bf16.msra.mxu0 %v8485_v10  ;;  %v5076_v10 = vld [vmem:[#allocation20 + $0x698] sm:$0xff] }
 0xb5b   :  { %6738 = vmatpush1.bf16.msra.mxu1 %v8487_v37  ;;  %6657 = vmatprep.subr.bf16.mxu0 %v8494_v60  ;;  %v5080_v37 = vld [vmem:[#allocation20 + $0x6b8] sm:$0xff]  ;;  %v8541_v60 = vcombine.low %v5067_v47, %v5071_v48  ;;  %v8590_v47 = vcombine.high %v5115_v39, %v5119_v40 }
 0xb5c   :  { %6739 = vmatprep.subr.bf16.mxu1 %v8496_v61  ;;  %v8543_v61 = vcombine.low %v5068_v50, %v5072_v52  ;;  %v8552_v18 = vcombine.high %v5076_v10, %v5080_v37  ;;  %v8589_v50 = vcombine.low %v5115_v39, %v5119_v40 }
 0xb5e   :  { %6658 = vmatpush1.bf16.msra.mxu0 %v8493_v44  ;;  %v5084_v44 = vld [vmem:[#allocation20 + $0x6d8] sm:$0xff] }
 0xb5f   :  { %6740 = vmatpush1.bf16.msra.mxu1 %v8495_v1  ;;  %6659 = vmatprep.subr.bf16.mxu0 %v8502_v3  ;;  %v5088_v1 = vld [vmem:[#allocation20 + $0x6f8] sm:$0xff]  ;;  %v8549_v3 = vcombine.low %v5075_v58, %v5079_v59  ;;  %v9616_v58 = vld [vmem:[#allocation22 + $0x24] ss:$8 sps:$4 sm:$0xff]   ;;  %v9614_v59 = vld [vmem:[#allocation22 + $0x20] ss:$8 sps:$4 sm:$0xff]  }
 0xb60   :  { %6741 = vmatprep.subr.bf16.mxu1 %v8504_v4  ;;  %v8551_v4 = vcombine.low %v5076_v10, %v5080_v37  ;;  %v8560_v6 = vcombine.high %v5084_v44, %v5088_v1  ;;  %v9619_v10 = vld [vmem:[#allocation22 + $0x34] ss:$8 sps:$4 sm:$0xff]   ;;  %v9617_v37 = vld [vmem:[#allocation22 + $0x30] ss:$8 sps:$4 sm:$0xff]  }
 0xb62   :  { %6660 = vmatpush1.bf16.msra.mxu0 %v8501_v11  ;;  %v5092_v11 = vld [vmem:[#allocation20 + $0x718] sm:$0xff] }
 0xb63   :  { %6742 = vmatpush1.bf16.msra.mxu1 %v8503_v12  ;;  %6661 = vmatprep.subr.bf16.mxu0 %v8510_v13  ;;  %v5096_v12 = vld [vmem:[#allocation20 + $0x738] sm:$0xff]  ;;  %v8557_v13 = vcombine.low %v5083_v63, %v5087_v0  ;;  %v9626_v63 = vld [vmem:[#allocation22 + $0x60] ss:$8 sps:$4 sm:$0xff]  }
 0xb64   :  { %6743 = vmatprep.subr.bf16.mxu1 %v8512_v14  ;;  %v8559_v14 = vcombine.low %v5084_v44, %v5088_v1  ;;  %v8568_v17 = vcombine.high %v5092_v11, %v5096_v12  ;;  %v9631_v0 = vld [vmem:[#allocation22 + $0x74] ss:$8 sps:$4 sm:$0xff]   ;;  %v9629_v44 = vld [vmem:[#allocation22 + $0x70] ss:$8 sps:$4 sm:$0xff]   ;;  %v9634_v1 = vld [vmem:[#allocation22 + $0x84] ss:$8 sps:$4 sm:$0xff]  }
 0xb66   :  { %6662 = vmatpush1.bf16.msra.mxu0 %v8509_v22  ;;  %v5100_v22 = vld [vmem:[#allocation20 + $0x758] sm:$0xff] }
 0xb67   :  { %6744 = vmatpush1.bf16.msra.mxu1 %v8511_v23  ;;  %6663 = vmatprep.subr.bf16.mxu0 %v8518_v19  ;;  %v5104_v23 = vld [vmem:[#allocation20 + $0x778] sm:$0xff]  ;;  %v8565_v19 = vcombine.low %v5091_v55, %v5095_v9  ;;  %v9638_v55 = vld [vmem:[#allocation22 + $0xa0] ss:$8 sps:$4 sm:$0xff]  }
 0xb68   :  { %6745 = vmatprep.subr.bf16.mxu1 %v8520_v26  ;;  %v8567_v26 = vcombine.low %v5092_v11, %v5096_v12  ;;  %v8576_v29 = vcombine.high %v5100_v22, %v5104_v23  ;;  %v9643_v9 = vld [vmem:[#allocation22 + $0xb4] ss:$8 sps:$4 sm:$0xff]   ;;  %v9641_v11 = vld [vmem:[#allocation22 + $0xb0] ss:$8 sps:$4 sm:$0xff]   ;;  %v9646_v12 = vld [vmem:[#allocation22 + $0xc4] ss:$8 sps:$4 sm:$0xff]  }
 0xb6a   :  { %6664 = vmatpush1.bf16.msra.mxu0 %v8517_v32  ;;  %v5108_v32 = vld [vmem:[#allocation20 + $0x798] sm:$0xff] }
 0xb6b   :  { %6746 = vmatpush1.bf16.msra.mxu1 %v8519_v33  ;;  %6665 = vmatprep.subr.bf16.mxu0 %v8526_v34  ;;  %v5112_v33 = vld [vmem:[#allocation20 + $0x7b8] sm:$0xff]  ;;  %v8573_v34 = vcombine.low %v5099_v20, %v5103_v21  ;;  %v9650_v20 = vld [vmem:[#allocation22 + $0xe0] ss:$8 sps:$4 sm:$0xff]  }
 0xb6c   :  { %6747 = vmatprep.subr.bf16.mxu1 %v8528_v35  ;;  %v8575_v35 = vcombine.low %v5100_v22, %v5104_v23  ;;  %v8584_v38 = vcombine.high %v5108_v32, %v5112_v33  ;;  %v9655_v21 = vld [vmem:[#allocation22 + $0xf4] ss:$8 sps:$4 sm:$0xff]   ;;  %v9653_v22 = vld [vmem:[#allocation22 + $0xf0] ss:$8 sps:$4 sm:$0xff]   ;;  %v9658_v23 = vld [vmem:[#allocation22 + $0x104] ss:$8 sps:$4 sm:$0xff]  }
 0xb6e   :  { %6666 = vmatpush1.bf16.msra.mxu0 %v8525_v41  ;;  %v5116_v41 = vld [vmem:[#allocation20 + $0x7d8] sm:$0xff] }
 0xb6f   :  { %6748 = vmatpush1.bf16.msra.mxu1 %v8527_v42  ;;  %6667 = vmatprep.subr.bf16.mxu0 %v8534_v43  ;;  %v5120_v42 = vld [vmem:[#allocation20 + $0x7f8] sm:$0xff]  ;;  %v8581_v43 = vcombine.low %v5107_v30, %v5111_v31 }
 0xb70   :  { %6749 = vmatprep.subr.bf16.mxu1 %v8536_v45  ;;  %v8583_v45 = vcombine.low %v5108_v32, %v5112_v33  ;;  %v8592_v48 = vcombine.high %v5116_v41, %v5120_v42  ;;  %v8591_v52 = vcombine.low %v5116_v41, %v5120_v42 }
 0xb72   :  { %6668 = vmatpush1.bf16.msra.mxu0 %v8533_v53  ;;  %v9610_v53 = vld [vmem:[#allocation22 + $0x4] ss:$8 sps:$4 sm:$0xff]  }
 0xb73   :  { %6750 = vmatpush1.bf16.msra.mxu1 %v8535_v54  ;;  %6669 = vmatprep.subr.bf16.mxu0 %v8542_v25  ;;  %v9608_v54 = vld [vmem:[#allocation22] ss:$8 sps:$4 sm:$0xff]   ;;  %v9613_v25 = vld [vmem:[#allocation22 + $0x14] ss:$8 sps:$4 sm:$0xff]  }
 0xb74   :  { %6751 = vmatprep.subr.bf16.mxu1 %v8544_v56  ;;  %v9611_v56 = vld [vmem:[#allocation22 + $0x10] ss:$8 sps:$4 sm:$0xff]  }
 0xb76   :  { %6670 = vmatpush1.bf16.msra.mxu0 %v8541_v60  ;;  %v9622_v60 = vld [vmem:[#allocation22 + $0x44] ss:$8 sps:$4 sm:$0xff]  }
 0xb77   :  { %6752 = vmatpush1.bf16.msra.mxu1 %v8543_v61  ;;  %6671 = vmatprep.subr.bf16.mxu0 %v8550_v62  ;;  %v9620_v61 = vld [vmem:[#allocation22 + $0x40] ss:$8 sps:$4 sm:$0xff]   ;;  %v9625_v62 = vld [vmem:[#allocation22 + $0x54] ss:$8 sps:$4 sm:$0xff]  }
 0xb78   :  { %6753 = vmatprep.subr.bf16.mxu1 %v8552_v18  ;;  %v9623_v18 = vld [vmem:[#allocation22 + $0x50] ss:$8 sps:$4 sm:$0xff]  }
 0xb7a   :  { %6672 = vmatpush1.bf16.msra.mxu0 %v8549_v3  ;;  %v9632_v3 = vld [vmem:[#allocation22 + $0x80] ss:$8 sps:$4 sm:$0xff]  }
 0xb7b   :  { %6754 = vmatpush1.bf16.msra.mxu1 %v8551_v4  ;;  %6673 = vmatprep.subr.bf16.mxu0 %v8558_v15  ;;  %v9637_v4 = vld [vmem:[#allocation22 + $0x94] ss:$8 sps:$4 sm:$0xff]   ;;  %v9635_v15 = vld [vmem:[#allocation22 + $0x90] ss:$8 sps:$4 sm:$0xff]  }
 0xb7c   :  { %6755 = vmatprep.subr.bf16.mxu1 %v8560_v6  ;;  %v9640_v6 = vld [vmem:[#allocation22 + $0xa4] ss:$8 sps:$4 sm:$0xff]  }
 0xb7e   :  { %6674 = vmatpush1.bf16.msra.mxu0 %v8557_v13  ;;  %v9644_v13 = vld [vmem:[#allocation22 + $0xc0] ss:$8 sps:$4 sm:$0xff]  }
 0xb7f   :  { %6756 = vmatpush1.bf16.msra.mxu1 %v8559_v14  ;;  %6675 = vmatprep.subr.bf16.mxu0 %v8566_v16  ;;  %v9649_v14 = vld [vmem:[#allocation22 + $0xd4] ss:$8 sps:$4 sm:$0xff]   ;;  %v9647_v16 = vld [vmem:[#allocation22 + $0xd0] ss:$8 sps:$4 sm:$0xff]  }
 0xb80   :  { %6757 = vmatprep.subr.bf16.mxu1 %v8568_v17  ;;  %v9652_v17 = vld [vmem:[#allocation22 + $0xe4] ss:$8 sps:$4 sm:$0xff]  }
 0xb82   :  { %6676 = vmatpush1.bf16.msra.mxu0 %v8565_v19  ;;  %v5122_v19 = vld [vmem:[#allocation23 + $0x42] ss:$8 sm:$0xf] }
 0xb83   :  { %6758 = vmatpush1.bf16.msra.mxu1 %v8567_v26  ;;  %6677 = vmatprep.subr.bf16.mxu0 %v8574_v28  ;;  %v5123_v26 = vld [vmem:[#allocation23 + $0x42] ss:$8 sm:$0xf0] }
 0xb84   :  { %6759 = vmatprep.subr.bf16.mxu1 %v8576_v29  ;;  %v10662_v28 = vor.u32 %v5123_v26, %v5122_v19  ;;  %v9706_v26 = vld [vmem:[#allocation22 + $0x204] ss:$8 sps:$4 sm:$0xff]  }
 0xb86   :  { %6678 = vmatpush1.bf16.msra.mxu0 %v8573_v34  ;;  %v5129_v29 = vrot.slane %v10662_v28, %v10520_v7  ;;  %v5133_v30 = vrot.slane %v10662_v28, %v10523_v57  ;;  %v5141_v31 = vrot.slane %v10662_v28, %v10537_v5 }
 0xb87   :  { %6760 = vmatpush1.bf16.msra.mxu1 %v8575_v35  ;;  %6679 = vmatprep.subr.bf16.mxu0 %v8582_v36 }
 0xb88   :  { %6761 = vmatprep.subr.bf16.mxu1 %v8584_v38 }
 0xb8a   :  { %6680 = vmatpush1.bf16.msra.mxu0 %v8581_v43 }
 0xb8b   :  { %6762 = vmatpush1.bf16.msra.mxu1 %v8583_v45  ;;  %6681 = vmatprep.subr.bf16.mxu0 %v8590_v47 }
 0xb8c   :  { %6763 = vmatprep.subr.bf16.mxu1 %v8592_v48 }
 0xb8e   :  { %6682 = vmatpush1.bf16.msra.mxu0 %v8589_v50 }
 0xb8f   :  { %6764 = vmatpush1.bf16.msra.mxu1 %v8591_v52  ;;  %7571 = vmatprep.subr.bf16.mxu0 %v9610_v53  ;;  %v9656_v52 = vld [vmem:[#allocation22 + $0x100] ss:$8 sps:$4 sm:$0xff]  }
 0xb91   :  { %6684 = vmatmul.mubr.bf16.vlgmr.msra.gmra.mrb[20].mxu0 %v10650_v8 }
 0xb92   :  { %6766 = vmatmul.mubr.bf16.vlgmr.msra.gmra.mrb[48].mxu1 %v10650_v8  ;;  %7572 = vmatpush1.bf16.msra.mxu0 %v9608_v54  ;;  %v9628_v8 = vld [vmem:[#allocation22 + $0x64] ss:$8 sps:$4 sm:$0xff]   ;;  %v9661_v54 = vld [vmem:[#allocation22 + $0x114] ss:$8 sps:$4 sm:$0xff]  }
 0xb93   :  { %7573 = vmatprep.subr.bf16.mxu0 %v9613_v25  ;;  %v9659_v25 = vld [vmem:[#allocation22 + $0x110] ss:$8 sps:$4 sm:$0xff]  }
 0xb96   :  { %7574 = vmatpush1.bf16.msra.mxu0 %v9611_v56  ;;  %v9664_v56 = vld [vmem:[#allocation22 + $0x124] ss:$8 sps:$4 sm:$0xff]  }
 0xb97   :  { %7575 = vmatprep.subr.bf16.mxu0 %v9616_v58  ;;  %v9662_v58 = vld [vmem:[#allocation22 + $0x120] ss:$8 sps:$4 sm:$0xff]  }
 0xb9a   :  { %7576 = vmatpush1.bf16.msra.mxu0 %v9614_v59  ;;  %v9667_v59 = vld [vmem:[#allocation22 + $0x134] ss:$8 sps:$4 sm:$0xff]  }
 0xb9b   :  { %7577 = vmatprep.subr.bf16.mxu0 %v9619_v10  ;;  %v9665_v10 = vld [vmem:[#allocation22 + $0x130] ss:$8 sps:$4 sm:$0xff]  }
 0xb9e   :  { %7578 = vmatpush1.bf16.msra.mxu0 %v9617_v37  ;;  %v9670_v37 = vld [vmem:[#allocation22 + $0x144] ss:$8 sps:$4 sm:$0xff]  }
 0xb9f   :  { %7579 = vmatprep.subr.bf16.mxu0 %v9622_v60  ;;  %v9668_v60 = vld [vmem:[#allocation22 + $0x140] ss:$8 sps:$4 sm:$0xff]  }
 0xba2   :  { %7580 = vmatpush1.bf16.msra.mxu0 %v9620_v61  ;;  %v9673_v61 = vld [vmem:[#allocation22 + $0x154] ss:$8 sps:$4 sm:$0xff]  }
 0xba3   :  { %7581 = vmatprep.subr.bf16.mxu0 %v9625_v62  ;;  %v9671_v62 = vld [vmem:[#allocation22 + $0x150] ss:$8 sps:$4 sm:$0xff]  }
 0xba6   :  { %7582 = vmatpush1.bf16.msra.mxu0 %v9623_v18  ;;  %v9676_v18 = vld [vmem:[#allocation22 + $0x164] ss:$8 sps:$4 sm:$0xff]  }
 0xba7   :  { %7583 = vmatprep.subr.bf16.mxu0 %v9628_v8  ;;  %v9674_v8 = vld [vmem:[#allocation22 + $0x160] ss:$8 sps:$4 sm:$0xff]  }
 0xbaa   :  { %7584 = vmatpush1.bf16.msra.mxu0 %v9626_v63  ;;  %v9679_v63 = vld [vmem:[#allocation22 + $0x174] ss:$8 sps:$4 sm:$0xff]  }
 0xbab   :  { %7585 = vmatprep.subr.bf16.mxu0 %v9631_v0  ;;  %v9677_v0 = vld [vmem:[#allocation22 + $0x170] ss:$8 sps:$4 sm:$0xff]  }
 0xbae   :  { %7586 = vmatpush1.bf16.msra.mxu0 %v9629_v44  ;;  %v9682_v44 = vld [vmem:[#allocation22 + $0x184] ss:$8 sps:$4 sm:$0xff]  }
 0xbaf   :  { %7587 = vmatprep.subr.bf16.mxu0 %v9634_v1  ;;  %v9680_v1 = vld [vmem:[#allocation22 + $0x180] ss:$8 sps:$4 sm:$0xff]  }
 0xbb2   :  { %7588 = vmatpush1.bf16.msra.mxu0 %v9632_v3  ;;  %v9685_v3 = vld [vmem:[#allocation22 + $0x194] ss:$8 sps:$4 sm:$0xff]  }
 0xbb3   :  { %7589 = vmatprep.subr.bf16.mxu0 %v9637_v4  ;;  %v9683_v4 = vld [vmem:[#allocation22 + $0x190] ss:$8 sps:$4 sm:$0xff]  }
 0xbb6   :  { %7590 = vmatpush1.bf16.msra.mxu0 %v9635_v15  ;;  %v9688_v15 = vld [vmem:[#allocation22 + $0x1a4] ss:$8 sps:$4 sm:$0xff]  }
 0xbb7   :  { %7591 = vmatprep.subr.bf16.mxu0 %v9640_v6  ;;  %v9686_v6 = vld [vmem:[#allocation22 + $0x1a0] ss:$8 sps:$4 sm:$0xff]  }
 0xbba   :  { %7592 = vmatpush1.bf16.msra.mxu0 %v9638_v55  ;;  %v9691_v55 = vld [vmem:[#allocation22 + $0x1b4] ss:$8 sps:$4 sm:$0xff]  }
 0xbbb   :  { %7593 = vmatprep.subr.bf16.mxu0 %v9643_v9  ;;  %v9689_v9 = vld [vmem:[#allocation22 + $0x1b0] ss:$8 sps:$4 sm:$0xff]  }
 0xbbe   :  { %7594 = vmatpush1.bf16.msra.mxu0 %v9641_v11  ;;  %v9694_v11 = vld [vmem:[#allocation22 + $0x1c4] ss:$8 sps:$4 sm:$0xff]  }
 0xbbf   :  { %7595 = vmatprep.subr.bf16.mxu0 %v9646_v12  ;;  %v9692_v12 = vld [vmem:[#allocation22 + $0x1c0] ss:$8 sps:$4 sm:$0xff]  }
 0xbc2   :  { %7596 = vmatpush1.bf16.msra.mxu0 %v9644_v13  ;;  %v9697_v13 = vld [vmem:[#allocation22 + $0x1d4] ss:$8 sps:$4 sm:$0xff]  }
 0xbc3   :  { %7597 = vmatprep.subr.bf16.mxu0 %v9649_v14  ;;  %v9695_v14 = vld [vmem:[#allocation22 + $0x1d0] ss:$8 sps:$4 sm:$0xff]  }
 0xbc6   :  { %7598 = vmatpush1.bf16.msra.mxu0 %v9647_v16  ;;  %v5137_v16 = vrot.slane %v10662_v28, %v10534_v2  ;;  %v9707_v2 = vld [vmem:[#allocation22 + $0x210] ss:$8 sps:$4 sm:$0xff]  }
 0xbc7   :  { %7599 = vmatprep.subr.bf16.mxu0 %v9652_v17  ;;  %v9700_v17 = vld [vmem:[#allocation22 + $0x1e4] ss:$8 sps:$4 sm:$0xff]  }
 0xbca   :  { %7600 = vmatpush1.bf16.msra.mxu0 %v9650_v20  ;;  %v9698_v20 = vld [vmem:[#allocation22 + $0x1e0] ss:$8 sps:$4 sm:$0xff]  }
 0xbcb   :  { %7601 = vmatprep.subr.bf16.mxu0 %v9655_v21 }
 0xbce   :  { %7602 = vmatpush1.bf16.msra.mxu0 %v9653_v22  ;;  %v9703_v22 = vld [vmem:[#allocation22 + $0x1f4] ss:$8 sps:$4 sm:$0xff]  }
 0xbcf   :  { %7612 = vmatprep.subr.bf16.mxu0 %v9658_v23  ;;  %v9701_v23 = vld [vmem:[#allocation22 + $0x1f0] ss:$8 sps:$4 sm:$0xff]  }
 0xbe4   :  { %v6521_v32 = vpop.f32.mrb[16].mxu0  ;;  %v10670_v33 = vpop.f32.mrb[44].mxu1 }
 0xbe5   :  { %v8865_v34 = vadd.f32 %v6521_v32, %v5129_v29  ;;  %v6523_v35 = vpop.f32.mrb[17].mxu0  ;;  %v6605_v36 = vpop.f32.mrb[45].mxu1  ;;  %v8867_v21 = vadd.f32 %v10670_v33, %v5137_v16  ;;  %v9704_v29 = vld [vmem:[#allocation22 + $0x200] ss:$8 sps:$4 sm:$0xff]   ;;  %v9712_v32 = vld [vmem:[#allocation22 + $0x224] ss:$8 sps:$4 sm:$0xff]  }
 0xbe6   :  { %v8866_v38 = vadd.f32 %v6523_v35, %v5133_v30  ;;  %v8868_v39 = vadd.f32 %v6605_v36, %v5141_v31  ;;  %v6525_v40 = vpop.f32.mrb[18].mxu0  ;;  %v6607_v41 = vpop.f32.mrb[46].mxu1  ;;  %v9709_v31 = vld [vmem:[#allocation22 + $0x214] ss:$8 sps:$4 sm:$0xff]   ;;  %v9713_v35 = vld [vmem:[#allocation22 + $0x230] ss:$8 sps:$4 sm:$0xff]  }
 0xbe7   :  { %v6774_v42 = vmax.f32 %v8865_v34, 0.0  ;;  %v6526_v43 = vpop.f32.mrb[19].mxu0  ;;  %v6608_v45 = vpop.f32.mrb[47].mxu1  ;;  %v6776_v19 = vmax.f32 %v8867_v21, 0.0  ;;  %v9710_v34 = vld [vmem:[#allocation22 + $0x220] ss:$8 sps:$4 sm:$0xff]  }
 0xbe8   :  { %v6775_v47 = vmax.f32 %v8866_v38, 0.0  ;;  %v6777_v48 = vmax.f32 %v8868_v39, 0.0  ;;  %v9715_v33 = vld [vmem:[#allocation22 + $0x234] ss:$8 sps:$4 sm:$0xff]   ;;  %v9718_v36 = vld [vmem:[#allocation22 + $0x244] ss:$8 sps:$4 sm:$0xff]  }
 0xbe9   :  { %v6782_v53 = vpack.c.bf16 %v6774_v42, %v6774_v42  ;;  %v6784_v30 = vpack.c.bf16 %v6776_v19, %v6776_v19  ;;  %v9716_v38 = vld [vmem:[#allocation22 + $0x240] ss:$8 sps:$4 sm:$0xff]   ;;  %v9721_v39 = vld [vmem:[#allocation22 + $0x254] ss:$8 sps:$4 sm:$0xff]   ;;  %v9719_v40 = vld [vmem:[#allocation22 + $0x250] ss:$8 sps:$4 sm:$0xff]  }
 0xbea   :  { %v6783_v50 = vpack.c.bf16 %v6775_v47, %v6775_v47  ;;  %v6785_v5 = vpack.c.bf16 %v6777_v48, %v6777_v48  ;;  %v9724_v41 = vld [vmem:[#allocation22 + $0x264] ss:$8 sps:$4 sm:$0xff]   ;;  %v9722_v42 = vld [vmem:[#allocation22 + $0x260] ss:$8 sps:$4 sm:$0xff]   ;;  %v9727_v43 = vld [vmem:[#allocation22 + $0x274] ss:$8 sps:$4 sm:$0xff]  }
 0xbeb   :  { %v9725_v45 = vld [vmem:[#allocation22 + $0x270] ss:$8 sps:$4 sm:$0xff]   ;;  %v9730_v47 = vld [vmem:[#allocation22 + $0x284] ss:$8 sps:$4 sm:$0xff]   ;;  %v9728_v48 = vld [vmem:[#allocation22 + $0x280] ss:$8 sps:$4 sm:$0xff]  }
 0xbec   :  { %7603 = vmatprep.mubr.bf16.mxu0 %v6783_v50  ;;  %v9733_v50 = vld [vmem:[#allocation22 + $0x294] ss:$8 sps:$4 sm:$0xff]   ;;  %v9752_v16 = vld [vmem:[#allocation22 + $0x300] ss:$8 sps:$4 sm:$0xff]  }
 0xbed   :  { %7604 = vmatmul.mubr.bf16.vlgmr.msra.gmra.mrb[24].mxu0 %v6782_v53  ;;  %v9736_v53 = vld [vmem:[#allocation22 + $0x2a4] ss:$8 sps:$4 sm:$0xff]   ;;  %v9758_v19 = vld [vmem:[#allocation22 + $0x320] ss:$8 sps:$4 sm:$0xff]  }
 0xbee   :  { %7613 = vmatpush1.bf16.msra.mxu0 %v9656_v52  ;;  %7644 = vmatprep.mubr.bf16.mxu0 %v6785_v5  ;;  %v9731_v52 = vld [vmem:[#allocation22 + $0x290] ss:$8 sps:$4 sm:$0xff]   ;;  %v9739_v5 = vld [vmem:[#allocation22 + $0x2b4] ss:$8 sps:$4 sm:$0xff]  }
 0xbef   :  { %7614 = vmatprep.subr.bf16.mxu0 %v9661_v54  ;;  %v9734_v54 = vld [vmem:[#allocation22 + $0x2a0] ss:$8 sps:$4 sm:$0xff]  }
 0xbf2   :  { %7615 = vmatpush1.bf16.msra.mxu0 %v9659_v25  ;;  %v9737_v25 = vld [vmem:[#allocation22 + $0x2b0] ss:$8 sps:$4 sm:$0xff]  }
 0xbf3   :  { %7616 = vmatprep.subr.bf16.mxu0 %v9664_v56  ;;  %v9742_v56 = vld [vmem:[#allocation22 + $0x2c4] ss:$8 sps:$4 sm:$0xff]  }
 0xbf6   :  { %7617 = vmatpush1.bf16.msra.mxu0 %v9662_v58  ;;  %v9740_v58 = vld [vmem:[#allocation22 + $0x2c0] ss:$8 sps:$4 sm:$0xff]  }
 0xbf7   :  { %7618 = vmatprep.subr.bf16.mxu0 %v9667_v59  ;;  %v9745_v59 = vld [vmem:[#allocation22 + $0x2d4] ss:$8 sps:$4 sm:$0xff]  }
 0xbfa   :  { %7619 = vmatpush1.bf16.msra.mxu0 %v9665_v10  ;;  %v9743_v10 = vld [vmem:[#allocation22 + $0x2d0] ss:$8 sps:$4 sm:$0xff]  }
 0xbfb   :  { %7620 = vmatprep.subr.bf16.mxu0 %v9670_v37  ;;  %v9748_v37 = vld [vmem:[#allocation22 + $0x2e4] ss:$8 sps:$4 sm:$0xff]  }
 0xbfe   :  { %7621 = vmatpush1.bf16.msra.mxu0 %v9668_v60  ;;  %v5145_v60 = vrot.slane %v10662_v28, %v388_v24 }
 0xbff   :  { %7622 = vmatprep.subr.bf16.mxu0 %v9673_v61  ;;  %v9746_v61 = vld [vmem:[#allocation22 + $0x2e0] ss:$8 sps:$4 sm:$0xff]  }
 0xc02   :  { %7623 = vmatpush1.bf16.msra.mxu0 %v9671_v62  ;;  %v5149_v62 = vrot.slane %v10662_v28, %v392_v27 }
 0xc03   :  { %7624 = vmatprep.subr.bf16.mxu0 %v9676_v18  ;;  %v5157_v18 = vrot.slane %v10662_v28, %v400_v49 }
 0xc06   :  { %7625 = vmatpush1.bf16.msra.mxu0 %v9674_v8  ;;  %v9751_v8 = vld [vmem:[#allocation22 + $0x2f4] ss:$8 sps:$4 sm:$0xff]  }
 0xc07   :  { %7626 = vmatprep.subr.bf16.mxu0 %v9679_v63 }
 0xc0a   :  { %7627 = vmatpush1.bf16.msra.mxu0 %v9677_v0 }
 0xc0b   :  { %7628 = vmatprep.subr.bf16.mxu0 %v9682_v44 }
 0xc0e   :  { %7629 = vmatpush1.bf16.msra.mxu0 %v9680_v1 }
 0xc0f   :  { %7630 = vmatprep.subr.bf16.mxu0 %v9685_v3 }
 0xc12   :  { %7631 = vmatpush1.bf16.msra.mxu0 %v9683_v4 }
 0xc13   :  { %7632 = vmatprep.subr.bf16.mxu0 %v9688_v15  ;;  %v9749_v15 = vld [vmem:[#allocation22 + $0x2f0] ss:$8 sps:$4 sm:$0xff]  }
 0xc16   :  { %7633 = vmatpush1.bf16.msra.mxu0 %v9686_v6 }
 0xc17   :  { %7634 = vmatprep.subr.bf16.mxu0 %v9691_v55 }
 0xc1a   :  { %7635 = vmatpush1.bf16.msra.mxu0 %v9689_v9 }
 0xc1b   :  { %7636 = vmatprep.subr.bf16.mxu0 %v9694_v11  ;;  %v9754_v11 = vld [vmem:[#allocation22 + $0x304] ss:$8 sps:$4 sm:$0xff]  }
 0xc1e   :  { %7637 = vmatpush1.bf16.msra.mxu0 %v9692_v12 }
 0xc1f   :  { %7638 = vmatprep.subr.bf16.mxu0 %v9697_v13 }
 0xc22   :  { %7639 = vmatpush1.bf16.msra.mxu0 %v9695_v14 }
 0xc23   :  { %7640 = vmatprep.subr.bf16.mxu0 %v9700_v17 }
 0xc26   :  { %7641 = vmatpush1.bf16.msra.mxu0 %v9698_v20  ;;  %v9757_v20 = vld [vmem:[#allocation22 + $0x314] ss:$8 sps:$4 sm:$0xff]  }
 0xc27   :  { %7642 = vmatprep.subr.bf16.mxu0 %v9703_v22  ;;  %v9755_v22 = vld [vmem:[#allocation22 + $0x310] ss:$8 sps:$4 sm:$0xff]  }
 0xc2a   :  { %7643 = vmatpush1.bf16.msra.mxu0 %v9701_v23  ;;  %v9760_v23 = vld [vmem:[#allocation22 + $0x324] ss:$8 sps:$4 sm:$0xff]  }
 0xc2b   :  { %7653 = vmatprep.subr.bf16.mxu0 %v9706_v26  ;;  %v9763_v26 = vld [vmem:[#allocation22 + $0x334] ss:$8 sps:$4 sm:$0xff]  }
 0xc2d   :  { %7645 = vmatmul.mubr.bf16.vlgmr.msra.gmra.mrb[24].mxu0 %v6784_v30  ;;  %v9766_v30 = vld [vmem:[#allocation22 + $0x344] ss:$8 sps:$4 sm:$0xff]  }
 0xc2e   :  { %7654 = vmatpush1.bf16.msra.mxu0 %v9704_v29  ;;  %v9761_v29 = vld [vmem:[#allocation22 + $0x330] ss:$8 sps:$4 sm:$0xff]  }
 0xc2f   :  { %7655 = vmatprep.subr.bf16.mxu0 %v9709_v31  ;;  %v9764_v31 = vld [vmem:[#allocation22 + $0x340] ss:$8 sps:$4 sm:$0xff]  }
 0xc32   :  { %7656 = vmatpush1.bf16.msra.mxu0 %v9707_v2  ;;  %v9769_v2 = vld [vmem:[#allocation22 + $0x354] ss:$8 sps:$4 sm:$0xff]  }
 0xc33   :  { %7657 = vmatprep.subr.bf16.mxu0 %v9712_v32  ;;  %v9767_v32 = vld [vmem:[#allocation22 + $0x350] ss:$8 sps:$4 sm:$0xff]  }
 0xc36   :  { %7658 = vmatpush1.bf16.msra.mxu0 %v9710_v34  ;;  %v9772_v34 = vld [vmem:[#allocation22 + $0x364] ss:$8 sps:$4 sm:$0xff]  }
 0xc37   :  { %7659 = vmatprep.subr.bf16.mxu0 %v9715_v33  ;;  %v9770_v33 = vld [vmem:[#allocation22 + $0x360] ss:$8 sps:$4 sm:$0xff]  }
 0xc3a   :  { %7660 = vmatpush1.bf16.msra.mxu0 %v9713_v35  ;;  %v9775_v35 = vld [vmem:[#allocation22 + $0x374] ss:$8 sps:$4 sm:$0xff]  }
 0xc3b   :  { %7661 = vmatprep.subr.bf16.mxu0 %v9718_v36  ;;  %v9773_v36 = vld [vmem:[#allocation22 + $0x370] ss:$8 sps:$4 sm:$0xff]  }
 0xc3e   :  { %7662 = vmatpush1.bf16.msra.mxu0 %v9716_v38  ;;  %v9778_v38 = vld [vmem:[#allocation22 + $0x384] ss:$8 sps:$4 sm:$0xff]  }
 0xc3f   :  { %7663 = vmatprep.subr.bf16.mxu0 %v9721_v39  ;;  %v9776_v39 = vld [vmem:[#allocation22 + $0x380] ss:$8 sps:$4 sm:$0xff]  }
 0xc42   :  { %7664 = vmatpush1.bf16.msra.mxu0 %v9719_v40  ;;  %v9781_v40 = vld [vmem:[#allocation22 + $0x394] ss:$8 sps:$4 sm:$0xff]  }
 0xc43   :  { %7665 = vmatprep.subr.bf16.mxu0 %v9724_v41  ;;  %v9779_v41 = vld [vmem:[#allocation22 + $0x390] ss:$8 sps:$4 sm:$0xff]  }
 0xc46   :  { %7666 = vmatpush1.bf16.msra.mxu0 %v9722_v42  ;;  %v9784_v42 = vld [vmem:[#allocation22 + $0x3a4] ss:$8 sps:$4 sm:$0xff]  }
 0xc47   :  { %7667 = vmatprep.subr.bf16.mxu0 %v9727_v43  ;;  %v9782_v43 = vld [vmem:[#allocation22 + $0x3a0] ss:$8 sps:$4 sm:$0xff]  }
 0xc4a   :  { %7668 = vmatpush1.bf16.msra.mxu0 %v9725_v45  ;;  %v9787_v45 = vld [vmem:[#allocation22 + $0x3b4] ss:$8 sps:$4 sm:$0xff]  }
 0xc4b   :  { %7669 = vmatprep.subr.bf16.mxu0 %v9730_v47  ;;  %v9785_v47 = vld [vmem:[#allocation22 + $0x3b0] ss:$8 sps:$4 sm:$0xff]  }
 0xc4e   :  { %7670 = vmatpush1.bf16.msra.mxu0 %v9728_v48  ;;  %v9790_v48 = vld [vmem:[#allocation22 + $0x3c4] ss:$8 sps:$4 sm:$0xff]  }
 0xc4f   :  { %7671 = vmatprep.subr.bf16.mxu0 %v9733_v50  ;;  %v9788_v50 = vld [vmem:[#allocation22 + $0x3c0] ss:$8 sps:$4 sm:$0xff]  }
 0xc52   :  { %7672 = vmatpush1.bf16.msra.mxu0 %v9731_v52  ;;  %v9793_v52 = vld [vmem:[#allocation22 + $0x3d4] ss:$8 sps:$4 sm:$0xff]  }
 0xc53   :  { %7673 = vmatprep.subr.bf16.mxu0 %v9736_v53  ;;  %v9791_v53 = vld [vmem:[#allocation22 + $0x3d0] ss:$8 sps:$4 sm:$0xff]  }
 0xc56   :  { %7674 = vmatpush1.bf16.msra.mxu0 %v9734_v54  ;;  %v5153_v54 = vrot.slane %v10662_v28, %v396_v46 }
 0xc57   :  { %7675 = vmatprep.subr.bf16.mxu0 %v9739_v5  ;;  %v9796_v5 = vld [vmem:[#allocation22 + $0x3e4] ss:$8 sps:$4 sm:$0xff]  }
 0xc5a   :  { %7676 = vmatpush1.bf16.msra.mxu0 %v9737_v25  ;;  %v9794_v25 = vld [vmem:[#allocation22 + $0x3e0] ss:$8 sps:$4 sm:$0xff]  }
 0xc5b   :  { %7677 = vmatprep.subr.bf16.mxu0 %v9742_v56 }
 0xc5e   :  { %7678 = vmatpush1.bf16.msra.mxu0 %v9740_v58  ;;  %v9799_v58 = vld [vmem:[#allocation22 + $0x3f4] ss:$8 sps:$4 sm:$0xff]  }
 0xc5f   :  { %7679 = vmatprep.subr.bf16.mxu0 %v9745_v59  ;;  %v9797_v59 = vld [vmem:[#allocation22 + $0x3f0] ss:$8 sps:$4 sm:$0xff]  }
 0xc62   :  { %7680 = vmatpush1.bf16.msra.mxu0 %v9743_v10 }
 0xc63   :  { %7681 = vmatprep.subr.bf16.mxu0 %v9748_v37 }
 0xc64   :  { %v6685_v63 = vpop.f32.mrb[20].mxu0 }
 0xc65   :  { %v8869_v0 = vadd.f32 %v6685_v63, %v5145_v60  ;;  %v10684_v44 = vpop.f32.mrb[48].mxu1  ;;  %v6687_v1 = vpop.f32.mrb[21].mxu0  ;;  %v6919_v60 = vld [vmem:[#allocation23 + $0x43] ss:$8 sm:$0x3] }
 0xc66   :  { %v8870_v3 = vadd.f32 %v6687_v1, %v5149_v62  ;;  %v6769_v4 = vpop.f32.mrb[49].mxu1  ;;  %7682 = vmatpush1.bf16.msra.mxu0 %v9746_v61  ;;  %v6689_v24 = vpop.f32.mrb[22].mxu0  ;;  %v8871_v56 = vadd.f32 %v10684_v44, %v5153_v54  ;;  %v6924_v51 = vrot.slane %v6919_v60, %v10520_v7  ;;  %v6928_v46 = vrot.slane %v6919_v60, %v10523_v57 }
 0xc67   :  { %v6778_v6 = vmax.f32 %v8869_v0, 0.0  ;;  %v8872_v55 = vadd.f32 %v6769_v4, %v5157_v18  ;;  %v6771_v9 = vpop.f32.mrb[50].mxu1  ;;  %v6690_v27 = vpop.f32.mrb[23].mxu0  ;;  %7683 = vmatprep.subr.bf16.mxu0 %v9751_v8 }
 0xc68   :  { %v6779_v12 = vmax.f32 %v8870_v3, 0.0  ;;  %v6772_v13 = vpop.f32.mrb[51].mxu1  ;;  %v6780_v10 = vmax.f32 %v8871_v56, 0.0 }
 0xc69   :  { %v6781_v49 = vmax.f32 %v8872_v55, 0.0  ;;  %v6786_v17 = vpack.c.bf16 %v6778_v6, %v6778_v6 }
 0xc6a   :  { %v6787_v14 = vpack.c.bf16 %v6779_v12, %v6779_v12  ;;  %7684 = vmatpush1.bf16.msra.mxu0 %v9749_v15  ;;  %v6788_v37 = vpack.c.bf16 %v6780_v10, %v6780_v10 }
 0xc6b   :  { %7694 = vmatprep.subr.bf16.mxu0 %v9754_v11  ;;  %v6789_v21 = vpack.c.bf16 %v6781_v49, %v6781_v49 }
 0xc6c   :  { %7685 = vmatprep.mubr.bf16.mxu0 %v6787_v14 }
 0xc6d   :  { %7686 = vmatmul.mubr.bf16.vlgmr.msra.gmra.mrb[24].mxu0 %v6786_v17 }
 0xc6e   :  { %7695 = vmatpush1.bf16.msra.mxu0 %v9752_v16  ;;  %7726 = vmatprep.mubr.bf16.mxu0 %v6789_v21 }
 0xc6f   :  { %7696 = vmatprep.subr.bf16.mxu0 %v9757_v20 }
 0xc72   :  { %7697 = vmatpush1.bf16.msra.mxu0 %v9755_v22 }
 0xc73   :  { %7698 = vmatprep.subr.bf16.mxu0 %v9760_v23 }
 0xc76   :  { %7699 = vmatpush1.bf16.msra.mxu0 %v9758_v19 }
 0xc77   :  { %7700 = vmatprep.subr.bf16.mxu0 %v9763_v26 }
 0xc7a   :  { %7701 = vmatpush1.bf16.msra.mxu0 %v9761_v29 }
 0xc7b   :  { %7702 = vmatprep.subr.bf16.mxu0 %v9766_v30 }
 0xc7e   :  { %7703 = vmatpush1.bf16.msra.mxu0 %v9764_v31 }
 0xc7f   :  { %7704 = vmatprep.subr.bf16.mxu0 %v9769_v2 }
 0xc82   :  { %7705 = vmatpush1.bf16.msra.mxu0 %v9767_v32 }
 0xc83   :  { %7706 = vmatprep.subr.bf16.mxu0 %v9772_v34 }
 0xc86   :  { %7707 = vmatpush1.bf16.msra.mxu0 %v9770_v33 }
 0xc87   :  { %7708 = vmatprep.subr.bf16.mxu0 %v9775_v35 }
 0xc8a   :  { %7709 = vmatpush1.bf16.msra.mxu0 %v9773_v36 }
 0xc8b   :  { %7710 = vmatprep.subr.bf16.mxu0 %v9778_v38 }
 0xc8e   :  { %7711 = vmatpush1.bf16.msra.mxu0 %v9776_v39 }
 0xc8f   :  { %7712 = vmatprep.subr.bf16.mxu0 %v9781_v40 }
 0xc92   :  { %7713 = vmatpush1.bf16.msra.mxu0 %v9779_v41 }
 0xc93   :  { %7714 = vmatprep.subr.bf16.mxu0 %v9784_v42 }
 0xc96   :  { %7715 = vmatpush1.bf16.msra.mxu0 %v9782_v43 }
 0xc97   :  { %7716 = vmatprep.subr.bf16.mxu0 %v9787_v45 }
 0xc9a   :  { %7717 = vmatpush1.bf16.msra.mxu0 %v9785_v47 }
 0xc9b   :  { %7718 = vmatprep.subr.bf16.mxu0 %v9790_v48 }
 0xc9e   :  { %7719 = vmatpush1.bf16.msra.mxu0 %v9788_v50 }
 0xc9f   :  { %7720 = vmatprep.subr.bf16.mxu0 %v9793_v52 }
 0xca2   :  { %7721 = vmatpush1.bf16.msra.mxu0 %v9791_v53 }
 0xca3   :  { %7722 = vmatprep.subr.bf16.mxu0 %v9796_v5 }
 0xca6   :  { %7723 = vmatpush1.bf16.msra.mxu0 %v9794_v25 }
 0xca7   :  { %7724 = vmatprep.subr.bf16.mxu0 %v9799_v58 }
 0xcaa   :  { %7725 = vmatpush1.bf16.msra.mxu0 %v9797_v59 }
 0xcad   :  { %7727 = vmatmul.mubr.bf16.vlgmr.msra.gmra.mrb[24].mxu0 %v6788_v37 }
 0xd80   :  { %v7728_v28 = vpop.f32.mrb[24].mxu0 }
 0xd81   :  { %v8873_v61 = vadd.f32 %v7728_v28, %v6924_v51  ;;  %v7730_v62 = vpop.f32.mrb[25].mxu0 }
 0xd82   :  { %v8874_v18 = vadd.f32 %v7730_v62, %v6928_v46  ;;  %v7732_v8 = vpop.f32.mrb[26].mxu0 }
 0xd83   :  { %7735 = vst [vmem:[#allocation25] sm:$0xff] %v8873_v61  ;;  %v7733_v63 = vpop.f32.mrb[27].mxu0 }
 0xd84   :  { %7736 = vst [vmem:[#allocation25 + $0x8] sm:$0xff] %v8874_v18 }
 0xd85   :  { %10119 = shalt.err (!%p10116_p4)
}
 0xd86   :  { %s10120_s9 = scalar_lea.hbm %s10718_s14, 256 }
 0xd87   :  { %p10121_p5 = scmp.ne.s32.totalorder %s10718_s14, %s10120_s9  ;;  %p10124_p6 = scmp.lt.u32.totalorder %s10120_s9, %s10718_s14 }
 0xd89   :  { %p10126_p7 = pnand %p10124_p6, %p10121_p5 }
 0xd8b   :  { %10129 = shalt.err (!%p10126_p7)
}
 0xd8c   :  { %7746 = dma.vmem_to_hbm [thread:$0]  %s7744_s28, 256, %s10718_s14, [#allocation4]  }
 0xd8d   :  { %10146 = dma.done.wait [#allocation4], 256  }
 0xd8e   :  { %10147 = vsyncadd [#allocation4], 4294967040 }
 0xd8f   :  { %7750 = vsyncpa [#allocation3], 1 }
 0xd90   :  { %7751 = vsyncpa [#allocation6], 1 }
 0xd91   :  { %7752 = vsyncpa [#allocation9], 1 }
 0xd92   :  { %7753 = vsyncpa [#allocation12], 1 }
 0xd93   :  { %7754 = vsyncpa [#allocation15], 1 }
 0xd94   :  { %7755 = vsyncpa [#allocation18], 1 }
 0xd95   :  { %7756 = vsyncpa [#allocation21], 1 }
 0xd96   :  { %7757 = vsyncpa [#allocation24], 1 }
 0xd97   :  { %7758 = vsyncpa [#allocation4], 1 }

// kernel: tpu_custom_call.1
= control target key start
LH: loop header
LB: loop body
LE: loop exit
PB: predicated region body
PF: predicated region fallthrough
CT: control target
= control target key end

     0   :  { %19 = vsyncpa [#allocation3], 0  ;;  %s10704_s0 = inlined_call_operand.hbm [shape: bf16[8,256], index: 0, kind: input, shape index: {}]   ;;  %s10705_s1 = inlined_call_operand.hbm [shape: bf16[256,1024], index: 1, kind: input, shape index: {}]   ;;  %s10706_s2 = inlined_call_operand.hbm [shape: bf16[1024,512], index: 2, kind: input, shape index: {}]   ;;  %s10707_s3 = inlined_call_operand.hbm [shape: bf16[512,256], index: 3, kind: input, shape index: {}]   ;;  %s10708_s4 = inlined_call_operand.hbm [shape: bf16[256,128], index: 4, kind: input, shape index: {}]   ;;  %s10709_s5 = inlined_call_operand.hbm [shape: bf16[128,128], index: 5, kind: input, shape index: {}]   ;;  %s10710_s6 = inlined_call_operand.hbm [shape: bf16[128,128], index: 6, kind: input, shape index: {}]   ;;  %s10711_s7 = inlined_call_operand.hbm [shape: bf16[128,128], index: 7, kind: input, shape index: {}]   ;;  %s10712_s8 = inlined_call_operand.hbm [shape: bf16[128,128], index: 8, kind: input, shape index: {}]   ;;  %s10713_s9 = inlined_call_operand.hbm [shape: bf16[128,256], index: 9, kind: input, shape index: {}]   ;;  %s10714_s10 = inlined_call_operand.hbm [shape: bf16[256,512], index: 10, kind: input, shape index: {}]   ;;  %s10715_s11 = inlined_call_operand.hbm [shape: bf16[512,1024], index: 11, kind: input, shape index: {}]   ;;  %s10716_s12 = inlined_call_operand.hbm [shape: bf16[1024,256], index: 12, kind: input, shape index: {}]   ;;  %s10717_s13 = inlined_call_operand.hbm [shape: f32[12,1024], index: 13, kind: input, shape index: {}]   ;;  %s10718_s14 = inlined_call_operand.hbm [shape: f32[8,256], index: 14, kind: output, shape index: {}]  }
   0x1   :  { %20 = vsyncpa [#allocation6], 0 }
   0x2   :  { %21 = vsyncpa [#allocation9], 0 }
   0x3   :  { %22 = vsyncpa [#allocation12], 0 }
   0x4   :  { %23 = vsyncpa [#allocation15], 0 }
   0x5   :  { %24 = vsyncpa [#allocation18], 0 }
   0x6   :  { %25 = vsyncpa [#allocation21], 0 }
   0x7   :  { %26 = vsyncpa [#allocation24], 0 }
   0x8   :  { %27 = vsyncpa [#allocation4], 0  ;;  %s10148_s29 = smov [#allocation5]   ;;  %s9800_s17 = scalar_lea.hbm %s10705_s1, 16384 }
   0x9   :  { %s43_s30 = sshll.u32 %s10148_s29, 4  ;;  %p9801_p0 = scmp.ne.s32.totalorder %s10705_s1, %s9800_s17  ;;  %s44_s30 = int_to_ptr.vmem [resolvable:$true] %s43_s30 }
   0xa   :  { %p9804_p1 = scmp.lt.u32.totalorder %s9800_s17, %s10705_s1 }
   0xc   :  { %p9806_p2 = pnand %p9804_p1, %p9801_p0 }
   0xe   :  { %9809 = shalt.err (!%p9806_p2)
}
   0xf   :  { %s9810_s22 = scalar_lea.vmem %s44_s30, 16384  ;;  %p9815_p4 = scmp.lt.s32.totalorder %s44_s30, %s44_s30 }
  0x10   :  { %p9811_p3 = scmp.ne.s32.totalorder %s44_s30, %s9810_s22  ;;  %p9816_p5 = scmp.lt.s32.totalorder %s9810_s22, %s9810_s22 }
  0x12   :  { %p9817_p6 = por %p9816_p5, %p9815_p4 }
  0x14   :  { %p9818_p7 = pnand %p9817_p6, %p9811_p3 }
  0x16   :  { %9821 = shalt.err (!%p9818_p7)
}
  0x17   :  { %s10719_s23 = smov 512   ;;  %s10150_s24 = smov 32  }
  0x18   :  { %49 = dma.hbm_to_vmem [thread:$0]  %s10705_s1, 16384, %s44_s30, [#allocation6], %s10719_s23, %s10719_s23, %s10150_s24  }
  0x19   :  { %s10151_s27 = smov [#allocation8]   ;;  %s9822_s16 = scalar_lea.hbm %s10707_s3, 8192 }
  0x1a   :  { %s67_s28 = sshll.u32 %s10151_s27, 4  ;;  %p9823_p8 = scmp.ne.s32.totalorder %s10707_s3, %s9822_s16  ;;  %s68_s28 = int_to_ptr.vmem [resolvable:$true] %s67_s28 }
  0x1b   :  { %p9826_p9 = scmp.lt.u32.totalorder %s9822_s16, %s10707_s3 }
  0x1d   :  { %p9828_p10 = pnand %p9826_p9, %p9823_p8 }
  0x1f   :  { %9831 = shalt.err (!%p9828_p10)
}
  0x20   :  { %s9832_s21 = scalar_lea.vmem %s68_s28, 8192  ;;  %p9837_p12 = scmp.lt.s32.totalorder %s68_s28, %s68_s28 }
  0x21   :  { %p9833_p11 = scmp.ne.s32.totalorder %s68_s28, %s9832_s21  ;;  %p9838_p13 = scmp.lt.s32.totalorder %s9832_s21, %s9832_s21 }
  0x23   :  { %p9839_p0 = por %p9838_p13, %p9837_p12 }
  0x25   :  { %p9840_p1 = pnand %p9839_p0, %p9833_p11 }
  0x27   :  { %9843 = shalt.err (!%p9840_p1)
}
  0x28   :  { %s10152_s1 = smov 128   ;;  %s10153_s30 = smov 8  }
  0x29   :  { %73 = dma.hbm_to_vmem [thread:$0]  %s10707_s3, 8192, %s68_s28, [#allocation9], %s10152_s1, %s10152_s1, %s10153_s30  }
  0x2a   :  { %s10154_s26 = smov [#allocation11]   ;;  %s10155_s29 = smov [#allocation14]  }
  0x2b   :  { %s91_s27 = sshll.u32 %s10154_s26, 4  ;;  %s115_s15 = sshll.u32 %s10155_s29, 4  ;;  %s92_s27 = int_to_ptr.vmem [resolvable:$true] %s91_s27  ;;  %s10280_s15 = int_to_ptr.vmem [resolvable:$true] %s115_s15 }
  0x2c   :  { %s9844_s18 = scalar_lea.hbm %s10709_s5, 1024 }
  0x2d   :  { %p9845_p2 = scmp.ne.s32.totalorder %s10709_s5, %s9844_s18  ;;  %p9848_p3 = scmp.lt.u32.totalorder %s9844_s18, %s10709_s5 }
  0x2f   :  { %p9850_p4 = pnand %p9848_p3, %p9845_p2 }
  0x31   :  { %9853 = shalt.err (!%p9850_p4)
}
  0x32   :  { %s9854_s3 = scalar_lea.vmem %s92_s27, 1024  ;;  %p9859_p6 = scmp.lt.s32.totalorder %s92_s27, %s92_s27 }
  0x33   :  { %p9855_p5 = scmp.ne.s32.totalorder %s92_s27, %s9854_s3  ;;  %p9860_p7 = scmp.lt.s32.totalorder %s9854_s3, %s9854_s3 }
  0x35   :  { %p9861_p8 = por %p9860_p7, %p9859_p6 }
  0x37   :  { %p9862_p9 = pnand %p9861_p8, %p9855_p5 }
  0x39   :  { %9865 = shalt.err (!%p9862_p9)
}
  0x3a   :  { %s10156_s28 = smov 64   ;;  %s10157_s22 = smov 4  }
  0x3b   :  { %97 = dma.hbm_to_vmem [thread:$0]  %s10709_s5, 1024, %s92_s27, [#allocation12], %s10156_s28, %s10156_s28, %s10157_s22  }
  0x3c   :  { %s9866_s16 = scalar_lea.hbm %s10711_s7, 1024 }
  0x3d   :  { %p9867_p10 = scmp.ne.s32.totalorder %s10711_s7, %s9866_s16  ;;  %p9870_p11 = scmp.lt.u32.totalorder %s9866_s16, %s10711_s7 }
  0x3f   :  { %p9872_p12 = pnand %p9870_p11, %p9867_p10 }
  0x41   :  { %9875 = shalt.err (!%p9872_p12)
}
  0x42   :  { %s9876_s21 = scalar_lea.vmem %s10280_s15, 1024  ;;  %p9881_p0 = scmp.lt.s32.totalorder %s10280_s15, %s10280_s15 }
  0x43   :  { %p9877_p13 = scmp.ne.s32.totalorder %s10280_s15, %s9876_s21  ;;  %p9882_p1 = scmp.lt.s32.totalorder %s9876_s21, %s9876_s21 }
  0x45   :  { %p9883_p2 = por %p9882_p1, %p9881_p0 }
  0x47   :  { %p9884_p3 = pnand %p9883_p2, %p9877_p13 }
  0x49   :  { %9887 = shalt.err (!%p9884_p3)
}
  0x4a   :  { %121 = dma.hbm_to_vmem [thread:$0]  %s10711_s7, 1024, %s10280_s15, [#allocation15], %s10156_s28, %s10156_s28, %s10157_s22  }
  0x4b   :  { %s10158_s3 = smov [#allocation17]   ;;  %s10159_s26 = smov [#allocation20]  }
  0x4c   :  { %s139_s25 = sshll.u32 %s10158_s3, 4  ;;  %s163_s23 = sshll.u32 %s10159_s26, 4  ;;  %s140_s25 = int_to_ptr.vmem [resolvable:$true] %s139_s25  ;;  %s10317_s23 = int_to_ptr.vmem [resolvable:$true] %s163_s23 }
  0x4d   :  { %s9888_s17 = scalar_lea.hbm %s10713_s9, 2048 }
  0x4e   :  { %p9889_p4 = scmp.ne.s32.totalorder %s10713_s9, %s9888_s17  ;;  %p9892_p5 = scmp.lt.u32.totalorder %s9888_s17, %s10713_s9 }
  0x50   :  { %p9894_p6 = pnand %p9892_p5, %p9889_p4 }
  0x52   :  { %9897 = shalt.err (!%p9894_p6)
}
  0x53   :  { %s9898_s7 = scalar_lea.vmem %s140_s25, 2048  ;;  %p9903_p8 = scmp.lt.s32.totalorder %s140_s25, %s140_s25 }
  0x54   :  { %p9899_p7 = scmp.ne.s32.totalorder %s140_s25, %s9898_s7  ;;  %p9904_p9 = scmp.lt.s32.totalorder %s9898_s7, %s9898_s7 }
  0x56   :  { %p9905_p10 = por %p9904_p9, %p9903_p8 }
  0x58   :  { %p9906_p11 = pnand %p9905_p10, %p9899_p7 }
  0x5a   :  { %9909 = shalt.err (!%p9906_p11)
}
  0x5b   :  { %145 = dma.hbm_to_vmem [thread:$0]  %s10713_s9, 2048, %s140_s25, [#allocation18], %s10152_s1, %s10152_s1, %s10153_s30  }
  0x5c   :  { %s9910_s26 = scalar_lea.hbm %s10715_s11, 32768 }
  0x5d   :  { %p9911_p12 = scmp.ne.s32.totalorder %s10715_s11, %s9910_s26  ;;  %p9914_p13 = scmp.lt.u32.totalorder %s9910_s26, %s10715_s11 }
  0x5f   :  { %p9916_p0 = pnand %p9914_p13, %p9911_p12 }
  0x61   :  { %9919 = shalt.err (!%p9916_p0)
}
  0x62   :  { %s9920_s19 = scalar_lea.vmem %s10317_s23, 32768  ;;  %p9925_p2 = scmp.lt.s32.totalorder %s10317_s23, %s10317_s23 }
  0x63   :  { %p9921_p1 = scmp.ne.s32.totalorder %s10317_s23, %s9920_s19  ;;  %p9926_p3 = scmp.lt.s32.totalorder %s9920_s19, %s9920_s19 }
  0x65   :  { %p9927_p4 = por %p9926_p3, %p9925_p2 }
  0x67   :  { %p9928_p5 = pnand %p9927_p4, %p9921_p1 }
  0x69   :  { %9931 = shalt.err (!%p9928_p5)
}
  0x6a   :  { %s10720_s9 = smov 512   ;;  %s10160_s21 = smov [#allocation2]  }
  0x6b   :  { %169 = dma.hbm_to_vmem [thread:$0]  %s10715_s11, 32768, %s10317_s23, [#allocation21], %s10720_s9, %s10720_s9, %s10150_s24  }
  0x6c   :  { %s34_s7 = sshll.u32 %s10160_s21, 4  ;;  %s10161_s15 = smov [#allocation7]   ;;  %s35_s7 = int_to_ptr.vmem [resolvable:$true] %s34_s7 }
  0x6d   :  { %s55_s5 = sshll.u32 %s10161_s15, 4  ;;  %s9932_s26 = scalar_lea.hbm %s10704_s0, 128  ;;  %s10354_s5 = int_to_ptr.vmem [resolvable:$true] %s55_s5 }
  0x6e   :  { %p9933_p6 = scmp.ne.s32.totalorder %s10704_s0, %s9932_s26  ;;  %p9936_p7 = scmp.lt.u32.totalorder %s9932_s26, %s10704_s0 }
  0x70   :  { %p9938_p8 = pnand %p9936_p7, %p9933_p6 }
  0x72   :  { %9941 = shalt.err (!%p9938_p8)
}
  0x73   :  { %s9942_s11 = scalar_lea.vmem %s35_s7, 128  ;;  %p9947_p10 = scmp.lt.s32.totalorder %s35_s7, %s35_s7 }
  0x74   :  { %p9943_p9 = scmp.ne.s32.totalorder %s35_s7, %s9942_s11  ;;  %p9948_p11 = scmp.lt.s32.totalorder %s9942_s11, %s9942_s11 }
  0x76   :  { %p9949_p12 = por %p9948_p11, %p9947_p10 }
  0x78   :  { %p9950_p13 = pnand %p9949_p12, %p9943_p9 }
  0x7a   :  { %9953 = shalt.err (!%p9950_p13)
}
  0x7b   :  { %37 = dma.hbm_to_vmem [thread:$0]  %s10704_s0, 128, %s35_s7, [#allocation3]  }
  0x7c   :  { %s9954_s25 = scalar_lea.hbm %s10706_s2, 32768 }
  0x7d   :  { %p9955_p0 = scmp.ne.s32.totalorder %s10706_s2, %s9954_s25  ;;  %p9958_p1 = scmp.lt.u32.totalorder %s9954_s25, %s10706_s2 }
  0x7f   :  { %p9960_p2 = pnand %p9958_p1, %p9955_p0 }
  0x81   :  { %9963 = shalt.err (!%p9960_p2)
}
  0x82   :  { %s9964_s3 = scalar_lea.vmem %s10354_s5, 32768  ;;  %p9969_p4 = scmp.lt.s32.totalorder %s10354_s5, %s10354_s5 }
  0x83   :  { %p9965_p3 = scmp.ne.s32.totalorder %s10354_s5, %s9964_s3  ;;  %p9970_p5 = scmp.lt.s32.totalorder %s9964_s3, %s9964_s3 }
  0x85   :  { %p9971_p6 = por %p9970_p5, %p9969_p4 }
  0x87   :  { %p9972_p7 = pnand %p9971_p6, %p9965_p3 }
  0x89   :  { %9975 = shalt.err (!%p9972_p7)
}
  0x8a   :  { %s10162_s0 = smov 256   ;;  %s10163_s7 = smov 16  }
  0x8b   :  { %61 = dma.hbm_to_vmem [thread:$0]  %s10706_s2, 32768, %s10354_s5, [#allocation6], %s10162_s0, %s10162_s0, %s10163_s7  }
  0x8c   :  { %s10164_s16 = smov [#allocation10]   ;;  %s10165_s18 = smov [#allocation13]  }
  0x8d   :  { %s79_s17 = sshll.u32 %s10164_s16, 4  ;;  %s103_s11 = sshll.u32 %s10165_s18, 4  ;;  %s80_s17 = int_to_ptr.vmem [resolvable:$true] %s79_s17  ;;  %s10388_s11 = int_to_ptr.vmem [resolvable:$true] %s103_s11 }
  0x8e   :  { %s9976_s19 = scalar_lea.hbm %s10708_s4, 2048 }
  0x8f   :  { %p9977_p8 = scmp.ne.s32.totalorder %s10708_s4, %s9976_s19  ;;  %p9980_p9 = scmp.lt.u32.totalorder %s9976_s19, %s10708_s4 }
  0x91   :  { %p9982_p10 = pnand %p9980_p9, %p9977_p8 }
  0x93   :  { %9985 = shalt.err (!%p9982_p10)
}
  0x94   :  { %s9986_s2 = scalar_lea.vmem %s80_s17, 2048  ;;  %p9991_p12 = scmp.lt.s32.totalorder %s80_s17, %s80_s17 }
  0x95   :  { %p9987_p11 = scmp.ne.s32.totalorder %s80_s17, %s9986_s2  ;;  %p9992_p13 = scmp.lt.s32.totalorder %s9986_s2, %s9986_s2 }
  0x97   :  { %p9993_p0 = por %p9992_p13, %p9991_p12 }
  0x99   :  { %p9994_p1 = pnand %p9993_p0, %p9987_p11 }
  0x9b   :  { %9997 = shalt.err (!%p9994_p1)
}
  0x9c   :  { %85 = dma.hbm_to_vmem [thread:$0]  %s10708_s4, 2048, %s80_s17, [#allocation9], %s10156_s28, %s10156_s28, %s10157_s22  }
  0x9d   :  { %s9998_s26 = scalar_lea.hbm %s10710_s6, 1024 }
  0x9e   :  { %p9999_p2 = scmp.ne.s32.totalorder %s10710_s6, %s9998_s26  ;;  %p10002_p3 = scmp.lt.u32.totalorder %s9998_s26, %s10710_s6 }
  0xa0   :  { %p10004_p4 = pnand %p10002_p3, %p9999_p2 }
  0xa2   :  { %10007 = shalt.err (!%p10004_p4)
}
  0xa3   :  { %s10008_s23 = scalar_lea.vmem %s10388_s11, 1024  ;;  %p10013_p6 = scmp.lt.s32.totalorder %s10388_s11, %s10388_s11 }
  0xa4   :  { %p10009_p5 = scmp.ne.s32.totalorder %s10388_s11, %s10008_s23  ;;  %p10014_p7 = scmp.lt.s32.totalorder %s10008_s23, %s10008_s23 }
  0xa6   :  { %p10015_p8 = por %p10014_p7, %p10013_p6 }
  0xa8   :  { %p10016_p9 = pnand %p10015_p8, %p10009_p5 }
  0xaa   :  { %10019 = shalt.err (!%p10016_p9)
}
  0xab   :  { %109 = dma.hbm_to_vmem [thread:$0]  %s10710_s6, 1024, %s10388_s11, [#allocation12], %s10156_s28, %s10156_s28, %s10157_s22  }
  0xac   :  { %s10166_s19 = smov [#allocation16]   ;;  %s10167_s25 = smov [#allocation19]  }
  0xad   :  { %s127_s9 = sshll.u32 %s10166_s19, 4  ;;  %s151_s20 = sshll.u32 %s10167_s25, 4  ;;  %s128_s9 = int_to_ptr.vmem [resolvable:$true] %s127_s9  ;;  %s10425_s20 = int_to_ptr.vmem [resolvable:$true] %s151_s20 }
  0xae   :  { %s10020_s5 = scalar_lea.hbm %s10712_s8, 1024 }
  0xaf   :  { %p10021_p10 = scmp.ne.s32.totalorder %s10712_s8, %s10020_s5  ;;  %p10024_p11 = scmp.lt.u32.totalorder %s10020_s5, %s10712_s8 }
  0xb1   :  { %p10026_p12 = pnand %p10024_p11, %p10021_p10 }
  0xb3   :  { %10029 = shalt.err (!%p10026_p12)
}
  0xb4   :  { %s10030_s6 = scalar_lea.vmem %s128_s9, 1024  ;;  %p10035_p0 = scmp.lt.s32.totalorder %s128_s9, %s128_s9 }
  0xb5   :  { %p10031_p13 = scmp.ne.s32.totalorder %s128_s9, %s10030_s6  ;;  %p10036_p1 = scmp.lt.s32.totalorder %s10030_s6, %s10030_s6 }
  0xb7   :  { %p10037_p2 = por %p10036_p1, %p10035_p0 }
  0xb9   :  { %p10038_p3 = pnand %p10037_p2, %p10031_p13 }
  0xbb   :  { %10041 = shalt.err (!%p10038_p3)
}
  0xbc   :  { %133 = dma.hbm_to_vmem [thread:$0]  %s10712_s8, 1024, %s128_s9, [#allocation15], %s10156_s28, %s10156_s28, %s10157_s22  }
  0xbd   :  { %s10042_s24 = scalar_lea.hbm %s10714_s10, 8192 }
  0xbe   :  { %p10043_p4 = scmp.ne.s32.totalorder %s10714_s10, %s10042_s24  ;;  %p10046_p5 = scmp.lt.u32.totalorder %s10042_s24, %s10714_s10 }
  0xc0   :  { %p10048_p6 = pnand %p10046_p5, %p10043_p4 }
  0xc2   :  { %10051 = shalt.err (!%p10048_p6)
}
  0xc3   :  { %s10052_s25 = scalar_lea.vmem %s10425_s20, 8192  ;;  %p10057_p8 = scmp.lt.s32.totalorder %s10425_s20, %s10425_s20 }
  0xc4   :  { %p10053_p7 = scmp.ne.s32.totalorder %s10425_s20, %s10052_s25  ;;  %p10058_p9 = scmp.lt.s32.totalorder %s10052_s25, %s10052_s25 }
  0xc6   :  { %p10059_p10 = por %p10058_p9, %p10057_p8 }
  0xc8   :  { %p10060_p11 = pnand %p10059_p10, %p10053_p7 }
  0xca   :  { %10063 = shalt.err (!%p10060_p11)
}
  0xcb   :  { %157 = dma.hbm_to_vmem [thread:$0]  %s10714_s10, 8192, %s10425_s20, [#allocation18], %s10162_s0, %s10162_s0, %s10163_s7  }
  0xcc   :  { %s10168_s9 = smov [#allocation22]   ;;  %s10169_s2 = smov [#allocation23]  }
  0xcd   :  { %s175_s21 = sshll.u32 %s10168_s9, 4  ;;  %s187_s5 = sshll.u32 %s10169_s2, 4  ;;  %s176_s21 = int_to_ptr.vmem [resolvable:$true] %s175_s21  ;;  %s10462_s5 = int_to_ptr.vmem [resolvable:$true] %s187_s5 }
  0xce   :  { %s10064_s3 = scalar_lea.hbm %s10716_s12, 16384 }
  0xcf   :  { %p10065_p12 = scmp.ne.s32.totalorder %s10716_s12, %s10064_s3  ;;  %p10068_p13 = scmp.lt.u32.totalorder %s10064_s3, %s10716_s12 }
  0xd1   :  { %p10070_p0 = pnand %p10068_p13, %p10065_p12 }
  0xd3   :  { %10073 = shalt.err (!%p10070_p0)
}
  0xd4   :  { %s10074_s10 = scalar_lea.vmem %s176_s21, 16384  ;;  %p10079_p2 = scmp.lt.s32.totalorder %s176_s21, %s176_s21 }
  0xd5   :  { %p10075_p1 = scmp.ne.s32.totalorder %s176_s21, %s10074_s10  ;;  %p10080_p3 = scmp.lt.s32.totalorder %s10074_s10, %s10074_s10 }
  0xd7   :  { %p10081_p4 = por %p10080_p3, %p10079_p2 }
  0xd9   :  { %p10082_p5 = pnand %p10081_p4, %p10075_p1 }
  0xdb   :  { %10085 = shalt.err (!%p10082_p5)
}
  0xdc   :  { %181 = dma.hbm_to_vmem [thread:$0]  %s10716_s12, 16384, %s176_s21, [#allocation21], %s10152_s1, %s10152_s1, %s10153_s30  }
  0xdd   :  { %s10086_s18 = scalar_lea.hbm %s10717_s13, 2048 }
  0xde   :  { %p10087_p6 = scmp.ne.s32.totalorder %s10717_s13, %s10086_s18  ;;  %p10090_p7 = scmp.lt.u32.totalorder %s10086_s18, %s10717_s13 }
  0xe0   :  { %p10092_p8 = pnand %p10090_p7, %p10087_p6 }
  0xe2   :  { %10095 = shalt.err (!%p10092_p8)
}
  0xe3   :  { %s10096_s19 = scalar_lea.vmem %s10462_s5, 2048  ;;  %p10101_p10 = scmp.lt.s32.totalorder %s10462_s5, %s10462_s5 }
  0xe4   :  { %p10097_p9 = scmp.ne.s32.totalorder %s10462_s5, %s10096_s19  ;;  %p10102_p11 = scmp.lt.s32.totalorder %s10096_s19, %s10096_s19 }
  0xe6   :  { %p10103_p12 = por %p10102_p11, %p10101_p10 }
  0xe8   :  { %p10104_p13 = pnand %p10103_p12, %p10097_p9 }
  0xea   :  { %10107 = shalt.err (!%p10104_p13)
}
  0xeb   :  { %s10170_s12 = smov 1024  }
  0xec   :  { %193 = dma.hbm_to_vmem [thread:$0]  %s10717_s13, 2048, %s10462_s5, [#allocation24], %s10170_s12, %s10170_s12, %s10156_s28  }
  0xed   :  { %10130 = dma.done.wait [#allocation3], 128  }
  0xee   :  { %10131 = vsyncadd [#allocation3], 4294967168 }
  0xef   :  { %10132 = dma.done.wait [#allocation6], 49152  }
  0xf0   :  { %10133 = vsyncadd [#allocation6], 4294918144 }
  0xf1   :  { %10134 = dma.done.wait [#allocation9], 10240  }
  0xf2   :  { %10135 = vsyncadd [#allocation9], 4294957056 }
  0xf3   :  { %10136 = dma.done.wait [#allocation12], 2048  }
  0xf4   :  { %10137 = vsyncadd [#allocation12], 4294965248 }
  0xf5   :  { %10138 = dma.done.wait [#allocation15], 2048  }
  0xf6   :  { %10139 = vsyncadd [#allocation15], 4294965248 }
  0xf7   :  { %10140 = dma.done.wait [#allocation18], 10240  }
  0xf8   :  { %10141 = vsyncadd [#allocation18], 4294957056 }
  0xf9   :  { %10142 = dma.done.wait [#allocation21], 49152  }
  0xfa   :  { %10143 = vsyncadd [#allocation21], 4294918144 }
  0xfb   :  { %10144 = dma.done.wait [#allocation24], 2048  }
  0xfc   :  { %10145 = vsyncadd [#allocation24], 4294965248  ;;  %v238_v0 = vld [vmem:[#allocation5] sm:$0xff]  ;;  %v10497_v17 = vld [vmem:[#allocation2] sm:$0xff]  ;;  %vm10172_vm0 = vmmov 0   ;;  %s10174_s13 = smov [#allocation25]  }
  0xfd   :  { %v242_v1 = vld [vmem:[#allocation5 + $0x20] sm:$0xff]  ;;  %v10501_v18 = vcombine.high %v10497_v17, %v10497_v17  ;;  %s7743_s28 = sshll.u32 %s10174_s13, 4  ;;  %s7744_s28 = int_to_ptr.vmem [resolvable:$true] %s7743_s28 }
  0xfe   :  { %v246_v2 = vld [vmem:[#allocation5 + $0x40] sm:$0xff]  ;;  %v7762_v3 = vcombine.high %v238_v0, %v242_v1  ;;  %v7761_v4 = vcombine.low %v238_v0, %v242_v1  ;;  %v239_v0 = vld [vmem:[#allocation5 + $0x8] sm:$0xff]  ;;  %s10108_s25 = scalar_lea.vmem %s7744_s28, 256  ;;  %p10113_p1 = scmp.lt.s32.totalorder %s7744_s28, %s7744_s28 }
  0xff   :  { %v250_v5 = vld [vmem:[#allocation5 + $0x60] sm:$0xff]  ;;  %1089 = vmatprep.mubr.bf16.mxu1 %v10501_v18  ;;  %v243_v1 = vld [vmem:[#allocation5 + $0x28] sm:$0xff]  ;;  %p10109_p0 = scmp.ne.s32.totalorder %s7744_s28, %s10108_s25  ;;  %p10114_p2 = scmp.lt.s32.totalorder %s10108_s25, %s10108_s25 }
 0x100   :  { %v7770_v6 = vcombine.high %v246_v2, %v250_v5  ;;  %v254_v7 = vld [vmem:[#allocation5 + $0x80] sm:$0xff]  ;;  %1057 = vmatprep.subr.bf16.mxu1 %v7762_v3  ;;  %v7769_v9 = vcombine.low %v246_v2, %v250_v5  ;;  %v251_v5 = vld [vmem:[#allocation5 + $0x68] sm:$0xff] }
 0x101   :  { %v258_v8 = vld [vmem:[#allocation5 + $0xa0] sm:$0xff]  ;;  %1058 = vmatpush1.bf16.msra.mxu1 %v7761_v4  ;;  %v247_v4 = vld [vmem:[#allocation5 + $0x48] sm:$0xff]  ;;  %p10115_p3 = por %p10114_p2, %p10113_p1 }
 0x102   :  { %1059 = vmatprep.subr.bf16.mxu1 %v7770_v6  ;;  %v7778_v10 = vcombine.high %v254_v7, %v258_v8  ;;  %v262_v11 = vld [vmem:[#allocation5 + $0xc0] sm:$0xff]  ;;  %v7777_v13 = vcombine.low %v254_v7, %v258_v8  ;;  %v7764_v6 = vcombine.high %v239_v0, %v243_v1  ;;  %v10506_v7 = vcombine.low %v10497_v17, %v10497_v17  ;;  %v271_v17 = vld [vmem:[#allocation5 + $0x108] sm:$0xff] }
 0x103   :  { %v266_v12 = vld [vmem:[#allocation5 + $0xe0] sm:$0xff]  ;;  %v7763_v8 = vcombine.low %v239_v0, %v243_v1  ;;  %p10116_p4 = pnand %p10115_p3, %p10109_p0 }
 0x104   :  { %v7786_v14 = vcombine.high %v262_v11, %v266_v12  ;;  %v270_v15 = vld [vmem:[#allocation5 + $0x100] sm:$0xff]  ;;  %v7785_v19 = vcombine.low %v262_v11, %v266_v12  ;;  %v7772_v11 = vcombine.high %v247_v4, %v251_v5  ;;  %v7771_v12 = vcombine.low %v247_v4, %v251_v5  ;;  %v351_v4 = vld [vmem:[#allocation5 + $0x388] sm:$0xff] }
 0x105   :  { %1060 = vmatpush1.bf16.msra.mxu1 %v7769_v9  ;;  %v274_v16 = vld [vmem:[#allocation5 + $0x120] sm:$0xff]  ;;  %v255_v9 = vld [vmem:[#allocation5 + $0x88] sm:$0xff] }
 0x106   :  { %1061 = vmatprep.subr.bf16.mxu1 %v7778_v10  ;;  %v7794_v20 = vcombine.high %v270_v15, %v274_v16  ;;  %v278_v21 = vld [vmem:[#allocation5 + $0x140] sm:$0xff]  ;;  %v7793_v23 = vcombine.low %v270_v15, %v274_v16  ;;  %v259_v10 = vld [vmem:[#allocation5 + $0xa8] sm:$0xff] }
 0x107   :  { %v282_v22 = vld [vmem:[#allocation5 + $0x160] sm:$0xff]  ;;  %v7780_v15 = vcombine.high %v255_v9, %v259_v10  ;;  %v7779_v16 = vcombine.low %v255_v9, %v259_v10  ;;  %v355_v5 = vld [vmem:[#allocation5 + $0x3a8] sm:$0xff] }
 0x108   :  { %v7802_v24 = vcombine.high %v278_v21, %v282_v22  ;;  %v286_v25 = vld [vmem:[#allocation5 + $0x180] sm:$0xff]  ;;  %v7801_v27 = vcombine.low %v278_v21, %v282_v22  ;;  %v279_v22 = vld [vmem:[#allocation5 + $0x148] sm:$0xff] }
 0x109   :  { %1062 = vmatpush1.bf16.msra.mxu1 %v7777_v13  ;;  %v290_v26 = vld [vmem:[#allocation5 + $0x1a0] sm:$0xff]  ;;  %v263_v13 = vld [vmem:[#allocation5 + $0xc8] sm:$0xff] }
 0x10a   :  { %1063 = vmatprep.subr.bf16.mxu1 %v7786_v14  ;;  %v7810_v28 = vcombine.high %v286_v25, %v290_v26  ;;  %v294_v29 = vld [vmem:[#allocation5 + $0x1c0] sm:$0xff]  ;;  %v7809_v31 = vcombine.low %v286_v25, %v290_v26  ;;  %v267_v14 = vld [vmem:[#allocation5 + $0xe8] sm:$0xff] }
 0x10b   :  { %v298_v30 = vld [vmem:[#allocation5 + $0x1e0] sm:$0xff]  ;;  %v7787_v21 = vcombine.low %v263_v13, %v267_v14  ;;  %v287_v26 = vld [vmem:[#allocation5 + $0x188] sm:$0xff] }
 0x10c   :  { %v7818_v32 = vcombine.high %v294_v29, %v298_v30  ;;  %v302_v33 = vld [vmem:[#allocation5 + $0x200] sm:$0xff]  ;;  %v7817_v35 = vcombine.low %v294_v29, %v298_v30  ;;  %v295_v30 = vld [vmem:[#allocation5 + $0x1c8] sm:$0xff] }
 0x10d   :  { %1064 = vmatpush1.bf16.msra.mxu1 %v7785_v19  ;;  %v306_v34 = vld [vmem:[#allocation5 + $0x220] sm:$0xff]  ;;  %v275_v19 = vld [vmem:[#allocation5 + $0x128] sm:$0xff] }
 0x10e   :  { %1065 = vmatprep.subr.bf16.mxu1 %v7794_v20  ;;  %v310_v36 = vld [vmem:[#allocation5 + $0x240] sm:$0xff]  ;;  %v7826_v38 = vcombine.high %v302_v33, %v306_v34  ;;  %v7825_v39 = vcombine.low %v302_v33, %v306_v34  ;;  %v7788_v20 = vcombine.high %v263_v13, %v267_v14  ;;  %v7795_v25 = vcombine.low %v271_v17, %v275_v19  ;;  %v303_v34 = vld [vmem:[#allocation5 + $0x208] sm:$0xff] }
 0x10f   :  { %v314_v37 = vld [vmem:[#allocation5 + $0x260] sm:$0xff]  ;;  %v7876_v13 = vcombine.high %v351_v4, %v355_v5 }
 0x110   :  { %v318_v40 = vld [vmem:[#allocation5 + $0x280] sm:$0xff]  ;;  %v7834_v42 = vcombine.high %v310_v36, %v314_v37  ;;  %v7833_v43 = vcombine.low %v310_v36, %v314_v37 }
 0x111   :  { %1066 = vmatpush1.bf16.msra.mxu1 %v7793_v23  ;;  %v322_v41 = vld [vmem:[#allocation5 + $0x2a0] sm:$0xff]  ;;  %v283_v23 = vld [vmem:[#allocation5 + $0x168] sm:$0xff] }
 0x112   :  { %1067 = vmatprep.subr.bf16.mxu1 %v7802_v24  ;;  %v326_v44 = vld [vmem:[#allocation5 + $0x2c0] sm:$0xff]  ;;  %v7842_v46 = vcombine.high %v318_v40, %v322_v41  ;;  %v7841_v47 = vcombine.low %v318_v40, %v322_v41  ;;  %v7796_v24 = vcombine.high %v271_v17, %v275_v19  ;;  %v7803_v29 = vcombine.low %v279_v22, %v283_v23  ;;  %v240_v17 = vld [vmem:[#allocation5 + $0x10] sm:$0xff] }
 0x113   :  { %v330_v45 = vld [vmem:[#allocation5 + $0x2e0] sm:$0xff]  ;;  %v244_v19 = vld [vmem:[#allocation5 + $0x30] sm:$0xff] }
 0x114   :  { %v334_v48 = vld [vmem:[#allocation5 + $0x300] sm:$0xff]  ;;  %v7850_v50 = vcombine.high %v326_v44, %v330_v45  ;;  %v7849_v51 = vcombine.low %v326_v44, %v330_v45  ;;  %v319_v44 = vld [vmem:[#allocation5 + $0x288] sm:$0xff] }
 0x115   :  { %1068 = vmatpush1.bf16.msra.mxu1 %v7801_v27  ;;  %v338_v49 = vld [vmem:[#allocation5 + $0x320] sm:$0xff]  ;;  %v291_v27 = vld [vmem:[#allocation5 + $0x1a8] sm:$0xff] }
 0x116   :  { %1069 = vmatprep.subr.bf16.mxu1 %v7810_v28  ;;  %v342_v52 = vld [vmem:[#allocation5 + $0x340] sm:$0xff]  ;;  %v7858_v54 = vcombine.high %v334_v48, %v338_v49  ;;  %v7857_v55 = vcombine.low %v334_v48, %v338_v49  ;;  %v7804_v28 = vcombine.high %v279_v22, %v283_v23  ;;  %v7811_v33 = vcombine.low %v287_v26, %v291_v27  ;;  %v323_v45 = vld [vmem:[#allocation5 + $0x2a8] sm:$0xff] }
 0x117   :  { %v346_v53 = vld [vmem:[#allocation5 + $0x360] sm:$0xff] }
 0x118   :  { %v350_v56 = vld [vmem:[#allocation5 + $0x380] sm:$0xff]  ;;  %v7866_v58 = vcombine.high %v342_v52, %v346_v53  ;;  %v7865_v59 = vcombine.low %v342_v52, %v346_v53  ;;  %v7844_v52 = vcombine.high %v319_v44, %v323_v45 }
 0x119   :  { %1070 = vmatpush1.bf16.msra.mxu1 %v7809_v31  ;;  %v354_v57 = vld [vmem:[#allocation5 + $0x3a0] sm:$0xff]  ;;  %v299_v31 = vld [vmem:[#allocation5 + $0x1e8] sm:$0xff] }
 0x11a   :  { %1071 = vmatprep.subr.bf16.mxu1 %v7818_v32  ;;  %v358_v60 = vld [vmem:[#allocation5 + $0x3c0] sm:$0xff]  ;;  %v7874_v62 = vcombine.high %v350_v56, %v354_v57  ;;  %v7873_v63 = vcombine.low %v350_v56, %v354_v57  ;;  %v7812_v32 = vcombine.high %v287_v26, %v291_v27  ;;  %v7820_v36 = vcombine.high %v295_v30, %v299_v31  ;;  %v335_v56 = vld [vmem:[#allocation5 + $0x308] sm:$0xff] }
 0x11b   :  { %v362_v61 = vld [vmem:[#allocation5 + $0x3e0] sm:$0xff]  ;;  %v7819_v37 = vcombine.low %v295_v30, %v299_v31  ;;  %v339_v57 = vld [vmem:[#allocation5 + $0x328] sm:$0xff]  ;;  %v7766_v26 = vcombine.high %v240_v17, %v244_v19  ;;  %v256_v31 = vld [vmem:[#allocation5 + $0x90] sm:$0xff] }
 0x11c   :  { %v7882_v2 = vcombine.high %v358_v60, %v362_v61  ;;  %v7881_v3 = vcombine.low %v358_v60, %v362_v61  ;;  %v8960_v41 = vld [vmem:[#allocation7 + $0x4] ss:$16 sps:$4 sm:$0xff]   ;;  %v8965_v48 = vld [vmem:[#allocation7 + $0x20] ss:$16 sps:$4 sm:$0xff]   ;;  %v7860_v0 = vcombine.high %v335_v56, %v339_v57 }
 0x11d   :  { %1072 = vmatpush1.bf16.msra.mxu1 %v7817_v35  ;;  %v307_v35 = vld [vmem:[#allocation5 + $0x228] sm:$0xff]  ;;  %2796 = vmatprep.subr.bf16.mxu0 %v8960_v41  ;;  %v8966_v53 = vld [vmem:[#allocation7 + $0x44] ss:$16 sps:$4 sm:$0xff]   ;;  %v8971_v60 = vld [vmem:[#allocation7 + $0x60] ss:$16 sps:$4 sm:$0xff]  }
 0x11e   :  { %1073 = vmatprep.subr.bf16.mxu1 %v7826_v38  ;;  %v311_v38 = vld [vmem:[#allocation5 + $0x248] sm:$0xff]  ;;  %v7828_v40 = vcombine.high %v303_v34, %v307_v35  ;;  %v8972_v1 = vld [vmem:[#allocation7 + $0x84] ss:$16 sps:$4 sm:$0xff]   ;;  %v8977_v9 = vld [vmem:[#allocation7 + $0xa0] ss:$16 sps:$4 sm:$0xff]  }
 0x11f   :  { %v8978_v14 = vld [vmem:[#allocation7 + $0xc4] ss:$16 sps:$4 sm:$0xff]   ;;  %v8983_v22 = vld [vmem:[#allocation7 + $0xe0] ss:$16 sps:$4 sm:$0xff]  }
 0x120   :  { %v8984_v27 = vld [vmem:[#allocation7 + $0x104] ss:$16 sps:$4 sm:$0xff]  }
 0x121   :  { %1074 = vmatpush1.bf16.msra.mxu1 %v7825_v39  ;;  %v315_v39 = vld [vmem:[#allocation5 + $0x268] sm:$0xff] }
 0x122   :  { %1075 = vmatprep.subr.bf16.mxu1 %v7834_v42  ;;  %v8962_v42 = vld [vmem:[#allocation7] ss:$16 sps:$4 sm:$0xff]   ;;  %v7835_v49 = vcombine.low %v311_v38, %v315_v39 }
 0x123   :  { %2797 = vmatpush1.bf16.msra.mxu0 %v8962_v42  ;;  %v272_v42 = vld [vmem:[#allocation5 + $0x110] sm:$0xff] }
 0x125   :  { %1076 = vmatpush1.bf16.msra.mxu1 %v7833_v43  ;;  %v7827_v43 = vcombine.low %v303_v34, %v307_v35  ;;  %v8992_v34 = vld [vmem:[#allocation7 + $0x120] ss:$16 sps:$4 sm:$0xff]  }
 0x126   :  { %1077 = vmatprep.subr.bf16.mxu1 %v7842_v46  ;;  %v7836_v46 = vcombine.high %v311_v38, %v315_v39  ;;  %v8993_v38 = vld [vmem:[#allocation7 + $0x144] ss:$16 sps:$4 sm:$0xff]  }
 0x129   :  { %1078 = vmatpush1.bf16.msra.mxu1 %v7841_v47  ;;  %v8963_v47 = vld [vmem:[#allocation7 + $0x24] ss:$16 sps:$4 sm:$0xff]  }
 0x12a   :  { %1079 = vmatprep.subr.bf16.mxu1 %v7850_v50  ;;  %2798 = vmatprep.subr.bf16.mxu0 %v8963_v47  ;;  %v327_v50 = vld [vmem:[#allocation5 + $0x2c8] sm:$0xff] }
 0x12b   :  { %2799 = vmatpush1.bf16.msra.mxu0 %v8965_v48  ;;  %v280_v48 = vld [vmem:[#allocation5 + $0x150] sm:$0xff] }
 0x12c   :  { %2800 = vmatprep.subr.bf16.mxu0 %v8966_v53 }
 0x12d   :  { %1080 = vmatpush1.bf16.msra.mxu1 %v7849_v51  ;;  %v331_v51 = vld [vmem:[#allocation5 + $0x2e8] sm:$0xff] }
 0x12e   :  { %1081 = vmatprep.subr.bf16.mxu1 %v7858_v54  ;;  %v8968_v54 = vld [vmem:[#allocation7 + $0x40] ss:$16 sps:$4 sm:$0xff]   ;;  %v7851_v61 = vcombine.low %v327_v50, %v331_v51 }
 0x12f   :  { %2801 = vmatpush1.bf16.msra.mxu0 %v8968_v54  ;;  %v288_v54 = vld [vmem:[#allocation5 + $0x190] sm:$0xff] }
 0x131   :  { %1082 = vmatpush1.bf16.msra.mxu1 %v7857_v55  ;;  %v7843_v55 = vcombine.low %v319_v44, %v323_v45  ;;  %v8999_v44 = vld [vmem:[#allocation7 + $0x164] ss:$16 sps:$4 sm:$0xff]  }
 0x132   :  { %1083 = vmatprep.subr.bf16.mxu1 %v7866_v58  ;;  %v7852_v58 = vcombine.high %v327_v50, %v331_v51  ;;  %v9005_v50 = vld [vmem:[#allocation7 + $0x184] ss:$16 sps:$4 sm:$0xff]  }
 0x135   :  { %1084 = vmatpush1.bf16.msra.mxu1 %v7865_v59  ;;  %v8969_v59 = vld [vmem:[#allocation7 + $0x64] ss:$16 sps:$4 sm:$0xff]  }
 0x136   :  { %1085 = vmatprep.subr.bf16.mxu1 %v7874_v62  ;;  %2802 = vmatprep.subr.bf16.mxu0 %v8969_v59  ;;  %v343_v62 = vld [vmem:[#allocation5 + $0x348] sm:$0xff] }
 0x137   :  { %2803 = vmatpush1.bf16.msra.mxu0 %v8971_v60 }
 0x138   :  { %2804 = vmatprep.subr.bf16.mxu0 %v8972_v1 }
 0x139   :  { %1086 = vmatpush1.bf16.msra.mxu1 %v7873_v63  ;;  %v347_v63 = vld [vmem:[#allocation5 + $0x368] sm:$0xff] }
 0x13a   :  { %1087 = vmatprep.subr.bf16.mxu1 %v7882_v2  ;;  %v8974_v2 = vld [vmem:[#allocation7 + $0x80] ss:$16 sps:$4 sm:$0xff]   ;;  %v7867_v10 = vcombine.low %v343_v62, %v347_v63 }
 0x13b   :  { %2805 = vmatpush1.bf16.msra.mxu0 %v8974_v2 }
 0x13d   :  { %1088 = vmatpush1.bf16.msra.mxu1 %v7881_v3  ;;  %v7859_v3 = vcombine.low %v335_v56, %v339_v57  ;;  %v9011_v56 = vld [vmem:[#allocation7 + $0x1a4] ss:$16 sps:$4 sm:$0xff]  }
 0x13e   :  { %1098 = vmatprep.subr.bf16.mxu1 %v7764_v6  ;;  %v7868_v6 = vcombine.high %v343_v62, %v347_v63  ;;  %v9017_v62 = vld [vmem:[#allocation7 + $0x1c4] ss:$16 sps:$4 sm:$0xff]  }
 0x13f   :  { %v300_v63 = vld [vmem:[#allocation5 + $0x1f0] sm:$0xff] }
 0x140   :  { %1090 = vmatmul.mubr.bf16.vlgmr.msra.gmra.mrb[0].mxu1 %v10506_v7 }
 0x141   :  { %1099 = vmatpush1.bf16.msra.mxu1 %v7763_v8  ;;  %1130 = vmatprep.mubr.bf16.mxu1 %v10501_v18  ;;  %v8975_v8 = vld [vmem:[#allocation7 + $0xa4] ss:$16 sps:$4 sm:$0xff]  }
 0x142   :  { %1100 = vmatprep.subr.bf16.mxu1 %v7772_v11  ;;  %2806 = vmatprep.subr.bf16.mxu0 %v8975_v8  ;;  %v359_v11 = vld [vmem:[#allocation5 + $0x3c8] sm:$0xff] }
 0x143   :  { %2807 = vmatpush1.bf16.msra.mxu0 %v8977_v9 }
 0x144   :  { %2808 = vmatprep.subr.bf16.mxu0 %v8978_v14 }
 0x145   :  { %1101 = vmatpush1.bf16.msra.mxu1 %v7771_v12  ;;  %v363_v12 = vld [vmem:[#allocation5 + $0x3e8] sm:$0xff] }
 0x146   :  { %1102 = vmatprep.subr.bf16.mxu1 %v7780_v15  ;;  %v8980_v15 = vld [vmem:[#allocation7 + $0xc0] ss:$16 sps:$4 sm:$0xff]   ;;  %v7883_v23 = vcombine.low %v359_v11, %v363_v12 }
 0x147   :  { %2809 = vmatpush1.bf16.msra.mxu0 %v8980_v15  ;;  %v320_v15 = vld [vmem:[#allocation5 + $0x290] sm:$0xff] }
 0x149   :  { %1103 = vmatpush1.bf16.msra.mxu1 %v7779_v16  ;;  %v7875_v16 = vcombine.low %v351_v4, %v355_v5  ;;  %v9023_v4 = vld [vmem:[#allocation7 + $0x1e4] ss:$16 sps:$4 sm:$0xff]  }
 0x14a   :  { %1104 = vmatprep.subr.bf16.mxu1 %v7788_v20  ;;  %v7884_v20 = vcombine.high %v359_v11, %v363_v12  ;;  %v308_v5 = vld [vmem:[#allocation5 + $0x230] sm:$0xff] }
 0x14b   :  { %v312_v11 = vld [vmem:[#allocation5 + $0x250] sm:$0xff] }
 0x14c   :  { %v316_v12 = vld [vmem:[#allocation5 + $0x270] sm:$0xff] }
 0x14d   :  { %1105 = vmatpush1.bf16.msra.mxu1 %v7787_v21  ;;  %v8981_v21 = vld [vmem:[#allocation7 + $0xe4] ss:$16 sps:$4 sm:$0xff]   ;;  %v7838_v14 = vcombine.high %v312_v11, %v316_v12 }
 0x14e   :  { %1106 = vmatprep.subr.bf16.mxu1 %v7796_v24  ;;  %2810 = vmatprep.subr.bf16.mxu0 %v8981_v21  ;;  %v248_v24 = vld [vmem:[#allocation5 + $0x50] sm:$0xff] }
 0x14f   :  { %2811 = vmatpush1.bf16.msra.mxu0 %v8983_v22  ;;  %v332_v21 = vld [vmem:[#allocation5 + $0x2f0] sm:$0xff] }
 0x150   :  { %2812 = vmatprep.subr.bf16.mxu0 %v8984_v27 }
 0x151   :  { %1107 = vmatpush1.bf16.msra.mxu1 %v7795_v25  ;;  %v252_v25 = vld [vmem:[#allocation5 + $0x70] sm:$0xff] }
 0x152   :  { %1108 = vmatprep.subr.bf16.mxu1 %v7804_v28  ;;  %v8986_v28 = vld [vmem:[#allocation7 + $0x100] ss:$16 sps:$4 sm:$0xff]   ;;  %v7774_v30 = vcombine.high %v248_v24, %v252_v25  ;;  %v7773_v35 = vcombine.low %v248_v24, %v252_v25 }
 0x153   :  { %2813 = vmatpush1.bf16.msra.mxu0 %v8986_v28  ;;  %v336_v24 = vld [vmem:[#allocation5 + $0x310] sm:$0xff] }
 0x154   :  { %v340_v25 = vld [vmem:[#allocation5 + $0x330] sm:$0xff] }
 0x155   :  { %1109 = vmatpush1.bf16.msra.mxu1 %v7803_v29  ;;  %v7765_v29 = vcombine.low %v240_v17, %v244_v19  ;;  %v7837_v17 = vcombine.low %v312_v11, %v316_v12  ;;  %v7862_v27 = vcombine.high %v336_v24, %v340_v25  ;;  %v344_v28 = vld [vmem:[#allocation5 + $0x350] sm:$0xff]  ;;  %v313_v12 = vld [vmem:[#allocation5 + $0x258] sm:$0xff] }
 0x156   :  { %1110 = vmatprep.subr.bf16.mxu1 %v7812_v32  ;;  %v8987_v32 = vld [vmem:[#allocation7 + $0x124] ss:$16 sps:$4 sm:$0xff]  }
 0x157   :  { %2814 = vmatprep.subr.bf16.mxu0 %v8987_v32  ;;  %v352_v32 = vld [vmem:[#allocation5 + $0x390] sm:$0xff] }
 0x158   :  { %2815 = vmatpush1.bf16.msra.mxu0 %v8992_v34 }
 0x159   :  { %1111 = vmatpush1.bf16.msra.mxu1 %v7811_v33  ;;  %v260_v33 = vld [vmem:[#allocation5 + $0xb0] sm:$0xff]  ;;  %2816 = vmatprep.subr.bf16.mxu0 %v8993_v38 }
 0x15a   :  { %1112 = vmatprep.subr.bf16.mxu1 %v7820_v36  ;;  %v264_v36 = vld [vmem:[#allocation5 + $0xd0] sm:$0xff]  ;;  %v7782_v39 = vcombine.high %v256_v31, %v260_v33  ;;  %v7781_v41 = vcombine.low %v256_v31, %v260_v33 }
 0x15b   :  { %v356_v33 = vld [vmem:[#allocation5 + $0x3b0] sm:$0xff] }
 0x15c   :  { %v7877_v38 = vcombine.low %v352_v32, %v356_v33 }
 0x15d   :  { %1113 = vmatpush1.bf16.msra.mxu1 %v7819_v37  ;;  %v268_v37 = vld [vmem:[#allocation5 + $0xf0] sm:$0xff] }
 0x15e   :  { %1114 = vmatprep.subr.bf16.mxu1 %v7828_v40  ;;  %v8998_v40 = vld [vmem:[#allocation7 + $0x140] ss:$16 sps:$4 sm:$0xff]   ;;  %v7790_v45 = vcombine.high %v264_v36, %v268_v37  ;;  %v7789_v47 = vcombine.low %v264_v36, %v268_v37 }
 0x15f   :  { %2817 = vmatpush1.bf16.msra.mxu0 %v8998_v40  ;;  %v360_v36 = vld [vmem:[#allocation5 + $0x3d0] sm:$0xff]  ;;  %v241_v40 = vld [vmem:[#allocation5 + $0x18] sm:$0xff] }
 0x160   :  { %2818 = vmatprep.subr.bf16.mxu0 %v8999_v44  ;;  %v364_v37 = vld [vmem:[#allocation5 + $0x3f0] sm:$0xff]  ;;  %v249_v44 = vld [vmem:[#allocation5 + $0x58] sm:$0xff] }
 0x161   :  { %1115 = vmatpush1.bf16.msra.mxu1 %v7827_v43  ;;  %v276_v43 = vld [vmem:[#allocation5 + $0x130] sm:$0xff] }
 0x162   :  { %1116 = vmatprep.subr.bf16.mxu1 %v7836_v46  ;;  %v9004_v46 = vld [vmem:[#allocation7 + $0x160] ss:$16 sps:$4 sm:$0xff]   ;;  %v7798_v51 = vcombine.high %v272_v42, %v276_v43  ;;  %v7797_v53 = vcombine.low %v272_v42, %v276_v43  ;;  %v7885_v42 = vcombine.low %v360_v36, %v364_v37 }
 0x163   :  { %2819 = vmatpush1.bf16.msra.mxu0 %v9004_v46 }
 0x164   :  { %2820 = vmatprep.subr.bf16.mxu0 %v9005_v50 }
 0x165   :  { %1117 = vmatpush1.bf16.msra.mxu1 %v7835_v49  ;;  %v284_v49 = vld [vmem:[#allocation5 + $0x170] sm:$0xff] }
 0x166   :  { %1118 = vmatprep.subr.bf16.mxu1 %v7844_v52  ;;  %v9010_v52 = vld [vmem:[#allocation7 + $0x180] ss:$16 sps:$4 sm:$0xff]   ;;  %v7806_v57 = vcombine.high %v280_v48, %v284_v49  ;;  %v7805_v59 = vcombine.low %v280_v48, %v284_v49  ;;  %v257_v48 = vld [vmem:[#allocation5 + $0x98] sm:$0xff] }
 0x167   :  { %2821 = vmatpush1.bf16.msra.mxu0 %v9010_v52  ;;  %v261_v49 = vld [vmem:[#allocation5 + $0xb8] sm:$0xff] }
 0x168   :  { %2822 = vmatprep.subr.bf16.mxu0 %v9011_v56  ;;  %v265_v52 = vld [vmem:[#allocation5 + $0xd8] sm:$0xff] }
 0x169   :  { %1119 = vmatpush1.bf16.msra.mxu1 %v7843_v55  ;;  %v292_v55 = vld [vmem:[#allocation5 + $0x1b0] sm:$0xff]  ;;  %v273_v56 = vld [vmem:[#allocation5 + $0x118] sm:$0xff] }
 0x16a   :  { %1120 = vmatprep.subr.bf16.mxu1 %v7852_v58  ;;  %v9016_v58 = vld [vmem:[#allocation7 + $0x1a0] ss:$16 sps:$4 sm:$0xff]   ;;  %v7814_v60 = vcombine.high %v288_v54, %v292_v55  ;;  %v7813_v1 = vcombine.low %v288_v54, %v292_v55  ;;  %v7783_v54 = vcombine.low %v257_v48, %v261_v49 }
 0x16b   :  { %2823 = vmatpush1.bf16.msra.mxu0 %v9016_v58 }
 0x16c   :  { %2824 = vmatprep.subr.bf16.mxu0 %v9017_v62 }
 0x16d   :  { %1121 = vmatpush1.bf16.msra.mxu1 %v7851_v61  ;;  %v296_v61 = vld [vmem:[#allocation5 + $0x1d0] sm:$0xff] }
 0x16e   :  { %1122 = vmatprep.subr.bf16.mxu1 %v7860_v0  ;;  %v9022_v0 = vld [vmem:[#allocation7 + $0x1c0] ss:$16 sps:$4 sm:$0xff]   ;;  %v7822_v2 = vcombine.high %v296_v61, %v300_v63  ;;  %v7821_v8 = vcombine.low %v296_v61, %v300_v63  ;;  %v285_v61 = vld [vmem:[#allocation5 + $0x178] sm:$0xff] }
 0x16f   :  { %2825 = vmatpush1.bf16.msra.mxu0 %v9022_v0  ;;  %v289_v63 = vld [vmem:[#allocation5 + $0x198] sm:$0xff] }
 0x170   :  { %2826 = vmatprep.subr.bf16.mxu0 %v9023_v4  ;;  %v293_v0 = vld [vmem:[#allocation5 + $0x1b8] sm:$0xff] }
 0x171   :  { %1123 = vmatpush1.bf16.msra.mxu1 %v7859_v3  ;;  %v304_v3 = vld [vmem:[#allocation5 + $0x210] sm:$0xff]  ;;  %v301_v4 = vld [vmem:[#allocation5 + $0x1f8] sm:$0xff] }
 0x172   :  { %1124 = vmatprep.subr.bf16.mxu1 %v7868_v6  ;;  %v9028_v6 = vld [vmem:[#allocation7 + $0x1e0] ss:$16 sps:$4 sm:$0xff]   ;;  %v7830_v9 = vcombine.high %v304_v3, %v308_v5 }
 0x173   :  { %2827 = vmatpush1.bf16.msra.mxu0 %v9028_v6 }
 0x175   :  { %1125 = vmatpush1.bf16.msra.mxu1 %v7867_v10  ;;  %v9031_v10 = vld [vmem:[#allocation7 + $0x204] ss:$16 sps:$4 sm:$0xff]  }
 0x176   :  { %1126 = vmatprep.subr.bf16.mxu1 %v7876_v13  ;;  %2837 = vmatprep.subr.bf16.mxu0 %v9031_v10  ;;  %v7829_v13 = vcombine.low %v304_v3, %v308_v5  ;;  %v297_v3 = vld [vmem:[#allocation5 + $0x1d8] sm:$0xff]  ;;  %v7815_v5 = vcombine.low %v289_v63, %v293_v0 }
 0x177   :  { %v7824_v6 = vcombine.high %v297_v3, %v301_v4  ;;  %v7823_v10 = vcombine.low %v297_v3, %v301_v4 }
 0x179   :  { %1127 = vmatpush1.bf16.msra.mxu1 %v7875_v16  ;;  %v324_v16 = vld [vmem:[#allocation5 + $0x2b0] sm:$0xff] }
 0x17a   :  { %1128 = vmatprep.subr.bf16.mxu1 %v7884_v20  ;;  %v7846_v19 = vcombine.high %v320_v15, %v324_v16  ;;  %v328_v20 = vld [vmem:[#allocation5 + $0x2d0] sm:$0xff]  ;;  %v7845_v22 = vcombine.low %v320_v15, %v324_v16  ;;  %v321_v16 = vld [vmem:[#allocation5 + $0x298] sm:$0xff] }
 0x17d   :  { %1129 = vmatpush1.bf16.msra.mxu1 %v7883_v23  ;;  %v7854_v23 = vcombine.high %v328_v20, %v332_v21 }
 0x17e   :  { %1139 = vmatprep.subr.bf16.mxu1 %v7766_v26  ;;  %v7853_v26 = vcombine.low %v328_v20, %v332_v21  ;;  %v329_v21 = vld [vmem:[#allocation5 + $0x2d8] sm:$0xff] }
 0x180   :  { %1131 = vmatmul.mubr.bf16.vlgmr.msra.gmra.mrb[4].mxu1 %v10506_v7 }
 0x181   :  { %1140 = vmatpush1.bf16.msra.mxu1 %v7765_v29  ;;  %1171 = vmatprep.mubr.bf16.mxu1 %v10501_v18  ;;  %v348_v29 = vld [vmem:[#allocation5 + $0x370] sm:$0xff] }
 0x182   :  { %1141 = vmatprep.subr.bf16.mxu1 %v7774_v30  ;;  %v7861_v30 = vcombine.low %v336_v24, %v340_v25  ;;  %v7870_v31 = vcombine.high %v344_v28, %v348_v29  ;;  %v7869_v34 = vcombine.low %v344_v28, %v348_v29  ;;  %v337_v25 = vld [vmem:[#allocation5 + $0x318] sm:$0xff] }
 0x183   :  { %v345_v29 = vld [vmem:[#allocation5 + $0x358] sm:$0xff] }
 0x185   :  { %1142 = vmatpush1.bf16.msra.mxu1 %v7773_v35  ;;  %v7878_v35 = vcombine.high %v352_v32, %v356_v33  ;;  %v353_v33 = vld [vmem:[#allocation5 + $0x398] sm:$0xff] }
 0x186   :  { %1143 = vmatprep.subr.bf16.mxu1 %v7782_v39  ;;  %v7886_v39 = vcombine.high %v360_v36, %v364_v37  ;;  %v361_v37 = vld [vmem:[#allocation5 + $0x3d8] sm:$0xff] }
 0x189   :  { %1144 = vmatpush1.bf16.msra.mxu1 %v7781_v41  ;;  %v245_v41 = vld [vmem:[#allocation5 + $0x38] sm:$0xff] }
 0x18a   :  { %1145 = vmatprep.subr.bf16.mxu1 %v7790_v45  ;;  %v7768_v43 = vcombine.high %v241_v40, %v245_v41  ;;  %v253_v45 = vld [vmem:[#allocation5 + $0x78] sm:$0xff]  ;;  %v7767_v46 = vcombine.low %v241_v40, %v245_v41 }
 0x18b   :  { %v7775_v50 = vcombine.low %v249_v44, %v253_v45 }
 0x18d   :  { %1146 = vmatpush1.bf16.msra.mxu1 %v7789_v47  ;;  %v7776_v47 = vcombine.high %v249_v44, %v253_v45  ;;  %v8997_v44 = vld [vmem:[#allocation7 + $0x2c] ss:$16 sps:$4 sm:$0xff]   ;;  %v8995_v45 = vld [vmem:[#allocation7 + $0x28] ss:$16 sps:$4 sm:$0xff]  }
 0x18e   :  { %1147 = vmatprep.subr.bf16.mxu1 %v7798_v51  ;;  %v7784_v51 = vcombine.high %v257_v48, %v261_v49  ;;  %v9001_v48 = vld [vmem:[#allocation7 + $0x48] ss:$16 sps:$4 sm:$0xff]   ;;  %v9009_v49 = vld [vmem:[#allocation7 + $0x6c] ss:$16 sps:$4 sm:$0xff]  }
 0x191   :  { %1148 = vmatpush1.bf16.msra.mxu1 %v7797_v53  ;;  %v269_v53 = vld [vmem:[#allocation5 + $0xf8] sm:$0xff] }
 0x192   :  { %1149 = vmatprep.subr.bf16.mxu1 %v7806_v57  ;;  %v7792_v55 = vcombine.high %v265_v52, %v269_v53  ;;  %v277_v57 = vld [vmem:[#allocation5 + $0x138] sm:$0xff]  ;;  %v7791_v58 = vcombine.low %v265_v52, %v269_v53 }
 0x193   :  { %v7799_v62 = vcombine.low %v273_v56, %v277_v57  ;;  %v9007_v52 = vld [vmem:[#allocation7 + $0x68] ss:$16 sps:$4 sm:$0xff]  }
 0x194   :  { %v367_v53 = vld [vmem:[#allocation23] ss:$8 sm:$0xf0] }
 0x195   :  { %1150 = vmatpush1.bf16.msra.mxu1 %v7805_v59  ;;  %v7800_v59 = vcombine.high %v273_v56, %v277_v57  ;;  %v9013_v56 = vld [vmem:[#allocation7 + $0x88] ss:$16 sps:$4 sm:$0xff]  }
 0x196   :  { %1151 = vmatprep.subr.bf16.mxu1 %v7814_v60  ;;  %v281_v60 = vld [vmem:[#allocation5 + $0x158] sm:$0xff] }
 0x199   :  { %1152 = vmatpush1.bf16.msra.mxu1 %v7813_v1  ;;  %v7807_v1 = vcombine.low %v281_v60, %v285_v61 }
 0x19a   :  { %1153 = vmatprep.subr.bf16.mxu1 %v7822_v2  ;;  %v7816_v2 = vcombine.high %v289_v63, %v293_v0  ;;  %v9025_v63 = vld [vmem:[#allocation7 + $0xc8] ss:$16 sps:$4 sm:$0xff]  }
 0x19d   :  { %1154 = vmatpush1.bf16.msra.mxu1 %v7821_v8  ;;  %v305_v8 = vld [vmem:[#allocation5 + $0x218] sm:$0xff] }
 0x19e   :  { %1155 = vmatprep.subr.bf16.mxu1 %v7830_v9  ;;  %v309_v9 = vld [vmem:[#allocation5 + $0x238] sm:$0xff] }
 0x19f   :  { %v7832_v11 = vcombine.high %v305_v8, %v309_v9 }
 0x1a1   :  { %1156 = vmatpush1.bf16.msra.mxu1 %v7829_v13  ;;  %v317_v13 = vld [vmem:[#allocation5 + $0x278] sm:$0xff] }
 0x1a2   :  { %1157 = vmatprep.subr.bf16.mxu1 %v7838_v14  ;;  %v7831_v14 = vcombine.low %v305_v8, %v309_v9  ;;  %v7840_v15 = vcombine.high %v313_v12, %v317_v13  ;;  %v9029_v9 = vld [vmem:[#allocation7 + $0x200] ss:$16 sps:$4 sm:$0xff]  }
 0x1a5   :  { %1158 = vmatpush1.bf16.msra.mxu1 %v7837_v17  ;;  %v325_v17 = vld [vmem:[#allocation5 + $0x2b8] sm:$0xff] }
 0x1a6   :  { %1159 = vmatprep.subr.bf16.mxu1 %v7846_v19  ;;  %v7839_v19 = vcombine.low %v313_v12, %v317_v13  ;;  %v7848_v20 = vcombine.high %v321_v16, %v325_v17  ;;  %v9037_v13 = vld [vmem:[#allocation7 + $0x224] ss:$16 sps:$4 sm:$0xff]  }
 0x1a9   :  { %1160 = vmatpush1.bf16.msra.mxu1 %v7845_v22  ;;  %v333_v22 = vld [vmem:[#allocation5 + $0x2f8] sm:$0xff] }
 0x1aa   :  { %1161 = vmatprep.subr.bf16.mxu1 %v7854_v23  ;;  %v7847_v23 = vcombine.low %v321_v16, %v325_v17  ;;  %v7856_v24 = vcombine.high %v329_v21, %v333_v22  ;;  %v9038_v16 = vld [vmem:[#allocation7 + $0x108] ss:$16 sps:$4 sm:$0xff]   ;;  %v9043_v17 = vld [vmem:[#allocation7 + $0x244] ss:$16 sps:$4 sm:$0xff]  }
 0x1ad   :  { %1162 = vmatpush1.bf16.msra.mxu1 %v7853_v26  ;;  %v341_v26 = vld [vmem:[#allocation5 + $0x338] sm:$0xff] }
 0x1ae   :  { %1163 = vmatprep.subr.bf16.mxu1 %v7862_v27  ;;  %v7855_v27 = vcombine.low %v329_v21, %v333_v22  ;;  %v7864_v28 = vcombine.high %v337_v25, %v341_v26  ;;  %v9044_v21 = vld [vmem:[#allocation7 + $0x128] ss:$16 sps:$4 sm:$0xff]   ;;  %v9049_v22 = vld [vmem:[#allocation7 + $0x264] ss:$16 sps:$4 sm:$0xff]  }
 0x1b1   :  { %1164 = vmatpush1.bf16.msra.mxu1 %v7861_v30  ;;  %v349_v30 = vld [vmem:[#allocation5 + $0x378] sm:$0xff] }
 0x1b2   :  { %1165 = vmatprep.subr.bf16.mxu1 %v7870_v31  ;;  %v7863_v31 = vcombine.low %v337_v25, %v341_v26  ;;  %v7872_v32 = vcombine.high %v345_v29, %v349_v30  ;;  %v9050_v25 = vld [vmem:[#allocation7 + $0x148] ss:$16 sps:$4 sm:$0xff]   ;;  %v9055_v26 = vld [vmem:[#allocation7 + $0x284] ss:$16 sps:$4 sm:$0xff]  }
 0x1b5   :  { %1166 = vmatpush1.bf16.msra.mxu1 %v7869_v34  ;;  %v357_v34 = vld [vmem:[#allocation5 + $0x3b8] sm:$0xff] }
 0x1b6   :  { %1167 = vmatprep.subr.bf16.mxu1 %v7878_v35  ;;  %v7871_v35 = vcombine.low %v345_v29, %v349_v30  ;;  %v7880_v36 = vcombine.high %v353_v33, %v357_v34  ;;  %v9056_v29 = vld [vmem:[#allocation7 + $0x168] ss:$16 sps:$4 sm:$0xff]   ;;  %v9061_v30 = vld [vmem:[#allocation7 + $0x2a4] ss:$16 sps:$4 sm:$0xff]  }
 0x1b9   :  { %1168 = vmatpush1.bf16.msra.mxu1 %v7877_v38  ;;  %v365_v38 = vld [vmem:[#allocation5 + $0x3f8] sm:$0xff] }
 0x1ba   :  { %1169 = vmatprep.subr.bf16.mxu1 %v7886_v39  ;;  %v7879_v39 = vcombine.low %v353_v33, %v357_v34  ;;  %v7888_v40 = vcombine.high %v361_v37, %v365_v38  ;;  %v7887_v41 = vcombine.low %v361_v37, %v365_v38  ;;  %v9062_v33 = vld [vmem:[#allocation7 + $0x188] ss:$16 sps:$4 sm:$0xff]   ;;  %v9067_v34 = vld [vmem:[#allocation7 + $0x2c4] ss:$16 sps:$4 sm:$0xff]  }
 0x1bb   :  { %v9068_v37 = vld [vmem:[#allocation7 + $0x1a8] ss:$16 sps:$4 sm:$0xff]   ;;  %v9073_v38 = vld [vmem:[#allocation7 + $0x2e4] ss:$16 sps:$4 sm:$0xff]  }
 0x1bd   :  { %1170 = vmatpush1.bf16.msra.mxu1 %v7885_v42  ;;  %v8991_v42 = vld [vmem:[#allocation7 + $0xc] ss:$16 sps:$4 sm:$0xff]  }
 0x1be   :  { %1180 = vmatprep.subr.bf16.mxu1 %v7768_v43  ;;  %v8989_v43 = vld [vmem:[#allocation7 + $0x8] ss:$16 sps:$4 sm:$0xff]  }
 0x1c0   :  { %1172 = vmatmul.mubr.bf16.vlgmr.msra.gmra.mrb[8].mxu1 %v10506_v7 }
 0x1c1   :  { %1181 = vmatpush1.bf16.msra.mxu1 %v7767_v46  ;;  %1212 = vmatprep.mubr.bf16.mxu1 %v10501_v18  ;;  %v7808_v18 = vcombine.high %v281_v60, %v285_v61  ;;  %v9003_v46 = vld [vmem:[#allocation7 + $0x4c] ss:$16 sps:$4 sm:$0xff]  }
 0x1c2   :  { %1182 = vmatprep.subr.bf16.mxu1 %v7776_v47  ;;  %v370_v47 = vlaneseq }
 0x1c5   :  { %1183 = vmatpush1.bf16.msra.mxu1 %v7775_v50  ;;  %v366_v50 = vld [vmem:[#allocation23] ss:$8 sm:$0xf] }
 0x1c6   :  { %1184 = vmatprep.subr.bf16.mxu1 %v7784_v51  ;;  %v10515_v51 = vshrl.u32 %v370_v47, 7  ;;  %v9088_v47 = vld [vmem:[#allocation7 + $0x20c] ss:$16 sps:$4 sm:$0xff]  }
 0x1c8   :  { %v10523_v57 = vsub.s32 1, %v10515_v51 }
 0x1c9   :  { %1185 = vmatpush1.bf16.msra.mxu1 %v7783_v54  ;;  %v9015_v54 = vld [vmem:[#allocation7 + $0x8c] ss:$16 sps:$4 sm:$0xff]  }
 0x1ca   :  { %1186 = vmatprep.subr.bf16.mxu1 %v7792_v55  ;;  %v10517_v55 = vor.u32 %v367_v53, %v366_v50  ;;  %v9091_v50 = vld [vmem:[#allocation7 + $0x344] ss:$16 sps:$4 sm:$0xff]   ;;  %v9089_v53 = vld [vmem:[#allocation7 + $0x340] ss:$16 sps:$4 sm:$0xff]  }
 0x1cc   :  { %v377_v61 = vrot.slane %v10517_v55, %v10523_v57 }
 0x1cd   :  { %1187 = vmatpush1.bf16.msra.mxu1 %v7791_v58  ;;  %v9021_v58 = vld [vmem:[#allocation7 + $0xac] ss:$16 sps:$4 sm:$0xff]  }
 0x1ce   :  { %1188 = vmatprep.subr.bf16.mxu1 %v7800_v59  ;;  %v9019_v59 = vld [vmem:[#allocation7 + $0xa8] ss:$16 sps:$4 sm:$0xff]  }
 0x1d1   :  { %1189 = vmatpush1.bf16.msra.mxu1 %v7799_v62  ;;  %v9027_v62 = vld [vmem:[#allocation7 + $0xcc] ss:$16 sps:$4 sm:$0xff]  }
 0x1d2   :  { %1190 = vmatprep.subr.bf16.mxu1 %v7808_v18 }
 0x1d5   :  { %1191 = vmatpush1.bf16.msra.mxu1 %v7807_v1 }
 0x1d6   :  { %1192 = vmatprep.subr.bf16.mxu1 %v7816_v2 }
 0x1d9   :  { %1193 = vmatpush1.bf16.msra.mxu1 %v7815_v5 }
 0x1da   :  { %1194 = vmatprep.subr.bf16.mxu1 %v7824_v6  ;;  %v9034_v6 = vld [vmem:[#allocation7 + $0xec] ss:$16 sps:$4 sm:$0xff]  }
 0x1dd   :  { %1195 = vmatpush1.bf16.msra.mxu1 %v7823_v10  ;;  %v9032_v10 = vld [vmem:[#allocation7 + $0xe8] ss:$16 sps:$4 sm:$0xff]  }
 0x1de   :  { %1196 = vmatprep.subr.bf16.mxu1 %v7832_v11 }
 0x1e1   :  { %1197 = vmatpush1.bf16.msra.mxu1 %v7831_v14  ;;  %v9040_v14 = vld [vmem:[#allocation7 + $0x10c] ss:$16 sps:$4 sm:$0xff]  }
 0x1e2   :  { %1198 = vmatprep.subr.bf16.mxu1 %v7840_v15  ;;  %v9035_v15 = vld [vmem:[#allocation7 + $0x220] ss:$16 sps:$4 sm:$0xff]  }
 0x1e5   :  { %1199 = vmatpush1.bf16.msra.mxu1 %v7839_v19  ;;  %v9046_v19 = vld [vmem:[#allocation7 + $0x12c] ss:$16 sps:$4 sm:$0xff]  }
 0x1e6   :  { %1200 = vmatprep.subr.bf16.mxu1 %v7848_v20  ;;  %v9041_v20 = vld [vmem:[#allocation7 + $0x240] ss:$16 sps:$4 sm:$0xff]  }
 0x1e9   :  { %1201 = vmatpush1.bf16.msra.mxu1 %v7847_v23  ;;  %v9052_v23 = vld [vmem:[#allocation7 + $0x14c] ss:$16 sps:$4 sm:$0xff]  }
 0x1ea   :  { %1202 = vmatprep.subr.bf16.mxu1 %v7856_v24  ;;  %v9047_v24 = vld [vmem:[#allocation7 + $0x260] ss:$16 sps:$4 sm:$0xff]  }
 0x1ed   :  { %1203 = vmatpush1.bf16.msra.mxu1 %v7855_v27  ;;  %v9058_v27 = vld [vmem:[#allocation7 + $0x16c] ss:$16 sps:$4 sm:$0xff]  }
 0x1ee   :  { %1204 = vmatprep.subr.bf16.mxu1 %v7864_v28  ;;  %v9053_v28 = vld [vmem:[#allocation7 + $0x280] ss:$16 sps:$4 sm:$0xff]  }
 0x1f1   :  { %1205 = vmatpush1.bf16.msra.mxu1 %v7863_v31  ;;  %v9064_v31 = vld [vmem:[#allocation7 + $0x18c] ss:$16 sps:$4 sm:$0xff]  }
 0x1f2   :  { %1206 = vmatprep.subr.bf16.mxu1 %v7872_v32  ;;  %v9059_v32 = vld [vmem:[#allocation7 + $0x2a0] ss:$16 sps:$4 sm:$0xff]  }
 0x1f5   :  { %1207 = vmatpush1.bf16.msra.mxu1 %v7871_v35  ;;  %v9070_v35 = vld [vmem:[#allocation7 + $0x1ac] ss:$16 sps:$4 sm:$0xff]  }
 0x1f6   :  { %1208 = vmatprep.subr.bf16.mxu1 %v7880_v36  ;;  %v9065_v36 = vld [vmem:[#allocation7 + $0x2c0] ss:$16 sps:$4 sm:$0xff]  }
 0x1f9   :  { %1209 = vmatpush1.bf16.msra.mxu1 %v7879_v39  ;;  %v9076_v39 = vld [vmem:[#allocation7 + $0x1cc] ss:$16 sps:$4 sm:$0xff]  }
 0x1fa   :  { %1210 = vmatprep.subr.bf16.mxu1 %v7888_v40  ;;  %v9071_v40 = vld [vmem:[#allocation7 + $0x2e0] ss:$16 sps:$4 sm:$0xff]  }
 0x1fd   :  { %1211 = vmatpush1.bf16.msra.mxu1 %v7887_v41  ;;  %v9074_v41 = vld [vmem:[#allocation7 + $0x1c8] ss:$16 sps:$4 sm:$0xff]  }
 0x1fe   :  { %2960 = vmatprep.subr.bf16.mxu1 %v8991_v42  ;;  %v9079_v42 = vld [vmem:[#allocation7 + $0x304] ss:$16 sps:$4 sm:$0xff]  }
 0x200   :  { %1213 = vmatmul.mubr.bf16.vlgmr.msra.gmra.mrb[12].mxu1 %v10506_v7  ;;  %v10520_v7 = vsub.s32 0, %v10515_v51 }
 0x201   :  { %2961 = vmatpush1.bf16.msra.mxu1 %v8989_v43  ;;  %v9082_v43 = vld [vmem:[#allocation7 + $0x1ec] ss:$16 sps:$4 sm:$0xff]  }
 0x202   :  { %2962 = vmatprep.subr.bf16.mxu1 %v8997_v44  ;;  %v373_v60 = vrot.slane %v10517_v55, %v10520_v7  ;;  %v9077_v44 = vld [vmem:[#allocation7 + $0x300] ss:$16 sps:$4 sm:$0xff]  }
 0x205   :  { %2963 = vmatpush1.bf16.msra.mxu1 %v8995_v45  ;;  %v9080_v45 = vld [vmem:[#allocation7 + $0x1e8] ss:$16 sps:$4 sm:$0xff]  }
 0x206   :  { %2964 = vmatprep.subr.bf16.mxu1 %v9003_v46  ;;  %v9085_v46 = vld [vmem:[#allocation7 + $0x324] ss:$16 sps:$4 sm:$0xff]  }
 0x209   :  { %2965 = vmatpush1.bf16.msra.mxu1 %v9001_v48  ;;  %v9083_v48 = vld [vmem:[#allocation7 + $0x320] ss:$16 sps:$4 sm:$0xff]  }
 0x20a   :  { %2966 = vmatprep.subr.bf16.mxu1 %v9009_v49  ;;  %v9086_v49 = vld [vmem:[#allocation7 + $0x208] ss:$16 sps:$4 sm:$0xff]  }
 0x20d   :  { %2967 = vmatpush1.bf16.msra.mxu1 %v9007_v52  ;;  %v9094_v52 = vld [vmem:[#allocation7 + $0x22c] ss:$16 sps:$4 sm:$0xff]  }
 0x20e   :  { %2968 = vmatprep.subr.bf16.mxu1 %v9015_v54  ;;  %v9092_v54 = vld [vmem:[#allocation7 + $0x228] ss:$16 sps:$4 sm:$0xff]  }
 0x211   :  { %2969 = vmatpush1.bf16.msra.mxu1 %v9013_v56  ;;  %v9097_v56 = vld [vmem:[#allocation7 + $0x364] ss:$16 sps:$4 sm:$0xff]  }
 0x212   :  { %2970 = vmatprep.subr.bf16.mxu1 %v9021_v58  ;;  %v9100_v58 = vld [vmem:[#allocation7 + $0x24c] ss:$16 sps:$4 sm:$0xff]  }
 0x213   :  { %v1091_v18 = vpop.f32.mrb[0].mxu1 }
 0x214   :  { %v1092_v0 = vadd.f32 %v1091_v18, %v373_v60  ;;  %v1093_v1 = vpop.f32.mrb[1].mxu1  ;;  %v9098_v60 = vld [vmem:[#allocation7 + $0x248] ss:$16 sps:$4 sm:$0xff]   ;;  %v9101_v18 = vld [vmem:[#allocation7 + $0x380] ss:$16 sps:$4 sm:$0xff]  }
 0x215   :  { %v1094_v2 = vadd.f32 %v1093_v1, %v377_v61  ;;  %v1095_v3 = vpop.f32.mrb[2].mxu1  ;;  %2971 = vmatpush1.bf16.msra.mxu1 %v9019_v59  ;;  %v9095_v59 = vld [vmem:[#allocation7 + $0x360] ss:$16 sps:$4 sm:$0xff]   ;;  %v9103_v61 = vld [vmem:[#allocation7 + $0x384] ss:$16 sps:$4 sm:$0xff]  }
 0x216   :  { %v1221_v4 = vmax.f32 %v1092_v0, 0.0  ;;  %v1096_v5 = vpop.f32.mrb[3].mxu1  ;;  %2972 = vmatprep.subr.bf16.mxu1 %v9027_v62  ;;  %v9106_v62 = vld [vmem:[#allocation7 + $0x26c] ss:$16 sps:$4 sm:$0xff]   ;;  %v9109_v0 = vld [vmem:[#allocation7 + $0x3a4] ss:$16 sps:$4 sm:$0xff]  }
 0x217   :  { %v1222_v8 = vmax.f32 %v1094_v2, 0.0  ;;  %v9112_v1 = vld [vmem:[#allocation7 + $0x28c] ss:$16 sps:$4 sm:$0xff]   ;;  %v10534_v2 = vsub.s32 2, %v10515_v51  ;;  %v9107_v3 = vld [vmem:[#allocation7 + $0x3a0] ss:$16 sps:$4 sm:$0xff]  }
 0x218   :  { %v10529_v11 = vpack.c.bf16 %v1221_v4, %v1221_v4  ;;  %v9110_v4 = vld [vmem:[#allocation7 + $0x288] ss:$16 sps:$4 sm:$0xff]   ;;  %v10537_v5 = vsub.s32 3, %v10515_v51 }
 0x219   :  { %2973 = vmatpush1.bf16.msra.mxu1 %v9025_v63  ;;  %v1230_v12 = vpack.c.bf16 %v1222_v8, %v1222_v8  ;;  %v9104_v63 = vld [vmem:[#allocation7 + $0x268] ss:$16 sps:$4 sm:$0xff]   ;;  %v9118_v8 = vld [vmem:[#allocation7 + $0x2ac] ss:$16 sps:$4 sm:$0xff]  }
 0x21a   :  { %2974 = vmatprep.subr.bf16.mxu1 %v9034_v6  ;;  %v9115_v6 = vld [vmem:[#allocation7 + $0x3c4] ss:$16 sps:$4 sm:$0xff]  }
 0x21b   :  { %2828 = vmatprep.mubr.bf16.mxu0 %v1230_v12  ;;  %2992 = vmatprep.mubr.bf16.mxu1 %v1230_v12  ;;  %v9116_v12 = vld [vmem:[#allocation7 + $0x2a8] ss:$16 sps:$4 sm:$0xff]  }
 0x21c   :  { %2829 = vmatmul.mubr.bf16.vlgmr.msra.gmra.mrb[0].mxu0 %v10529_v11 }
 0x21d   :  { %2838 = vmatpush1.bf16.msra.mxu0 %v9029_v9  ;;  %2975 = vmatpush1.bf16.msra.mxu1 %v9032_v10  ;;  %v381_v9 = vrot.slane %v10517_v55, %v10534_v2  ;;  %v385_v10 = vrot.slane %v10517_v55, %v10537_v5 }
 0x21e   :  { %2839 = vmatprep.subr.bf16.mxu0 %v9037_v13  ;;  %2976 = vmatprep.subr.bf16.mxu1 %v9040_v14  ;;  %v9121_v13 = vld [vmem:[#allocation7 + $0x3e4] ss:$16 sps:$4 sm:$0xff]   ;;  %v9124_v14 = vld [vmem:[#allocation7 + $0x2cc] ss:$16 sps:$4 sm:$0xff]  }
 0x221   :  { %2840 = vmatpush1.bf16.msra.mxu0 %v9035_v15  ;;  %2977 = vmatpush1.bf16.msra.mxu1 %v9038_v16 }
 0x222   :  { %2841 = vmatprep.subr.bf16.mxu0 %v9043_v17  ;;  %2978 = vmatprep.subr.bf16.mxu1 %v9046_v19 }
 0x225   :  { %2842 = vmatpush1.bf16.msra.mxu0 %v9041_v20  ;;  %2979 = vmatpush1.bf16.msra.mxu1 %v9044_v21  ;;  %v9119_v21 = vld [vmem:[#allocation7 + $0x3e0] ss:$16 sps:$4 sm:$0xff]  }
 0x226   :  { %2843 = vmatprep.subr.bf16.mxu0 %v9049_v22  ;;  %2980 = vmatprep.subr.bf16.mxu1 %v9052_v23  ;;  %v9122_v22 = vld [vmem:[#allocation7 + $0x2c8] ss:$16 sps:$4 sm:$0xff]  }
 0x229   :  { %2844 = vmatpush1.bf16.msra.mxu0 %v9047_v24  ;;  %2981 = vmatpush1.bf16.msra.mxu1 %v9050_v25  ;;  %v9127_v25 = vld [vmem:[#allocation7 + $0x404] ss:$16 sps:$4 sm:$0xff]  }
 0x22a   :  { %2845 = vmatprep.subr.bf16.mxu0 %v9055_v26  ;;  %2982 = vmatprep.subr.bf16.mxu1 %v9058_v27  ;;  %v9130_v26 = vld [vmem:[#allocation7 + $0x2ec] ss:$16 sps:$4 sm:$0xff]  }
 0x22d   :  { %2846 = vmatpush1.bf16.msra.mxu0 %v9053_v28  ;;  %2983 = vmatpush1.bf16.msra.mxu1 %v9056_v29 }
 0x22e   :  { %2847 = vmatprep.subr.bf16.mxu0 %v9061_v30  ;;  %2984 = vmatprep.subr.bf16.mxu1 %v9064_v31  ;;  %v9125_v30 = vld [vmem:[#allocation7 + $0x400] ss:$16 sps:$4 sm:$0xff]   ;;  %v9128_v31 = vld [vmem:[#allocation7 + $0x2e8] ss:$16 sps:$4 sm:$0xff]  }
 0x231   :  { %2848 = vmatpush1.bf16.msra.mxu0 %v9059_v32  ;;  %2985 = vmatpush1.bf16.msra.mxu1 %v9062_v33  ;;  %v9133_v32 = vld [vmem:[#allocation7 + $0x424] ss:$16 sps:$4 sm:$0xff]   ;;  %v9136_v33 = vld [vmem:[#allocation7 + $0x30c] ss:$16 sps:$4 sm:$0xff]  }
 0x232   :  { %2849 = vmatprep.subr.bf16.mxu0 %v9067_v34  ;;  %2986 = vmatprep.subr.bf16.mxu1 %v9070_v35  ;;  %v9131_v34 = vld [vmem:[#allocation7 + $0x420] ss:$16 sps:$4 sm:$0xff]   ;;  %v9134_v35 = vld [vmem:[#allocation7 + $0x308] ss:$16 sps:$4 sm:$0xff]  }
 0x235   :  { %2850 = vmatpush1.bf16.msra.mxu0 %v9065_v36  ;;  %2987 = vmatpush1.bf16.msra.mxu1 %v9068_v37  ;;  %v9139_v36 = vld [vmem:[#allocation7 + $0x444] ss:$16 sps:$4 sm:$0xff]   ;;  %v9142_v37 = vld [vmem:[#allocation7 + $0x32c] ss:$16 sps:$4 sm:$0xff]  }
 0x236   :  { %2851 = vmatprep.subr.bf16.mxu0 %v9073_v38  ;;  %2988 = vmatprep.subr.bf16.mxu1 %v9076_v39  ;;  %v9137_v38 = vld [vmem:[#allocation7 + $0x440] ss:$16 sps:$4 sm:$0xff]   ;;  %v9140_v39 = vld [vmem:[#allocation7 + $0x328] ss:$16 sps:$4 sm:$0xff]  }
 0x239   :  { %2852 = vmatpush1.bf16.msra.mxu0 %v9071_v40  ;;  %2989 = vmatpush1.bf16.msra.mxu1 %v9074_v41  ;;  %v9145_v40 = vld [vmem:[#allocation7 + $0x464] ss:$16 sps:$4 sm:$0xff]   ;;  %v9148_v41 = vld [vmem:[#allocation7 + $0x34c] ss:$16 sps:$4 sm:$0xff]  }
 0x23a   :  { %2853 = vmatprep.subr.bf16.mxu0 %v9079_v42  ;;  %2990 = vmatprep.subr.bf16.mxu1 %v9082_v43  ;;  %v9143_v42 = vld [vmem:[#allocation7 + $0x460] ss:$16 sps:$4 sm:$0xff]   ;;  %v9146_v43 = vld [vmem:[#allocation7 + $0x348] ss:$16 sps:$4 sm:$0xff]  }
 0x23d   :  { %2854 = vmatpush1.bf16.msra.mxu0 %v9077_v44  ;;  %2991 = vmatpush1.bf16.msra.mxu1 %v9080_v45  ;;  %v9151_v44 = vld [vmem:[#allocation7 + $0x484] ss:$16 sps:$4 sm:$0xff]   ;;  %v9154_v45 = vld [vmem:[#allocation7 + $0x36c] ss:$16 sps:$4 sm:$0xff]  }
 0x23e   :  { %2855 = vmatprep.subr.bf16.mxu0 %v9085_v46  ;;  %3001 = vmatprep.subr.bf16.mxu1 %v9088_v47  ;;  %v9149_v46 = vld [vmem:[#allocation7 + $0x480] ss:$16 sps:$4 sm:$0xff]   ;;  %v9152_v47 = vld [vmem:[#allocation7 + $0x368] ss:$16 sps:$4 sm:$0xff]  }
 0x240   :  { %2993 = vmatmul.mubr.bf16.vlgmr.msra.gmra.mrb[16].mxu1 %v10529_v11  ;;  %v9113_v11 = vld [vmem:[#allocation7 + $0x3c0] ss:$16 sps:$4 sm:$0xff]  }
 0x241   :  { %2856 = vmatpush1.bf16.msra.mxu0 %v9083_v48  ;;  %3002 = vmatpush1.bf16.msra.mxu1 %v9086_v49  ;;  %v9157_v48 = vld [vmem:[#allocation7 + $0x4a4] ss:$16 sps:$4 sm:$0xff]   ;;  %v9160_v49 = vld [vmem:[#allocation7 + $0x38c] ss:$16 sps:$4 sm:$0xff]  }
 0x242   :  { %2857 = vmatprep.subr.bf16.mxu0 %v9091_v50  ;;  %3003 = vmatprep.subr.bf16.mxu1 %v9094_v52  ;;  %v9155_v50 = vld [vmem:[#allocation7 + $0x4a0] ss:$16 sps:$4 sm:$0xff]   ;;  %v9158_v52 = vld [vmem:[#allocation7 + $0x388] ss:$16 sps:$4 sm:$0xff]  }
 0x245   :  { %2858 = vmatpush1.bf16.msra.mxu0 %v9089_v53  ;;  %3004 = vmatpush1.bf16.msra.mxu1 %v9092_v54  ;;  %v9163_v53 = vld [vmem:[#allocation7 + $0x4c4] ss:$16 sps:$4 sm:$0xff]   ;;  %v9166_v54 = vld [vmem:[#allocation7 + $0x3ac] ss:$16 sps:$4 sm:$0xff]  }
 0x246   :  { %2859 = vmatprep.subr.bf16.mxu0 %v9097_v56  ;;  %3005 = vmatprep.subr.bf16.mxu1 %v9100_v58  ;;  %v9161_v56 = vld [vmem:[#allocation7 + $0x4c0] ss:$16 sps:$4 sm:$0xff]   ;;  %v9164_v58 = vld [vmem:[#allocation7 + $0x3a8] ss:$16 sps:$4 sm:$0xff]  }
 0x249   :  { %2860 = vmatpush1.bf16.msra.mxu0 %v9095_v59  ;;  %3006 = vmatpush1.bf16.msra.mxu1 %v9098_v60  ;;  %v9169_v59 = vld [vmem:[#allocation7 + $0x4e4] ss:$16 sps:$4 sm:$0xff]   ;;  %v9172_v60 = vld [vmem:[#allocation7 + $0x3cc] ss:$16 sps:$4 sm:$0xff]  }
 0x24a   :  { %2861 = vmatprep.subr.bf16.mxu0 %v9103_v61  ;;  %3007 = vmatprep.subr.bf16.mxu1 %v9106_v62  ;;  %v9167_v61 = vld [vmem:[#allocation7 + $0x4e0] ss:$16 sps:$4 sm:$0xff]   ;;  %v9170_v62 = vld [vmem:[#allocation7 + $0x3c8] ss:$16 sps:$4 sm:$0xff]  }
 0x24d   :  { %2862 = vmatpush1.bf16.msra.mxu0 %v9101_v18  ;;  %3008 = vmatpush1.bf16.msra.mxu1 %v9104_v63  ;;  %v9175_v18 = vld [vmem:[#allocation7 + $0x504] ss:$16 sps:$4 sm:$0xff]   ;;  %v9178_v63 = vld [vmem:[#allocation7 + $0x3ec] ss:$16 sps:$4 sm:$0xff]  }
 0x24e   :  { %2863 = vmatprep.subr.bf16.mxu0 %v9109_v0  ;;  %3009 = vmatprep.subr.bf16.mxu1 %v9112_v1  ;;  %v9173_v0 = vld [vmem:[#allocation7 + $0x500] ss:$16 sps:$4 sm:$0xff]   ;;  %v9176_v1 = vld [vmem:[#allocation7 + $0x3e8] ss:$16 sps:$4 sm:$0xff]  }
 0x251   :  { %2864 = vmatpush1.bf16.msra.mxu0 %v9107_v3  ;;  %3010 = vmatpush1.bf16.msra.mxu1 %v9110_v4  ;;  %v9181_v3 = vld [vmem:[#allocation7 + $0x524] ss:$16 sps:$4 sm:$0xff]   ;;  %v9184_v4 = vld [vmem:[#allocation7 + $0x40c] ss:$16 sps:$4 sm:$0xff]  }
 0x252   :  { %2865 = vmatprep.subr.bf16.mxu0 %v9115_v6  ;;  %3011 = vmatprep.subr.bf16.mxu1 %v9118_v8  ;;  %v9179_v6 = vld [vmem:[#allocation7 + $0x520] ss:$16 sps:$4 sm:$0xff]   ;;  %v9182_v8 = vld [vmem:[#allocation7 + $0x408] ss:$16 sps:$4 sm:$0xff]  }
 0x253   :  { %v1132_v15 = vpop.f32.mrb[4].mxu1 }
 0x254   :  { %v1133_v16 = vadd.f32 %v1132_v15, %v381_v9  ;;  %v1134_v17 = vpop.f32.mrb[5].mxu1  ;;  %v9187_v9 = vld [vmem:[#allocation7 + $0x544] ss:$16 sps:$4 sm:$0xff]   ;;  %v9191_v15 = vld [vmem:[#allocation7 + $0x560] ss:$16 sps:$4 sm:$0xff]  }
 0x255   :  { %v1135_v19 = vadd.f32 %v1134_v17, %v385_v10  ;;  %v1136_v20 = vpop.f32.mrb[6].mxu1  ;;  %2866 = vmatpush1.bf16.msra.mxu0 %v9113_v11  ;;  %3012 = vmatpush1.bf16.msra.mxu1 %v9116_v12  ;;  %v9190_v10 = vld [vmem:[#allocation7 + $0x42c] ss:$16 sps:$4 sm:$0xff]   ;;  %v9185_v11 = vld [vmem:[#allocation7 + $0x540] ss:$16 sps:$4 sm:$0xff]  }
 0x256   :  { %v1223_v23 = vmax.f32 %v1133_v16, 0.0  ;;  %v1137_v24 = vpop.f32.mrb[7].mxu1  ;;  %2867 = vmatprep.subr.bf16.mxu0 %v9121_v13  ;;  %3013 = vmatprep.subr.bf16.mxu1 %v9124_v14  ;;  %v9188_v12 = vld [vmem:[#allocation7 + $0x428] ss:$16 sps:$4 sm:$0xff]   ;;  %v9193_v13 = vld [vmem:[#allocation7 + $0x564] ss:$16 sps:$4 sm:$0xff]  }
 0x257   :  { %v1224_v27 = vmax.f32 %v1135_v19, 0.0  ;;  %v9196_v14 = vld [vmem:[#allocation7 + $0x44c] ss:$16 sps:$4 sm:$0xff]   ;;  %v9194_v16 = vld [vmem:[#allocation7 + $0x448] ss:$16 sps:$4 sm:$0xff]   ;;  %v388_v24 = vsub.s32 4, %v10515_v51 }
 0x258   :  { %v10543_v28 = vpack.c.bf16 %v1223_v23, %v1223_v23  ;;  %v9199_v17 = vld [vmem:[#allocation7 + $0x584] ss:$16 sps:$4 sm:$0xff]   ;;  %v9202_v19 = vld [vmem:[#allocation7 + $0x46c] ss:$16 sps:$4 sm:$0xff]   ;;  %v9197_v20 = vld [vmem:[#allocation7 + $0x580] ss:$16 sps:$4 sm:$0xff]  }
 0x259   :  { %v1232_v29 = vpack.c.bf16 %v1224_v27, %v1224_v27  ;;  %2868 = vmatpush1.bf16.msra.mxu0 %v9119_v21  ;;  %3014 = vmatpush1.bf16.msra.mxu1 %v9122_v22  ;;  %v9200_v21 = vld [vmem:[#allocation7 + $0x468] ss:$16 sps:$4 sm:$0xff]   ;;  %v9205_v22 = vld [vmem:[#allocation7 + $0x5a4] ss:$16 sps:$4 sm:$0xff]   ;;  %v9208_v23 = vld [vmem:[#allocation7 + $0x48c] ss:$16 sps:$4 sm:$0xff]  }
 0x25a   :  { %2878 = vmatprep.subr.bf16.mxu0 %v9127_v25  ;;  %3015 = vmatprep.subr.bf16.mxu1 %v9130_v26  ;;  %v9203_v25 = vld [vmem:[#allocation7 + $0x5a0] ss:$16 sps:$4 sm:$0xff]   ;;  %v9206_v26 = vld [vmem:[#allocation7 + $0x488] ss:$16 sps:$4 sm:$0xff]   ;;  %v392_v27 = vsub.s32 5, %v10515_v51 }
 0x25b   :  { %2869 = vmatprep.mubr.bf16.mxu0 %v1232_v29  ;;  %3033 = vmatprep.mubr.bf16.mxu1 %v1232_v29  ;;  %v9214_v29 = vld [vmem:[#allocation7 + $0x4ac] ss:$16 sps:$4 sm:$0xff]  }
 0x25c   :  { %2870 = vmatmul.mubr.bf16.vlgmr.msra.gmra.mrb[0].mxu0 %v10543_v28 }
 0x25d   :  { %2879 = vmatpush1.bf16.msra.mxu0 %v9125_v30  ;;  %3016 = vmatpush1.bf16.msra.mxu1 %v9128_v31  ;;  %v389_v30 = vrot.slane %v10517_v55, %v388_v24  ;;  %v393_v31 = vrot.slane %v10517_v55, %v392_v27 }
 0x25e   :  { %2880 = vmatprep.subr.bf16.mxu0 %v9133_v32  ;;  %3017 = vmatprep.subr.bf16.mxu1 %v9136_v33  ;;  %v9209_v32 = vld [vmem:[#allocation7 + $0x5c0] ss:$16 sps:$4 sm:$0xff]   ;;  %v9212_v33 = vld [vmem:[#allocation7 + $0x4a8] ss:$16 sps:$4 sm:$0xff]  }
 0x261   :  { %2881 = vmatpush1.bf16.msra.mxu0 %v9131_v34  ;;  %3018 = vmatpush1.bf16.msra.mxu1 %v9134_v35  ;;  %v9217_v34 = vld [vmem:[#allocation7 + $0x5e4] ss:$16 sps:$4 sm:$0xff]   ;;  %v9220_v35 = vld [vmem:[#allocation7 + $0x4cc] ss:$16 sps:$4 sm:$0xff]  }
 0x262   :  { %2882 = vmatprep.subr.bf16.mxu0 %v9139_v36  ;;  %3019 = vmatprep.subr.bf16.mxu1 %v9142_v37 }
 0x265   :  { %2883 = vmatpush1.bf16.msra.mxu0 %v9137_v38  ;;  %3020 = vmatpush1.bf16.msra.mxu1 %v9140_v39 }
 0x266   :  { %2884 = vmatprep.subr.bf16.mxu0 %v9145_v40  ;;  %3021 = vmatprep.subr.bf16.mxu1 %v9148_v41  ;;  %v9215_v41 = vld [vmem:[#allocation7 + $0x5e0] ss:$16 sps:$4 sm:$0xff]  }
 0x269   :  { %2885 = vmatpush1.bf16.msra.mxu0 %v9143_v42  ;;  %3022 = vmatpush1.bf16.msra.mxu1 %v9146_v43  ;;  %v9218_v42 = vld [vmem:[#allocation7 + $0x4c8] ss:$16 sps:$4 sm:$0xff]  }
 0x26a   :  { %2886 = vmatprep.subr.bf16.mxu0 %v9151_v44  ;;  %3023 = vmatprep.subr.bf16.mxu1 %v9154_v45  ;;  %v9223_v45 = vld [vmem:[#allocation7 + $0x604] ss:$16 sps:$4 sm:$0xff]  }
 0x26d   :  { %2887 = vmatpush1.bf16.msra.mxu0 %v9149_v46  ;;  %3024 = vmatpush1.bf16.msra.mxu1 %v9152_v47  ;;  %v9226_v46 = vld [vmem:[#allocation7 + $0x4ec] ss:$16 sps:$4 sm:$0xff]  }
 0x26e   :  { %2888 = vmatprep.subr.bf16.mxu0 %v9157_v48  ;;  %3025 = vmatprep.subr.bf16.mxu1 %v9160_v49 }
 0x271   :  { %2889 = vmatpush1.bf16.msra.mxu0 %v9155_v50  ;;  %3026 = vmatpush1.bf16.msra.mxu1 %v9158_v52  ;;  %v9221_v50 = vld [vmem:[#allocation7 + $0x600] ss:$16 sps:$4 sm:$0xff]   ;;  %v9224_v52 = vld [vmem:[#allocation7 + $0x4e8] ss:$16 sps:$4 sm:$0xff]  }
 0x272   :  { %2890 = vmatprep.subr.bf16.mxu0 %v9163_v53  ;;  %3027 = vmatprep.subr.bf16.mxu1 %v9166_v54  ;;  %v9229_v53 = vld [vmem:[#allocation7 + $0x624] ss:$16 sps:$4 sm:$0xff]   ;;  %v9232_v54 = vld [vmem:[#allocation7 + $0x50c] ss:$16 sps:$4 sm:$0xff]  }
 0x275   :  { %2891 = vmatpush1.bf16.msra.mxu0 %v9161_v56  ;;  %3028 = vmatpush1.bf16.msra.mxu1 %v9164_v58  ;;  %v9227_v56 = vld [vmem:[#allocation7 + $0x620] ss:$16 sps:$4 sm:$0xff]   ;;  %v9230_v58 = vld [vmem:[#allocation7 + $0x508] ss:$16 sps:$4 sm:$0xff]  }
 0x276   :  { %2892 = vmatprep.subr.bf16.mxu0 %v9169_v59  ;;  %3029 = vmatprep.subr.bf16.mxu1 %v9172_v60  ;;  %v9235_v59 = vld [vmem:[#allocation7 + $0x644] ss:$16 sps:$4 sm:$0xff]   ;;  %v9238_v60 = vld [vmem:[#allocation7 + $0x52c] ss:$16 sps:$4 sm:$0xff]  }
 0x279   :  { %2893 = vmatpush1.bf16.msra.mxu0 %v9167_v61  ;;  %3030 = vmatpush1.bf16.msra.mxu1 %v9170_v62  ;;  %v9233_v61 = vld [vmem:[#allocation7 + $0x640] ss:$16 sps:$4 sm:$0xff]   ;;  %v9236_v62 = vld [vmem:[#allocation7 + $0x528] ss:$16 sps:$4 sm:$0xff]  }
 0x27a   :  { %2894 = vmatprep.subr.bf16.mxu0 %v9175_v18  ;;  %3031 = vmatprep.subr.bf16.mxu1 %v9178_v63  ;;  %v9241_v18 = vld [vmem:[#allocation7 + $0x664] ss:$16 sps:$4 sm:$0xff]   ;;  %v9244_v63 = vld [vmem:[#allocation7 + $0x54c] ss:$16 sps:$4 sm:$0xff]  }
 0x27d   :  { %2895 = vmatpush1.bf16.msra.mxu0 %v9173_v0  ;;  %3032 = vmatpush1.bf16.msra.mxu1 %v9176_v1  ;;  %v9239_v0 = vld [vmem:[#allocation7 + $0x660] ss:$16 sps:$4 sm:$0xff]   ;;  %v9242_v1 = vld [vmem:[#allocation7 + $0x548] ss:$16 sps:$4 sm:$0xff]  }
 0x27e   :  { %2896 = vmatprep.subr.bf16.mxu0 %v9181_v3  ;;  %3042 = vmatprep.subr.bf16.mxu1 %v9184_v4  ;;  %v9247_v3 = vld [vmem:[#allocation7 + $0x684] ss:$16 sps:$4 sm:$0xff]   ;;  %v9250_v4 = vld [vmem:[#allocation7 + $0x56c] ss:$16 sps:$4 sm:$0xff]  }
 0x280   :  { %3034 = vmatmul.mubr.bf16.vlgmr.msra.gmra.mrb[16].mxu1 %v10543_v28  ;;  %v9211_v28 = vld [vmem:[#allocation7 + $0x5c4] ss:$16 sps:$4 sm:$0xff]  }
 0x281   :  { %2897 = vmatpush1.bf16.msra.mxu0 %v9179_v6  ;;  %3043 = vmatpush1.bf16.msra.mxu1 %v9182_v8  ;;  %v9245_v6 = vld [vmem:[#allocation7 + $0x680] ss:$16 sps:$4 sm:$0xff]   ;;  %v9248_v8 = vld [vmem:[#allocation7 + $0x568] ss:$16 sps:$4 sm:$0xff]  }
 0x282   :  { %2898 = vmatprep.subr.bf16.mxu0 %v9187_v9  ;;  %3044 = vmatprep.subr.bf16.mxu1 %v9190_v10  ;;  %v9253_v9 = vld [vmem:[#allocation7 + $0x6a4] ss:$16 sps:$4 sm:$0xff]   ;;  %v9256_v10 = vld [vmem:[#allocation7 + $0x58c] ss:$16 sps:$4 sm:$0xff]  }
 0x285   :  { %2899 = vmatpush1.bf16.msra.mxu0 %v9185_v11  ;;  %3045 = vmatpush1.bf16.msra.mxu1 %v9188_v12  ;;  %v9251_v11 = vld [vmem:[#allocation7 + $0x6a0] ss:$16 sps:$4 sm:$0xff]   ;;  %v9254_v12 = vld [vmem:[#allocation7 + $0x588] ss:$16 sps:$4 sm:$0xff]  }
 0x286   :  { %2900 = vmatprep.subr.bf16.mxu0 %v9193_v13  ;;  %3046 = vmatprep.subr.bf16.mxu1 %v9196_v14  ;;  %v9259_v13 = vld [vmem:[#allocation7 + $0x6c4] ss:$16 sps:$4 sm:$0xff]   ;;  %v9262_v14 = vld [vmem:[#allocation7 + $0x5ac] ss:$16 sps:$4 sm:$0xff]  }
 0x289   :  { %2901 = vmatpush1.bf16.msra.mxu0 %v9191_v15  ;;  %3047 = vmatpush1.bf16.msra.mxu1 %v9194_v16  ;;  %v9257_v15 = vld [vmem:[#allocation7 + $0x6c0] ss:$16 sps:$4 sm:$0xff]   ;;  %v9260_v16 = vld [vmem:[#allocation7 + $0x5a8] ss:$16 sps:$4 sm:$0xff]  }
 0x28a   :  { %2902 = vmatprep.subr.bf16.mxu0 %v9199_v17  ;;  %3048 = vmatprep.subr.bf16.mxu1 %v9202_v19  ;;  %v9265_v17 = vld [vmem:[#allocation7 + $0x6e4] ss:$16 sps:$4 sm:$0xff]   ;;  %v9268_v19 = vld [vmem:[#allocation7 + $0x5cc] ss:$16 sps:$4 sm:$0xff]  }
 0x28d   :  { %2903 = vmatpush1.bf16.msra.mxu0 %v9197_v20  ;;  %3049 = vmatpush1.bf16.msra.mxu1 %v9200_v21  ;;  %v9263_v20 = vld [vmem:[#allocation7 + $0x6e0] ss:$16 sps:$4 sm:$0xff]   ;;  %v9266_v21 = vld [vmem:[#allocation7 + $0x5c8] ss:$16 sps:$4 sm:$0xff]  }
 0x28e   :  { %2904 = vmatprep.subr.bf16.mxu0 %v9205_v22  ;;  %3050 = vmatprep.subr.bf16.mxu1 %v9208_v23  ;;  %v9271_v22 = vld [vmem:[#allocation7 + $0x704] ss:$16 sps:$4 sm:$0xff]   ;;  %v9274_v23 = vld [vmem:[#allocation7 + $0x5ec] ss:$16 sps:$4 sm:$0xff]  }
 0x291   :  { %2905 = vmatpush1.bf16.msra.mxu0 %v9203_v25  ;;  %3051 = vmatpush1.bf16.msra.mxu1 %v9206_v26  ;;  %v9269_v25 = vld [vmem:[#allocation7 + $0x700] ss:$16 sps:$4 sm:$0xff]   ;;  %v9272_v26 = vld [vmem:[#allocation7 + $0x5e8] ss:$16 sps:$4 sm:$0xff]  }
 0x292   :  { %2906 = vmatprep.subr.bf16.mxu0 %v9211_v28  ;;  %3052 = vmatprep.subr.bf16.mxu1 %v9214_v29  ;;  %v9277_v28 = vld [vmem:[#allocation7 + $0x724] ss:$16 sps:$4 sm:$0xff]   ;;  %v9280_v29 = vld [vmem:[#allocation7 + $0x60c] ss:$16 sps:$4 sm:$0xff]  }
 0x293   :  { %v1173_v36 = vpop.f32.mrb[8].mxu1 }
 0x294   :  { %v1174_v37 = vadd.f32 %v1173_v36, %v389_v30  ;;  %v1175_v38 = vpop.f32.mrb[9].mxu1  ;;  %v9275_v30 = vld [vmem:[#allocation7 + $0x720] ss:$16 sps:$4 sm:$0xff]   ;;  %v9289_v36 = vld [vmem:[#allocation7 + $0x764] ss:$16 sps:$4 sm:$0xff]  }
 0x295   :  { %v1176_v39 = vadd.f32 %v1175_v38, %v393_v31  ;;  %v1177_v40 = vpop.f32.mrb[10].mxu1  ;;  %2907 = vmatpush1.bf16.msra.mxu0 %v9209_v32  ;;  %3053 = vmatpush1.bf16.msra.mxu1 %v9212_v33  ;;  %v9278_v31 = vld [vmem:[#allocation7 + $0x608] ss:$16 sps:$4 sm:$0xff]   ;;  %v9283_v32 = vld [vmem:[#allocation7 + $0x744] ss:$16 sps:$4 sm:$0xff]  }
 0x296   :  { %v1225_v43 = vmax.f32 %v1174_v37, 0.0  ;;  %v1178_v44 = vpop.f32.mrb[11].mxu1  ;;  %2908 = vmatprep.subr.bf16.mxu0 %v9217_v34  ;;  %3054 = vmatprep.subr.bf16.mxu1 %v9220_v35  ;;  %v9286_v33 = vld [vmem:[#allocation7 + $0x62c] ss:$16 sps:$4 sm:$0xff]   ;;  %v9281_v34 = vld [vmem:[#allocation7 + $0x740] ss:$16 sps:$4 sm:$0xff]  }
 0x297   :  { %v1226_v47 = vmax.f32 %v1176_v39, 0.0  ;;  %v9284_v35 = vld [vmem:[#allocation7 + $0x628] ss:$16 sps:$4 sm:$0xff]   ;;  %v9292_v37 = vld [vmem:[#allocation7 + $0x64c] ss:$16 sps:$4 sm:$0xff]  }
 0x298   :  { %v10555_v48 = vpack.c.bf16 %v1225_v43, %v1225_v43  ;;  %v9287_v38 = vld [vmem:[#allocation7 + $0x760] ss:$16 sps:$4 sm:$0xff]   ;;  %v9290_v39 = vld [vmem:[#allocation7 + $0x648] ss:$16 sps:$4 sm:$0xff]   ;;  %v9295_v40 = vld [vmem:[#allocation7 + $0x784] ss:$16 sps:$4 sm:$0xff]  }
 0x299   :  { %v1234_v49 = vpack.c.bf16 %v1226_v47, %v1226_v47  ;;  %2909 = vmatpush1.bf16.msra.mxu0 %v9215_v41  ;;  %3055 = vmatpush1.bf16.msra.mxu1 %v9218_v42  ;;  %v9298_v41 = vld [vmem:[#allocation7 + $0x66c] ss:$16 sps:$4 sm:$0xff]   ;;  %v9293_v42 = vld [vmem:[#allocation7 + $0x780] ss:$16 sps:$4 sm:$0xff]   ;;  %v9296_v43 = vld [vmem:[#allocation7 + $0x668] ss:$16 sps:$4 sm:$0xff]  }
 0x29a   :  { %2919 = vmatprep.subr.bf16.mxu0 %v9223_v45  ;;  %3056 = vmatprep.subr.bf16.mxu1 %v9226_v46  ;;  %v9301_v44 = vld [vmem:[#allocation7 + $0x7a4] ss:$16 sps:$4 sm:$0xff]   ;;  %v9304_v45 = vld [vmem:[#allocation7 + $0x68c] ss:$16 sps:$4 sm:$0xff]   ;;  %v396_v46 = vsub.s32 6, %v10515_v51 }
 0x29b   :  { %2910 = vmatprep.mubr.bf16.mxu0 %v1234_v49  ;;  %3074 = vmatprep.mubr.bf16.mxu1 %v1234_v49  ;;  %v9299_v47 = vld [vmem:[#allocation7 + $0x7a0] ss:$16 sps:$4 sm:$0xff]   ;;  %v400_v49 = vsub.s32 7, %v10515_v51 }
 0x29c   :  { %2911 = vmatmul.mubr.bf16.vlgmr.msra.gmra.mrb[0].mxu0 %v10555_v48 }
 0x29d   :  { %2920 = vmatpush1.bf16.msra.mxu0 %v9221_v50  ;;  %3057 = vmatpush1.bf16.msra.mxu1 %v9224_v52  ;;  %v9307_v50 = vld [vmem:[#allocation7 + $0x7c4] ss:$16 sps:$4 sm:$0xff]   ;;  %v9310_v52 = vld [vmem:[#allocation7 + $0x6ac] ss:$16 sps:$4 sm:$0xff]  }
 0x29e   :  { %2921 = vmatprep.subr.bf16.mxu0 %v9229_v53  ;;  %3058 = vmatprep.subr.bf16.mxu1 %v9232_v54  ;;  %v397_v53 = vrot.slane %v10517_v55, %v396_v46  ;;  %v401_v54 = vrot.slane %v10517_v55, %v400_v49  ;;  %v9319_v55 = vld [vmem:[#allocation7 + $0x6ec] ss:$16 sps:$4 sm:$0xff]  }
 0x2a1   :  { %2922 = vmatpush1.bf16.msra.mxu0 %v9227_v56  ;;  %3059 = vmatpush1.bf16.msra.mxu1 %v9230_v58  ;;  %v9305_v56 = vld [vmem:[#allocation7 + $0x7c0] ss:$16 sps:$4 sm:$0xff]   ;;  %v9308_v58 = vld [vmem:[#allocation7 + $0x6a8] ss:$16 sps:$4 sm:$0xff]  }
 0x2a2   :  { %2923 = vmatprep.subr.bf16.mxu0 %v9235_v59  ;;  %3060 = vmatprep.subr.bf16.mxu1 %v9238_v60  ;;  %v9313_v59 = vld [vmem:[#allocation7 + $0x7e4] ss:$16 sps:$4 sm:$0xff]   ;;  %v9316_v60 = vld [vmem:[#allocation7 + $0x6cc] ss:$16 sps:$4 sm:$0xff]  }
 0x2a5   :  { %2924 = vmatpush1.bf16.msra.mxu0 %v9233_v61  ;;  %3061 = vmatpush1.bf16.msra.mxu1 %v9236_v62 }
 0x2a6   :  { %2925 = vmatprep.subr.bf16.mxu0 %v9241_v18  ;;  %3062 = vmatprep.subr.bf16.mxu1 %v9244_v63 }
 0x2a9   :  { %2926 = vmatpush1.bf16.msra.mxu0 %v9239_v0  ;;  %3063 = vmatpush1.bf16.msra.mxu1 %v9242_v1  ;;  %v9311_v1 = vld [vmem:[#allocation7 + $0x7e0] ss:$16 sps:$4 sm:$0xff]  }
 0x2aa   :  { %2927 = vmatprep.subr.bf16.mxu0 %v9247_v3  ;;  %3064 = vmatprep.subr.bf16.mxu1 %v9250_v4  ;;  %v9314_v3 = vld [vmem:[#allocation7 + $0x6c8] ss:$16 sps:$4 sm:$0xff]  }
 0x2ad   :  { %2928 = vmatpush1.bf16.msra.mxu0 %v9245_v6  ;;  %3065 = vmatpush1.bf16.msra.mxu1 %v9248_v8  ;;  %v9346_v8 = vld [vmem:[#allocation8 + $0x4] ss:$8 sps:$4 sm:$0xff]  }
 0x2ae   :  { %2929 = vmatprep.subr.bf16.mxu0 %v9253_v9  ;;  %3066 = vmatprep.subr.bf16.mxu1 %v9256_v10 }
 0x2b1   :  { %2930 = vmatpush1.bf16.msra.mxu0 %v9251_v11  ;;  %3067 = vmatpush1.bf16.msra.mxu1 %v9254_v12  ;;  %v9317_v11 = vld [vmem:[#allocation7 + $0x6e8] ss:$16 sps:$4 sm:$0xff]  }
 0x2b2   :  { %2931 = vmatprep.subr.bf16.mxu0 %v9259_v13  ;;  %3068 = vmatprep.subr.bf16.mxu1 %v9262_v14  ;;  %v9344_v12 = vld [vmem:[#allocation8] ss:$8 sps:$4 sm:$0xff]   ;;  %v9322_v14 = vld [vmem:[#allocation7 + $0x70c] ss:$16 sps:$4 sm:$0xff]  }
 0x2b5   :  { %2932 = vmatpush1.bf16.msra.mxu0 %v9257_v15  ;;  %3069 = vmatpush1.bf16.msra.mxu1 %v9260_v16  ;;  %v9349_v15 = vld [vmem:[#allocation8 + $0x14] ss:$8 sps:$4 sm:$0xff]   ;;  %v9320_v16 = vld [vmem:[#allocation7 + $0x708] ss:$16 sps:$4 sm:$0xff]  }
 0x2b6   :  { %2933 = vmatprep.subr.bf16.mxu0 %v9265_v17  ;;  %3070 = vmatprep.subr.bf16.mxu1 %v9268_v19  ;;  %v9347_v17 = vld [vmem:[#allocation8 + $0x10] ss:$8 sps:$4 sm:$0xff]   ;;  %v9325_v19 = vld [vmem:[#allocation7 + $0x72c] ss:$16 sps:$4 sm:$0xff]  }
 0x2b9   :  { %2934 = vmatpush1.bf16.msra.mxu0 %v9263_v20  ;;  %3071 = vmatpush1.bf16.msra.mxu1 %v9266_v21  ;;  %v9352_v20 = vld [vmem:[#allocation8 + $0x24] ss:$8 sps:$4 sm:$0xff]   ;;  %v9323_v21 = vld [vmem:[#allocation7 + $0x728] ss:$16 sps:$4 sm:$0xff]  }
 0x2ba   :  { %2935 = vmatprep.subr.bf16.mxu0 %v9271_v22  ;;  %3072 = vmatprep.subr.bf16.mxu1 %v9274_v23  ;;  %v9350_v22 = vld [vmem:[#allocation8 + $0x20] ss:$8 sps:$4 sm:$0xff]   ;;  %v9328_v23 = vld [vmem:[#allocation7 + $0x74c] ss:$16 sps:$4 sm:$0xff]  }
 0x2bd   :  { %2936 = vmatpush1.bf16.msra.mxu0 %v9269_v25  ;;  %3073 = vmatpush1.bf16.msra.mxu1 %v9272_v26  ;;  %v9355_v25 = vld [vmem:[#allocation8 + $0x34] ss:$8 sps:$4 sm:$0xff]   ;;  %v9326_v26 = vld [vmem:[#allocation7 + $0x748] ss:$16 sps:$4 sm:$0xff]  }
 0x2be   :  { %2937 = vmatprep.subr.bf16.mxu0 %v9277_v28  ;;  %3083 = vmatprep.subr.bf16.mxu1 %v9280_v29  ;;  %v9353_v28 = vld [vmem:[#allocation8 + $0x30] ss:$8 sps:$4 sm:$0xff]   ;;  %v9331_v29 = vld [vmem:[#allocation7 + $0x76c] ss:$16 sps:$4 sm:$0xff]  }
 0x2c0   :  { %3075 = vmatmul.mubr.bf16.vlgmr.msra.gmra.mrb[16].mxu1 %v10555_v48  ;;  %v9302_v48 = vld [vmem:[#allocation7 + $0x688] ss:$16 sps:$4 sm:$0xff]  }
 0x2c1   :  { %2938 = vmatpush1.bf16.msra.mxu0 %v9275_v30  ;;  %3084 = vmatpush1.bf16.msra.mxu1 %v9278_v31  ;;  %v9358_v30 = vld [vmem:[#allocation8 + $0x44] ss:$8 sps:$4 sm:$0xff]   ;;  %v9329_v31 = vld [vmem:[#allocation7 + $0x768] ss:$16 sps:$4 sm:$0xff]  }
 0x2c2   :  { %2939 = vmatprep.subr.bf16.mxu0 %v9283_v32  ;;  %3085 = vmatprep.subr.bf16.mxu1 %v9286_v33  ;;  %v9356_v32 = vld [vmem:[#allocation8 + $0x40] ss:$8 sps:$4 sm:$0xff]   ;;  %v9334_v33 = vld [vmem:[#allocation7 + $0x78c] ss:$16 sps:$4 sm:$0xff]  }
 0x2c5   :  { %2940 = vmatpush1.bf16.msra.mxu0 %v9281_v34  ;;  %3086 = vmatpush1.bf16.msra.mxu1 %v9284_v35  ;;  %v9361_v34 = vld [vmem:[#allocation8 + $0x54] ss:$8 sps:$4 sm:$0xff]   ;;  %v9332_v35 = vld [vmem:[#allocation7 + $0x788] ss:$16 sps:$4 sm:$0xff]  }
 0x2c6   :  { %2941 = vmatprep.subr.bf16.mxu0 %v9289_v36  ;;  %3087 = vmatprep.subr.bf16.mxu1 %v9292_v37  ;;  %v9359_v36 = vld [vmem:[#allocation8 + $0x50] ss:$8 sps:$4 sm:$0xff]   ;;  %v9337_v37 = vld [vmem:[#allocation7 + $0x7ac] ss:$16 sps:$4 sm:$0xff]  }
 0x2c9   :  { %2942 = vmatpush1.bf16.msra.mxu0 %v9287_v38  ;;  %3088 = vmatpush1.bf16.msra.mxu1 %v9290_v39  ;;  %v9364_v38 = vld [vmem:[#allocation8 + $0x64] ss:$8 sps:$4 sm:$0xff]   ;;  %v9335_v39 = vld [vmem:[#allocation7 + $0x7a8] ss:$16 sps:$4 sm:$0xff]  }
 0x2ca   :  { %2943 = vmatprep.subr.bf16.mxu0 %v9295_v40  ;;  %3089 = vmatprep.subr.bf16.mxu1 %v9298_v41  ;;  %v9362_v40 = vld [vmem:[#allocation8 + $0x60] ss:$8 sps:$4 sm:$0xff]   ;;  %v9340_v41 = vld [vmem:[#allocation7 + $0x7cc] ss:$16 sps:$4 sm:$0xff]  }
 0x2cd   :  { %2944 = vmatpush1.bf16.msra.mxu0 %v9293_v42  ;;  %3090 = vmatpush1.bf16.msra.mxu1 %v9296_v43  ;;  %v9367_v42 = vld [vmem:[#allocation8 + $0x74] ss:$8 sps:$4 sm:$0xff]   ;;  %v9338_v43 = vld [vmem:[#allocation7 + $0x7c8] ss:$16 sps:$4 sm:$0xff]  }
 0x2ce   :  { %2945 = vmatprep.subr.bf16.mxu0 %v9301_v44  ;;  %3091 = vmatprep.subr.bf16.mxu1 %v9304_v45  ;;  %v9365_v44 = vld [vmem:[#allocation8 + $0x70] ss:$8 sps:$4 sm:$0xff]   ;;  %v9343_v45 = vld [vmem:[#allocation7 + $0x7ec] ss:$16 sps:$4 sm:$0xff]  }
 0x2d1   :  { %2946 = vmatpush1.bf16.msra.mxu0 %v9299_v47  ;;  %3092 = vmatpush1.bf16.msra.mxu1 %v9302_v48  ;;  %v9370_v47 = vld [vmem:[#allocation8 + $0x84] ss:$8 sps:$4 sm:$0xff]   ;;  %v9341_v48 = vld [vmem:[#allocation7 + $0x7e8] ss:$16 sps:$4 sm:$0xff]  }
 0x2d2   :  { %2947 = vmatprep.subr.bf16.mxu0 %v9307_v50  ;;  %3093 = vmatprep.subr.bf16.mxu1 %v9310_v52  ;;  %v9368_v50 = vld [vmem:[#allocation8 + $0x80] ss:$8 sps:$4 sm:$0xff]   ;;  %v9373_v52 = vld [vmem:[#allocation8 + $0x94] ss:$8 sps:$4 sm:$0xff]  }
 0x2d3   :  { %v1214_v61 = vpop.f32.mrb[12].mxu1 }
 0x2d4   :  { %v1215_v62 = vadd.f32 %v1214_v61, %v397_v53  ;;  %v1216_v18 = vpop.f32.mrb[13].mxu1  ;;  %v9371_v53 = vld [vmem:[#allocation8 + $0x90] ss:$8 sps:$4 sm:$0xff]   ;;  %v9380_v61 = vld [vmem:[#allocation8 + $0xc0] ss:$8 sps:$4 sm:$0xff]  }
 0x2d5   :  { %v1217_v63 = vadd.f32 %v1216_v18, %v401_v54  ;;  %v1218_v0 = vpop.f32.mrb[14].mxu1  ;;  %2948 = vmatpush1.bf16.msra.mxu0 %v9305_v56  ;;  %3094 = vmatpush1.bf16.msra.mxu1 %v9308_v58  ;;  %v9376_v54 = vld [vmem:[#allocation8 + $0xa4] ss:$8 sps:$4 sm:$0xff]   ;;  %v9374_v56 = vld [vmem:[#allocation8 + $0xa0] ss:$8 sps:$4 sm:$0xff]  }
 0x2d6   :  { %v1227_v4 = vmax.f32 %v1215_v62, 0.0  ;;  %v1219_v6 = vpop.f32.mrb[15].mxu1  ;;  %2949 = vmatprep.subr.bf16.mxu0 %v9313_v59  ;;  %3095 = vmatprep.subr.bf16.mxu1 %v9316_v60  ;;  %v9379_v58 = vld [vmem:[#allocation8 + $0xb4] ss:$8 sps:$4 sm:$0xff]   ;;  %v9377_v59 = vld [vmem:[#allocation8 + $0xb0] ss:$8 sps:$4 sm:$0xff]  }
 0x2d7   :  { %v1228_v9 = vmax.f32 %v1217_v63, 0.0  ;;  %v9382_v60 = vld [vmem:[#allocation8 + $0xc4] ss:$8 sps:$4 sm:$0xff]   ;;  %v9385_v62 = vld [vmem:[#allocation8 + $0xd4] ss:$8 sps:$4 sm:$0xff]  }
 0x2d8   :  { %v10567_v13 = vpack.c.bf16 %v1227_v4, %v1227_v4  ;;  %v9383_v18 = vld [vmem:[#allocation8 + $0xd0] ss:$8 sps:$4 sm:$0xff]   ;;  %v9388_v63 = vld [vmem:[#allocation8 + $0xe4] ss:$8 sps:$4 sm:$0xff]   ;;  %v9386_v0 = vld [vmem:[#allocation8 + $0xe0] ss:$8 sps:$4 sm:$0xff]  }
 0x2d9   :  { %v1236_v10 = vpack.c.bf16 %v1228_v9, %v1228_v9  ;;  %2950 = vmatpush1.bf16.msra.mxu0 %v9311_v1  ;;  %3096 = vmatpush1.bf16.msra.mxu1 %v9314_v3  ;;  %v9391_v1 = vld [vmem:[#allocation8 + $0xf4] ss:$8 sps:$4 sm:$0xff]   ;;  %v9389_v3 = vld [vmem:[#allocation8 + $0xf0] ss:$8 sps:$4 sm:$0xff]   ;;  %v9394_v4 = vld [vmem:[#allocation8 + $0x104] ss:$8 sps:$4 sm:$0xff]  }
 0x2da   :  { %3097 = vmatprep.subr.bf16.mxu1 %v9319_v55  ;;  %3529 = vmatprep.subr.bf16.mxu0 %v9346_v8  ;;  %v9440_v6 = vld [vmem:[#allocation10 + $0x40] sm:$0xff]   ;;  %v9442_v8 = vld [vmem:[#allocation10 + $0x48] sm:$0xff]  }
 0x2db   :  { %2951 = vmatprep.mubr.bf16.mxu0 %v1236_v10  ;;  %3115 = vmatprep.mubr.bf16.mxu1 %v1236_v10  ;;  %v9441_v55 = vld [vmem:[#allocation10] sm:$0xff]   ;;  %v9443_v9 = vld [vmem:[#allocation10 + $0x8] sm:$0xff]   ;;  %v9444_v10 = vld [vmem:[#allocation10 + $0x50] sm:$0xff]  }
 0x2dc   :  { %2952 = vmatmul.mubr.bf16.vlgmr.msra.gmra.mrb[0].mxu0 %v10567_v13 }
 0x2dd   :  { %3098 = vmatpush1.bf16.msra.mxu1 %v9317_v11  ;;  %3530 = vmatpush1.bf16.msra.mxu0 %v9344_v12  ;;  %v9445_v11 = vld [vmem:[#allocation10 + $0x10] sm:$0xff]   ;;  %v9446_v12 = vld [vmem:[#allocation10 + $0x58] sm:$0xff]  }
 0x2de   :  { %3099 = vmatprep.subr.bf16.mxu1 %v9322_v14  ;;  %3531 = vmatprep.subr.bf16.mxu0 %v9349_v15  ;;  %v9448_v14 = vld [vmem:[#allocation10 + $0x60] sm:$0xff]  }
 0x2df   :  { %v9449_v15 = vld [vmem:[#allocation10 + $0x20] sm:$0xff]  }
 0x2e1   :  { %3100 = vmatpush1.bf16.msra.mxu1 %v9320_v16  ;;  %3532 = vmatpush1.bf16.msra.mxu0 %v9347_v17  ;;  %v9450_v16 = vld [vmem:[#allocation10 + $0x68] sm:$0xff]  }
 0x2e2   :  { %3101 = vmatprep.subr.bf16.mxu1 %v9325_v19  ;;  %3533 = vmatprep.subr.bf16.mxu0 %v9352_v20  ;;  %v9451_v17 = vld [vmem:[#allocation10 + $0x28] sm:$0xff]  }
 0x2e3   :  { %v10571_v19 = vld [vmem:[#allocation23 + $0x1] ss:$8 sm:$0xf] }
 0x2e4   :  { %v1499_v20 = vrot.slane %v10571_v19, %v10520_v7 }
 0x2e5   :  { %3102 = vmatpush1.bf16.msra.mxu1 %v9323_v21  ;;  %3534 = vmatpush1.bf16.msra.mxu0 %v9350_v22  ;;  %v1503_v21 = vrot.slane %v10571_v19, %v10523_v57 }
 0x2e6   :  { %3103 = vmatprep.subr.bf16.mxu1 %v9328_v23  ;;  %3535 = vmatprep.subr.bf16.mxu0 %v9355_v25 }
 0x2e9   :  { %3104 = vmatpush1.bf16.msra.mxu1 %v9326_v26  ;;  %3536 = vmatpush1.bf16.msra.mxu0 %v9353_v28 }
 0x2ea   :  { %3105 = vmatprep.subr.bf16.mxu1 %v9331_v29  ;;  %3537 = vmatprep.subr.bf16.mxu0 %v9358_v30 }
 0x2ed   :  { %3106 = vmatpush1.bf16.msra.mxu1 %v9329_v31  ;;  %3538 = vmatpush1.bf16.msra.mxu0 %v9356_v32 }
 0x2ee   :  { %3107 = vmatprep.subr.bf16.mxu1 %v9334_v33  ;;  %3539 = vmatprep.subr.bf16.mxu0 %v9361_v34  ;;  %v9392_v33 = vld [vmem:[#allocation8 + $0x100] ss:$8 sps:$4 sm:$0xff]  }
 0x2f1   :  { %3108 = vmatpush1.bf16.msra.mxu1 %v9332_v35  ;;  %3540 = vmatpush1.bf16.msra.mxu0 %v9359_v36  ;;  %v9397_v35 = vld [vmem:[#allocation8 + $0x114] ss:$8 sps:$4 sm:$0xff]   ;;  %v9395_v36 = vld [vmem:[#allocation8 + $0x110] ss:$8 sps:$4 sm:$0xff]  }
 0x2f2   :  { %3109 = vmatprep.subr.bf16.mxu1 %v9337_v37  ;;  %3541 = vmatprep.subr.bf16.mxu0 %v9364_v38  ;;  %v9400_v37 = vld [vmem:[#allocation8 + $0x124] ss:$8 sps:$4 sm:$0xff]   ;;  %v9398_v38 = vld [vmem:[#allocation8 + $0x120] ss:$8 sps:$4 sm:$0xff]  }
 0x2f5   :  { %3110 = vmatpush1.bf16.msra.mxu1 %v9335_v39  ;;  %3542 = vmatpush1.bf16.msra.mxu0 %v9362_v40  ;;  %v9403_v39 = vld [vmem:[#allocation8 + $0x134] ss:$8 sps:$4 sm:$0xff]   ;;  %v9401_v40 = vld [vmem:[#allocation8 + $0x130] ss:$8 sps:$4 sm:$0xff]  }
 0x2f6   :  { %3111 = vmatprep.subr.bf16.mxu1 %v9340_v41  ;;  %3543 = vmatprep.subr.bf16.mxu0 %v9367_v42  ;;  %v9406_v41 = vld [vmem:[#allocation8 + $0x144] ss:$8 sps:$4 sm:$0xff]   ;;  %v9404_v42 = vld [vmem:[#allocation8 + $0x140] ss:$8 sps:$4 sm:$0xff]  }
 0x2f9   :  { %3112 = vmatpush1.bf16.msra.mxu1 %v9338_v43  ;;  %3544 = vmatpush1.bf16.msra.mxu0 %v9365_v44  ;;  %v9409_v43 = vld [vmem:[#allocation8 + $0x154] ss:$8 sps:$4 sm:$0xff]   ;;  %v9407_v44 = vld [vmem:[#allocation8 + $0x150] ss:$8 sps:$4 sm:$0xff]  }
 0x2fa   :  { %3113 = vmatprep.subr.bf16.mxu1 %v9343_v45  ;;  %3545 = vmatprep.subr.bf16.mxu0 %v9370_v47  ;;  %v9412_v45 = vld [vmem:[#allocation8 + $0x164] ss:$8 sps:$4 sm:$0xff]   ;;  %v9410_v47 = vld [vmem:[#allocation8 + $0x160] ss:$8 sps:$4 sm:$0xff]  }
 0x2fd   :  { %3114 = vmatpush1.bf16.msra.mxu1 %v9341_v48  ;;  %3546 = vmatpush1.bf16.msra.mxu0 %v9368_v50  ;;  %v9415_v48 = vld [vmem:[#allocation8 + $0x174] ss:$8 sps:$4 sm:$0xff]   ;;  %v9413_v50 = vld [vmem:[#allocation8 + $0x170] ss:$8 sps:$4 sm:$0xff]  }
 0x2fe   :  { %3547 = vmatprep.subr.bf16.mxu0 %v9373_v52  ;;  %8721 = vmatprep.subr.bf16.mxu1 %v9440_v6  ;;  %v1511_v52 = vrot.slane %v10571_v19, %v10537_v5  ;;  %v9425_v6 = vld [vmem:[#allocation8 + $0x1b0] ss:$8 sps:$4 sm:$0xff]  }
 0x300   :  { %3116 = vmatmul.mubr.bf16.vlgmr.msra.gmra.mrb[16].mxu1 %v10567_v13  ;;  %v9447_v13 = vld [vmem:[#allocation10 + $0x18] sm:$0xff]  }
 0x301   :  { %3548 = vmatpush1.bf16.msra.mxu0 %v9371_v53  ;;  %8722 = vmatpush3.bf16.msra.mxu1 %v9441_v55  ;;  %v9418_v53 = vld [vmem:[#allocation8 + $0x184] ss:$8 sps:$4 sm:$0xff]  }
 0x302   :  { %3549 = vmatprep.subr.bf16.mxu0 %v9376_v54  ;;  %8723 = vmatprep.subr.bf16.mxu1 %v9442_v8  ;;  %v9430_v55 = vld [vmem:[#allocation8 + $0x1c4] ss:$8 sps:$4 sm:$0xff]   ;;  %v9428_v8 = vld [vmem:[#allocation8 + $0x1c0] ss:$8 sps:$4 sm:$0xff]  }
 0x305   :  { %3550 = vmatpush1.bf16.msra.mxu0 %v9374_v56  ;;  %8724 = vmatpush3.bf16.msra.mxu1 %v9443_v9  ;;  %v9433_v9 = vld [vmem:[#allocation8 + $0x1d4] ss:$8 sps:$4 sm:$0xff]  }
 0x306   :  { %3551 = vmatprep.subr.bf16.mxu0 %v9379_v58  ;;  %8725 = vmatprep.subr.bf16.mxu1 %v9444_v10  ;;  %v9431_v10 = vld [vmem:[#allocation8 + $0x1d0] ss:$8 sps:$4 sm:$0xff]  }
 0x309   :  { %3552 = vmatpush1.bf16.msra.mxu0 %v9377_v59  ;;  %8726 = vmatpush3.bf16.msra.mxu1 %v9445_v11  ;;  %v1507_v11 = vrot.slane %v10571_v19, %v10534_v2  ;;  %v9455_v19 = vld [vmem:[#allocation10 + $0x38] sm:$0xff]  }
 0x30a   :  { %3553 = vmatprep.subr.bf16.mxu0 %v9382_v60  ;;  %8727 = vmatprep.subr.bf16.mxu1 %v9446_v12  ;;  %v9416_v60 = vld [vmem:[#allocation8 + $0x180] ss:$8 sps:$4 sm:$0xff]   ;;  %v9436_v12 = vld [vmem:[#allocation8 + $0x1e4] ss:$8 sps:$4 sm:$0xff]  }
 0x30d   :  { %3554 = vmatpush1.bf16.msra.mxu0 %v9380_v61  ;;  %8728 = vmatpush3.bf16.msra.mxu1 %v9447_v13  ;;  %v9434_v13 = vld [vmem:[#allocation8 + $0x1e0] ss:$8 sps:$4 sm:$0xff]  }
 0x30e   :  { %3555 = vmatprep.subr.bf16.mxu0 %v9385_v62  ;;  %8729 = vmatprep.subr.bf16.mxu1 %v9448_v14  ;;  %v9421_v62 = vld [vmem:[#allocation8 + $0x194] ss:$8 sps:$4 sm:$0xff]  }
 0x311   :  { %3556 = vmatpush1.bf16.msra.mxu0 %v9383_v18  ;;  %8730 = vmatpush3.bf16.msra.mxu1 %v9449_v15  ;;  %v9439_v15 = vld [vmem:[#allocation8 + $0x1f4] ss:$8 sps:$4 sm:$0xff]  }
 0x312   :  { %3557 = vmatprep.subr.bf16.mxu0 %v9388_v63  ;;  %8731 = vmatprep.subr.bf16.mxu1 %v9450_v16  ;;  %v9437_v16 = vld [vmem:[#allocation8 + $0x1f0] ss:$8 sps:$4 sm:$0xff]  }
 0x315   :  { %3558 = vmatpush1.bf16.msra.mxu0 %v9386_v0  ;;  %8732 = vmatpush3.bf16.msra.mxu1 %v9451_v17  ;;  %v9419_v0 = vld [vmem:[#allocation8 + $0x190] ss:$8 sps:$4 sm:$0xff]  }
 0x316   :  { %3559 = vmatprep.subr.bf16.mxu0 %v9391_v1  ;;  %v9424_v1 = vld [vmem:[#allocation8 + $0x1a4] ss:$8 sps:$4 sm:$0xff]  }
 0x319   :  { %3560 = vmatpush1.bf16.msra.mxu0 %v9389_v3  ;;  %v9422_v3 = vld [vmem:[#allocation8 + $0x1a0] ss:$8 sps:$4 sm:$0xff]  }
 0x31a   :  { %3570 = vmatprep.subr.bf16.mxu0 %v9394_v4  ;;  %v9427_v4 = vld [vmem:[#allocation8 + $0x1b4] ss:$8 sps:$4 sm:$0xff]  }
 0x3af   :  { %v2953_v22 = vpop.f32.mrb[0].mxu0 }
 0x3b0   :  { %v8859_v23 = vadd.f32 %v2953_v22, %v1499_v20  ;;  %v2955_v25 = vpop.f32.mrb[1].mxu0  ;;  %v9453_v22 = vld [vmem:[#allocation10 + $0x30] sm:$0xff]  }
 0x3b1   :  { %v8860_v26 = vadd.f32 %v2955_v25, %v1503_v21  ;;  %v2957_v28 = vpop.f32.mrb[2].mxu0  ;;  %v9452_v21 = vld [vmem:[#allocation10 + $0x70] sm:$0xff]   ;;  %v10171_v25 = vmov 0.0  }
 0x3b2   :  { %v3124_v29 = vmax.f32 %v8859_v23, 0.0  ;;  %v2958_v30 = vpop.f32.mrb[3].mxu0  ;;  %8733 = vmatprep.subr.bf16.mxu1 %v9452_v21  ;;  %v9454_v23 = vld [vmem:[#allocation10 + $0x78] sm:$0xff]   ;;  %v9476_v21 = vld [vmem:[#allocation14 + $0x20] sm:$0xff]  }
 0x3b3   :  { %v3125_v31 = vmax.f32 %v8860_v26, 0.0  ;;  %8734 = vmatpush3.bf16.msra.mxu1 %v9453_v22  ;;  %v3197_v26 = vld [vmem:[#allocation23 + $0x2] ss:$8 sm:$0x3] }
 0x3b4   :  { %v3128_v34 = vpack.c.bf16 %v3124_v29, %v3124_v29  ;;  %8735 = vmatprep.subr.bf16.mxu1 %v9454_v23  ;;  %v3202_v28 = vrot.slane %v3197_v26, %v10520_v7  ;;  %v3206_v29 = vrot.slane %v3197_v26, %v10523_v57  ;;  %v9477_v22 = vld [vmem:[#allocation14 + $0x28] sm:$0xff]   ;;  %v9478_v23 = vld [vmem:[#allocation14 + $0x30] sm:$0xff]   ;;  %v9480_v26 = vld [vmem:[#allocation16] sm:$0xff]  }
 0x3b5   :  { %v3129_v32 = vpack.c.bf16 %v3125_v31, %v3125_v31 }
 0x3b7   :  { %3561 = vmatprep.mubr.bf16.mxu0 %v3129_v32  ;;  %8736 = vmatpush3.bf16.msra.mxu1 %v9455_v19  ;;  %v9479_v19 = vld [vmem:[#allocation14 + $0x38] sm:$0xff]  }
 0x3b8   :  { %3562 = vmatmul.mubr.bf16.vlgmr.msra.gmra.mrb[4].mxu0 %v3128_v34  ;;  %8779 = vmatprep.subr.bf16.mxu1 %v10171_v25 }
 0x3b9   :  { %3571 = vmatpush1.bf16.msra.mxu0 %v9392_v33 }
 0x3ba   :  { %3572 = vmatprep.subr.bf16.mxu0 %v9397_v35 }
 0x3bd   :  { %3573 = vmatpush1.bf16.msra.mxu0 %v9395_v36 }
 0x3be   :  { %3574 = vmatprep.subr.bf16.mxu0 %v9400_v37 }
 0x3c1   :  { %3575 = vmatpush1.bf16.msra.mxu0 %v9398_v38 }
 0x3c2   :  { %3576 = vmatprep.subr.bf16.mxu0 %v9403_v39  ;;  %v9456_v39 = vld [vmem:[#allocation11] sm:$0xff]  }
 0x3c5   :  { %3577 = vmatpush1.bf16.msra.mxu0 %v9401_v40 }
 0x3c6   :  { %3578 = vmatprep.subr.bf16.mxu0 %v9406_v41  ;;  %v9457_v41 = vld [vmem:[#allocation11 + $0x8] sm:$0xff]  }
 0x3c9   :  { %3579 = vmatpush1.bf16.msra.mxu0 %v9404_v42  ;;  %v9458_v42 = vld [vmem:[#allocation11 + $0x10] sm:$0xff]  }
 0x3ca   :  { %3580 = vmatprep.subr.bf16.mxu0 %v9409_v43  ;;  %v9459_v43 = vld [vmem:[#allocation11 + $0x18] sm:$0xff]  }
 0x3cd   :  { %3581 = vmatpush1.bf16.msra.mxu0 %v9407_v44  ;;  %v9460_v44 = vld [vmem:[#allocation11 + $0x20] sm:$0xff]  }
 0x3ce   :  { %3582 = vmatprep.subr.bf16.mxu0 %v9412_v45  ;;  %v9461_v45 = vld [vmem:[#allocation11 + $0x28] sm:$0xff]  }
 0x3d1   :  { %3583 = vmatpush1.bf16.msra.mxu0 %v9410_v47  ;;  %v9462_v47 = vld [vmem:[#allocation11 + $0x30] sm:$0xff]  }
 0x3d2   :  { %3584 = vmatprep.subr.bf16.mxu0 %v9415_v48  ;;  %v9463_v48 = vld [vmem:[#allocation11 + $0x38] sm:$0xff]  }
 0x3d3   :  { %v3117_v54 = vpop.f32.mrb[16].mxu1 }
 0x3d4   :  { %v3119_v56 = vpop.f32.mrb[17].mxu1  ;;  %v8861_v14 = vadd.f32 %v3117_v54, %v1507_v11 }
 0x3d5   :  { %v8862_v58 = vadd.f32 %v3119_v56, %v1511_v52  ;;  %3585 = vmatpush1.bf16.msra.mxu0 %v9413_v50  ;;  %v3121_v59 = vpop.f32.mrb[18].mxu1  ;;  %v3647_v52 = vld [vmem:[#allocation23 + $0x3] ss:$0 sm:$0xff] }
 0x3d6   :  { %v3122_v61 = vpop.f32.mrb[19].mxu1  ;;  %3586 = vmatprep.subr.bf16.mxu0 %v9418_v53  ;;  %v3126_v17 = vmax.f32 %v8861_v14, 0.0  ;;  %v9472_v14 = vld [vmem:[#allocation14] sm:$0xff]  }
 0x3d7   :  { %v3127_v18 = vmax.f32 %v8862_v58, 0.0  ;;  %v9464_v61 = vld [vmem:[#allocation13] sm:$0xff]  }
 0x3d8   :  { %v3130_v20 = vpack.c.bf16 %v3126_v17, %v3126_v17  ;;  %v9474_v17 = vld [vmem:[#allocation14 + $0x10] sm:$0xff]  }
 0x3d9   :  { %v3131_v63 = vpack.c.bf16 %v3127_v18, %v3127_v18  ;;  %3587 = vmatpush1.bf16.msra.mxu0 %v9416_v60  ;;  %v9465_v18 = vld [vmem:[#allocation13 + $0x8] sm:$0xff]  }
 0x3da   :  { %3588 = vmatprep.subr.bf16.mxu0 %v9421_v62 }
 0x3db   :  { %3602 = vmatprep.mubr.bf16.mxu0 %v3131_v63  ;;  %v9466_v63 = vld [vmem:[#allocation13 + $0x10] sm:$0xff]  }
 0x3dd   :  { %3589 = vmatpush1.bf16.msra.mxu0 %v9419_v0  ;;  %v9467_v0 = vld [vmem:[#allocation13 + $0x18] sm:$0xff]  }
 0x3de   :  { %3590 = vmatprep.subr.bf16.mxu0 %v9424_v1  ;;  %v9468_v1 = vld [vmem:[#allocation13 + $0x20] sm:$0xff]  }
 0x3e1   :  { %3591 = vmatpush1.bf16.msra.mxu0 %v9422_v3  ;;  %v9469_v3 = vld [vmem:[#allocation13 + $0x28] sm:$0xff]  }
 0x3e2   :  { %3592 = vmatprep.subr.bf16.mxu0 %v9427_v4  ;;  %v9470_v4 = vld [vmem:[#allocation13 + $0x30] sm:$0xff]  }
 0x3e5   :  { %3593 = vmatpush1.bf16.msra.mxu0 %v9425_v6  ;;  %v9471_v6 = vld [vmem:[#allocation13 + $0x38] sm:$0xff]  }
 0x3e6   :  { %3594 = vmatprep.subr.bf16.mxu0 %v9430_v55  ;;  %v3802_v55 = vld [vmem:[#allocation23 + $0x4] ss:$0 sm:$0xff] }
 0x3e9   :  { %3595 = vmatpush1.bf16.msra.mxu0 %v9428_v8 }
 0x3ea   :  { %3596 = vmatprep.subr.bf16.mxu0 %v9433_v9 }
 0x3ed   :  { %3597 = vmatpush1.bf16.msra.mxu0 %v9431_v10 }
 0x3ee   :  { %3598 = vmatprep.subr.bf16.mxu0 %v9436_v12 }
 0x3f1   :  { %3599 = vmatpush1.bf16.msra.mxu0 %v9434_v13 }
 0x3f2   :  { %3600 = vmatprep.subr.bf16.mxu0 %v9439_v15 }
 0x3f5   :  { %3601 = vmatpush1.bf16.msra.mxu0 %v9437_v16  ;;  %v9473_v16 = vld [vmem:[#allocation14 + $0x8] sm:$0xff]  }
 0x3f6   :  { %8839 = vmatprep.subr.bf16.mxu0 %v10171_v25 }
 0x3f8   :  { %3603 = vmatmul.mubr.bf16.vlgmr.msra.gmra.mrb[4].mxu0 %v3130_v20  ;;  %v9475_v20 = vld [vmem:[#allocation14 + $0x18] sm:$0xff]  }
 0x3f9   :  { %8855 = vmatprep.mubr.msk.bf16.mxu0 %vm10172_vm0, %v10171_v25  ;;  %8840 = vmatpush3.bf16.msra.mxu0 %v9480_v26  ;;  %v9548_v26 = vld [vmem:[#allocation19 + $0xc0] ss:$16 sps:$4 sm:$0xff]  }
 0x3fa   :  { %8841 = vmatprep.subr.bf16.mxu0 %v10171_v25 }
 0x4cb   :  { %v3604_v30 = vpop.f32.mrb[4].mxu0 }
 0x4cc   :  { %v8863_v31 = vadd.f32 %v3604_v30, %v3202_v28  ;;  %v3606_v32 = vpop.f32.mrb[5].mxu0  ;;  %v9481_v28 = vld [vmem:[#allocation16 + $0x8] sm:$0xff]   ;;  %v9483_v30 = vld [vmem:[#allocation16 + $0x18] sm:$0xff]  }
 0x4cd   :  { %v8864_v33 = vadd.f32 %v3606_v32, %v3206_v29  ;;  %v3608_v34 = vpop.f32.mrb[6].mxu0  ;;  %8842 = vmatpush3.bf16.msra.mxu0 %v9481_v28  ;;  %v9482_v29 = vld [vmem:[#allocation16 + $0x10] sm:$0xff]   ;;  %v9485_v32 = vld [vmem:[#allocation16 + $0x28] sm:$0xff]  }
 0x4ce   :  { %v3611_v35 = vmax.f32 %v8863_v31, 0.0  ;;  %v3609_v36 = vpop.f32.mrb[7].mxu0  ;;  %8843 = vmatprep.subr.bf16.mxu0 %v10171_v25  ;;  %v9484_v31 = vld [vmem:[#allocation16 + $0x20] sm:$0xff]  }
 0x4cf   :  { %v3612_v37 = vmax.f32 %v8864_v33, 0.0  ;;  %v3909_v33 = vld [vmem:[#allocation23 + $0x5] ss:$0 sm:$0xff] }
 0x4d0   :  { %v3613_v40 = vpack.c.bf16 %v3611_v35, %v3611_v35  ;;  %v9556_v28 = vld [vmem:[#allocation19 + $0xe4] ss:$16 sps:$4 sm:$0xff]  }
 0x4d1   :  { %v3614_v38 = vpack.c.bf16 %v3612_v37, %v3612_v37  ;;  %8844 = vmatpush3.bf16.msra.mxu0 %v9482_v29  ;;  %v9554_v29 = vld [vmem:[#allocation19 + $0xe0] ss:$16 sps:$4 sm:$0xff]  }
 0x4d2   :  { %8845 = vmatprep.subr.bf16.mxu0 %v10171_v25 }
 0x4d3   :  { %3776 = vmatprep.mubr.bf16.mxu1 %v3614_v38 }
 0x4d4   :  { %3777 = vmatmul.mubr.bf16.vlgmr.msra.gmra.mrb[20].mxu1 %v3613_v40 }
 0x4d5   :  { %8780 = vmatpush3.bf16.msra.mxu1 %v9456_v39  ;;  %8795 = vmatprep.mubr.msk.bf16.mxu1 %vm10172_vm0, %v10171_v25 }
 0x4d6   :  { %8781 = vmatprep.subr.bf16.mxu1 %v10171_v25  ;;  %8846 = vmatpush3.bf16.msra.mxu0 %v9483_v30  ;;  %v9562_v30 = vld [vmem:[#allocation19 + $0x104] ss:$16 sps:$4 sm:$0xff]  }
 0x4d7   :  { %8847 = vmatprep.subr.bf16.mxu0 %v10171_v25 }
 0x4d9   :  { %8782 = vmatpush3.bf16.msra.mxu1 %v9457_v41  ;;  %v9486_v41 = vld [vmem:[#allocation16 + $0x30] sm:$0xff]  }
 0x4da   :  { %8783 = vmatprep.subr.bf16.mxu1 %v10171_v25  ;;  %8848 = vmatpush3.bf16.msra.mxu0 %v9484_v31  ;;  %v9560_v31 = vld [vmem:[#allocation19 + $0x100] ss:$16 sps:$4 sm:$0xff]  }
 0x4db   :  { %8849 = vmatprep.subr.bf16.mxu0 %v10171_v25 }
 0x4dd   :  { %8784 = vmatpush3.bf16.msra.mxu1 %v9458_v42  ;;  %v9487_v42 = vld [vmem:[#allocation16 + $0x38] sm:$0xff]  }
 0x4de   :  { %8785 = vmatprep.subr.bf16.mxu1 %v10171_v25  ;;  %8850 = vmatpush3.bf16.msra.mxu0 %v9485_v32  ;;  %v9568_v32 = vld [vmem:[#allocation19 + $0x124] ss:$16 sps:$4 sm:$0xff]  }
 0x4df   :  { %8851 = vmatprep.subr.bf16.mxu0 %v10171_v25 }
 0x4e1   :  { %8786 = vmatpush3.bf16.msra.mxu1 %v9459_v43  ;;  %v9488_v43 = vld [vmem:[#allocation17] ss:$8 sps:$4 sm:$0xff]  }
 0x4e2   :  { %8787 = vmatprep.subr.bf16.mxu1 %v10171_v25  ;;  %8852 = vmatpush3.bf16.msra.mxu0 %v9486_v41  ;;  %v9590_v41 = vld [vmem:[#allocation19 + $0x1a0] ss:$16 sps:$4 sm:$0xff]  }
 0x4e3   :  { %8853 = vmatprep.subr.bf16.mxu0 %v10171_v25 }
 0x4e5   :  { %8788 = vmatpush3.bf16.msra.mxu1 %v9460_v44  ;;  %v9490_v44 = vld [vmem:[#allocation17 + $0x4] ss:$8 sps:$4 sm:$0xff]  }
 0x4e6   :  { %8789 = vmatprep.subr.bf16.mxu1 %v10171_v25  ;;  %8854 = vmatpush3.bf16.msra.mxu0 %v9487_v42  ;;  %v4123_v42 = vld [vmem:[#allocation23 + $0x7] ss:$0 sm:$0xff] }
 0x4e9   :  { %8790 = vmatpush3.bf16.msra.mxu1 %v9461_v45  ;;  %v9493_v45 = vld [vmem:[#allocation17 + $0x14] ss:$8 sps:$4 sm:$0xff]  }
 0x4ea   :  { %8791 = vmatprep.subr.bf16.mxu1 %v10171_v25 }
 0x4ed   :  { %8792 = vmatpush3.bf16.msra.mxu1 %v9462_v47  ;;  %v9491_v47 = vld [vmem:[#allocation17 + $0x10] ss:$8 sps:$4 sm:$0xff]  }
 0x4ee   :  { %8793 = vmatprep.subr.bf16.mxu1 %v10171_v25 }
 0x4f1   :  { %8794 = vmatpush3.bf16.msra.mxu1 %v9463_v48  ;;  %v9496_v48 = vld [vmem:[#allocation17 + $0x24] ss:$8 sps:$4 sm:$0xff]  }
 0x4f2   :  { %8799 = vmatprep.subr.bf16.mxu1 %v10171_v25 }
 0x5a7   :  { %v8737_v50 = vpop.f32.mrb[20].mxu1 }
 0x5a8   :  { %v8738_v53 = vpop.f32.mrb[21].mxu1 }
 0x5a9   :  { %v8739_v54 = vadd.f32 %v8738_v53, %v8737_v50  ;;  %v8740_v56 = vpop.f32.mrb[22].mxu1  ;;  %v9494_v50 = vld [vmem:[#allocation17 + $0x20] ss:$8 sps:$4 sm:$0xff]   ;;  %v9497_v53 = vld [vmem:[#allocation17 + $0x30] ss:$8 sps:$4 sm:$0xff]  }
 0x5aa   :  { %v8741_v58 = vpop.f32.mrb[23].mxu1  ;;  %v9505_v56 = vld [vmem:[#allocation17 + $0x54] ss:$8 sps:$4 sm:$0xff]  }
 0x5ab   :  { %v3779_v59 = vadd.f32 %v8739_v54, %v3647_v52  ;;  %v9499_v52 = vld [vmem:[#allocation17 + $0x34] ss:$8 sps:$4 sm:$0xff]   ;;  %v9502_v54 = vld [vmem:[#allocation17 + $0x44] ss:$8 sps:$4 sm:$0xff]   ;;  %v9503_v58 = vld [vmem:[#allocation17 + $0x50] ss:$8 sps:$4 sm:$0xff]  }
 0x5ad   :  { %v3784_v60 = vmax.f32 %v3779_v59, 0.0  ;;  %v9508_v59 = vld [vmem:[#allocation17 + $0x64] ss:$8 sps:$4 sm:$0xff]  }
 0x5af   :  { %v3785_v62 = vpack.c.bf16 %v3784_v60, %v3784_v60  ;;  %v9506_v60 = vld [vmem:[#allocation17 + $0x60] ss:$8 sps:$4 sm:$0xff]  }
 0x5b1   :  { %8796 = vmatmul.mubr.bf16.vlgmr.msra.gmra.mrb[24].mxu1 %v3785_v62 }
 0x5b2   :  { %8800 = vmatpush3.bf16.msra.mxu1 %v9464_v61  ;;  %8815 = vmatprep.mubr.msk.bf16.mxu1 %vm10172_vm0, %v10171_v25  ;;  %v4016_v61 = vld [vmem:[#allocation23 + $0x6] ss:$0 sm:$0xff] }
 0x5b3   :  { %8801 = vmatprep.subr.bf16.mxu1 %v10171_v25 }
 0x5b6   :  { %8802 = vmatpush3.bf16.msra.mxu1 %v9465_v18 }
 0x5b7   :  { %8803 = vmatprep.subr.bf16.mxu1 %v10171_v25 }
 0x5ba   :  { %8804 = vmatpush3.bf16.msra.mxu1 %v9466_v63 }
 0x5bb   :  { %8805 = vmatprep.subr.bf16.mxu1 %v10171_v25 }
 0x5be   :  { %8806 = vmatpush3.bf16.msra.mxu1 %v9467_v0 }
 0x5bf   :  { %8807 = vmatprep.subr.bf16.mxu1 %v10171_v25 }
 0x5c2   :  { %8808 = vmatpush3.bf16.msra.mxu1 %v9468_v1 }
 0x5c3   :  { %8809 = vmatprep.subr.bf16.mxu1 %v10171_v25 }
 0x5c6   :  { %8810 = vmatpush3.bf16.msra.mxu1 %v9469_v3 }
 0x5c7   :  { %8811 = vmatprep.subr.bf16.mxu1 %v10171_v25 }
 0x5ca   :  { %8812 = vmatpush3.bf16.msra.mxu1 %v9470_v4 }
 0x5cb   :  { %8813 = vmatprep.subr.bf16.mxu1 %v10171_v25 }
 0x5ce   :  { %8814 = vmatpush3.bf16.msra.mxu1 %v9471_v6  ;;  %v9511_v6 = vld [vmem:[#allocation17 + $0x74] ss:$8 sps:$4 sm:$0xff]  }
 0x5cf   :  { %8819 = vmatprep.subr.bf16.mxu1 %v10171_v25 }
 0x684   :  { %v3885_v8 = vpop.f32.mrb[24].mxu1 }
 0x685   :  { %v3886_v9 = vadd.f32 %v3885_v8, %v3802_v55  ;;  %v8797_v10 = vpop.f32.mrb[25].mxu1  ;;  %v9509_v55 = vld [vmem:[#allocation17 + $0x70] ss:$8 sps:$4 sm:$0xff]   ;;  %v10173_v8 = vmov 0  }
 0x686   :  { %v3888_v11 = vpop.f32.mrb[26].mxu1  ;;  %v9514_v10 = vld [vmem:[#allocation19 + $0x4] ss:$16 sps:$4 sm:$0xff]  }
 0x687   :  { %v3891_v12 = vmax.f32 %v3886_v9, 0.0  ;;  %v8798_v13 = vpop.f32.mrb[27].mxu1  ;;  %v9512_v9 = vld [vmem:[#allocation19] ss:$16 sps:$4 sm:$0xff]   ;;  %v9517_v11 = vld [vmem:[#allocation19 + $0xc] ss:$16 sps:$4 sm:$0xff]   ;;  %4775 = vmatprep.subr.bf16.mxu0 %v9514_v10 }
 0x688   :  { %v9518_v13 = vld [vmem:[#allocation19 + $0x20] ss:$16 sps:$4 sm:$0xff]   ;;  %v9577_v10 = vld [vmem:[#allocation19 + $0x14c] ss:$16 sps:$4 sm:$0xff]  }
 0x689   :  { %v3892_v15 = vpack.c.bf16 %v3891_v12, %v3891_v12  ;;  %v9520_v12 = vld [vmem:[#allocation19 + $0x24] ss:$16 sps:$4 sm:$0xff]  }
 0x68b   :  { %8816 = vmatmul.mubr.bf16.vlgmr.msra.gmra.mrb[28].mxu1 %v3892_v15  ;;  %v9524_v15 = vld [vmem:[#allocation19 + $0x40] ss:$16 sps:$4 sm:$0xff]  }
 0x68c   :  { %8820 = vmatpush3.bf16.msra.mxu1 %v9472_v14  ;;  %8835 = vmatprep.mubr.msk.bf16.mxu1 %vm10172_vm0, %v10171_v25  ;;  %v9526_v14 = vld [vmem:[#allocation19 + $0x44] ss:$16 sps:$4 sm:$0xff]  }
 0x68d   :  { %8821 = vmatprep.subr.bf16.mxu1 %v10171_v25 }
 0x690   :  { %8822 = vmatpush3.bf16.msra.mxu1 %v9473_v16  ;;  %v9532_v16 = vld [vmem:[#allocation19 + $0x64] ss:$16 sps:$4 sm:$0xff]  }
 0x691   :  { %8823 = vmatprep.subr.bf16.mxu1 %v10171_v25 }
 0x694   :  { %8824 = vmatpush3.bf16.msra.mxu1 %v9474_v17  ;;  %v9530_v17 = vld [vmem:[#allocation19 + $0x60] ss:$16 sps:$4 sm:$0xff]  }
 0x695   :  { %8825 = vmatprep.subr.bf16.mxu1 %v10171_v25 }
 0x698   :  { %8826 = vmatpush3.bf16.msra.mxu1 %v9475_v20  ;;  %v9538_v20 = vld [vmem:[#allocation19 + $0x84] ss:$16 sps:$4 sm:$0xff]  }
 0x699   :  { %8827 = vmatprep.subr.bf16.mxu1 %v10171_v25 }
 0x69c   :  { %8828 = vmatpush3.bf16.msra.mxu1 %v9476_v21  ;;  %v9536_v21 = vld [vmem:[#allocation19 + $0x80] ss:$16 sps:$4 sm:$0xff]  }
 0x69d   :  { %8829 = vmatprep.subr.bf16.mxu1 %v10171_v25 }
 0x6a0   :  { %8830 = vmatpush3.bf16.msra.mxu1 %v9477_v22  ;;  %v9544_v22 = vld [vmem:[#allocation19 + $0xa4] ss:$16 sps:$4 sm:$0xff]  }
 0x6a1   :  { %8831 = vmatprep.subr.bf16.mxu1 %v10171_v25 }
 0x6a4   :  { %8832 = vmatpush3.bf16.msra.mxu1 %v9478_v23  ;;  %v9542_v23 = vld [vmem:[#allocation19 + $0xa0] ss:$16 sps:$4 sm:$0xff]  }
 0x6a5   :  { %8833 = vmatprep.subr.bf16.mxu1 %v10171_v25  ;;  %v9500_v25 = vld [vmem:[#allocation17 + $0x40] ss:$8 sps:$4 sm:$0xff]  }
 0x6a8   :  { %8834 = vmatpush3.bf16.msra.mxu1 %v9479_v19  ;;  %v9550_v19 = vld [vmem:[#allocation19 + $0xc4] ss:$16 sps:$4 sm:$0xff]  }
 0x6a9   :  { %4323 = vmatprep.subr.bf16.mxu1 %v9490_v44 }
 0x75e   :  { %v3992_v34 = vpop.f32.mrb[28].mxu1 }
 0x75f   :  { %v3993_v35 = vadd.f32 %v3992_v34, %v3909_v33  ;;  %v8817_v36 = vpop.f32.mrb[29].mxu1  ;;  %v9566_v33 = vld [vmem:[#allocation19 + $0x120] ss:$16 sps:$4 sm:$0xff]   ;;  %v9574_v34 = vld [vmem:[#allocation19 + $0x144] ss:$16 sps:$4 sm:$0xff]  }
 0x760   :  { %v3995_v37 = vpop.f32.mrb[30].mxu1  ;;  %v9580_v36 = vld [vmem:[#allocation19 + $0x164] ss:$16 sps:$4 sm:$0xff]  }
 0x761   :  { %v3998_v38 = vmax.f32 %v3993_v35, 0.0  ;;  %v8818_v39 = vpop.f32.mrb[31].mxu1  ;;  %v9572_v35 = vld [vmem:[#allocation19 + $0x140] ss:$16 sps:$4 sm:$0xff]  }
 0x762   :  { %v9578_v37 = vld [vmem:[#allocation19 + $0x160] ss:$16 sps:$4 sm:$0xff]  }
 0x763   :  { %v3999_v40 = vpack.c.bf16 %v3998_v38, %v3998_v38  ;;  %v9586_v38 = vld [vmem:[#allocation19 + $0x184] ss:$16 sps:$4 sm:$0xff]   ;;  %v9584_v39 = vld [vmem:[#allocation19 + $0x180] ss:$16 sps:$4 sm:$0xff]  }
 0x765   :  { %8836 = vmatmul.mubr.bf16.vlgmr.msra.gmra.mrb[32].mxu1 %v3999_v40  ;;  %v9592_v40 = vld [vmem:[#allocation19 + $0x1a4] ss:$16 sps:$4 sm:$0xff]  }
 0x766   :  { %4324 = vmatpush1.bf16.msra.mxu1 %v9488_v43  ;;  %4355 = vmatprep.mubr.bf16.mxu1 %v10173_v8  ;;  %v9571_v8 = vld [vmem:[#allocation19 + $0x12c] ss:$16 sps:$4 sm:$0xff]  }
 0x767   :  { %4325 = vmatprep.subr.bf16.mxu1 %v9493_v45 }
 0x76a   :  { %4326 = vmatpush1.bf16.msra.mxu1 %v9491_v47 }
 0x76b   :  { %4327 = vmatprep.subr.bf16.mxu1 %v9496_v48 }
 0x76e   :  { %4328 = vmatpush1.bf16.msra.mxu1 %v9494_v50 }
 0x76f   :  { %4329 = vmatprep.subr.bf16.mxu1 %v9499_v52  ;;  %v9515_v52 = vld [vmem:[#allocation19 + $0x8] ss:$16 sps:$4 sm:$0xff]  }
 0x772   :  { %4330 = vmatpush1.bf16.msra.mxu1 %v9497_v53 }
 0x773   :  { %4331 = vmatprep.subr.bf16.mxu1 %v9502_v54  ;;  %v9523_v54 = vld [vmem:[#allocation19 + $0x2c] ss:$16 sps:$4 sm:$0xff]  }
 0x776   :  { %4332 = vmatpush1.bf16.msra.mxu1 %v9500_v25  ;;  %v9521_v25 = vld [vmem:[#allocation19 + $0x28] ss:$16 sps:$4 sm:$0xff]  }
 0x777   :  { %4333 = vmatprep.subr.bf16.mxu1 %v9505_v56  ;;  %v9529_v56 = vld [vmem:[#allocation19 + $0x4c] ss:$16 sps:$4 sm:$0xff]  }
 0x77a   :  { %4334 = vmatpush1.bf16.msra.mxu1 %v9503_v58  ;;  %v9527_v58 = vld [vmem:[#allocation19 + $0x48] ss:$16 sps:$4 sm:$0xff]  }
 0x77b   :  { %4335 = vmatprep.subr.bf16.mxu1 %v9508_v59  ;;  %v9535_v59 = vld [vmem:[#allocation19 + $0x6c] ss:$16 sps:$4 sm:$0xff]  }
 0x77e   :  { %4336 = vmatpush1.bf16.msra.mxu1 %v9506_v60  ;;  %v9533_v60 = vld [vmem:[#allocation19 + $0x68] ss:$16 sps:$4 sm:$0xff]  }
 0x77f   :  { %4337 = vmatprep.subr.bf16.mxu1 %v9511_v6  ;;  %v9565_v6 = vld [vmem:[#allocation19 + $0x10c] ss:$16 sps:$4 sm:$0xff]  }
 0x782   :  { %4338 = vmatpush1.bf16.msra.mxu1 %v9509_v55  ;;  %v9563_v55 = vld [vmem:[#allocation19 + $0x108] ss:$16 sps:$4 sm:$0xff]  }
 0x783   :  { %4816 = vmatprep.subr.bf16.mxu1 %v9517_v11  ;;  %v9575_v11 = vld [vmem:[#allocation19 + $0x148] ss:$16 sps:$4 sm:$0xff]  }
 0x838   :  { %v4099_v62 = vpop.f32.mrb[32].mxu1 }
 0x839   :  { %v4100_v18 = vadd.f32 %v4099_v62, %v4016_v61  ;;  %v8837_v63 = vpop.f32.mrb[33].mxu1  ;;  %v9541_v61 = vld [vmem:[#allocation19 + $0x8c] ss:$16 sps:$4 sm:$0xff]   ;;  %v9539_v62 = vld [vmem:[#allocation19 + $0x88] ss:$16 sps:$4 sm:$0xff]  }
 0x83a   :  { %v4102_v0 = vpop.f32.mrb[34].mxu1  ;;  %v9545_v63 = vld [vmem:[#allocation19 + $0xa8] ss:$16 sps:$4 sm:$0xff]  }
 0x83b   :  { %v4105_v1 = vmax.f32 %v4100_v18, 0.0  ;;  %v8838_v3 = vpop.f32.mrb[35].mxu1  ;;  %v9547_v18 = vld [vmem:[#allocation19 + $0xac] ss:$16 sps:$4 sm:$0xff]  }
 0x83c   :  { %v9553_v0 = vld [vmem:[#allocation19 + $0xcc] ss:$16 sps:$4 sm:$0xff]  }
 0x83d   :  { %v4106_v4 = vpack.c.bf16 %v4105_v1, %v4105_v1  ;;  %v9551_v1 = vld [vmem:[#allocation19 + $0xc8] ss:$16 sps:$4 sm:$0xff]   ;;  %v9559_v3 = vld [vmem:[#allocation19 + $0xec] ss:$16 sps:$4 sm:$0xff]  }
 0x83f   :  { %8856 = vmatmul.mubr.bf16.vlgmr.msra.gmra.mrb[8].mxu0 %v4106_v4  ;;  %v9557_v4 = vld [vmem:[#allocation19 + $0xe8] ss:$16 sps:$4 sm:$0xff]  }
 0x840   :  { %4776 = vmatpush1.bf16.msra.mxu0 %v9512_v9  ;;  %v9569_v9 = vld [vmem:[#allocation19 + $0x128] ss:$16 sps:$4 sm:$0xff]  }
 0x841   :  { %4777 = vmatprep.subr.bf16.mxu0 %v9520_v12  ;;  %v9583_v12 = vld [vmem:[#allocation19 + $0x16c] ss:$16 sps:$4 sm:$0xff]  }
 0x844   :  { %4778 = vmatpush1.bf16.msra.mxu0 %v9518_v13  ;;  %v9581_v13 = vld [vmem:[#allocation19 + $0x168] ss:$16 sps:$4 sm:$0xff]  }
 0x845   :  { %4779 = vmatprep.subr.bf16.mxu0 %v9526_v14  ;;  %v9589_v14 = vld [vmem:[#allocation19 + $0x18c] ss:$16 sps:$4 sm:$0xff]  }
 0x848   :  { %4780 = vmatpush1.bf16.msra.mxu0 %v9524_v15  ;;  %v9587_v15 = vld [vmem:[#allocation19 + $0x188] ss:$16 sps:$4 sm:$0xff]  }
 0x849   :  { %4781 = vmatprep.subr.bf16.mxu0 %v9532_v16  ;;  %v9595_v16 = vld [vmem:[#allocation19 + $0x1ac] ss:$16 sps:$4 sm:$0xff]  }
 0x84c   :  { %4782 = vmatpush1.bf16.msra.mxu0 %v9530_v17  ;;  %v9593_v17 = vld [vmem:[#allocation19 + $0x1a8] ss:$16 sps:$4 sm:$0xff]  }
 0x84d   :  { %4783 = vmatprep.subr.bf16.mxu0 %v9538_v20  ;;  %v9598_v20 = vld [vmem:[#allocation19 + $0x1c4] ss:$16 sps:$4 sm:$0xff]  }
 0x850   :  { %4784 = vmatpush1.bf16.msra.mxu0 %v9536_v21  ;;  %v9601_v21 = vld [vmem:[#allocation19 + $0x1cc] ss:$16 sps:$4 sm:$0xff]  }
 0x851   :  { %4785 = vmatprep.subr.bf16.mxu0 %v9544_v22  ;;  %v9596_v22 = vld [vmem:[#allocation19 + $0x1c0] ss:$16 sps:$4 sm:$0xff]  }
 0x854   :  { %4786 = vmatpush1.bf16.msra.mxu0 %v9542_v23  ;;  %v9599_v23 = vld [vmem:[#allocation19 + $0x1c8] ss:$16 sps:$4 sm:$0xff]  }
 0x855   :  { %4787 = vmatprep.subr.bf16.mxu0 %v9550_v19  ;;  %v9604_v19 = vld [vmem:[#allocation19 + $0x1e4] ss:$16 sps:$4 sm:$0xff]  }
 0x858   :  { %4788 = vmatpush1.bf16.msra.mxu0 %v9548_v26  ;;  %v9607_v26 = vld [vmem:[#allocation19 + $0x1ec] ss:$16 sps:$4 sm:$0xff]  }
 0x859   :  { %4789 = vmatprep.subr.bf16.mxu0 %v9556_v28  ;;  %v9602_v28 = vld [vmem:[#allocation19 + $0x1e0] ss:$16 sps:$4 sm:$0xff]  }
 0x85c   :  { %4790 = vmatpush1.bf16.msra.mxu0 %v9554_v29  ;;  %v9605_v29 = vld [vmem:[#allocation19 + $0x1e8] ss:$16 sps:$4 sm:$0xff]  }
 0x85d   :  { %4791 = vmatprep.subr.bf16.mxu0 %v9562_v30  ;;  %v4865_v30 = vld [vmem:[#allocation20] sm:$0xff] }
 0x860   :  { %4792 = vmatpush1.bf16.msra.mxu0 %v9560_v31  ;;  %v4869_v31 = vld [vmem:[#allocation20 + $0x20] sm:$0xff] }
 0x861   :  { %4793 = vmatprep.subr.bf16.mxu0 %v9568_v32  ;;  %v4866_v32 = vld [vmem:[#allocation20 + $0x8] sm:$0xff] }
 0x864   :  { %4794 = vmatpush1.bf16.msra.mxu0 %v9566_v33  ;;  %v8337_v33 = vcombine.low %v4865_v30, %v4869_v31 }
 0x865   :  { %4795 = vmatprep.subr.bf16.mxu0 %v9574_v34  ;;  %v8338_v34 = vcombine.high %v4865_v30, %v4869_v31 }
 0x868   :  { %4796 = vmatpush1.bf16.msra.mxu0 %v9572_v35  ;;  %v4870_v35 = vld [vmem:[#allocation20 + $0x28] sm:$0xff] }
 0x869   :  { %4797 = vmatprep.subr.bf16.mxu0 %v9580_v36  ;;  %v8339_v36 = vcombine.low %v4866_v32, %v4870_v35 }
 0x86c   :  { %4798 = vmatpush1.bf16.msra.mxu0 %v9578_v37  ;;  %v8340_v37 = vcombine.high %v4866_v32, %v4870_v35  ;;  %v4917_v35 = vld [vmem:[#allocation20 + $0x1a0] sm:$0xff] }
 0x86d   :  { %4799 = vmatprep.subr.bf16.mxu0 %v9586_v38  ;;  %v4231_v38 = vld [vmem:[#allocation23 + $0x40] ss:$8 sm:$0x3] }
 0x870   :  { %4800 = vmatpush1.bf16.msra.mxu0 %v9584_v39  ;;  %v4236_v39 = vrot.slane %v4231_v38, %v10520_v7 }
 0x871   :  { %4801 = vmatprep.subr.bf16.mxu0 %v9592_v40  ;;  %v4240_v40 = vrot.slane %v4231_v38, %v10523_v57 }
 0x874   :  { %4802 = vmatpush1.bf16.msra.mxu0 %v9590_v41 }
 0x875   :  { %4803 = vmatprep.subr.bf16.mxu0 %v9598_v20 }
 0x878   :  { %4804 = vmatpush1.bf16.msra.mxu0 %v9596_v22 }
 0x879   :  { %4805 = vmatprep.subr.bf16.mxu0 %v9604_v19  ;;  %v4905_v19 = vld [vmem:[#allocation20 + $0x140] sm:$0xff] }
 0x87c   :  { %4806 = vmatpush1.bf16.msra.mxu0 %v9602_v28  ;;  %v4906_v28 = vld [vmem:[#allocation20 + $0x148] sm:$0xff] }
 0x87d   :  { %6446 = vmatprep.subr.bf16.mxu0 %v8338_v34  ;;  %v4913_v34 = vld [vmem:[#allocation20 + $0x180] sm:$0xff] }
 0x912   :  { %v4206_v43 = vpop.f32.mrb[8].mxu0 }
 0x913   :  { %v4207_v44 = vadd.f32 %v4206_v43, %v4123_v42  ;;  %v8857_v45 = vpop.f32.mrb[9].mxu0 }
 0x914   :  { %v4209_v47 = vpop.f32.mrb[10].mxu0 }
 0x915   :  { %v4212_v48 = vmax.f32 %v4207_v44, 0.0  ;;  %v8858_v50 = vpop.f32.mrb[11].mxu0 }
 0x916   :  { %v4873_v50 = vld [vmem:[#allocation20 + $0x40] sm:$0xff] }
 0x917   :  { %v4213_v53 = vpack.c.bf16 %v4212_v48, %v4212_v48 }
 0x919   :  { %4356 = vmatmul.mubr.bf16.vlgmr.msra.gmra.mrb[36].mxu1 %v4213_v53  ;;  %v4877_v53 = vld [vmem:[#allocation20 + $0x60] sm:$0xff] }
 0x91a   :  { %4817 = vmatpush1.bf16.msra.mxu1 %v9515_v52 }
 0x91b   :  { %4818 = vmatprep.subr.bf16.mxu1 %v9523_v54  ;;  %v4874_v54 = vld [vmem:[#allocation20 + $0x48] sm:$0xff] }
 0x91e   :  { %4819 = vmatpush1.bf16.msra.mxu1 %v9521_v25  ;;  %v4878_v25 = vld [vmem:[#allocation20 + $0x68] sm:$0xff] }
 0x91f   :  { %4820 = vmatprep.subr.bf16.mxu1 %v9529_v56 }
 0x922   :  { %4821 = vmatpush1.bf16.msra.mxu1 %v9527_v58 }
 0x923   :  { %4822 = vmatprep.subr.bf16.mxu1 %v9535_v59  ;;  %v8346_v59 = vcombine.high %v4873_v50, %v4877_v53 }
 0x926   :  { %4823 = vmatpush1.bf16.msra.mxu1 %v9533_v60  ;;  %v8348_v60 = vcombine.high %v4874_v54, %v4878_v25 }
 0x927   :  { %4824 = vmatprep.subr.bf16.mxu1 %v9541_v61  ;;  %v4881_v61 = vld [vmem:[#allocation20 + $0x80] sm:$0xff] }
 0x92a   :  { %4825 = vmatpush1.bf16.msra.mxu1 %v9539_v62  ;;  %v4885_v62 = vld [vmem:[#allocation20 + $0xa0] sm:$0xff] }
 0x92b   :  { %4826 = vmatprep.subr.bf16.mxu1 %v9547_v18  ;;  %v4882_v18 = vld [vmem:[#allocation20 + $0x88] sm:$0xff] }
 0x92e   :  { %4827 = vmatpush1.bf16.msra.mxu1 %v9545_v63  ;;  %v4886_v63 = vld [vmem:[#allocation20 + $0xa8] sm:$0xff] }
 0x92f   :  { %4828 = vmatprep.subr.bf16.mxu1 %v9553_v0  ;;  %v8345_v0 = vcombine.low %v4873_v50, %v4877_v53  ;;  %v4929_v53 = vld [vmem:[#allocation20 + $0x200] sm:$0xff] }
 0x932   :  { %4829 = vmatpush1.bf16.msra.mxu1 %v9551_v1  ;;  %v8347_v1 = vcombine.low %v4874_v54, %v4878_v25  ;;  %v4933_v54 = vld [vmem:[#allocation20 + $0x220] sm:$0xff]  ;;  %v4930_v25 = vld [vmem:[#allocation20 + $0x208] sm:$0xff] }
 0x933   :  { %4830 = vmatprep.subr.bf16.mxu1 %v9559_v3  ;;  %v8354_v3 = vcombine.high %v4881_v61, %v4885_v62 }
 0x936   :  { %4831 = vmatpush1.bf16.msra.mxu1 %v9557_v4  ;;  %v8356_v4 = vcombine.high %v4882_v18, %v4886_v63 }
 0x937   :  { %4832 = vmatprep.subr.bf16.mxu1 %v9565_v6  ;;  %v4889_v6 = vld [vmem:[#allocation20 + $0xc0] sm:$0xff] }
 0x93a   :  { %4833 = vmatpush1.bf16.msra.mxu1 %v9563_v55  ;;  %v4893_v55 = vld [vmem:[#allocation20 + $0xe0] sm:$0xff] }
 0x93b   :  { %4834 = vmatprep.subr.bf16.mxu1 %v9571_v8  ;;  %v4890_v8 = vld [vmem:[#allocation20 + $0xc8] sm:$0xff]  ;;  %v8361_v20 = vcombine.low %v4889_v6, %v4893_v55 }
 0x93e   :  { %4835 = vmatpush1.bf16.msra.mxu1 %v9569_v9  ;;  %v4894_v9 = vld [vmem:[#allocation20 + $0xe8] sm:$0xff] }
 0x93f   :  { %4836 = vmatprep.subr.bf16.mxu1 %v9577_v10  ;;  %v8353_v10 = vcombine.low %v4881_v61, %v4885_v62  ;;  %v4937_v62 = vld [vmem:[#allocation20 + $0x240] sm:$0xff] }
 0x942   :  { %4837 = vmatpush1.bf16.msra.mxu1 %v9575_v11  ;;  %v8355_v11 = vcombine.low %v4882_v18, %v4886_v63  ;;  %v4941_v18 = vld [vmem:[#allocation20 + $0x260] sm:$0xff]  ;;  %v4938_v63 = vld [vmem:[#allocation20 + $0x248] sm:$0xff] }
 0x943   :  { %4838 = vmatprep.subr.bf16.mxu1 %v9583_v12  ;;  %v8362_v12 = vcombine.high %v4889_v6, %v4893_v55  ;;  %v4945_v55 = vld [vmem:[#allocation20 + $0x280] sm:$0xff] }
 0x946   :  { %4839 = vmatpush1.bf16.msra.mxu1 %v9581_v13  ;;  %v8364_v13 = vcombine.high %v4890_v8, %v4894_v9 }
 0x947   :  { %4840 = vmatprep.subr.bf16.mxu1 %v9589_v14  ;;  %v4897_v14 = vld [vmem:[#allocation20 + $0x100] sm:$0xff] }
 0x94a   :  { %4841 = vmatpush1.bf16.msra.mxu1 %v9587_v15  ;;  %v4901_v15 = vld [vmem:[#allocation20 + $0x120] sm:$0xff] }
 0x94b   :  { %4842 = vmatprep.subr.bf16.mxu1 %v9595_v16  ;;  %v4898_v16 = vld [vmem:[#allocation20 + $0x108] sm:$0xff]  ;;  %v8370_v22 = vcombine.high %v4897_v14, %v4901_v15  ;;  %v8369_v30 = vcombine.low %v4897_v14, %v4901_v15  ;;  %v4953_v15 = vld [vmem:[#allocation20 + $0x2c0] sm:$0xff] }
 0x94e   :  { %4843 = vmatpush1.bf16.msra.mxu1 %v9593_v17  ;;  %v4902_v17 = vld [vmem:[#allocation20 + $0x128] sm:$0xff] }
 0x94f   :  { %4844 = vmatprep.subr.bf16.mxu1 %v9601_v21  ;;  %v8363_v21 = vcombine.low %v4890_v8, %v4894_v9  ;;  %v8371_v31 = vcombine.low %v4898_v16, %v4902_v17  ;;  %v4949_v8 = vld [vmem:[#allocation20 + $0x2a0] sm:$0xff]  ;;  %v4946_v9 = vld [vmem:[#allocation20 + $0x288] sm:$0xff] }
 0x952   :  { %4845 = vmatpush1.bf16.msra.mxu1 %v9599_v23  ;;  %v8372_v23 = vcombine.high %v4898_v16, %v4902_v17  ;;  %v4957_v16 = vld [vmem:[#allocation20 + $0x2e0] sm:$0xff]  ;;  %v4954_v17 = vld [vmem:[#allocation20 + $0x2c8] sm:$0xff] }
 0x953   :  { %4846 = vmatprep.subr.bf16.mxu1 %v9607_v26  ;;  %v4909_v26 = vld [vmem:[#allocation20 + $0x160] sm:$0xff] }
 0x954   :  { %v8378_v32 = vcombine.high %v4905_v19, %v4909_v26  ;;  %v8377_v38 = vcombine.low %v4905_v19, %v4909_v26  ;;  %v4961_v26 = vld [vmem:[#allocation20 + $0x300] sm:$0xff] }
 0x956   :  { %4847 = vmatpush1.bf16.msra.mxu1 %v9605_v29  ;;  %v4910_v29 = vld [vmem:[#allocation20 + $0x168] sm:$0xff] }
 0x957   :  { %6528 = vmatprep.subr.bf16.mxu1 %v8340_v37  ;;  %v4918_v37 = vld [vmem:[#allocation20 + $0x1a8] sm:$0xff] }
 0x9ec   :  { %v4357_v41 = vpop.f32.mrb[36].mxu1 }
 0x9ed   :  { %v4358_v42 = vadd.f32 %v4357_v41, %v4236_v39  ;;  %v4359_v43 = vpop.f32.mrb[37].mxu1  ;;  %v8379_v39 = vcombine.low %v4906_v28, %v4910_v29 }
 0x9ee   :  { %v4360_v44 = vadd.f32 %v4359_v43, %v4240_v40  ;;  %v4361_v45 = vpop.f32.mrb[38].mxu1  ;;  %v8386_v40 = vcombine.high %v4913_v34, %v4917_v35  ;;  %v4925_v43 = vld [vmem:[#allocation20 + $0x1e0] sm:$0xff] }
 0x9ef   :  { %v4364_v47 = vmax.f32 %v4358_v42, 0.0  ;;  %v4362_v48 = vpop.f32.mrb[39].mxu1  ;;  %v4921_v42 = vld [vmem:[#allocation20 + $0x1c0] sm:$0xff]  ;;  %v4926_v45 = vld [vmem:[#allocation20 + $0x1e8] sm:$0xff] }
 0x9f0   :  { %v4365_v52 = vmax.f32 %v4360_v44, 0.0  ;;  %v4922_v44 = vld [vmem:[#allocation20 + $0x1c8] sm:$0xff]  ;;  %v8394_v50 = vcombine.high %v4921_v42, %v4925_v43 }
 0x9f1   :  { %v4366_v58 = vpack.c.bf16 %v4364_v47, %v4364_v47  ;;  %v8385_v47 = vcombine.low %v4913_v34, %v4917_v35  ;;  %v4969_v35 = vld [vmem:[#allocation20 + $0x340] sm:$0xff] }
 0x9f2   :  { %v4367_v56 = vpack.c.bf16 %v4365_v52, %v4365_v52  ;;  %v8396_v52 = vcombine.high %v4922_v44, %v4926_v45 }
 0x9f4   :  { %4807 = vmatprep.mubr.bf16.mxu0 %v4367_v56  ;;  %4848 = vmatprep.mubr.bf16.mxu1 %v4367_v56  ;;  %v4934_v56 = vld [vmem:[#allocation20 + $0x228] sm:$0xff] }
 0x9f5   :  { %4808 = vmatmul.mubr.bf16.vlgmr.msra.gmra.mrb[12].mxu0 %v4366_v58  ;;  %4849 = vmatmul.mubr.bf16.vlgmr.msra.gmra.mrb[40].mxu1 %v4366_v58  ;;  %v8393_v58 = vcombine.low %v4921_v42, %v4925_v43  ;;  %v8404_v61 = vcombine.high %v4930_v25, %v4934_v56 }
 0x9f6   :  { %6447 = vmatpush1.bf16.msra.mxu0 %v8337_v33  ;;  %6529 = vmatpush1.bf16.msra.mxu1 %v8339_v36  ;;  %v8380_v33 = vcombine.high %v4906_v28, %v4910_v29  ;;  %v4914_v36 = vld [vmem:[#allocation20 + $0x188] sm:$0xff]  ;;  %v4965_v28 = vld [vmem:[#allocation20 + $0x320] sm:$0xff] }
 0x9f7   :  { %6448 = vmatprep.subr.bf16.mxu0 %v8346_v59  ;;  %6530 = vmatprep.subr.bf16.mxu1 %v8348_v60  ;;  %v8388_v41 = vcombine.high %v4914_v36, %v4918_v37  ;;  %v8387_v48 = vcombine.low %v4914_v36, %v4918_v37  ;;  %v8395_v59 = vcombine.low %v4922_v44, %v4926_v45  ;;  %v4962_v29 = vld [vmem:[#allocation20 + $0x308] sm:$0xff]  ;;  %v4973_v36 = vld [vmem:[#allocation20 + $0x360] sm:$0xff] }
 0x9f8   :  { %v8402_v60 = vcombine.high %v4929_v53, %v4933_v54  ;;  %v4970_v37 = vld [vmem:[#allocation20 + $0x348] sm:$0xff]  ;;  %v8441_v43 = vcombine.low %v4969_v35, %v4973_v36  ;;  %v4977_v45 = vld [vmem:[#allocation20 + $0x380] sm:$0xff] }
 0x9fa   :  { %6449 = vmatpush1.bf16.msra.mxu0 %v8345_v0  ;;  %6531 = vmatpush1.bf16.msra.mxu1 %v8347_v1  ;;  %v4942_v0 = vld [vmem:[#allocation20 + $0x268] sm:$0xff]  ;;  %v8401_v1 = vcombine.low %v4929_v53, %v4933_v54 }
 0x9fb   :  { %6450 = vmatprep.subr.bf16.mxu0 %v8354_v3  ;;  %6532 = vmatprep.subr.bf16.mxu1 %v8356_v4  ;;  %v8403_v3 = vcombine.low %v4930_v25, %v4934_v56  ;;  %v8410_v4 = vcombine.high %v4937_v62, %v4941_v18  ;;  %v8412_v6 = vcombine.high %v4938_v63, %v4942_v0  ;;  %v4985_v56 = vld [vmem:[#allocation20 + $0x3c0] sm:$0xff] }
 0x9fe   :  { %6451 = vmatpush1.bf16.msra.mxu0 %v8353_v10  ;;  %6533 = vmatpush1.bf16.msra.mxu1 %v8355_v11  ;;  %v4950_v10 = vld [vmem:[#allocation20 + $0x2a8] sm:$0xff]  ;;  %v8409_v11 = vcombine.low %v4937_v62, %v4941_v18 }
 0x9ff   :  { %6452 = vmatprep.subr.bf16.mxu0 %v8362_v12  ;;  %6534 = vmatprep.subr.bf16.mxu1 %v8364_v13  ;;  %v8411_v12 = vcombine.low %v4938_v63, %v4942_v0  ;;  %v8418_v13 = vcombine.high %v4945_v55, %v4949_v8  ;;  %v8420_v14 = vcombine.high %v4946_v9, %v4950_v10  ;;  %v4993_v0 = vld [vmem:[#allocation20 + $0x400] sm:$0xff] }
 0xa02   :  { %6453 = vmatpush1.bf16.msra.mxu0 %v8361_v20  ;;  %6535 = vmatpush1.bf16.msra.mxu1 %v8363_v21  ;;  %v4958_v20 = vld [vmem:[#allocation20 + $0x2e8] sm:$0xff]  ;;  %v8417_v21 = vcombine.low %v4945_v55, %v4949_v8 }
 0xa03   :  { %6454 = vmatprep.subr.bf16.mxu0 %v8370_v22  ;;  %6536 = vmatprep.subr.bf16.mxu1 %v8372_v23  ;;  %v8419_v22 = vcombine.low %v4946_v9, %v4950_v10  ;;  %v8426_v23 = vcombine.high %v4953_v15, %v4957_v16  ;;  %v8428_v19 = vcombine.high %v4954_v17, %v4958_v20  ;;  %v10625_v10 = vld [vmem:[#allocation23 + $0x41] ss:$8 sm:$0xf] }
 0xa06   :  { %6455 = vmatpush1.bf16.msra.mxu0 %v8369_v30  ;;  %6537 = vmatpush1.bf16.msra.mxu1 %v8371_v31  ;;  %v4966_v30 = vld [vmem:[#allocation20 + $0x328] sm:$0xff]  ;;  %v8425_v31 = vcombine.low %v4953_v15, %v4957_v16 }
 0xa07   :  { %6456 = vmatprep.subr.bf16.mxu0 %v8378_v32  ;;  %6538 = vmatprep.subr.bf16.mxu1 %v8380_v33  ;;  %v8427_v32 = vcombine.low %v4954_v17, %v4958_v20  ;;  %v8434_v33 = vcombine.high %v4961_v26, %v4965_v28  ;;  %v8436_v34 = vcombine.high %v4962_v29, %v4966_v30 }
 0xa0a   :  { %6457 = vmatpush1.bf16.msra.mxu0 %v8377_v38  ;;  %6539 = vmatpush1.bf16.msra.mxu1 %v8379_v39  ;;  %v4974_v38 = vld [vmem:[#allocation20 + $0x368] sm:$0xff]  ;;  %v8433_v39 = vcombine.low %v4961_v26, %v4965_v28 }
 0xa0b   :  { %6458 = vmatprep.subr.bf16.mxu0 %v8386_v40  ;;  %6540 = vmatprep.subr.bf16.mxu1 %v8388_v41  ;;  %v8435_v40 = vcombine.low %v4962_v29, %v4966_v30  ;;  %v8442_v41 = vcombine.high %v4969_v35, %v4973_v36  ;;  %v8444_v42 = vcombine.high %v4970_v37, %v4974_v38  ;;  %v5006_v35 = vld [vmem:[#allocation20 + $0x468] sm:$0xff] }
 0xa0c   :  { %v8443_v44 = vcombine.low %v4970_v37, %v4974_v38  ;;  %v5009_v38 = vld [vmem:[#allocation20 + $0x480] sm:$0xff] }
 0xa0e   :  { %6459 = vmatpush1.bf16.msra.mxu0 %v8385_v47  ;;  %6541 = vmatpush1.bf16.msra.mxu1 %v8387_v48  ;;  %v4981_v47 = vld [vmem:[#allocation20 + $0x3a0] sm:$0xff]  ;;  %v4978_v48 = vld [vmem:[#allocation20 + $0x388] sm:$0xff] }
 0xa0f   :  { %6460 = vmatprep.subr.bf16.mxu0 %v8394_v50  ;;  %6542 = vmatprep.subr.bf16.mxu1 %v8396_v52  ;;  %v8450_v50 = vcombine.high %v4977_v45, %v4981_v47  ;;  %v4982_v52 = vld [vmem:[#allocation20 + $0x3a8] sm:$0xff]  ;;  %v8449_v53 = vcombine.low %v4977_v45, %v4981_v47 }
 0xa10   :  { %v8451_v54 = vcombine.low %v4978_v48, %v4982_v52  ;;  %v8452_v25 = vcombine.high %v4978_v48, %v4982_v52  ;;  %v5017_v52 = vld [vmem:[#allocation20 + $0x4c0] sm:$0xff] }
 0xa12   :  { %6461 = vmatpush1.bf16.msra.mxu0 %v8393_v58  ;;  %6543 = vmatpush1.bf16.msra.mxu1 %v8395_v59  ;;  %v4989_v58 = vld [vmem:[#allocation20 + $0x3e0] sm:$0xff]  ;;  %v4986_v59 = vld [vmem:[#allocation20 + $0x3c8] sm:$0xff] }
 0xa13   :  { %6462 = vmatprep.subr.bf16.mxu0 %v8402_v60  ;;  %6544 = vmatprep.subr.bf16.mxu1 %v8404_v61  ;;  %v8458_v60 = vcombine.high %v4985_v56, %v4989_v58  ;;  %v4990_v61 = vld [vmem:[#allocation20 + $0x3e8] sm:$0xff]  ;;  %v8457_v62 = vcombine.low %v4985_v56, %v4989_v58 }
 0xa14   :  { %v8459_v18 = vcombine.low %v4986_v59, %v4990_v61  ;;  %v8460_v63 = vcombine.high %v4986_v59, %v4990_v61  ;;  %v5025_v61 = vld [vmem:[#allocation20 + $0x500] sm:$0xff] }
 0xa16   :  { %6463 = vmatpush1.bf16.msra.mxu0 %v8401_v1  ;;  %6545 = vmatpush1.bf16.msra.mxu1 %v8403_v3  ;;  %v4997_v1 = vld [vmem:[#allocation20 + $0x420] sm:$0xff]  ;;  %v4994_v3 = vld [vmem:[#allocation20 + $0x408] sm:$0xff] }
 0xa17   :  { %6464 = vmatprep.subr.bf16.mxu0 %v8410_v4  ;;  %6546 = vmatprep.subr.bf16.mxu1 %v8412_v6  ;;  %v8466_v4 = vcombine.high %v4993_v0, %v4997_v1  ;;  %v4998_v6 = vld [vmem:[#allocation20 + $0x428] sm:$0xff]  ;;  %v8465_v55 = vcombine.low %v4993_v0, %v4997_v1 }
 0xa18   :  { %v8467_v8 = vcombine.low %v4994_v3, %v4998_v6  ;;  %v8468_v9 = vcombine.high %v4994_v3, %v4998_v6  ;;  %v5033_v6 = vld [vmem:[#allocation20 + $0x540] sm:$0xff] }
 0xa1a   :  { %6465 = vmatpush1.bf16.msra.mxu0 %v8409_v11  ;;  %6547 = vmatpush1.bf16.msra.mxu1 %v8411_v12  ;;  %v4438_v11 = vrot.slane %v10625_v10, %v10520_v7  ;;  %v4442_v12 = vrot.slane %v10625_v10, %v10523_v57 }
 0xa1b   :  { %6466 = vmatprep.subr.bf16.mxu0 %v8418_v13  ;;  %6548 = vmatprep.subr.bf16.mxu1 %v8420_v14  ;;  %v4450_v13 = vrot.slane %v10625_v10, %v10537_v5 }
 0xa1e   :  { %6467 = vmatpush1.bf16.msra.mxu0 %v8417_v21  ;;  %6549 = vmatpush1.bf16.msra.mxu1 %v8419_v22 }
 0xa1f   :  { %6468 = vmatprep.subr.bf16.mxu0 %v8426_v23  ;;  %6550 = vmatprep.subr.bf16.mxu1 %v8428_v19 }
 0xa22   :  { %6469 = vmatpush1.bf16.msra.mxu0 %v8425_v31  ;;  %6551 = vmatpush1.bf16.msra.mxu1 %v8427_v32  ;;  %v5001_v31 = vld [vmem:[#allocation20 + $0x440] sm:$0xff] }
 0xa23   :  { %6470 = vmatprep.subr.bf16.mxu0 %v8434_v33  ;;  %6552 = vmatprep.subr.bf16.mxu1 %v8436_v34  ;;  %v5005_v33 = vld [vmem:[#allocation20 + $0x460] sm:$0xff]  ;;  %v5002_v34 = vld [vmem:[#allocation20 + $0x448] sm:$0xff] }
 0xa24   :  { %v8473_v45 = vcombine.low %v5001_v31, %v5005_v33  ;;  %v8475_v47 = vcombine.low %v5002_v34, %v5006_v35 }
 0xa26   :  { %6471 = vmatpush1.bf16.msra.mxu0 %v8433_v39  ;;  %6553 = vmatpush1.bf16.msra.mxu1 %v8435_v40  ;;  %v8474_v39 = vcombine.high %v5001_v31, %v5005_v33  ;;  %v8476_v40 = vcombine.high %v5002_v34, %v5006_v35  ;;  %v5054_v31 = vld [vmem:[#allocation20 + $0x5e8] sm:$0xff] }
 0xa27   :  { %6472 = vmatprep.subr.bf16.mxu0 %v8442_v41  ;;  %6554 = vmatprep.subr.bf16.mxu1 %v8444_v42  ;;  %v5013_v41 = vld [vmem:[#allocation20 + $0x4a0] sm:$0xff]  ;;  %v5010_v42 = vld [vmem:[#allocation20 + $0x488] sm:$0xff] }
 0xa28   :  { %v8482_v48 = vcombine.high %v5009_v38, %v5013_v41  ;;  %v8481_v56 = vcombine.low %v5009_v38, %v5013_v41  ;;  %v5057_v38 = vld [vmem:[#allocation20 + $0x600] sm:$0xff]  ;;  %v5062_v41 = vld [vmem:[#allocation20 + $0x628] sm:$0xff] }
 0xa2a   :  { %6473 = vmatpush1.bf16.msra.mxu0 %v8441_v43  ;;  %6555 = vmatpush1.bf16.msra.mxu1 %v8443_v44  ;;  %v5014_v43 = vld [vmem:[#allocation20 + $0x4a8] sm:$0xff] }
 0xa2b   :  { %6474 = vmatprep.subr.bf16.mxu0 %v8450_v50  ;;  %6556 = vmatprep.subr.bf16.mxu1 %v8452_v25  ;;  %v8484_v50 = vcombine.high %v5010_v42, %v5014_v43  ;;  %v5022_v25 = vld [vmem:[#allocation20 + $0x4e8] sm:$0xff]  ;;  %v8483_v58 = vcombine.low %v5010_v42, %v5014_v43 }
 0xa2e   :  { %6475 = vmatpush1.bf16.msra.mxu0 %v8449_v53  ;;  %6557 = vmatpush1.bf16.msra.mxu1 %v8451_v54  ;;  %v5021_v53 = vld [vmem:[#allocation20 + $0x4e0] sm:$0xff]  ;;  %v5018_v54 = vld [vmem:[#allocation20 + $0x4c8] sm:$0xff] }
 0xa2f   :  { %6476 = vmatprep.subr.bf16.mxu0 %v8458_v60  ;;  %6558 = vmatprep.subr.bf16.mxu1 %v8460_v63  ;;  %v8490_v59 = vcombine.high %v5017_v52, %v5021_v53  ;;  %v8492_v60 = vcombine.high %v5018_v54, %v5022_v25  ;;  %v5030_v63 = vld [vmem:[#allocation20 + $0x528] sm:$0xff]  ;;  %v8489_v0 = vcombine.low %v5017_v52, %v5021_v53 }
 0xa30   :  { %v8491_v1 = vcombine.low %v5018_v54, %v5022_v25  ;;  %v5066_v52 = vld [vmem:[#allocation20 + $0x648] sm:$0xff] }
 0xa31   :  { %v5070_v53 = vld [vmem:[#allocation20 + $0x668] sm:$0xff] }
 0xa32   :  { %6477 = vmatpush1.bf16.msra.mxu0 %v8457_v62  ;;  %6559 = vmatpush1.bf16.msra.mxu1 %v8459_v18  ;;  %v5029_v62 = vld [vmem:[#allocation20 + $0x520] sm:$0xff]  ;;  %v5026_v18 = vld [vmem:[#allocation20 + $0x508] sm:$0xff] }
 0xa33   :  { %6487 = vmatprep.subr.bf16.mxu0 %v8466_v4  ;;  %6569 = vmatprep.subr.bf16.mxu1 %v8468_v9  ;;  %v8498_v3 = vcombine.high %v5025_v61, %v5029_v62  ;;  %v8500_v4 = vcombine.high %v5026_v18, %v5030_v63  ;;  %v5038_v9 = vld [vmem:[#allocation20 + $0x568] sm:$0xff] }
 0xac8   :  { %v4809_v14 = vpop.f32.mrb[12].mxu0  ;;  %v10633_v15 = vpop.f32.mrb[40].mxu1 }
 0xac9   :  { %v4810_v16 = vadd.f32 %v4809_v14, %v4438_v11  ;;  %v4811_v17 = vpop.f32.mrb[13].mxu0  ;;  %v4852_v20 = vpop.f32.mrb[41].mxu1  ;;  %v8497_v11 = vcombine.low %v5025_v61, %v5029_v62  ;;  %v5074_v61 = vld [vmem:[#allocation20 + $0x688] sm:$0xff] }
 0xaca   :  { %v4812_v21 = vadd.f32 %v4811_v17, %v4442_v12  ;;  %v4853_v22 = vadd.f32 %v4852_v20, %v4450_v13  ;;  %v4813_v23 = vpop.f32.mrb[14].mxu0  ;;  %v4854_v19 = vpop.f32.mrb[42].mxu1  ;;  %v8499_v12 = vcombine.low %v5026_v18, %v5030_v63  ;;  %v5045_v17 = vld [vmem:[#allocation20 + $0x5a0] sm:$0xff]  ;;  %v5042_v20 = vld [vmem:[#allocation20 + $0x588] sm:$0xff]  ;;  %v8539_v63 = vcombine.low %v5066_v52, %v5070_v53 }
 0xacb   :  { %v4857_v26 = vmax.f32 %v4810_v16, 0.0  ;;  %v4814_v28 = vpop.f32.mrb[15].mxu0  ;;  %v4855_v29 = vpop.f32.mrb[43].mxu1  ;;  %v5041_v16 = vld [vmem:[#allocation20 + $0x580] sm:$0xff]  ;;  %v5078_v62 = vld [vmem:[#allocation20 + $0x6a8] sm:$0xff] }
 0xacc   :  { %v4858_v30 = vmax.f32 %v4812_v21, 0.0  ;;  %v4860_v32 = vmax.f32 %v4853_v22, 0.0  ;;  %v5046_v21 = vld [vmem:[#allocation20 + $0x5a8] sm:$0xff]  ;;  %v8514_v19 = vcombine.high %v5041_v16, %v5045_v17  ;;  %v5049_v28 = vld [vmem:[#allocation20 + $0x5c0] sm:$0xff] }
 0xacd   :  { %v10637_v37 = vpack.c.bf16 %v4857_v26, %v4857_v26  ;;  %v8516_v26 = vcombine.high %v5042_v20, %v5046_v21  ;;  %v5053_v29 = vld [vmem:[#allocation20 + $0x5e0] sm:$0xff]  ;;  %v8515_v33 = vcombine.low %v5042_v20, %v5046_v21 }
 0xace   :  { %v10635_v36 = vpack.c.bf16 %v4858_v30, %v4858_v30  ;;  %v10641_v44 = vpack.c.bf16 %v4860_v32, %v4860_v32  ;;  %v5050_v30 = vld [vmem:[#allocation20 + $0x5c8] sm:$0xff]  ;;  %v8513_v32 = vcombine.low %v5041_v16, %v5045_v17  ;;  %v8522_v34 = vcombine.high %v5049_v28, %v5053_v29 }
 0xacf   :  { %v8524_v35 = vcombine.high %v5050_v30, %v5054_v31  ;;  %v8521_v42 = vcombine.low %v5049_v28, %v5053_v29  ;;  %v8523_v43 = vcombine.low %v5050_v30, %v5054_v31  ;;  %v5090_v16 = vld [vmem:[#allocation20 + $0x708] sm:$0xff] }
 0xad0   :  { %6478 = vmatprep.mubr.bf16.mxu0 %v10635_v36  ;;  %6560 = vmatprep.mubr.bf16.mxu1 %v10635_v36  ;;  %v5094_v17 = vld [vmem:[#allocation20 + $0x728] sm:$0xff] }
 0xad1   :  { %6479 = vmatmul.mubr.bf16.vlgmr.msra.gmra.mrb[16].mxu0 %v10637_v37  ;;  %6561 = vmatmul.mubr.bf16.vlgmr.msra.gmra.mrb[44].mxu1 %v10637_v37  ;;  %v5098_v28 = vld [vmem:[#allocation20 + $0x748] sm:$0xff]  ;;  %v8563_v31 = vcombine.low %v5090_v16, %v5094_v17 }
 0xad2   :  { %6488 = vmatpush1.bf16.msra.mxu0 %v8465_v55  ;;  %6570 = vmatpush1.bf16.msra.mxu1 %v8467_v8  ;;  %v5037_v55 = vld [vmem:[#allocation20 + $0x560] sm:$0xff]  ;;  %v5034_v8 = vld [vmem:[#allocation20 + $0x548] sm:$0xff] }
 0xad3   :  { %6519 = vmatprep.mubr.bf16.mxu0 %v10641_v44  ;;  %6601 = vmatprep.mubr.bf16.mxu1 %v10641_v44  ;;  %v8506_v13 = vcombine.high %v5033_v6, %v5037_v55  ;;  %v8508_v14 = vcombine.high %v5034_v8, %v5038_v9  ;;  %v8505_v22 = vcombine.low %v5033_v6, %v5037_v55  ;;  %v5082_v6 = vld [vmem:[#allocation20 + $0x6c8] sm:$0xff] }
 0xad4   :  { %6489 = vmatprep.subr.bf16.mxu0 %v8474_v39  ;;  %6571 = vmatprep.subr.bf16.mxu1 %v8476_v40  ;;  %v8507_v23 = vcombine.low %v5034_v8, %v5038_v9  ;;  %v5061_v39 = vld [vmem:[#allocation20 + $0x620] sm:$0xff]  ;;  %v5058_v40 = vld [vmem:[#allocation20 + $0x608] sm:$0xff]  ;;  %v8547_v9 = vcombine.low %v5074_v61, %v5078_v62 }
 0xad5   :  { %v8529_v54 = vcombine.low %v5057_v38, %v5061_v39  ;;  %v8531_v25 = vcombine.low %v5058_v40, %v5062_v41  ;;  %v5086_v55 = vld [vmem:[#allocation20 + $0x6e8] sm:$0xff] }
 0xad6   :  { %6490 = vmatpush1.bf16.msra.mxu0 %v8473_v45  ;;  %6572 = vmatpush1.bf16.msra.mxu1 %v8475_v47  ;;  %v8530_v45 = vcombine.high %v5057_v38, %v5061_v39  ;;  %v8532_v47 = vcombine.high %v5058_v40, %v5062_v41  ;;  %v8555_v21 = vcombine.low %v5082_v6, %v5086_v55  ;;  %v5102_v29 = vld [vmem:[#allocation20 + $0x768] sm:$0xff] }
 0xad7   :  { %6491 = vmatprep.subr.bf16.mxu0 %v8482_v48  ;;  %6573 = vmatprep.subr.bf16.mxu1 %v8484_v50  ;;  %v5065_v48 = vld [vmem:[#allocation20 + $0x640] sm:$0xff]  ;;  %v5106_v38 = vld [vmem:[#allocation20 + $0x788] sm:$0xff]  ;;  %v8571_v41 = vcombine.low %v5098_v28, %v5102_v29 }
 0xad8   :  { %v5069_v50 = vld [vmem:[#allocation20 + $0x660] sm:$0xff]  ;;  %v5110_v39 = vld [vmem:[#allocation20 + $0x7a8] sm:$0xff] }
 0xad9   :  { %v8537_v18 = vcombine.low %v5065_v48, %v5069_v50 }
 0xada   :  { %6492 = vmatpush1.bf16.msra.mxu0 %v8481_v56  ;;  %6574 = vmatpush1.bf16.msra.mxu1 %v8483_v58  ;;  %v8538_v56 = vcombine.high %v5065_v48, %v5069_v50  ;;  %v8540_v58 = vcombine.high %v5066_v52, %v5070_v53  ;;  %v5117_v48 = vld [vmem:[#allocation20 + $0x7e0] sm:$0xff]  ;;  %v5114_v50 = vld [vmem:[#allocation20 + $0x7c8] sm:$0xff] }
 0xadb   :  { %6493 = vmatprep.subr.bf16.mxu0 %v8490_v59  ;;  %6575 = vmatprep.subr.bf16.mxu1 %v8492_v60  ;;  %v5073_v59 = vld [vmem:[#allocation20 + $0x680] sm:$0xff]  ;;  %v5118_v52 = vld [vmem:[#allocation20 + $0x7e8] sm:$0xff] }
 0xadc   :  { %v5077_v60 = vld [vmem:[#allocation20 + $0x6a0] sm:$0xff] }
 0xadd   :  { %v8545_v8 = vcombine.low %v5073_v59, %v5077_v60 }
 0xade   :  { %6494 = vmatpush1.bf16.msra.mxu0 %v8489_v0  ;;  %6576 = vmatpush1.bf16.msra.mxu1 %v8491_v1  ;;  %v8546_v0 = vcombine.high %v5073_v59, %v5077_v60  ;;  %v8548_v1 = vcombine.high %v5074_v61, %v5078_v62  ;;  %v4867_v59 = vld [vmem:[#allocation20 + $0x10] sm:$0xff]  ;;  %v4868_v60 = vld [vmem:[#allocation20 + $0x18] sm:$0xff] }
 0xadf   :  { %6495 = vmatprep.subr.bf16.mxu0 %v8498_v3  ;;  %6577 = vmatprep.subr.bf16.mxu1 %v8500_v4  ;;  %v5081_v3 = vld [vmem:[#allocation20 + $0x6c0] sm:$0xff]  ;;  %v4872_v61 = vld [vmem:[#allocation20 + $0x38] sm:$0xff] }
 0xae0   :  { %v5085_v4 = vld [vmem:[#allocation20 + $0x6e0] sm:$0xff] }
 0xae1   :  { %v8553_v20 = vcombine.low %v5081_v3, %v5085_v4 }
 0xae2   :  { %6496 = vmatpush1.bf16.msra.mxu0 %v8497_v11  ;;  %6578 = vmatpush1.bf16.msra.mxu1 %v8499_v12  ;;  %v8554_v11 = vcombine.high %v5081_v3, %v5085_v4  ;;  %v8556_v12 = vcombine.high %v5082_v6, %v5086_v55  ;;  %v4875_v3 = vld [vmem:[#allocation20 + $0x50] sm:$0xff]  ;;  %v4880_v6 = vld [vmem:[#allocation20 + $0x78] sm:$0xff] }
 0xae3   :  { %6497 = vmatprep.subr.bf16.mxu0 %v8506_v13  ;;  %6579 = vmatprep.subr.bf16.mxu1 %v8508_v14  ;;  %v5089_v13 = vld [vmem:[#allocation20 + $0x700] sm:$0xff]  ;;  %v4879_v4 = vld [vmem:[#allocation20 + $0x70] sm:$0xff] }
 0xae4   :  { %v5093_v14 = vld [vmem:[#allocation20 + $0x720] sm:$0xff] }
 0xae5   :  { %v8561_v30 = vcombine.low %v5089_v13, %v5093_v14 }
 0xae6   :  { %6498 = vmatpush1.bf16.msra.mxu0 %v8505_v22  ;;  %6580 = vmatpush1.bf16.msra.mxu1 %v8507_v23  ;;  %v8562_v22 = vcombine.high %v5089_v13, %v5093_v14  ;;  %v8564_v23 = vcombine.high %v5090_v16, %v5094_v17  ;;  %v4883_v13 = vld [vmem:[#allocation20 + $0x90] sm:$0xff]  ;;  %v4884_v16 = vld [vmem:[#allocation20 + $0x98] sm:$0xff] }
 0xae7   :  { %6499 = vmatprep.subr.bf16.mxu0 %v8514_v19  ;;  %6581 = vmatprep.subr.bf16.mxu1 %v8516_v26  ;;  %v5097_v19 = vld [vmem:[#allocation20 + $0x740] sm:$0xff]  ;;  %v4887_v14 = vld [vmem:[#allocation20 + $0xb0] sm:$0xff]  ;;  %v4888_v17 = vld [vmem:[#allocation20 + $0xb8] sm:$0xff] }
 0xae8   :  { %v5101_v26 = vld [vmem:[#allocation20 + $0x760] sm:$0xff] }
 0xae9   :  { %v8569_v40 = vcombine.low %v5097_v19, %v5101_v26 }
 0xaea   :  { %6500 = vmatpush1.bf16.msra.mxu0 %v8513_v32  ;;  %6582 = vmatpush1.bf16.msra.mxu1 %v8515_v33  ;;  %v8570_v32 = vcombine.high %v5097_v19, %v5101_v26  ;;  %v8572_v33 = vcombine.high %v5098_v28, %v5102_v29  ;;  %v4891_v19 = vld [vmem:[#allocation20 + $0xd0] sm:$0xff]  ;;  %v4892_v28 = vld [vmem:[#allocation20 + $0xd8] sm:$0xff] }
 0xaeb   :  { %6501 = vmatprep.subr.bf16.mxu0 %v8522_v34  ;;  %6583 = vmatprep.subr.bf16.mxu1 %v8524_v35  ;;  %v5105_v34 = vld [vmem:[#allocation20 + $0x780] sm:$0xff]  ;;  %v4895_v26 = vld [vmem:[#allocation20 + $0xf0] sm:$0xff]  ;;  %v4896_v29 = vld [vmem:[#allocation20 + $0xf8] sm:$0xff] }
 0xaec   :  { %v5109_v35 = vld [vmem:[#allocation20 + $0x7a0] sm:$0xff] }
 0xaed   :  { %v8577_v53 = vcombine.low %v5105_v34, %v5109_v35 }
 0xaee   :  { %6502 = vmatpush1.bf16.msra.mxu0 %v8521_v42  ;;  %6584 = vmatpush1.bf16.msra.mxu1 %v8523_v43  ;;  %v4446_v42 = vrot.slane %v10625_v10, %v10534_v2  ;;  %v8578_v43 = vcombine.high %v5105_v34, %v5109_v35  ;;  %v4871_v10 = vld [vmem:[#allocation20 + $0x30] sm:$0xff] }
 0xaef   :  { %6503 = vmatprep.subr.bf16.mxu0 %v8530_v45  ;;  %6585 = vmatprep.subr.bf16.mxu1 %v8532_v47  ;;  %v8580_v45 = vcombine.high %v5106_v38, %v5110_v39  ;;  %v5113_v47 = vld [vmem:[#allocation20 + $0x7c0] sm:$0xff]  ;;  %v8341_v55 = vcombine.low %v4867_v59, %v4871_v10  ;;  %v4899_v34 = vld [vmem:[#allocation20 + $0x110] sm:$0xff] }
 0xaf0   :  { %v8585_v62 = vcombine.low %v5113_v47, %v5117_v48  ;;  %v4903_v35 = vld [vmem:[#allocation20 + $0x130] sm:$0xff] }
 0xaf2   :  { %6504 = vmatpush1.bf16.msra.mxu0 %v8529_v54  ;;  %6586 = vmatpush1.bf16.msra.mxu1 %v8531_v25  ;;  %v8579_v54 = vcombine.low %v5106_v38, %v5110_v39  ;;  %v4851_v25 = vadd.f32 %v10633_v15, %v4446_v42  ;;  %v4876_v15 = vld [vmem:[#allocation20 + $0x58] sm:$0xff]  ;;  %v8365_v39 = vcombine.low %v4891_v19, %v4895_v26 }
 0xaf3   :  { %6505 = vmatprep.subr.bf16.mxu0 %v8538_v56  ;;  %6587 = vmatprep.subr.bf16.mxu1 %v8540_v58  ;;  %v8586_v56 = vcombine.high %v5113_v47, %v5117_v48  ;;  %v8588_v58 = vcombine.high %v5114_v50, %v5118_v52  ;;  %v4904_v38 = vld [vmem:[#allocation20 + $0x138] sm:$0xff] }
 0xaf4   :  { %v4908_v47 = vld [vmem:[#allocation20 + $0x158] sm:$0xff] }
 0xaf5   :  { %v4912_v48 = vld [vmem:[#allocation20 + $0x178] sm:$0xff] }
 0xaf6   :  { %6506 = vmatpush1.bf16.msra.mxu0 %v8537_v18  ;;  %6588 = vmatpush1.bf16.msra.mxu1 %v8539_v63  ;;  %v8587_v18 = vcombine.low %v5114_v50, %v5118_v52  ;;  %v4859_v63 = vmax.f32 %v4851_v25, 0.0  ;;  %v8373_v50 = vcombine.low %v4899_v34, %v4903_v35  ;;  %v4915_v25 = vld [vmem:[#allocation20 + $0x190] sm:$0xff] }
 0xaf7   :  { %6507 = vmatprep.subr.bf16.mxu0 %v8546_v0  ;;  %6589 = vmatprep.subr.bf16.mxu1 %v8548_v1  ;;  %v8342_v0 = vcombine.high %v4867_v59, %v4871_v10  ;;  %v8344_v1 = vcombine.high %v4868_v60, %v4872_v61  ;;  %v4920_v59 = vld [vmem:[#allocation20 + $0x1b8] sm:$0xff] }
 0xafa   :  { %6508 = vmatpush1.bf16.msra.mxu0 %v8545_v8  ;;  %6590 = vmatpush1.bf16.msra.mxu1 %v8547_v9  ;;  %v10650_v8 = vpack.c.bf16 %v4859_v63, %v4859_v63  ;;  %v8343_v9 = vcombine.low %v4868_v60, %v4872_v61  ;;  %v8383_v60 = vcombine.low %v4908_v47, %v4912_v48  ;;  %v4927_v63 = vld [vmem:[#allocation20 + $0x1f0] sm:$0xff] }
 0xafb   :  { %6509 = vmatprep.subr.bf16.mxu0 %v8554_v11  ;;  %6591 = vmatprep.subr.bf16.mxu1 %v8556_v12  ;;  %v8350_v11 = vcombine.high %v4875_v3, %v4879_v4  ;;  %v8352_v12 = vcombine.high %v4876_v15, %v4880_v6 }
 0xafe   :  { %6510 = vmatpush1.bf16.msra.mxu0 %v8553_v20  ;;  %6592 = vmatpush1.bf16.msra.mxu1 %v8555_v21  ;;  %v8349_v20 = vcombine.low %v4875_v3, %v4879_v4  ;;  %v8351_v21 = vcombine.low %v4876_v15, %v4880_v6 }
 0xaff   :  { %6511 = vmatprep.subr.bf16.mxu0 %v8562_v22  ;;  %6593 = vmatprep.subr.bf16.mxu1 %v8564_v23  ;;  %v8358_v22 = vcombine.high %v4883_v13, %v4887_v14  ;;  %v8360_v23 = vcombine.high %v4884_v16, %v4888_v17 }
 0xb02   :  { %6512 = vmatpush1.bf16.msra.mxu0 %v8561_v30  ;;  %6594 = vmatpush1.bf16.msra.mxu1 %v8563_v31  ;;  %v8357_v30 = vcombine.low %v4883_v13, %v4887_v14  ;;  %v8359_v31 = vcombine.low %v4884_v16, %v4888_v17 }
 0xb03   :  { %6513 = vmatprep.subr.bf16.mxu0 %v8570_v32  ;;  %6595 = vmatprep.subr.bf16.mxu1 %v8572_v33  ;;  %v8366_v32 = vcombine.high %v4891_v19, %v4895_v26  ;;  %v8368_v33 = vcombine.high %v4892_v28, %v4896_v29 }
 0xb06   :  { %6514 = vmatpush1.bf16.msra.mxu0 %v8569_v40  ;;  %6596 = vmatpush1.bf16.msra.mxu1 %v8571_v41  ;;  %v8367_v40 = vcombine.low %v4892_v28, %v4896_v29  ;;  %v8374_v41 = vcombine.high %v4899_v34, %v4903_v35 }
 0xb07   :  { %6515 = vmatprep.subr.bf16.mxu0 %v8578_v43  ;;  %6597 = vmatprep.subr.bf16.mxu1 %v8580_v45  ;;  %v4907_v43 = vld [vmem:[#allocation20 + $0x150] sm:$0xff] }
 0xb08   :  { %v4911_v45 = vld [vmem:[#allocation20 + $0x170] sm:$0xff] }
 0xb09   :  { %v8381_v10 = vcombine.low %v4907_v43, %v4911_v45 }
 0xb0a   :  { %6516 = vmatpush1.bf16.msra.mxu0 %v8577_v53  ;;  %6598 = vmatpush1.bf16.msra.mxu1 %v8579_v54  ;;  %v8382_v53 = vcombine.high %v4907_v43, %v4911_v45  ;;  %v8384_v54 = vcombine.high %v4908_v47, %v4912_v48 }
 0xb0b   :  { %6517 = vmatprep.subr.bf16.mxu0 %v8586_v56  ;;  %6599 = vmatprep.subr.bf16.mxu1 %v8588_v58  ;;  %v4919_v56 = vld [vmem:[#allocation20 + $0x1b0] sm:$0xff]  ;;  %v4916_v58 = vld [vmem:[#allocation20 + $0x198] sm:$0xff] }
 0xb0c   :  { %v8390_v61 = vcombine.high %v4915_v25, %v4919_v56  ;;  %v8389_v3 = vcombine.low %v4915_v25, %v4919_v56  ;;  %v8391_v4 = vcombine.low %v4916_v58, %v4920_v59 }
 0xb0e   :  { %6518 = vmatpush1.bf16.msra.mxu0 %v8585_v62  ;;  %6600 = vmatpush1.bf16.msra.mxu1 %v8587_v18  ;;  %v8392_v62 = vcombine.high %v4916_v58, %v4920_v59  ;;  %v4923_v18 = vld [vmem:[#allocation20 + $0x1d0] sm:$0xff] }
 0xb0f   :  { %6610 = vmatprep.subr.bf16.mxu0 %v8342_v0  ;;  %6692 = vmatprep.subr.bf16.mxu1 %v8344_v1  ;;  %v4924_v0 = vld [vmem:[#allocation20 + $0x1d8] sm:$0xff]  ;;  %v8398_v15 = vcombine.high %v4923_v18, %v4927_v63  ;;  %v8397_v13 = vcombine.low %v4923_v18, %v4927_v63 }
 0xb10   :  { %v4928_v1 = vld [vmem:[#allocation20 + $0x1f8] sm:$0xff] }
 0xb11   :  { %6520 = vmatmul.mubr.bf16.vlgmr.msra.gmra.mrb[16].mxu0 %v10650_v8  ;;  %6602 = vmatmul.mubr.bf16.vlgmr.msra.gmra.mrb[44].mxu1 %v10650_v8  ;;  %v8400_v6 = vcombine.high %v4924_v0, %v4928_v1  ;;  %v8399_v14 = vcombine.low %v4924_v0, %v4928_v1 }
 0xb12   :  { %6611 = vmatpush1.bf16.msra.mxu0 %v8341_v55  ;;  %6642 = vmatprep.mubr.bf16.mxu0 %v10635_v36  ;;  %v4931_v55 = vld [vmem:[#allocation20 + $0x210] sm:$0xff] }
 0xb13   :  { %6693 = vmatpush1.bf16.msra.mxu1 %v8343_v9  ;;  %6724 = vmatprep.mubr.bf16.mxu1 %v10635_v36  ;;  %v4900_v36 = vld [vmem:[#allocation20 + $0x118] sm:$0xff]  ;;  %v4935_v9 = vld [vmem:[#allocation20 + $0x230] sm:$0xff] }
 0xb14   :  { %6612 = vmatprep.subr.bf16.mxu0 %v8350_v11  ;;  %6694 = vmatprep.subr.bf16.mxu1 %v8352_v12  ;;  %v8376_v42 = vcombine.high %v4900_v36, %v4904_v38  ;;  %v8375_v52 = vcombine.low %v4900_v36, %v4904_v38  ;;  %v4932_v11 = vld [vmem:[#allocation20 + $0x218] sm:$0xff]  ;;  %v8406_v16 = vcombine.high %v4931_v55, %v4935_v9 }
 0xb15   :  { %v4936_v12 = vld [vmem:[#allocation20 + $0x238] sm:$0xff]  ;;  %v8405_v19 = vcombine.low %v4931_v55, %v4935_v9 }
 0xb16   :  { %6613 = vmatpush1.bf16.msra.mxu0 %v8349_v20  ;;  %v8408_v17 = vcombine.high %v4932_v11, %v4936_v12  ;;  %v4939_v20 = vld [vmem:[#allocation20 + $0x250] sm:$0xff]  ;;  %v8407_v26 = vcombine.low %v4932_v11, %v4936_v12 }
 0xb17   :  { %6695 = vmatpush1.bf16.msra.mxu1 %v8351_v21  ;;  %6614 = vmatprep.subr.bf16.mxu0 %v8358_v22  ;;  %v4943_v21 = vld [vmem:[#allocation20 + $0x270] sm:$0xff]  ;;  %v4940_v22 = vld [vmem:[#allocation20 + $0x258] sm:$0xff] }
 0xb18   :  { %6696 = vmatprep.subr.bf16.mxu1 %v8360_v23  ;;  %v4944_v23 = vld [vmem:[#allocation20 + $0x278] sm:$0xff]  ;;  %v8414_v28 = vcombine.high %v4939_v20, %v4943_v21  ;;  %v8413_v34 = vcombine.low %v4939_v20, %v4943_v21 }
 0xb19   :  { %v8416_v29 = vcombine.high %v4940_v22, %v4944_v23  ;;  %v8415_v35 = vcombine.low %v4940_v22, %v4944_v23 }
 0xb1a   :  { %6615 = vmatpush1.bf16.msra.mxu0 %v8357_v30  ;;  %v4947_v30 = vld [vmem:[#allocation20 + $0x290] sm:$0xff] }
 0xb1b   :  { %6697 = vmatpush1.bf16.msra.mxu1 %v8359_v31  ;;  %6616 = vmatprep.subr.bf16.mxu0 %v8366_v32  ;;  %v4951_v31 = vld [vmem:[#allocation20 + $0x2b0] sm:$0xff]  ;;  %v4948_v32 = vld [vmem:[#allocation20 + $0x298] sm:$0xff] }
 0xb1c   :  { %6698 = vmatprep.subr.bf16.mxu1 %v8368_v33  ;;  %v4952_v33 = vld [vmem:[#allocation20 + $0x2b8] sm:$0xff]  ;;  %v8422_v36 = vcombine.high %v4947_v30, %v4951_v31  ;;  %v8421_v43 = vcombine.low %v4947_v30, %v4951_v31 }
 0xb1d   :  { %v8424_v38 = vcombine.high %v4948_v32, %v4952_v33  ;;  %v8423_v45 = vcombine.low %v4948_v32, %v4952_v33 }
 0xb1e   :  { %6617 = vmatpush1.bf16.msra.mxu0 %v8365_v39  ;;  %v4955_v39 = vld [vmem:[#allocation20 + $0x2d0] sm:$0xff] }
 0xb1f   :  { %6699 = vmatpush1.bf16.msra.mxu1 %v8367_v40  ;;  %6618 = vmatprep.subr.bf16.mxu0 %v8374_v41  ;;  %v4959_v40 = vld [vmem:[#allocation20 + $0x2f0] sm:$0xff]  ;;  %v4956_v41 = vld [vmem:[#allocation20 + $0x2d8] sm:$0xff] }
 0xb20   :  { %6700 = vmatprep.subr.bf16.mxu1 %v8376_v42  ;;  %v4960_v42 = vld [vmem:[#allocation20 + $0x2f8] sm:$0xff]  ;;  %v8430_v47 = vcombine.high %v4955_v39, %v4959_v40  ;;  %v8429_v25 = vcombine.low %v4955_v39, %v4959_v40 }
 0xb21   :  { %v8432_v48 = vcombine.high %v4956_v41, %v4960_v42  ;;  %v8431_v56 = vcombine.low %v4956_v41, %v4960_v42  ;;  %v5008_v39 = vld [vmem:[#allocation20 + $0x478] sm:$0xff]  ;;  %v5011_v42 = vld [vmem:[#allocation20 + $0x490] sm:$0xff] }
 0xb22   :  { %6619 = vmatpush1.bf16.msra.mxu0 %v8373_v50  ;;  %v4963_v50 = vld [vmem:[#allocation20 + $0x310] sm:$0xff] }
 0xb23   :  { %6701 = vmatpush1.bf16.msra.mxu1 %v8375_v52  ;;  %6620 = vmatprep.subr.bf16.mxu0 %v8382_v53  ;;  %v4967_v52 = vld [vmem:[#allocation20 + $0x330] sm:$0xff]  ;;  %v4964_v53 = vld [vmem:[#allocation20 + $0x318] sm:$0xff] }
 0xb24   :  { %6702 = vmatprep.subr.bf16.mxu1 %v8384_v54  ;;  %v4968_v54 = vld [vmem:[#allocation20 + $0x338] sm:$0xff]  ;;  %v8438_v58 = vcombine.high %v4963_v50, %v4967_v52  ;;  %v8437_v18 = vcombine.low %v4963_v50, %v4967_v52 }
 0xb25   :  { %v8440_v59 = vcombine.high %v4964_v53, %v4968_v54  ;;  %v8439_v63 = vcombine.low %v4964_v53, %v4968_v54 }
 0xb26   :  { %6621 = vmatpush1.bf16.msra.mxu0 %v8381_v10  ;;  %v4971_v10 = vld [vmem:[#allocation20 + $0x350] sm:$0xff] }
 0xb27   :  { %6703 = vmatpush1.bf16.msra.mxu1 %v8383_v60  ;;  %6622 = vmatprep.subr.bf16.mxu0 %v8390_v61  ;;  %v4975_v60 = vld [vmem:[#allocation20 + $0x370] sm:$0xff]  ;;  %v4972_v61 = vld [vmem:[#allocation20 + $0x358] sm:$0xff] }
 0xb28   :  { %6704 = vmatprep.subr.bf16.mxu1 %v8392_v62  ;;  %v4976_v62 = vld [vmem:[#allocation20 + $0x378] sm:$0xff]  ;;  %v8446_v0 = vcombine.high %v4971_v10, %v4975_v60  ;;  %v8445_v55 = vcombine.low %v4971_v10, %v4975_v60 }
 0xb29   :  { %v8448_v1 = vcombine.high %v4972_v61, %v4976_v62  ;;  %v8447_v9 = vcombine.low %v4972_v61, %v4976_v62  ;;  %v5027_v62 = vld [vmem:[#allocation20 + $0x510] sm:$0xff] }
 0xb2a   :  { %6623 = vmatpush1.bf16.msra.mxu0 %v8389_v3  ;;  %v4979_v3 = vld [vmem:[#allocation20 + $0x390] sm:$0xff] }
 0xb2b   :  { %6705 = vmatpush1.bf16.msra.mxu1 %v8391_v4  ;;  %6624 = vmatprep.subr.bf16.mxu0 %v8398_v15  ;;  %v4983_v4 = vld [vmem:[#allocation20 + $0x3b0] sm:$0xff]  ;;  %v4980_v15 = vld [vmem:[#allocation20 + $0x398] sm:$0xff] }
 0xb2c   :  { %6706 = vmatprep.subr.bf16.mxu1 %v8400_v6  ;;  %v4984_v6 = vld [vmem:[#allocation20 + $0x3b8] sm:$0xff]  ;;  %v8454_v11 = vcombine.high %v4979_v3, %v4983_v4  ;;  %v8453_v20 = vcombine.low %v4979_v3, %v4983_v4 }
 0xb2d   :  { %v8456_v12 = vcombine.high %v4980_v15, %v4984_v6  ;;  %v8455_v21 = vcombine.low %v4980_v15, %v4984_v6  ;;  %v5035_v15 = vld [vmem:[#allocation20 + $0x550] sm:$0xff] }
 0xb2e   :  { %6625 = vmatpush1.bf16.msra.mxu0 %v8397_v13  ;;  %v4987_v13 = vld [vmem:[#allocation20 + $0x3d0] sm:$0xff] }
 0xb2f   :  { %6707 = vmatpush1.bf16.msra.mxu1 %v8399_v14  ;;  %6626 = vmatprep.subr.bf16.mxu0 %v8406_v16  ;;  %v4991_v14 = vld [vmem:[#allocation20 + $0x3f0] sm:$0xff]  ;;  %v4988_v16 = vld [vmem:[#allocation20 + $0x3d8] sm:$0xff] }
 0xb30   :  { %6708 = vmatprep.subr.bf16.mxu1 %v8408_v17  ;;  %v4992_v17 = vld [vmem:[#allocation20 + $0x3f8] sm:$0xff]  ;;  %v8462_v22 = vcombine.high %v4987_v13, %v4991_v14  ;;  %v8461_v30 = vcombine.low %v4987_v13, %v4991_v14  ;;  %v5039_v6 = vld [vmem:[#allocation20 + $0x570] sm:$0xff] }
 0xb31   :  { %v8464_v23 = vcombine.high %v4988_v16, %v4992_v17  ;;  %v8463_v31 = vcombine.low %v4988_v16, %v4992_v17  ;;  %v8510_v13 = vcombine.high %v5035_v15, %v5039_v6  ;;  %v5043_v16 = vld [vmem:[#allocation20 + $0x590] sm:$0xff] }
 0xb32   :  { %6627 = vmatpush1.bf16.msra.mxu0 %v8405_v19  ;;  %v4995_v19 = vld [vmem:[#allocation20 + $0x410] sm:$0xff] }
 0xb33   :  { %6709 = vmatpush1.bf16.msra.mxu1 %v8407_v26  ;;  %6628 = vmatprep.subr.bf16.mxu0 %v8414_v28  ;;  %v4999_v26 = vld [vmem:[#allocation20 + $0x430] sm:$0xff]  ;;  %v4996_v28 = vld [vmem:[#allocation20 + $0x418] sm:$0xff] }
 0xb34   :  { %6710 = vmatprep.subr.bf16.mxu1 %v8416_v29  ;;  %v5000_v29 = vld [vmem:[#allocation20 + $0x438] sm:$0xff]  ;;  %v8470_v32 = vcombine.high %v4995_v19, %v4999_v26  ;;  %v5047_v17 = vld [vmem:[#allocation20 + $0x5b0] sm:$0xff] }
 0xb35   :  { %v8472_v33 = vcombine.high %v4996_v28, %v5000_v29  ;;  %v8471_v40 = vcombine.low %v4996_v28, %v5000_v29  ;;  %v5051_v28 = vld [vmem:[#allocation20 + $0x5d0] sm:$0xff] }
 0xb36   :  { %6629 = vmatpush1.bf16.msra.mxu0 %v8413_v34  ;;  %v5003_v34 = vld [vmem:[#allocation20 + $0x450] sm:$0xff] }
 0xb37   :  { %6711 = vmatpush1.bf16.msra.mxu1 %v8415_v35  ;;  %6630 = vmatprep.subr.bf16.mxu0 %v8422_v36  ;;  %v5007_v35 = vld [vmem:[#allocation20 + $0x470] sm:$0xff]  ;;  %v8469_v36 = vcombine.low %v4995_v19, %v4999_v26  ;;  %v8518_v19 = vcombine.high %v5043_v16, %v5047_v17 }
 0xb38   :  { %6712 = vmatprep.subr.bf16.mxu1 %v8424_v38  ;;  %v5004_v38 = vld [vmem:[#allocation20 + $0x458] sm:$0xff]  ;;  %v8478_v41 = vcombine.high %v5003_v34, %v5007_v35  ;;  %v8477_v50 = vcombine.low %v5003_v34, %v5007_v35  ;;  %v5055_v29 = vld [vmem:[#allocation20 + $0x5f0] sm:$0xff] }
 0xb39   :  { %v8479_v52 = vcombine.low %v5004_v38, %v5008_v39  ;;  %v8526_v34 = vcombine.high %v5051_v28, %v5055_v29 }
 0xb3a   :  { %6631 = vmatpush1.bf16.msra.mxu0 %v8421_v43  ;;  %v5015_v43 = vld [vmem:[#allocation20 + $0x4b0] sm:$0xff] }
 0xb3b   :  { %6713 = vmatpush1.bf16.msra.mxu1 %v8423_v45  ;;  %6632 = vmatprep.subr.bf16.mxu0 %v8430_v47  ;;  %v8480_v45 = vcombine.high %v5004_v38, %v5008_v39  ;;  %v5012_v47 = vld [vmem:[#allocation20 + $0x498] sm:$0xff]  ;;  %v8486_v53 = vcombine.high %v5011_v42, %v5015_v43  ;;  %v8485_v10 = vcombine.low %v5011_v42, %v5015_v43  ;;  %v5063_v38 = vld [vmem:[#allocation20 + $0x630] sm:$0xff] }
 0xb3c   :  { %6714 = vmatprep.subr.bf16.mxu1 %v8432_v48  ;;  %v5016_v48 = vld [vmem:[#allocation20 + $0x4b8] sm:$0xff] }
 0xb3d   :  { %v8488_v54 = vcombine.high %v5012_v47, %v5016_v48  ;;  %v5060_v39 = vld [vmem:[#allocation20 + $0x618] sm:$0xff] }
 0xb3e   :  { %6633 = vmatpush1.bf16.msra.mxu0 %v8429_v25  ;;  %v5019_v25 = vld [vmem:[#allocation20 + $0x4d0] sm:$0xff] }
 0xb3f   :  { %6715 = vmatpush1.bf16.msra.mxu1 %v8431_v56  ;;  %6634 = vmatprep.subr.bf16.mxu0 %v8438_v58  ;;  %v5023_v56 = vld [vmem:[#allocation20 + $0x4f0] sm:$0xff]  ;;  %v5020_v58 = vld [vmem:[#allocation20 + $0x4d8] sm:$0xff] }
 0xb40   :  { %6716 = vmatprep.subr.bf16.mxu1 %v8440_v59  ;;  %v5024_v59 = vld [vmem:[#allocation20 + $0x4f8] sm:$0xff]  ;;  %v8494_v60 = vcombine.high %v5019_v25, %v5023_v56 }
 0xb41   :  { %v8496_v61 = vcombine.high %v5020_v58, %v5024_v59 }
 0xb42   :  { %6635 = vmatpush1.bf16.msra.mxu0 %v8437_v18  ;;  %v5031_v18 = vld [vmem:[#allocation20 + $0x530] sm:$0xff] }
 0xb43   :  { %6717 = vmatpush1.bf16.msra.mxu1 %v8439_v63  ;;  %6636 = vmatprep.subr.bf16.mxu0 %v8446_v0  ;;  %v5028_v63 = vld [vmem:[#allocation20 + $0x518] sm:$0xff]  ;;  %v8502_v3 = vcombine.high %v5027_v62, %v5031_v18 }
 0xb44   :  { %6718 = vmatprep.subr.bf16.mxu1 %v8448_v1  ;;  %v5032_v0 = vld [vmem:[#allocation20 + $0x538] sm:$0xff]  ;;  %v8495_v1 = vcombine.low %v5020_v58, %v5024_v59  ;;  %v5075_v58 = vld [vmem:[#allocation20 + $0x690] sm:$0xff] }
 0xb45   :  { %v8504_v4 = vcombine.high %v5028_v63, %v5032_v0  ;;  %v5079_v59 = vld [vmem:[#allocation20 + $0x6b0] sm:$0xff] }
 0xb46   :  { %6637 = vmatpush1.bf16.msra.mxu0 %v8445_v55  ;;  %v5036_v55 = vld [vmem:[#allocation20 + $0x558] sm:$0xff] }
 0xb47   :  { %6719 = vmatpush1.bf16.msra.mxu1 %v8447_v9  ;;  %6638 = vmatprep.subr.bf16.mxu0 %v8454_v11  ;;  %v5040_v9 = vld [vmem:[#allocation20 + $0x578] sm:$0xff]  ;;  %v8501_v11 = vcombine.low %v5027_v62, %v5031_v18  ;;  %v8550_v62 = vcombine.high %v5075_v58, %v5079_v59 }
 0xb48   :  { %6720 = vmatprep.subr.bf16.mxu1 %v8456_v12  ;;  %v8503_v12 = vcombine.low %v5028_v63, %v5032_v0  ;;  %v8512_v14 = vcombine.high %v5036_v55, %v5040_v9  ;;  %v5083_v63 = vld [vmem:[#allocation20 + $0x6d0] sm:$0xff] }
 0xb49   :  { %v5087_v0 = vld [vmem:[#allocation20 + $0x6f0] sm:$0xff] }
 0xb4a   :  { %6639 = vmatpush1.bf16.msra.mxu0 %v8453_v20  ;;  %v5044_v20 = vld [vmem:[#allocation20 + $0x598] sm:$0xff] }
 0xb4b   :  { %6721 = vmatpush1.bf16.msra.mxu1 %v8455_v21  ;;  %6640 = vmatprep.subr.bf16.mxu0 %v8462_v22  ;;  %v5048_v21 = vld [vmem:[#allocation20 + $0x5b8] sm:$0xff]  ;;  %v8509_v22 = vcombine.low %v5035_v15, %v5039_v6  ;;  %v8558_v15 = vcombine.high %v5083_v63, %v5087_v0 }
 0xb4c   :  { %6722 = vmatprep.subr.bf16.mxu1 %v8464_v23  ;;  %v8511_v23 = vcombine.low %v5036_v55, %v5040_v9  ;;  %v8520_v26 = vcombine.high %v5044_v20, %v5048_v21  ;;  %v5091_v55 = vld [vmem:[#allocation20 + $0x710] sm:$0xff] }
 0xb4d   :  { %v5095_v9 = vld [vmem:[#allocation20 + $0x730] sm:$0xff] }
 0xb4e   :  { %6641 = vmatpush1.bf16.msra.mxu0 %v8461_v30  ;;  %v5052_v30 = vld [vmem:[#allocation20 + $0x5d8] sm:$0xff] }
 0xb4f   :  { %6723 = vmatpush1.bf16.msra.mxu1 %v8463_v31  ;;  %6651 = vmatprep.subr.bf16.mxu0 %v8470_v32  ;;  %v5056_v31 = vld [vmem:[#allocation20 + $0x5f8] sm:$0xff]  ;;  %v8517_v32 = vcombine.low %v5043_v16, %v5047_v17  ;;  %v8566_v16 = vcombine.high %v5091_v55, %v5095_v9 }
 0xb50   :  { %6733 = vmatprep.subr.bf16.mxu1 %v8472_v33  ;;  %v8519_v33 = vcombine.low %v5044_v20, %v5048_v21  ;;  %v8528_v35 = vcombine.high %v5052_v30, %v5056_v31  ;;  %v8527_v42 = vcombine.low %v5052_v30, %v5056_v31  ;;  %v5099_v20 = vld [vmem:[#allocation20 + $0x750] sm:$0xff] }
 0xb51   :  { %6643 = vmatmul.mubr.bf16.vlgmr.msra.gmra.mrb[20].mxu0 %v10637_v37  ;;  %v5103_v21 = vld [vmem:[#allocation20 + $0x770] sm:$0xff] }
 0xb52   :  { %6725 = vmatmul.mubr.bf16.vlgmr.msra.gmra.mrb[48].mxu1 %v10637_v37  ;;  %6652 = vmatpush1.bf16.msra.mxu0 %v8469_v36  ;;  %v8487_v37 = vcombine.low %v5012_v47, %v5016_v48  ;;  %v5059_v36 = vld [vmem:[#allocation20 + $0x610] sm:$0xff] }
 0xb53   :  { %6683 = vmatprep.mubr.bf16.mxu0 %v10641_v44  ;;  %6734 = vmatpush1.bf16.msra.mxu1 %v8471_v40  ;;  %v5064_v40 = vld [vmem:[#allocation20 + $0x638] sm:$0xff]  ;;  %v8534_v43 = vcombine.high %v5059_v36, %v5063_v38  ;;  %v5067_v47 = vld [vmem:[#allocation20 + $0x650] sm:$0xff] }
 0xb54   :  { %6765 = vmatprep.mubr.bf16.mxu1 %v10641_v44  ;;  %6653 = vmatprep.subr.bf16.mxu0 %v8478_v41  ;;  %v8493_v44 = vcombine.low %v5019_v25, %v5023_v56  ;;  %v8525_v41 = vcombine.low %v5051_v28, %v5055_v29  ;;  %v5071_v48 = vld [vmem:[#allocation20 + $0x670] sm:$0xff]  ;;  %v8574_v28 = vcombine.high %v5099_v20, %v5103_v21 }
 0xb55   :  { %6735 = vmatprep.subr.bf16.mxu1 %v8480_v45  ;;  %v8536_v45 = vcombine.high %v5060_v39, %v5064_v40  ;;  %v8542_v25 = vcombine.high %v5067_v47, %v5071_v48  ;;  %v5107_v30 = vld [vmem:[#allocation20 + $0x790] sm:$0xff] }
 0xb56   :  { %6654 = vmatpush1.bf16.msra.mxu0 %v8477_v50  ;;  %v5068_v50 = vld [vmem:[#allocation20 + $0x658] sm:$0xff]  ;;  %v5111_v31 = vld [vmem:[#allocation20 + $0x7b0] sm:$0xff] }
 0xb57   :  { %6736 = vmatpush1.bf16.msra.mxu1 %v8479_v52  ;;  %6655 = vmatprep.subr.bf16.mxu0 %v8486_v53  ;;  %v5072_v52 = vld [vmem:[#allocation20 + $0x678] sm:$0xff]  ;;  %v8533_v53 = vcombine.low %v5059_v36, %v5063_v38  ;;  %v8582_v36 = vcombine.high %v5107_v30, %v5111_v31 }
 0xb58   :  { %6737 = vmatprep.subr.bf16.mxu1 %v8488_v54  ;;  %v8535_v54 = vcombine.low %v5060_v39, %v5064_v40  ;;  %v8544_v56 = vcombine.high %v5068_v50, %v5072_v52  ;;  %v5115_v39 = vld [vmem:[#allocation20 + $0x7d0] sm:$0xff] }
 0xb59   :  { %v5119_v40 = vld [vmem:[#allocation20 + $0x7f0] sm:$0xff] }
 0xb5a   :  { %6656 = vmatpush1.bf16.msra.mxu0 %v8485_v10  ;;  %v5076_v10 = vld [vmem:[#allocation20 + $0x698] sm:$0xff] }
 0xb5b   :  { %6738 = vmatpush1.bf16.msra.mxu1 %v8487_v37  ;;  %6657 = vmatprep.subr.bf16.mxu0 %v8494_v60  ;;  %v5080_v37 = vld [vmem:[#allocation20 + $0x6b8] sm:$0xff]  ;;  %v8541_v60 = vcombine.low %v5067_v47, %v5071_v48  ;;  %v8590_v47 = vcombine.high %v5115_v39, %v5119_v40 }
 0xb5c   :  { %6739 = vmatprep.subr.bf16.mxu1 %v8496_v61  ;;  %v8543_v61 = vcombine.low %v5068_v50, %v5072_v52  ;;  %v8552_v18 = vcombine.high %v5076_v10, %v5080_v37  ;;  %v8589_v50 = vcombine.low %v5115_v39, %v5119_v40 }
 0xb5e   :  { %6658 = vmatpush1.bf16.msra.mxu0 %v8493_v44  ;;  %v5084_v44 = vld [vmem:[#allocation20 + $0x6d8] sm:$0xff] }
 0xb5f   :  { %6740 = vmatpush1.bf16.msra.mxu1 %v8495_v1  ;;  %6659 = vmatprep.subr.bf16.mxu0 %v8502_v3  ;;  %v5088_v1 = vld [vmem:[#allocation20 + $0x6f8] sm:$0xff]  ;;  %v8549_v3 = vcombine.low %v5075_v58, %v5079_v59  ;;  %v9616_v58 = vld [vmem:[#allocation22 + $0x24] ss:$8 sps:$4 sm:$0xff]   ;;  %v9614_v59 = vld [vmem:[#allocation22 + $0x20] ss:$8 sps:$4 sm:$0xff]  }
 0xb60   :  { %6741 = vmatprep.subr.bf16.mxu1 %v8504_v4  ;;  %v8551_v4 = vcombine.low %v5076_v10, %v5080_v37  ;;  %v8560_v6 = vcombine.high %v5084_v44, %v5088_v1  ;;  %v9619_v10 = vld [vmem:[#allocation22 + $0x34] ss:$8 sps:$4 sm:$0xff]   ;;  %v9617_v37 = vld [vmem:[#allocation22 + $0x30] ss:$8 sps:$4 sm:$0xff]  }
 0xb62   :  { %6660 = vmatpush1.bf16.msra.mxu0 %v8501_v11  ;;  %v5092_v11 = vld [vmem:[#allocation20 + $0x718] sm:$0xff] }
 0xb63   :  { %6742 = vmatpush1.bf16.msra.mxu1 %v8503_v12  ;;  %6661 = vmatprep.subr.bf16.mxu0 %v8510_v13  ;;  %v5096_v12 = vld [vmem:[#allocation20 + $0x738] sm:$0xff]  ;;  %v8557_v13 = vcombine.low %v5083_v63, %v5087_v0  ;;  %v9626_v63 = vld [vmem:[#allocation22 + $0x60] ss:$8 sps:$4 sm:$0xff]  }
 0xb64   :  { %6743 = vmatprep.subr.bf16.mxu1 %v8512_v14  ;;  %v8559_v14 = vcombine.low %v5084_v44, %v5088_v1  ;;  %v8568_v17 = vcombine.high %v5092_v11, %v5096_v12  ;;  %v9631_v0 = vld [vmem:[#allocation22 + $0x74] ss:$8 sps:$4 sm:$0xff]   ;;  %v9629_v44 = vld [vmem:[#allocation22 + $0x70] ss:$8 sps:$4 sm:$0xff]   ;;  %v9634_v1 = vld [vmem:[#allocation22 + $0x84] ss:$8 sps:$4 sm:$0xff]  }
 0xb66   :  { %6662 = vmatpush1.bf16.msra.mxu0 %v8509_v22  ;;  %v5100_v22 = vld [vmem:[#allocation20 + $0x758] sm:$0xff] }
 0xb67   :  { %6744 = vmatpush1.bf16.msra.mxu1 %v8511_v23  ;;  %6663 = vmatprep.subr.bf16.mxu0 %v8518_v19  ;;  %v5104_v23 = vld [vmem:[#allocation20 + $0x778] sm:$0xff]  ;;  %v8565_v19 = vcombine.low %v5091_v55, %v5095_v9  ;;  %v9638_v55 = vld [vmem:[#allocation22 + $0xa0] ss:$8 sps:$4 sm:$0xff]  }
 0xb68   :  { %6745 = vmatprep.subr.bf16.mxu1 %v8520_v26  ;;  %v8567_v26 = vcombine.low %v5092_v11, %v5096_v12  ;;  %v8576_v29 = vcombine.high %v5100_v22, %v5104_v23  ;;  %v9643_v9 = vld [vmem:[#allocation22 + $0xb4] ss:$8 sps:$4 sm:$0xff]   ;;  %v9641_v11 = vld [vmem:[#allocation22 + $0xb0] ss:$8 sps:$4 sm:$0xff]   ;;  %v9646_v12 = vld [vmem:[#allocation22 + $0xc4] ss:$8 sps:$4 sm:$0xff]  }
 0xb6a   :  { %6664 = vmatpush1.bf16.msra.mxu0 %v8517_v32  ;;  %v5108_v32 = vld [vmem:[#allocation20 + $0x798] sm:$0xff] }
 0xb6b   :  { %6746 = vmatpush1.bf16.msra.mxu1 %v8519_v33  ;;  %6665 = vmatprep.subr.bf16.mxu0 %v8526_v34  ;;  %v5112_v33 = vld [vmem:[#allocation20 + $0x7b8] sm:$0xff]  ;;  %v8573_v34 = vcombine.low %v5099_v20, %v5103_v21  ;;  %v9650_v20 = vld [vmem:[#allocation22 + $0xe0] ss:$8 sps:$4 sm:$0xff]  }
 0xb6c   :  { %6747 = vmatprep.subr.bf16.mxu1 %v8528_v35  ;;  %v8575_v35 = vcombine.low %v5100_v22, %v5104_v23  ;;  %v8584_v38 = vcombine.high %v5108_v32, %v5112_v33  ;;  %v9655_v21 = vld [vmem:[#allocation22 + $0xf4] ss:$8 sps:$4 sm:$0xff]   ;;  %v9653_v22 = vld [vmem:[#allocation22 + $0xf0] ss:$8 sps:$4 sm:$0xff]   ;;  %v9658_v23 = vld [vmem:[#allocation22 + $0x104] ss:$8 sps:$4 sm:$0xff]  }
 0xb6e   :  { %6666 = vmatpush1.bf16.msra.mxu0 %v8525_v41  ;;  %v5116_v41 = vld [vmem:[#allocation20 + $0x7d8] sm:$0xff] }
 0xb6f   :  { %6748 = vmatpush1.bf16.msra.mxu1 %v8527_v42  ;;  %6667 = vmatprep.subr.bf16.mxu0 %v8534_v43  ;;  %v5120_v42 = vld [vmem:[#allocation20 + $0x7f8] sm:$0xff]  ;;  %v8581_v43 = vcombine.low %v5107_v30, %v5111_v31 }
 0xb70   :  { %6749 = vmatprep.subr.bf16.mxu1 %v8536_v45  ;;  %v8583_v45 = vcombine.low %v5108_v32, %v5112_v33  ;;  %v8592_v48 = vcombine.high %v5116_v41, %v5120_v42  ;;  %v8591_v52 = vcombine.low %v5116_v41, %v5120_v42 }
 0xb72   :  { %6668 = vmatpush1.bf16.msra.mxu0 %v8533_v53  ;;  %v9610_v53 = vld [vmem:[#allocation22 + $0x4] ss:$8 sps:$4 sm:$0xff]  }
 0xb73   :  { %6750 = vmatpush1.bf16.msra.mxu1 %v8535_v54  ;;  %6669 = vmatprep.subr.bf16.mxu0 %v8542_v25  ;;  %v9608_v54 = vld [vmem:[#allocation22] ss:$8 sps:$4 sm:$0xff]   ;;  %v9613_v25 = vld [vmem:[#allocation22 + $0x14] ss:$8 sps:$4 sm:$0xff]  }
 0xb74   :  { %6751 = vmatprep.subr.bf16.mxu1 %v8544_v56  ;;  %v9611_v56 = vld [vmem:[#allocation22 + $0x10] ss:$8 sps:$4 sm:$0xff]  }
 0xb76   :  { %6670 = vmatpush1.bf16.msra.mxu0 %v8541_v60  ;;  %v9622_v60 = vld [vmem:[#allocation22 + $0x44] ss:$8 sps:$4 sm:$0xff]  }
 0xb77   :  { %6752 = vmatpush1.bf16.msra.mxu1 %v8543_v61  ;;  %6671 = vmatprep.subr.bf16.mxu0 %v8550_v62  ;;  %v9620_v61 = vld [vmem:[#allocation22 + $0x40] ss:$8 sps:$4 sm:$0xff]   ;;  %v9625_v62 = vld [vmem:[#allocation22 + $0x54] ss:$8 sps:$4 sm:$0xff]  }
 0xb78   :  { %6753 = vmatprep.subr.bf16.mxu1 %v8552_v18  ;;  %v9623_v18 = vld [vmem:[#allocation22 + $0x50] ss:$8 sps:$4 sm:$0xff]  }
 0xb7a   :  { %6672 = vmatpush1.bf16.msra.mxu0 %v8549_v3  ;;  %v9632_v3 = vld [vmem:[#allocation22 + $0x80] ss:$8 sps:$4 sm:$0xff]  }
 0xb7b   :  { %6754 = vmatpush1.bf16.msra.mxu1 %v8551_v4  ;;  %6673 = vmatprep.subr.bf16.mxu0 %v8558_v15  ;;  %v9637_v4 = vld [vmem:[#allocation22 + $0x94] ss:$8 sps:$4 sm:$0xff]   ;;  %v9635_v15 = vld [vmem:[#allocation22 + $0x90] ss:$8 sps:$4 sm:$0xff]  }
 0xb7c   :  { %6755 = vmatprep.subr.bf16.mxu1 %v8560_v6  ;;  %v9640_v6 = vld [vmem:[#allocation22 + $0xa4] ss:$8 sps:$4 sm:$0xff]  }
 0xb7e   :  { %6674 = vmatpush1.bf16.msra.mxu0 %v8557_v13  ;;  %v9644_v13 = vld [vmem:[#allocation22 + $0xc0] ss:$8 sps:$4 sm:$0xff]  }
 0xb7f   :  { %6756 = vmatpush1.bf16.msra.mxu1 %v8559_v14  ;;  %6675 = vmatprep.subr.bf16.mxu0 %v8566_v16  ;;  %v9649_v14 = vld [vmem:[#allocation22 + $0xd4] ss:$8 sps:$4 sm:$0xff]   ;;  %v9647_v16 = vld [vmem:[#allocation22 + $0xd0] ss:$8 sps:$4 sm:$0xff]  }
 0xb80   :  { %6757 = vmatprep.subr.bf16.mxu1 %v8568_v17  ;;  %v9652_v17 = vld [vmem:[#allocation22 + $0xe4] ss:$8 sps:$4 sm:$0xff]  }
 0xb82   :  { %6676 = vmatpush1.bf16.msra.mxu0 %v8565_v19  ;;  %v5122_v19 = vld [vmem:[#allocation23 + $0x42] ss:$8 sm:$0xf] }
 0xb83   :  { %6758 = vmatpush1.bf16.msra.mxu1 %v8567_v26  ;;  %6677 = vmatprep.subr.bf16.mxu0 %v8574_v28  ;;  %v5123_v26 = vld [vmem:[#allocation23 + $0x42] ss:$8 sm:$0xf0] }
 0xb84   :  { %6759 = vmatprep.subr.bf16.mxu1 %v8576_v29  ;;  %v10662_v28 = vor.u32 %v5123_v26, %v5122_v19  ;;  %v9706_v26 = vld [vmem:[#allocation22 + $0x204] ss:$8 sps:$4 sm:$0xff]  }
 0xb86   :  { %6678 = vmatpush1.bf16.msra.mxu0 %v8573_v34  ;;  %v5129_v29 = vrot.slane %v10662_v28, %v10520_v7  ;;  %v5133_v30 = vrot.slane %v10662_v28, %v10523_v57  ;;  %v5141_v31 = vrot.slane %v10662_v28, %v10537_v5 }
 0xb87   :  { %6760 = vmatpush1.bf16.msra.mxu1 %v8575_v35  ;;  %6679 = vmatprep.subr.bf16.mxu0 %v8582_v36 }
 0xb88   :  { %6761 = vmatprep.subr.bf16.mxu1 %v8584_v38 }
 0xb8a   :  { %6680 = vmatpush1.bf16.msra.mxu0 %v8581_v43 }
 0xb8b   :  { %6762 = vmatpush1.bf16.msra.mxu1 %v8583_v45  ;;  %6681 = vmatprep.subr.bf16.mxu0 %v8590_v47 }
 0xb8c   :  { %6763 = vmatprep.subr.bf16.mxu1 %v8592_v48 }
 0xb8e   :  { %6682 = vmatpush1.bf16.msra.mxu0 %v8589_v50 }
 0xb8f   :  { %6764 = vmatpush1.bf16.msra.mxu1 %v8591_v52  ;;  %7571 = vmatprep.subr.bf16.mxu0 %v9610_v53  ;;  %v9656_v52 = vld [vmem:[#allocation22 + $0x100] ss:$8 sps:$4 sm:$0xff]  }
 0xb91   :  { %6684 = vmatmul.mubr.bf16.vlgmr.msra.gmra.mrb[20].mxu0 %v10650_v8 }
 0xb92   :  { %6766 = vmatmul.mubr.bf16.vlgmr.msra.gmra.mrb[48].mxu1 %v10650_v8  ;;  %7572 = vmatpush1.bf16.msra.mxu0 %v9608_v54  ;;  %v9628_v8 = vld [vmem:[#allocation22 + $0x64] ss:$8 sps:$4 sm:$0xff]   ;;  %v9661_v54 = vld [vmem:[#allocation22 + $0x114] ss:$8 sps:$4 sm:$0xff]  }
 0xb93   :  { %7573 = vmatprep.subr.bf16.mxu0 %v9613_v25  ;;  %v9659_v25 = vld [vmem:[#allocation22 + $0x110] ss:$8 sps:$4 sm:$0xff]  }
 0xb96   :  { %7574 = vmatpush1.bf16.msra.mxu0 %v9611_v56  ;;  %v9664_v56 = vld [vmem:[#allocation22 + $0x124] ss:$8 sps:$4 sm:$0xff]  }
 0xb97   :  { %7575 = vmatprep.subr.bf16.mxu0 %v9616_v58  ;;  %v9662_v58 = vld [vmem:[#allocation22 + $0x120] ss:$8 sps:$4 sm:$0xff]  }
 0xb9a   :  { %7576 = vmatpush1.bf16.msra.mxu0 %v9614_v59  ;;  %v9667_v59 = vld [vmem:[#allocation22 + $0x134] ss:$8 sps:$4 sm:$0xff]  }
 0xb9b   :  { %7577 = vmatprep.subr.bf16.mxu0 %v9619_v10  ;;  %v9665_v10 = vld [vmem:[#allocation22 + $0x130] ss:$8 sps:$4 sm:$0xff]  }
 0xb9e   :  { %7578 = vmatpush1.bf16.msra.mxu0 %v9617_v37  ;;  %v9670_v37 = vld [vmem:[#allocation22 + $0x144] ss:$8 sps:$4 sm:$0xff]  }
 0xb9f   :  { %7579 = vmatprep.subr.bf16.mxu0 %v9622_v60  ;;  %v9668_v60 = vld [vmem:[#allocation22 + $0x140] ss:$8 sps:$4 sm:$0xff]  }
 0xba2   :  { %7580 = vmatpush1.bf16.msra.mxu0 %v9620_v61  ;;  %v9673_v61 = vld [vmem:[#allocation22 + $0x154] ss:$8 sps:$4 sm:$0xff]  }
 0xba3   :  { %7581 = vmatprep.subr.bf16.mxu0 %v9625_v62  ;;  %v9671_v62 = vld [vmem:[#allocation22 + $0x150] ss:$8 sps:$4 sm:$0xff]  }
 0xba6   :  { %7582 = vmatpush1.bf16.msra.mxu0 %v9623_v18  ;;  %v9676_v18 = vld [vmem:[#allocation22 + $0x164] ss:$8 sps:$4 sm:$0xff]  }
 0xba7   :  { %7583 = vmatprep.subr.bf16.mxu0 %v9628_v8  ;;  %v9674_v8 = vld [vmem:[#allocation22 + $0x160] ss:$8 sps:$4 sm:$0xff]  }
 0xbaa   :  { %7584 = vmatpush1.bf16.msra.mxu0 %v9626_v63  ;;  %v9679_v63 = vld [vmem:[#allocation22 + $0x174] ss:$8 sps:$4 sm:$0xff]  }
 0xbab   :  { %7585 = vmatprep.subr.bf16.mxu0 %v9631_v0  ;;  %v9677_v0 = vld [vmem:[#allocation22 + $0x170] ss:$8 sps:$4 sm:$0xff]  }
 0xbae   :  { %7586 = vmatpush1.bf16.msra.mxu0 %v9629_v44  ;;  %v9682_v44 = vld [vmem:[#allocation22 + $0x184] ss:$8 sps:$4 sm:$0xff]  }
 0xbaf   :  { %7587 = vmatprep.subr.bf16.mxu0 %v9634_v1  ;;  %v9680_v1 = vld [vmem:[#allocation22 + $0x180] ss:$8 sps:$4 sm:$0xff]  }
 0xbb2   :  { %7588 = vmatpush1.bf16.msra.mxu0 %v9632_v3  ;;  %v9685_v3 = vld [vmem:[#allocation22 + $0x194] ss:$8 sps:$4 sm:$0xff]  }
 0xbb3   :  { %7589 = vmatprep.subr.bf16.mxu0 %v9637_v4  ;;  %v9683_v4 = vld [vmem:[#allocation22 + $0x190] ss:$8 sps:$4 sm:$0xff]  }
 0xbb6   :  { %7590 = vmatpush1.bf16.msra.mxu0 %v9635_v15  ;;  %v9688_v15 = vld [vmem:[#allocation22 + $0x1a4] ss:$8 sps:$4 sm:$0xff]  }
 0xbb7   :  { %7591 = vmatprep.subr.bf16.mxu0 %v9640_v6  ;;  %v9686_v6 = vld [vmem:[#allocation22 + $0x1a0] ss:$8 sps:$4 sm:$0xff]  }
 0xbba   :  { %7592 = vmatpush1.bf16.msra.mxu0 %v9638_v55  ;;  %v9691_v55 = vld [vmem:[#allocation22 + $0x1b4] ss:$8 sps:$4 sm:$0xff]  }
 0xbbb   :  { %7593 = vmatprep.subr.bf16.mxu0 %v9643_v9  ;;  %v9689_v9 = vld [vmem:[#allocation22 + $0x1b0] ss:$8 sps:$4 sm:$0xff]  }
 0xbbe   :  { %7594 = vmatpush1.bf16.msra.mxu0 %v9641_v11  ;;  %v9694_v11 = vld [vmem:[#allocation22 + $0x1c4] ss:$8 sps:$4 sm:$0xff]  }
 0xbbf   :  { %7595 = vmatprep.subr.bf16.mxu0 %v9646_v12  ;;  %v9692_v12 = vld [vmem:[#allocation22 + $0x1c0] ss:$8 sps:$4 sm:$0xff]  }
 0xbc2   :  { %7596 = vmatpush1.bf16.msra.mxu0 %v9644_v13  ;;  %v9697_v13 = vld [vmem:[#allocation22 + $0x1d4] ss:$8 sps:$4 sm:$0xff]  }
 0xbc3   :  { %7597 = vmatprep.subr.bf16.mxu0 %v9649_v14  ;;  %v9695_v14 = vld [vmem:[#allocation22 + $0x1d0] ss:$8 sps:$4 sm:$0xff]  }
 0xbc6   :  { %7598 = vmatpush1.bf16.msra.mxu0 %v9647_v16  ;;  %v5137_v16 = vrot.slane %v10662_v28, %v10534_v2  ;;  %v9707_v2 = vld [vmem:[#allocation22 + $0x210] ss:$8 sps:$4 sm:$0xff]  }
 0xbc7   :  { %7599 = vmatprep.subr.bf16.mxu0 %v9652_v17  ;;  %v9700_v17 = vld [vmem:[#allocation22 + $0x1e4] ss:$8 sps:$4 sm:$0xff]  }
 0xbca   :  { %7600 = vmatpush1.bf16.msra.mxu0 %v9650_v20  ;;  %v9698_v20 = vld [vmem:[#allocation22 + $0x1e0] ss:$8 sps:$4 sm:$0xff]  }
 0xbcb   :  { %7601 = vmatprep.subr.bf16.mxu0 %v9655_v21 }
 0xbce   :  { %7602 = vmatpush1.bf16.msra.mxu0 %v9653_v22  ;;  %v9703_v22 = vld [vmem:[#allocation22 + $0x1f4] ss:$8 sps:$4 sm:$0xff]  }
 0xbcf   :  { %7612 = vmatprep.subr.bf16.mxu0 %v9658_v23  ;;  %v9701_v23 = vld [vmem:[#allocation22 + $0x1f0] ss:$8 sps:$4 sm:$0xff]  }
 0xbe4   :  { %v6521_v32 = vpop.f32.mrb[16].mxu0  ;;  %v10670_v33 = vpop.f32.mrb[44].mxu1 }
 0xbe5   :  { %v8865_v34 = vadd.f32 %v6521_v32, %v5129_v29  ;;  %v6523_v35 = vpop.f32.mrb[17].mxu0  ;;  %v6605_v36 = vpop.f32.mrb[45].mxu1  ;;  %v8867_v21 = vadd.f32 %v10670_v33, %v5137_v16  ;;  %v9704_v29 = vld [vmem:[#allocation22 + $0x200] ss:$8 sps:$4 sm:$0xff]   ;;  %v9712_v32 = vld [vmem:[#allocation22 + $0x224] ss:$8 sps:$4 sm:$0xff]  }
 0xbe6   :  { %v8866_v38 = vadd.f32 %v6523_v35, %v5133_v30  ;;  %v8868_v39 = vadd.f32 %v6605_v36, %v5141_v31  ;;  %v6525_v40 = vpop.f32.mrb[18].mxu0  ;;  %v6607_v41 = vpop.f32.mrb[46].mxu1  ;;  %v9709_v31 = vld [vmem:[#allocation22 + $0x214] ss:$8 sps:$4 sm:$0xff]   ;;  %v9713_v35 = vld [vmem:[#allocation22 + $0x230] ss:$8 sps:$4 sm:$0xff]  }
 0xbe7   :  { %v6774_v42 = vmax.f32 %v8865_v34, 0.0  ;;  %v6526_v43 = vpop.f32.mrb[19].mxu0  ;;  %v6608_v45 = vpop.f32.mrb[47].mxu1  ;;  %v6776_v19 = vmax.f32 %v8867_v21, 0.0  ;;  %v9710_v34 = vld [vmem:[#allocation22 + $0x220] ss:$8 sps:$4 sm:$0xff]  }
 0xbe8   :  { %v6775_v47 = vmax.f32 %v8866_v38, 0.0  ;;  %v6777_v48 = vmax.f32 %v8868_v39, 0.0  ;;  %v9715_v33 = vld [vmem:[#allocation22 + $0x234] ss:$8 sps:$4 sm:$0xff]   ;;  %v9718_v36 = vld [vmem:[#allocation22 + $0x244] ss:$8 sps:$4 sm:$0xff]  }
 0xbe9   :  { %v6782_v53 = vpack.c.bf16 %v6774_v42, %v6774_v42  ;;  %v6784_v30 = vpack.c.bf16 %v6776_v19, %v6776_v19  ;;  %v9716_v38 = vld [vmem:[#allocation22 + $0x240] ss:$8 sps:$4 sm:$0xff]   ;;  %v9721_v39 = vld [vmem:[#allocation22 + $0x254] ss:$8 sps:$4 sm:$0xff]   ;;  %v9719_v40 = vld [vmem:[#allocation22 + $0x250] ss:$8 sps:$4 sm:$0xff]  }
 0xbea   :  { %v6783_v50 = vpack.c.bf16 %v6775_v47, %v6775_v47  ;;  %v6785_v5 = vpack.c.bf16 %v6777_v48, %v6777_v48  ;;  %v9724_v41 = vld [vmem:[#allocation22 + $0x264] ss:$8 sps:$4 sm:$0xff]   ;;  %v9722_v42 = vld [vmem:[#allocation22 + $0x260] ss:$8 sps:$4 sm:$0xff]   ;;  %v9727_v43 = vld [vmem:[#allocation22 + $0x274] ss:$8 sps:$4 sm:$0xff]  }
 0xbeb   :  { %v9725_v45 = vld [vmem:[#allocation22 + $0x270] ss:$8 sps:$4 sm:$0xff]   ;;  %v9730_v47 = vld [vmem:[#allocation22 + $0x284] ss:$8 sps:$4 sm:$0xff]   ;;  %v9728_v48 = vld [vmem:[#allocation22 + $0x280] ss:$8 sps:$4 sm:$0xff]  }
 0xbec   :  { %7603 = vmatprep.mubr.bf16.mxu0 %v6783_v50  ;;  %v9733_v50 = vld [vmem:[#allocation22 + $0x294] ss:$8 sps:$4 sm:$0xff]   ;;  %v9752_v16 = vld [vmem:[#allocation22 + $0x300] ss:$8 sps:$4 sm:$0xff]  }
 0xbed   :  { %7604 = vmatmul.mubr.bf16.vlgmr.msra.gmra.mrb[24].mxu0 %v6782_v53  ;;  %v9736_v53 = vld [vmem:[#allocation22 + $0x2a4] ss:$8 sps:$4 sm:$0xff]   ;;  %v9758_v19 = vld [vmem:[#allocation22 + $0x320] ss:$8 sps:$4 sm:$0xff]  }
 0xbee   :  { %7613 = vmatpush1.bf16.msra.mxu0 %v9656_v52  ;;  %7644 = vmatprep.mubr.bf16.mxu0 %v6785_v5  ;;  %v9731_v52 = vld [vmem:[#allocation22 + $0x290] ss:$8 sps:$4 sm:$0xff]   ;;  %v9739_v5 = vld [vmem:[#allocation22 + $0x2b4] ss:$8 sps:$4 sm:$0xff]  }
 0xbef   :  { %7614 = vmatprep.subr.bf16.mxu0 %v9661_v54  ;;  %v9734_v54 = vld [vmem:[#allocation22 + $0x2a0] ss:$8 sps:$4 sm:$0xff]  }
 0xbf2   :  { %7615 = vmatpush1.bf16.msra.mxu0 %v9659_v25  ;;  %v9737_v25 = vld [vmem:[#allocation22 + $0x2b0] ss:$8 sps:$4 sm:$0xff]  }
 0xbf3   :  { %7616 = vmatprep.subr.bf16.mxu0 %v9664_v56  ;;  %v9742_v56 = vld [vmem:[#allocation22 + $0x2c4] ss:$8 sps:$4 sm:$0xff]  }
 0xbf6   :  { %7617 = vmatpush1.bf16.msra.mxu0 %v9662_v58  ;;  %v9740_v58 = vld [vmem:[#allocation22 + $0x2c0] ss:$8 sps:$4 sm:$0xff]  }
 0xbf7   :  { %7618 = vmatprep.subr.bf16.mxu0 %v9667_v59  ;;  %v9745_v59 = vld [vmem:[#allocation22 + $0x2d4] ss:$8 sps:$4 sm:$0xff]  }
 0xbfa   :  { %7619 = vmatpush1.bf16.msra.mxu0 %v9665_v10  ;;  %v9743_v10 = vld [vmem:[#allocation22 + $0x2d0] ss:$8 sps:$4 sm:$0xff]  }
 0xbfb   :  { %7620 = vmatprep.subr.bf16.mxu0 %v9670_v37  ;;  %v9748_v37 = vld [vmem:[#allocation22 + $0x2e4] ss:$8 sps:$4 sm:$0xff]  }
 0xbfe   :  { %7621 = vmatpush1.bf16.msra.mxu0 %v9668_v60  ;;  %v5145_v60 = vrot.slane %v10662_v28, %v388_v24 }
 0xbff   :  { %7622 = vmatprep.subr.bf16.mxu0 %v9673_v61  ;;  %v9746_v61 = vld [vmem:[#allocation22 + $0x2e0] ss:$8 sps:$4 sm:$0xff]  }
 0xc02   :  { %7623 = vmatpush1.bf16.msra.mxu0 %v9671_v62  ;;  %v5149_v62 = vrot.slane %v10662_v28, %v392_v27 }
 0xc03   :  { %7624 = vmatprep.subr.bf16.mxu0 %v9676_v18  ;;  %v5157_v18 = vrot.slane %v10662_v28, %v400_v49 }
 0xc06   :  { %7625 = vmatpush1.bf16.msra.mxu0 %v9674_v8  ;;  %v9751_v8 = vld [vmem:[#allocation22 + $0x2f4] ss:$8 sps:$4 sm:$0xff]  }
 0xc07   :  { %7626 = vmatprep.subr.bf16.mxu0 %v9679_v63 }
 0xc0a   :  { %7627 = vmatpush1.bf16.msra.mxu0 %v9677_v0 }
 0xc0b   :  { %7628 = vmatprep.subr.bf16.mxu0 %v9682_v44 }
 0xc0e   :  { %7629 = vmatpush1.bf16.msra.mxu0 %v9680_v1 }
 0xc0f   :  { %7630 = vmatprep.subr.bf16.mxu0 %v9685_v3 }
 0xc12   :  { %7631 = vmatpush1.bf16.msra.mxu0 %v9683_v4 }
 0xc13   :  { %7632 = vmatprep.subr.bf16.mxu0 %v9688_v15  ;;  %v9749_v15 = vld [vmem:[#allocation22 + $0x2f0] ss:$8 sps:$4 sm:$0xff]  }
 0xc16   :  { %7633 = vmatpush1.bf16.msra.mxu0 %v9686_v6 }
 0xc17   :  { %7634 = vmatprep.subr.bf16.mxu0 %v9691_v55 }
 0xc1a   :  { %7635 = vmatpush1.bf16.msra.mxu0 %v9689_v9 }
 0xc1b   :  { %7636 = vmatprep.subr.bf16.mxu0 %v9694_v11  ;;  %v9754_v11 = vld [vmem:[#allocation22 + $0x304] ss:$8 sps:$4 sm:$0xff]  }
 0xc1e   :  { %7637 = vmatpush1.bf16.msra.mxu0 %v9692_v12 }
 0xc1f   :  { %7638 = vmatprep.subr.bf16.mxu0 %v9697_v13 }
 0xc22   :  { %7639 = vmatpush1.bf16.msra.mxu0 %v9695_v14 }
 0xc23   :  { %7640 = vmatprep.subr.bf16.mxu0 %v9700_v17 }
 0xc26   :  { %7641 = vmatpush1.bf16.msra.mxu0 %v9698_v20  ;;  %v9757_v20 = vld [vmem:[#allocation22 + $0x314] ss:$8 sps:$4 sm:$0xff]  }
 0xc27   :  { %7642 = vmatprep.subr.bf16.mxu0 %v9703_v22  ;;  %v9755_v22 = vld [vmem:[#allocation22 + $0x310] ss:$8 sps:$4 sm:$0xff]  }
 0xc2a   :  { %7643 = vmatpush1.bf16.msra.mxu0 %v9701_v23  ;;  %v9760_v23 = vld [vmem:[#allocation22 + $0x324] ss:$8 sps:$4 sm:$0xff]  }
 0xc2b   :  { %7653 = vmatprep.subr.bf16.mxu0 %v9706_v26  ;;  %v9763_v26 = vld [vmem:[#allocation22 + $0x334] ss:$8 sps:$4 sm:$0xff]  }
 0xc2d   :  { %7645 = vmatmul.mubr.bf16.vlgmr.msra.gmra.mrb[24].mxu0 %v6784_v30  ;;  %v9766_v30 = vld [vmem:[#allocation22 + $0x344] ss:$8 sps:$4 sm:$0xff]  }
 0xc2e   :  { %7654 = vmatpush1.bf16.msra.mxu0 %v9704_v29  ;;  %v9761_v29 = vld [vmem:[#allocation22 + $0x330] ss:$8 sps:$4 sm:$0xff]  }
 0xc2f   :  { %7655 = vmatprep.subr.bf16.mxu0 %v9709_v31  ;;  %v9764_v31 = vld [vmem:[#allocation22 + $0x340] ss:$8 sps:$4 sm:$0xff]  }
 0xc32   :  { %7656 = vmatpush1.bf16.msra.mxu0 %v9707_v2  ;;  %v9769_v2 = vld [vmem:[#allocation22 + $0x354] ss:$8 sps:$4 sm:$0xff]  }
 0xc33   :  { %7657 = vmatprep.subr.bf16.mxu0 %v9712_v32  ;;  %v9767_v32 = vld [vmem:[#allocation22 + $0x350] ss:$8 sps:$4 sm:$0xff]  }
 0xc36   :  { %7658 = vmatpush1.bf16.msra.mxu0 %v9710_v34  ;;  %v9772_v34 = vld [vmem:[#allocation22 + $0x364] ss:$8 sps:$4 sm:$0xff]  }
 0xc37   :  { %7659 = vmatprep.subr.bf16.mxu0 %v9715_v33  ;;  %v9770_v33 = vld [vmem:[#allocation22 + $0x360] ss:$8 sps:$4 sm:$0xff]  }
 0xc3a   :  { %7660 = vmatpush1.bf16.msra.mxu0 %v9713_v35  ;;  %v9775_v35 = vld [vmem:[#allocation22 + $0x374] ss:$8 sps:$4 sm:$0xff]  }
 0xc3b   :  { %7661 = vmatprep.subr.bf16.mxu0 %v9718_v36  ;;  %v9773_v36 = vld [vmem:[#allocation22 + $0x370] ss:$8 sps:$4 sm:$0xff]  }
 0xc3e   :  { %7662 = vmatpush1.bf16.msra.mxu0 %v9716_v38  ;;  %v9778_v38 = vld [vmem:[#allocation22 + $0x384] ss:$8 sps:$4 sm:$0xff]  }
 0xc3f   :  { %7663 = vmatprep.subr.bf16.mxu0 %v9721_v39  ;;  %v9776_v39 = vld [vmem:[#allocation22 + $0x380] ss:$8 sps:$4 sm:$0xff]  }
 0xc42   :  { %7664 = vmatpush1.bf16.msra.mxu0 %v9719_v40  ;;  %v9781_v40 = vld [vmem:[#allocation22 + $0x394] ss:$8 sps:$4 sm:$0xff]  }
 0xc43   :  { %7665 = vmatprep.subr.bf16.mxu0 %v9724_v41  ;;  %v9779_v41 = vld [vmem:[#allocation22 + $0x390] ss:$8 sps:$4 sm:$0xff]  }
 0xc46   :  { %7666 = vmatpush1.bf16.msra.mxu0 %v9722_v42  ;;  %v9784_v42 = vld [vmem:[#allocation22 + $0x3a4] ss:$8 sps:$4 sm:$0xff]  }
 0xc47   :  { %7667 = vmatprep.subr.bf16.mxu0 %v9727_v43  ;;  %v9782_v43 = vld [vmem:[#allocation22 + $0x3a0] ss:$8 sps:$4 sm:$0xff]  }
 0xc4a   :  { %7668 = vmatpush1.bf16.msra.mxu0 %v9725_v45  ;;  %v9787_v45 = vld [vmem:[#allocation22 + $0x3b4] ss:$8 sps:$4 sm:$0xff]  }
 0xc4b   :  { %7669 = vmatprep.subr.bf16.mxu0 %v9730_v47  ;;  %v9785_v47 = vld [vmem:[#allocation22 + $0x3b0] ss:$8 sps:$4 sm:$0xff]  }
 0xc4e   :  { %7670 = vmatpush1.bf16.msra.mxu0 %v9728_v48  ;;  %v9790_v48 = vld [vmem:[#allocation22 + $0x3c4] ss:$8 sps:$4 sm:$0xff]  }
 0xc4f   :  { %7671 = vmatprep.subr.bf16.mxu0 %v9733_v50  ;;  %v9788_v50 = vld [vmem:[#allocation22 + $0x3c0] ss:$8 sps:$4 sm:$0xff]  }
 0xc52   :  { %7672 = vmatpush1.bf16.msra.mxu0 %v9731_v52  ;;  %v9793_v52 = vld [vmem:[#allocation22 + $0x3d4] ss:$8 sps:$4 sm:$0xff]  }
 0xc53   :  { %7673 = vmatprep.subr.bf16.mxu0 %v9736_v53  ;;  %v9791_v53 = vld [vmem:[#allocation22 + $0x3d0] ss:$8 sps:$4 sm:$0xff]  }
 0xc56   :  { %7674 = vmatpush1.bf16.msra.mxu0 %v9734_v54  ;;  %v5153_v54 = vrot.slane %v10662_v28, %v396_v46 }
 0xc57   :  { %7675 = vmatprep.subr.bf16.mxu0 %v9739_v5  ;;  %v9796_v5 = vld [vmem:[#allocation22 + $0x3e4] ss:$8 sps:$4 sm:$0xff]  }
 0xc5a   :  { %7676 = vmatpush1.bf16.msra.mxu0 %v9737_v25  ;;  %v9794_v25 = vld [vmem:[#allocation22 + $0x3e0] ss:$8 sps:$4 sm:$0xff]  }
 0xc5b   :  { %7677 = vmatprep.subr.bf16.mxu0 %v9742_v56 }
 0xc5e   :  { %7678 = vmatpush1.bf16.msra.mxu0 %v9740_v58  ;;  %v9799_v58 = vld [vmem:[#allocation22 + $0x3f4] ss:$8 sps:$4 sm:$0xff]  }
 0xc5f   :  { %7679 = vmatprep.subr.bf16.mxu0 %v9745_v59  ;;  %v9797_v59 = vld [vmem:[#allocation22 + $0x3f0] ss:$8 sps:$4 sm:$0xff]  }
 0xc62   :  { %7680 = vmatpush1.bf16.msra.mxu0 %v9743_v10 }
 0xc63   :  { %7681 = vmatprep.subr.bf16.mxu0 %v9748_v37 }
 0xc64   :  { %v6685_v63 = vpop.f32.mrb[20].mxu0 }
 0xc65   :  { %v8869_v0 = vadd.f32 %v6685_v63, %v5145_v60  ;;  %v10684_v44 = vpop.f32.mrb[48].mxu1  ;;  %v6687_v1 = vpop.f32.mrb[21].mxu0  ;;  %v6919_v60 = vld [vmem:[#allocation23 + $0x43] ss:$8 sm:$0x3] }
 0xc66   :  { %v8870_v3 = vadd.f32 %v6687_v1, %v5149_v62  ;;  %v6769_v4 = vpop.f32.mrb[49].mxu1  ;;  %7682 = vmatpush1.bf16.msra.mxu0 %v9746_v61  ;;  %v6689_v24 = vpop.f32.mrb[22].mxu0  ;;  %v8871_v56 = vadd.f32 %v10684_v44, %v5153_v54  ;;  %v6924_v51 = vrot.slane %v6919_v60, %v10520_v7  ;;  %v6928_v46 = vrot.slane %v6919_v60, %v10523_v57 }
 0xc67   :  { %v6778_v6 = vmax.f32 %v8869_v0, 0.0  ;;  %v8872_v55 = vadd.f32 %v6769_v4, %v5157_v18  ;;  %v6771_v9 = vpop.f32.mrb[50].mxu1  ;;  %v6690_v27 = vpop.f32.mrb[23].mxu0  ;;  %7683 = vmatprep.subr.bf16.mxu0 %v9751_v8 }
 0xc68   :  { %v6779_v12 = vmax.f32 %v8870_v3, 0.0  ;;  %v6772_v13 = vpop.f32.mrb[51].mxu1  ;;  %v6780_v10 = vmax.f32 %v8871_v56, 0.0 }
 0xc69   :  { %v6781_v49 = vmax.f32 %v8872_v55, 0.0  ;;  %v6786_v17 = vpack.c.bf16 %v6778_v6, %v6778_v6 }
 0xc6a   :  { %v6787_v14 = vpack.c.bf16 %v6779_v12, %v6779_v12  ;;  %7684 = vmatpush1.bf16.msra.mxu0 %v9749_v15  ;;  %v6788_v37 = vpack.c.bf16 %v6780_v10, %v6780_v10 }
 0xc6b   :  { %7694 = vmatprep.subr.bf16.mxu0 %v9754_v11  ;;  %v6789_v21 = vpack.c.bf16 %v6781_v49, %v6781_v49 }
 0xc6c   :  { %7685 = vmatprep.mubr.bf16.mxu0 %v6787_v14 }
 0xc6d   :  { %7686 = vmatmul.mubr.bf16.vlgmr.msra.gmra.mrb[24].mxu0 %v6786_v17 }
 0xc6e   :  { %7695 = vmatpush1.bf16.msra.mxu0 %v9752_v16  ;;  %7726 = vmatprep.mubr.bf16.mxu0 %v6789_v21 }
 0xc6f   :  { %7696 = vmatprep.subr.bf16.mxu0 %v9757_v20 }
 0xc72   :  { %7697 = vmatpush1.bf16.msra.mxu0 %v9755_v22 }
 0xc73   :  { %7698 = vmatprep.subr.bf16.mxu0 %v9760_v23 }
 0xc76   :  { %7699 = vmatpush1.bf16.msra.mxu0 %v9758_v19 }
 0xc77   :  { %7700 = vmatprep.subr.bf16.mxu0 %v9763_v26 }
 0xc7a   :  { %7701 = vmatpush1.bf16.msra.mxu0 %v9761_v29 }
 0xc7b   :  { %7702 = vmatprep.subr.bf16.mxu0 %v9766_v30 }
 0xc7e   :  { %7703 = vmatpush1.bf16.msra.mxu0 %v9764_v31 }
 0xc7f   :  { %7704 = vmatprep.subr.bf16.mxu0 %v9769_v2 }
 0xc82   :  { %7705 = vmatpush1.bf16.msra.mxu0 %v9767_v32 }
 0xc83   :  { %7706 = vmatprep.subr.bf16.mxu0 %v9772_v34 }
 0xc86   :  { %7707 = vmatpush1.bf16.msra.mxu0 %v9770_v33 }
 0xc87   :  { %7708 = vmatprep.subr.bf16.mxu0 %v9775_v35 }
 0xc8a   :  { %7709 = vmatpush1.bf16.msra.mxu0 %v9773_v36 }
 0xc8b   :  { %7710 = vmatprep.subr.bf16.mxu0 %v9778_v38 }
 0xc8e   :  { %7711 = vmatpush1.bf16.msra.mxu0 %v9776_v39 }
 0xc8f   :  { %7712 = vmatprep.subr.bf16.mxu0 %v9781_v40 }
 0xc92   :  { %7713 = vmatpush1.bf16.msra.mxu0 %v9779_v41 }
 0xc93   :  { %7714 = vmatprep.subr.bf16.mxu0 %v9784_v42 }
 0xc96   :  { %7715 = vmatpush1.bf16.msra.mxu0 %v9782_v43 }
 0xc97   :  { %7716 = vmatprep.subr.bf16.mxu0 %v9787_v45 }
 0xc9a   :  { %7717 = vmatpush1.bf16.msra.mxu0 %v9785_v47 }
 0xc9b   :  { %7718 = vmatprep.subr.bf16.mxu0 %v9790_v48 }
 0xc9e   :  { %7719 = vmatpush1.bf16.msra.mxu0 %v9788_v50 }
 0xc9f   :  { %7720 = vmatprep.subr.bf16.mxu0 %v9793_v52 }
 0xca2   :  { %7721 = vmatpush1.bf16.msra.mxu0 %v9791_v53 }
 0xca3   :  { %7722 = vmatprep.subr.bf16.mxu0 %v9796_v5 }
 0xca6   :  { %7723 = vmatpush1.bf16.msra.mxu0 %v9794_v25 }
 0xca7   :  { %7724 = vmatprep.subr.bf16.mxu0 %v9799_v58 }
 0xcaa   :  { %7725 = vmatpush1.bf16.msra.mxu0 %v9797_v59 }
 0xcad   :  { %7727 = vmatmul.mubr.bf16.vlgmr.msra.gmra.mrb[24].mxu0 %v6788_v37 }
 0xd80   :  { %v7728_v28 = vpop.f32.mrb[24].mxu0 }
 0xd81   :  { %v8873_v61 = vadd.f32 %v7728_v28, %v6924_v51  ;;  %v7730_v62 = vpop.f32.mrb[25].mxu0 }
 0xd82   :  { %v8874_v18 = vadd.f32 %v7730_v62, %v6928_v46  ;;  %v7732_v8 = vpop.f32.mrb[26].mxu0 }
 0xd83   :  { %7735 = vst [vmem:[#allocation25] sm:$0xff] %v8873_v61  ;;  %v7733_v63 = vpop.f32.mrb[27].mxu0 }
 0xd84   :  { %7736 = vst [vmem:[#allocation25 + $0x8] sm:$0xff] %v8874_v18 }
 0xd85   :  { %10119 = shalt.err (!%p10116_p4)
}
 0xd86   :  { %s10120_s9 = scalar_lea.hbm %s10718_s14, 256 }
 0xd87   :  { %p10121_p5 = scmp.ne.s32.totalorder %s10718_s14, %s10120_s9  ;;  %p10124_p6 = scmp.lt.u32.totalorder %s10120_s9, %s10718_s14 }
 0xd89   :  { %p10126_p7 = pnand %p10124_p6, %p10121_p5 }
 0xd8b   :  { %10129 = shalt.err (!%p10126_p7)
}
 0xd8c   :  { %7746 = dma.vmem_to_hbm [thread:$0]  %s7744_s28, 256, %s10718_s14, [#allocation4]  }
 0xd8d   :  { %10146 = dma.done.wait [#allocation4], 256  }
 0xd8e   :  { %10147 = vsyncadd [#allocation4], 4294967040 }
 0xd8f   :  { %7750 = vsyncpa [#allocation3], 1 }
 0xd90   :  { %7751 = vsyncpa [#allocation6], 1 }
 0xd91   :  { %7752 = vsyncpa [#allocation9], 1 }
 0xd92   :  { %7753 = vsyncpa [#allocation12], 1 }
 0xd93   :  { %7754 = vsyncpa [#allocation15], 1 }
 0xd94   :  { %7755 = vsyncpa [#allocation18], 1 }
 0xd95   :  { %7756 = vsyncpa [#allocation21], 1 }
 0xd96   :  { %7757 = vsyncpa [#allocation24], 1 }
 0xd97   :  { %7758 = vsyncpa [#allocation4], 1 }

</bundles_post_ra>
